<compile_context>
chip_gen: v5e
topology: v5e:2x2
jax: 0.10.0
libtpu: 0.0.40
codegen_flags: <defaults>
</compile_context>

<pallas_src>
import functools
import math

import jax
import jax.numpy as jnp
from jax.experimental import pallas as pl
from jax.experimental.pallas import tpu as pltpu


# ------------------------------ helpers (in-kernel) -------------------------

def _layernorm(h, g, b, eps):
    mu = jnp.mean(h, axis=-1, keepdims=True)
    var = jnp.mean((h - mu) ** 2, axis=-1, keepdims=True)
    return (h - mu) * jax.lax.rsqrt(var + eps) * g + b


# ------------------------------ fused hybrid kernel -------------------------

def _hybrid_kernel(*refs, lstm_layers, tr_layers, num_heads, T, B, H, E, eps):
    """Whole HybridModel forward in one kernel.

    refs layout (inputs):
      [0]  x_tm   (T*B, I)   rows ordered (t, b)      -- LSTM input
      [1]  x_bs   (B*S, I)   rows ordered (b, s)      -- transformer input
      [2]  x3     (B, 3)                              -- x[:, -1, -3:]
      per LSTM layer (3):     w_ih_t (I_l,4H), w_hh_t (H,4H), b (1,4H)
      LSTM tail (4):          ln_g (1,H), ln_b (1,H), fc_w_t (H,O), fc_b (1,O)
      transformer head (2):   in_w_t (I,E), in_bias_pe (B*S,E)
      per encoder layer (12): qkv_w_t (E,3E), qkv_b (1,3E), out_w_t (E,E),
                              out_b (1,E), ln1_g, ln1_b, w1_t (E,F), b1 (1,F),
                              w2_t (F,E), b2 (1,E), ln2_g, ln2_b
      transformer tail (2):   fc_w_t (E,O), fc_b (1,O)
      final (4):              w_lstm (O,O), w_tr (O,O), w_x (3,O), fc_b (1,O)
    then: out (B, O), scratch hseq (T*B, H).
    """
    x_tm_ref, x_bs_ref, x3_ref = refs[0], refs[1], refs[2]
    base = 3
    lstm_refs = [refs[base + 3 * l: base + 3 * l + 3] for l in range(lstm_layers)]
    base += 3 * lstm_layers
    ln_g_ref, ln_b_ref, lfcw_ref, lfcb_ref = refs[base: base + 4]
    base += 4
    in_w_ref, in_bpe_ref = refs[base], refs[base + 1]
    base += 2
    tr_refs = [refs[base + 12 * l: base + 12 * l + 12] for l in range(tr_layers)]
    base += 12 * tr_layers
    tfcw_ref, tfcb_ref = refs[base], refs[base + 1]
    wl_ref, wt_ref, wx_ref, fb_ref = refs[base + 2: base + 6]
    o_ref = refs[base + 6]
    hseq_sc = refs[base + 7]

    S = T
    dh = E // num_heads
    scale = 1.0 / math.sqrt(dh)

    # ======================= LSTM branch =======================
    cur = x_tm_ref[...]                                # (T*B, I) layer input
    h = jnp.zeros((B, H), jnp.float32)
    for l in range(lstm_layers):
        wih_ref, whh_ref, b_ref = lstm_refs[l]

        # input-to-hidden contribution for all timesteps in one matmul
        gx = jnp.dot(cur, wih_ref[...],
                     preferred_element_type=jnp.float32) + b_ref[...]    # (T*B,4H)

        h = jnp.zeros((B, H), jnp.float32)
        c = jnp.zeros((B, H), jnp.float32)
        for t in range(T):                             # T small & static
            gates = gx[t * B:(t + 1) * B, :] + jnp.dot(
                h, whh_ref[...], preferred_element_type=jnp.float32)     # (B,4H)
            i_g = jax.nn.sigmoid(gates[:, 0:H])
            f_g = jax.nn.sigmoid(gates[:, H:2 * H])
            g_g = jnp.tanh(gates[:, 2 * H:3 * H])
            o_g = jax.nn.sigmoid(gates[:, 3 * H:4 * H])
            c = f_g * c + i_g * g_g
            h = o_g * jnp.tanh(c)
            if l < lstm_layers - 1:
                hseq_sc[t * B:(t + 1) * B, :] = h      # keep sequence in VMEM
        if l < lstm_layers - 1:
            cur = hseq_sc[...]                         # (T*B, H)
        # inter-layer dropout (p=0.3) is identity in eval mode

    lstm_out = jnp.dot(_layernorm(h, ln_g_ref[...], ln_b_ref[...], eps),
                       lfcw_ref[...],
                       preferred_element_type=jnp.float32) + lfcb_ref[...]  # (B,O)

    # ==================== Transformer branch ====================
    # input projection + (bias + positional encoding) pre-fused per row
    ht = jnp.dot(x_bs_ref[...], in_w_ref[...],
                 preferred_element_type=jnp.float32) + in_bpe_ref[...]   # (B*S,E)

    for l in range(tr_layers):
        (wqkv, bqkv, wout, bout, g1, bb1,
         w1, b1, w2, b2, g2, bb2) = tr_refs[l]

        # ---- self attention (heads handled in-kernel, no HBM round trips) ----
        qkv = jnp.dot(ht, wqkv[...],
                      preferred_element_type=jnp.float32) + bqkv[...]    # (B*S,3E)
        sa_rows = []
        for b in range(B):
            rows = slice(b * S, (b + 1) * S)
            acc = jnp.zeros((S, E), jnp.float32)
            for hh in range(num_heads):
                cq = slice(hh * dh, (hh + 1) * dh)
                ck = slice(E + hh * dh, E + (hh + 1) * dh)
                cv = slice(2 * E + hh * dh, 2 * E + (hh + 1) * dh)
                q = qkv[rows, cq]                                        # (S,dh)
                k = qkv[rows, ck]
                v = qkv[rows, cv]
                s = jax.lax.dot_general(
                    q, k, (((1,), (1,)), ((), ())),
                    preferred_element_type=jnp.float32) * scale          # (S,S)
                s = s - jnp.max(s, axis=-1, keepdims=True)
                p = jnp.exp(s)
                p = p / jnp.sum(p, axis=-1, keepdims=True)
                oh = jnp.dot(p, v, preferred_element_type=jnp.float32)   # (S,dh)
                # fold the output projection per head (no concat of heads)
                acc = acc + jnp.dot(oh, wout[hh * dh:(hh + 1) * dh, :],
                                    preferred_element_type=jnp.float32)
            sa_rows.append(acc + bout[...])
        sa = jnp.concatenate(sa_rows, axis=0)                            # (B*S,E)

        # ---- add & norm, feed-forward (relu), add & norm (post-LN) ----
        ht = _layernorm(ht + sa, g1[...], bb1[...], eps)
        ff = jnp.dot(ht, w1[...], preferred_element_type=jnp.float32) + b1[...]
        ff = jnp.maximum(ff, 0.0)
        ff = jnp.dot(ff, w2[...], preferred_element_type=jnp.float32) + b2[...]
        ht = _layernorm(ht + ff, g2[...], bb2[...], eps)
        # transformer dropouts (0.1) are identity in eval mode

    # fc on last-token rows (s = S-1 of each batch)
    last = jnp.concatenate(
        [ht[b * S + S - 1:b * S + S, :] for b in range(B)], axis=0)      # (B,E)
    tr_out = jnp.dot(last, tfcw_ref[...],
                     preferred_element_type=jnp.float32) + tfcb_ref[...]  # (B,O)

    # ========================= combine ==========================
    # Final fc on concat([lstm, transformer, xgb=0, x[:,-1,-3:]]) expressed as
    # a sum of matmuls (the xgb placeholder column is zero, so it is dropped).
    # Final dropout (0.3) is identity in eval mode.
    o_ref[...] = (jnp.dot(lstm_out, wl_ref[...], preferred_element_type=jnp.float32)
                  + jnp.dot(tr_out, wt_ref[...], preferred_element_type=jnp.float32)
                  + jnp.dot(x3_ref[...], wx_ref[...], preferred_element_type=jnp.float32)
                  + fb_ref[...])


# ------------------------------- model forward ------------------------------

def hybrid_forward(x, params, *, num_heads):
    B, S, I = x.shape
    lstm_p = params["lstm"]
    tr_p = params["transformer"]
    fin_p = params["final"]

    lstm_layers = len(lstm_p["layers"])
    tr_layers = len(tr_p["layers"])
    H = lstm_p["layers"][0]["w_hh_t"].shape[0]
    E = tr_p["in_w_t"].shape[1]
    O = fin_p["fc_b"].shape[1]

    # LSTM branch input: time-major rows ordered (t, b)
    x_tm = jnp.transpose(x, (1, 0, 2)).reshape(S * B, I)
    # Transformer branch input: rows ordered (b, s)
    x_bs = x.reshape(B * S, I)
    x_last3 = x[:, -1, -3:]
    # fuse input-projection bias with the (tiled) positional encoding: one
    # tiny XLA add outside the kernel, one per-row bias add inside.
    in_bias_pe = jnp.tile(tr_p["pe"][:S], (B, 1)) + tr_p["in_b"]          # (B*S,E)

    args = [x_tm, x_bs, x_last3]
    for lp in lstm_p["layers"]:
        args += [lp["w_ih_t"], lp["w_hh_t"], lp["b"]]
    args += [lstm_p["ln_g"], lstm_p["ln_b"], lstm_p["fc_w_t"], lstm_p["fc_b"]]
    args += [tr_p["in_w_t"], in_bias_pe]
    for lp in tr_p["layers"]:
        args += [lp["qkv_w_t"], lp["qkv_b"], lp["out_w_t"], lp["out_b"],
                 lp["ln1_g"], lp["ln1_b"], lp["w1_t"], lp["b1"],
                 lp["w2_t"], lp["b2"], lp["ln2_g"], lp["ln2_b"]]
    args += [tr_p["fc_w_t"], tr_p["fc_b"]]
    args += [fin_p["w_lstm"], fin_p["w_tr"], fin_p["w_x"], fin_p["fc_b"]]

    return pl.pallas_call(
        functools.partial(_hybrid_kernel,
                          lstm_layers=lstm_layers, tr_layers=tr_layers,
                          num_heads=num_heads, T=S, B=B, H=H, E=E, eps=1e-5),
        out_shape=jax.ShapeDtypeStruct((B, O), jnp.float32),
        scratch_shapes=[pltpu.VMEM((S * B, H), jnp.float32)],
    )(*args)


# ------------------------------ parameter init ------------------------------

def positional_encoding(max_len, d_model):
    position = jnp.arange(max_len, dtype=jnp.float32)[:, None]
    div_term = jnp.exp(jnp.arange(0, d_model, 2, dtype=jnp.float32)
                       * (-math.log(10000.0) / d_model))
    pe = jnp.zeros((max_len, d_model), jnp.float32)
    pe = pe.at[:, 0::2].set(jnp.sin(position * div_term))
    pe = pe.at[:, 1::2].set(jnp.cos(position * div_term))
    return pe


def init_params(key, input_size, lstm_hidden, lstm_layers, num_heads,
                tr_layers, output_size, ff_dim=2048, max_len=64):
    """All weight pre-processing (transposes, bias merges, reshapes, final-fc
    column splits) happens here, once, not per forward call."""
    keys = iter(jax.random.split(key, 512))

    def nrm(shape, scale=0.1):
        return (scale * jax.random.normal(next(keys), shape)).astype(jnp.float32)

    H, O = lstm_hidden, output_size

    lstm_p = {"layers": []}
    for l in range(lstm_layers):
        in_l = input_size if l == 0 else H
        w_ih, w_hh = nrm((4 * H, in_l)), nrm((4 * H, H))
        b_ih, b_hh = nrm((4 * H,)), nrm((4 * H,))
        lstm_p["layers"].append({
            "w_ih_t": w_ih.T,                        # (I_l, 4H)
            "w_hh_t": w_hh.T,                        # (H, 4H)
            "b": (b_ih + b_hh).reshape(1, 4 * H),
        })
    lstm_p["ln_g"] = jnp.ones((1, H), jnp.float32)
    lstm_p["ln_b"] = jnp.zeros((1, H), jnp.float32)
    lstm_p["fc_w_t"] = nrm((O, H)).T                 # (H, O)
    lstm_p["fc_b"] = nrm((O,)).reshape(1, O)

    E = (input_size + num_heads - 1) // num_heads * num_heads
    tr_p = {
        "in_w_t": nrm((E, input_size)).T,            # (I, E)
        "in_b": nrm((E,)).reshape(1, E),
        "pe": positional_encoding(max_len, E),
        "layers": [],
    }
    for _ in range(tr_layers):
        tr_p["layers"].append({
            "qkv_w_t": nrm((3 * E, E)).T,            # (E, 3E)
            "qkv_b": nrm((3 * E,)).reshape(1, 3 * E),
            "out_w_t": nrm((E, E)).T,                # (E, E)
            "out_b": nrm((E,)).reshape(1, E),
            "ln1_g": jnp.ones((1, E), jnp.float32),
            "ln1_b": jnp.zeros((1, E), jnp.float32),
            "w1_t": nrm((ff_dim, E)).T,              # (E, F)
            "b1": nrm((ff_dim,)).reshape(1, ff_dim),
            "w2_t": nrm((E, ff_dim)).T,              # (F, E)
            "b2": nrm((E,)).reshape(1, E),
            "ln2_g": jnp.ones((1, E), jnp.float32),
            "ln2_b": jnp.zeros((1, E), jnp.float32),
        })
    tr_p["fc_w_t"] = nrm((O, E)).T                   # (E, O)
    tr_p["fc_b"] = nrm((O,)).reshape(1, O)

    # Final fc: concat width is 2*O + 4 (see fidelity note at top of file).
    fc_in = 2 * O + 4
    fc_w_t = nrm((O, fc_in)).T                       # (fc_in, O)
    final = {
        "w_lstm": fc_w_t[0:O, :],                    # multiplies lstm_out
        "w_tr": fc_w_t[O:2 * O, :],                  # multiplies transformer_out
        # row 2*O multiplies the xgb placeholder column (zeros) — dropped
        "w_x": fc_w_t[2 * O + 1:2 * O + 4, :],       # multiplies x[:, -1, -3:]
        "fc_b": nrm((O,)).reshape(1, O),
    }
    return {"lstm": lstm_p, "transformer": tr_p, "final": final}


# ----------------------------------- main ------------------------------------

if __name__ == "__main__":
    key = jax.random.PRNGKey(0)
    k_x, k_p = jax.random.split(key)

    B, S, input_size = 2, 8, 8
    lstm_hidden, lstm_layers = 32, 2
    transformer_heads, transformer_layers = 4, 2
    output_size = 4

    x = jax.random.normal(k_x, (B, S, input_size), jnp.float32)
    params = init_params(k_p, input_size, lstm_hidden, lstm_layers,
                         transformer_heads, transformer_layers, output_size)

    forward = jax.jit(functools.partial(hybrid_forward,
                                        num_heads=transformer_heads))

    out = jax.block_until_ready(forward(x, params))   # compile + run
    out = jax.block_until_ready(forward(x, params))   # cached fast path
    assert out.shape == (B, output_size), out.shape
    assert bool(jnp.all(jnp.isfinite(out)))
    print("KERNEL_OK")
</pallas_src>

<mosaic_0001>
module attributes {stable_mosaic.version = 11 : i64} {
  func.func @_hybrid_kernel(%arg0: memref<16x8xf32, #tpu.memory_space<vmem>>, %arg1: memref<16x8xf32, #tpu.memory_space<vmem>>, %arg2: memref<2x3xf32, #tpu.memory_space<vmem>>, %arg3: memref<8x128xf32, #tpu.memory_space<vmem>>, %arg4: memref<32x128xf32, #tpu.memory_space<vmem>>, %arg5: memref<1x128xf32, #tpu.memory_space<vmem>>, %arg6: memref<32x128xf32, #tpu.memory_space<vmem>>, %arg7: memref<32x128xf32, #tpu.memory_space<vmem>>, %arg8: memref<1x128xf32, #tpu.memory_space<vmem>>, %arg9: memref<1x32xf32, #tpu.memory_space<vmem>>, %arg10: memref<1x32xf32, #tpu.memory_space<vmem>>, %arg11: memref<32x4xf32, #tpu.memory_space<vmem>>, %arg12: memref<1x4xf32, #tpu.memory_space<vmem>>, %arg13: memref<8x8xf32, #tpu.memory_space<vmem>>, %arg14: memref<16x8xf32, #tpu.memory_space<vmem>>, %arg15: memref<8x24xf32, #tpu.memory_space<vmem>>, %arg16: memref<1x24xf32, #tpu.memory_space<vmem>>, %arg17: memref<8x8xf32, #tpu.memory_space<vmem>>, %arg18: memref<1x8xf32, #tpu.memory_space<vmem>>, %arg19: memref<1x8xf32, #tpu.memory_space<vmem>>, %arg20: memref<1x8xf32, #tpu.memory_space<vmem>>, %arg21: memref<8x2048xf32, #tpu.memory_space<vmem>>, %arg22: memref<1x2048xf32, #tpu.memory_space<vmem>>, %arg23: memref<2048x8xf32, #tpu.memory_space<vmem>>, %arg24: memref<1x8xf32, #tpu.memory_space<vmem>>, %arg25: memref<1x8xf32, #tpu.memory_space<vmem>>, %arg26: memref<1x8xf32, #tpu.memory_space<vmem>>, %arg27: memref<8x24xf32, #tpu.memory_space<vmem>>, %arg28: memref<1x24xf32, #tpu.memory_space<vmem>>, %arg29: memref<8x8xf32, #tpu.memory_space<vmem>>, %arg30: memref<1x8xf32, #tpu.memory_space<vmem>>, %arg31: memref<1x8xf32, #tpu.memory_space<vmem>>, %arg32: memref<1x8xf32, #tpu.memory_space<vmem>>, %arg33: memref<8x2048xf32, #tpu.memory_space<vmem>>, %arg34: memref<1x2048xf32, #tpu.memory_space<vmem>>, %arg35: memref<2048x8xf32, #tpu.memory_space<vmem>>, %arg36: memref<1x8xf32, #tpu.memory_space<vmem>>, %arg37: memref<1x8xf32, #tpu.memory_space<vmem>>, %arg38: memref<1x8xf32, #tpu.memory_space<vmem>>, %arg39: memref<8x4xf32, #tpu.memory_space<vmem>>, %arg40: memref<1x4xf32, #tpu.memory_space<vmem>>, %arg41: memref<4x4xf32, #tpu.memory_space<vmem>>, %arg42: memref<4x4xf32, #tpu.memory_space<vmem>>, %arg43: memref<3x4xf32, #tpu.memory_space<vmem>>, %arg44: memref<1x4xf32, #tpu.memory_space<vmem>>, %arg45: memref<2x4xf32, #tpu.memory_space<vmem>>, %arg46: memref<16x32xf32, #tpu.memory_space<vmem>>) attributes {dimension_semantics = [], scalar_prefetch = 0 : i64, scratch_operands = 1 : i64, tpu.core_type = #tpu.core_type<tc>} {
    %c0 = arith.constant 0 : index
    %c0_0 = arith.constant 0 : index
    %0 = vector.load %arg0[%c0, %c0_0] : memref<16x8xf32, #tpu.memory_space<vmem>>, vector<16x8xf32>
    %c0_1 = arith.constant 0 : index
    %c0_2 = arith.constant 0 : index
    %1 = vector.load %arg3[%c0_1, %c0_2] : memref<8x128xf32, #tpu.memory_space<vmem>>, vector<8x128xf32>
    %cst = arith.constant dense<0.000000e+00> : vector<16x128xf32>
    %2 = tpu.matmul %0, %1, %cst {dimension_numbers = #tpu.dot_dimension_numbers<[1], [0], [0], [1], [0, 0, 1, 1], [], []>} : vector<16x8xf32>, vector<8x128xf32>, vector<16x128xf32> -> vector<16x128xf32>
    %c0_3 = arith.constant 0 : index
    %c0_4 = arith.constant 0 : index
    %3 = vector.load %arg5[%c0_3, %c0_4] : memref<1x128xf32, #tpu.memory_space<vmem>>, vector<1x128xf32>
    %4 = vector.broadcast %3 : vector<1x128xf32> to vector<16x128xf32>
    %5 = arith.addf %2, %4 : vector<16x128xf32>
    %cst_5 = arith.constant 0.000000e+00 : f32
    %6 = vector.broadcast %cst_5 : f32 to vector<2x32xf32>
    %cst_6 = arith.constant 0.000000e+00 : f32
    %7 = vector.broadcast %cst_6 : f32 to vector<2x32xf32>
    %8 = vector.extract_strided_slice %5 {offsets = [0, 0], sizes = [2, 128], strides = [1, 1]} : vector<16x128xf32> to vector<2x128xf32>
    %c0_7 = arith.constant 0 : index
    %c0_8 = arith.constant 0 : index
    %9 = vector.load %arg4[%c0_7, %c0_8] : memref<32x128xf32, #tpu.memory_space<vmem>>, vector<32x128xf32>
    %cst_9 = arith.constant dense<0.000000e+00> : vector<2x128xf32>
    %10 = tpu.matmul %6, %9, %cst_9 {dimension_numbers = #tpu.dot_dimension_numbers<[1], [0], [0], [1], [0, 0, 1, 1], [], []>} : vector<2x32xf32>, vector<32x128xf32>, vector<2x128xf32> -> vector<2x128xf32>
    %11 = arith.addf %8, %10 : vector<2x128xf32>
    %12 = vector.extract_strided_slice %11 {offsets = [0, 0], sizes = [2, 32], strides = [1, 1]} : vector<2x128xf32> to vector<2x32xf32>
    %13 = arith.negf %12 : vector<2x32xf32>
    %14 = math.exp %13 : vector<2x32xf32>
    %cst_10 = arith.constant 1.000000e+00 : f32
    %15 = vector.broadcast %cst_10 : f32 to vector<2x32xf32>
    %16 = arith.addf %15, %14 : vector<2x32xf32>
    %17 = arith.divf %15, %16 : vector<2x32xf32>
    %18 = vector.extract_strided_slice %11 {offsets = [0, 32], sizes = [2, 32], strides = [1, 1]} : vector<2x128xf32> to vector<2x32xf32>
    %19 = arith.negf %18 : vector<2x32xf32>
    %20 = math.exp %19 : vector<2x32xf32>
    %cst_11 = arith.constant 1.000000e+00 : f32
    %21 = vector.broadcast %cst_11 : f32 to vector<2x32xf32>
    %22 = arith.addf %21, %20 : vector<2x32xf32>
    %23 = arith.divf %21, %22 : vector<2x32xf32>
    %24 = vector.extract_strided_slice %11 {offsets = [0, 64], sizes = [2, 32], strides = [1, 1]} : vector<2x128xf32> to vector<2x32xf32>
    %25 = math.tanh %24 : vector<2x32xf32>
    %26 = vector.extract_strided_slice %11 {offsets = [0, 96], sizes = [2, 32], strides = [1, 1]} : vector<2x128xf32> to vector<2x32xf32>
    %27 = arith.negf %26 : vector<2x32xf32>
    %28 = math.exp %27 : vector<2x32xf32>
    %cst_12 = arith.constant 1.000000e+00 : f32
    %29 = vector.broadcast %cst_12 : f32 to vector<2x32xf32>
    %30 = arith.addf %29, %28 : vector<2x32xf32>
    %31 = arith.divf %29, %30 : vector<2x32xf32>
    %32 = arith.mulf %23, %7 : vector<2x32xf32>
    %33 = arith.mulf %17, %25 : vector<2x32xf32>
    %34 = arith.addf %32, %33 : vector<2x32xf32>
    %35 = math.tanh %34 : vector<2x32xf32>
    %36 = arith.mulf %31, %35 : vector<2x32xf32>
    %c0_13 = arith.constant 0 : index
    %c0_14 = arith.constant 0 : index
    %37 = vector.load %arg46[%c0_13, %c0_14] : memref<16x32xf32, #tpu.memory_space<vmem>>, vector<2x32xf32>
    tpu.vector_store %arg46[%c0_13, %c0_14], %36 {strides = array<i32>} : memref<16x32xf32, #tpu.memory_space<vmem>>, vector<2x32xf32>,
    %38 = vector.extract_strided_slice %5 {offsets = [2, 0], sizes = [2, 128], strides = [1, 1]} : vector<16x128xf32> to vector<2x128xf32>
    %c0_15 = arith.constant 0 : index
    %c0_16 = arith.constant 0 : index
    %39 = vector.load %arg4[%c0_15, %c0_16] : memref<32x128xf32, #tpu.memory_space<vmem>>, vector<32x128xf32>
    %cst_17 = arith.constant dense<0.000000e+00> : vector<2x128xf32>
    %40 = tpu.matmul %36, %39, %cst_17 {dimension_numbers = #tpu.dot_dimension_numbers<[1], [0], [0], [1], [0, 0, 1, 1], [], []>} : vector<2x32xf32>, vector<32x128xf32>, vector<2x128xf32> -> vector<2x128xf32>
    %41 = arith.addf %38, %40 : vector<2x128xf32>
    %42 = vector.extract_strided_slice %41 {offsets = [0, 0], sizes = [2, 32], strides = [1, 1]} : vector<2x128xf32> to vector<2x32xf32>
    %43 = arith.negf %42 : vector<2x32xf32>
    %44 = math.exp %43 : vector<2x32xf32>
    %cst_18 = arith.constant 1.000000e+00 : f32
    %45 = vector.broadcast %cst_18 : f32 to vector<2x32xf32>
    %46 = arith.addf %45, %44 : vector<2x32xf32>
    %47 = arith.divf %45, %46 : vector<2x32xf32>
    %48 = vector.extract_strided_slice %41 {offsets = [0, 32], sizes = [2, 32], strides = [1, 1]} : vector<2x128xf32> to vector<2x32xf32>
    %49 = arith.negf %48 : vector<2x32xf32>
    %50 = math.exp %49 : vector<2x32xf32>
    %cst_19 = arith.constant 1.000000e+00 : f32
    %51 = vector.broadcast %cst_19 : f32 to vector<2x32xf32>
    %52 = arith.addf %51, %50 : vector<2x32xf32>
    %53 = arith.divf %51, %52 : vector<2x32xf32>
    %54 = vector.extract_strided_slice %41 {offsets = [0, 64], sizes = [2, 32], strides = [1, 1]} : vector<2x128xf32> to vector<2x32xf32>
    %55 = math.tanh %54 : vector<2x32xf32>
    %56 = vector.extract_strided_slice %41 {offsets = [0, 96], sizes = [2, 32], strides = [1, 1]} : vector<2x128xf32> to vector<2x32xf32>
    %57 = arith.negf %56 : vector<2x32xf32>
    %58 = math.exp %57 : vector<2x32xf32>
    %cst_20 = arith.constant 1.000000e+00 : f32
    %59 = vector.broadcast %cst_20 : f32 to vector<2x32xf32>
    %60 = arith.addf %59, %58 : vector<2x32xf32>
    %61 = arith.divf %59, %60 : vector<2x32xf32>
    %62 = arith.mulf %53, %34 : vector<2x32xf32>
    %63 = arith.mulf %47, %55 : vector<2x32xf32>
    %64 = arith.addf %62, %63 : vector<2x32xf32>
    %65 = math.tanh %64 : vector<2x32xf32>
    %66 = arith.mulf %61, %65 : vector<2x32xf32>
    %c2 = arith.constant 2 : index
    %c0_21 = arith.constant 0 : index
    %67 = vector.load %arg46[%c2, %c0_21] : memref<16x32xf32, #tpu.memory_space<vmem>>, vector<2x32xf32>
    tpu.vector_store %arg46[%c2, %c0_21], %66 {strides = array<i32>} : memref<16x32xf32, #tpu.memory_space<vmem>>, vector<2x32xf32>,
    %68 = vector.extract_strided_slice %5 {offsets = [4, 0], sizes = [2, 128], strides = [1, 1]} : vector<16x128xf32> to vector<2x128xf32>
    %c0_22 = arith.constant 0 : index
    %c0_23 = arith.constant 0 : index
    %69 = vector.load %arg4[%c0_22, %c0_23] : memref<32x128xf32, #tpu.memory_space<vmem>>, vector<32x128xf32>
    %cst_24 = arith.constant dense<0.000000e+00> : vector<2x128xf32>
    %70 = tpu.matmul %66, %69, %cst_24 {dimension_numbers = #tpu.dot_dimension_numbers<[1], [0], [0], [1], [0, 0, 1, 1], [], []>} : vector<2x32xf32>, vector<32x128xf32>, vector<2x128xf32> -> vector<2x128xf32>
    %71 = arith.addf %68, %70 : vector<2x128xf32>
    %72 = vector.extract_strided_slice %71 {offsets = [0, 0], sizes = [2, 32], strides = [1, 1]} : vector<2x128xf32> to vector<2x32xf32>
    %73 = arith.negf %72 : vector<2x32xf32>
    %74 = math.exp %73 : vector<2x32xf32>
    %cst_25 = arith.constant 1.000000e+00 : f32
    %75 = vector.broadcast %cst_25 : f32 to vector<2x32xf32>
    %76 = arith.addf %75, %74 : vector<2x32xf32>
    %77 = arith.divf %75, %76 : vector<2x32xf32>
    %78 = vector.extract_strided_slice %71 {offsets = [0, 32], sizes = [2, 32], strides = [1, 1]} : vector<2x128xf32> to vector<2x32xf32>
    %79 = arith.negf %78 : vector<2x32xf32>
    %80 = math.exp %79 : vector<2x32xf32>
    %cst_26 = arith.constant 1.000000e+00 : f32
    %81 = vector.broadcast %cst_26 : f32 to vector<2x32xf32>
    %82 = arith.addf %81, %80 : vector<2x32xf32>
    %83 = arith.divf %81, %82 : vector<2x32xf32>
    %84 = vector.extract_strided_slice %71 {offsets = [0, 64], sizes = [2, 32], strides = [1, 1]} : vector<2x128xf32> to vector<2x32xf32>
    %85 = math.tanh %84 : vector<2x32xf32>
    %86 = vector.extract_strided_slice %71 {offsets = [0, 96], sizes = [2, 32], strides = [1, 1]} : vector<2x128xf32> to vector<2x32xf32>
    %87 = arith.negf %86 : vector<2x32xf32>
    %88 = math.exp %87 : vector<2x32xf32>
    %cst_27 = arith.constant 1.000000e+00 : f32
    %89 = vector.broadcast %cst_27 : f32 to vector<2x32xf32>
    %90 = arith.addf %89, %88 : vector<2x32xf32>
    %91 = arith.divf %89, %90 : vector<2x32xf32>
    %92 = arith.mulf %83, %64 : vector<2x32xf32>
    %93 = arith.mulf %77, %85 : vector<2x32xf32>
    %94 = arith.addf %92, %93 : vector<2x32xf32>
    %95 = math.tanh %94 : vector<2x32xf32>
    %96 = arith.mulf %91, %95 : vector<2x32xf32>
    %c4 = arith.constant 4 : index
    %c0_28 = arith.constant 0 : index
    %97 = vector.load %arg46[%c4, %c0_28] : memref<16x32xf32, #tpu.memory_space<vmem>>, vector<2x32xf32>
    tpu.vector_store %arg46[%c4, %c0_28], %96 {strides = array<i32>} : memref<16x32xf32, #tpu.memory_space<vmem>>, vector<2x32xf32>,
    %98 = vector.extract_strided_slice %5 {offsets = [6, 0], sizes = [2, 128], strides = [1, 1]} : vector<16x128xf32> to vector<2x128xf32>
    %c0_29 = arith.constant 0 : index
    %c0_30 = arith.constant 0 : index
    %99 = vector.load %arg4[%c0_29, %c0_30] : memref<32x128xf32, #tpu.memory_space<vmem>>, vector<32x128xf32>
    %cst_31 = arith.constant dense<0.000000e+00> : vector<2x128xf32>
    %100 = tpu.matmul %96, %99, %cst_31 {dimension_numbers = #tpu.dot_dimension_numbers<[1], [0], [0], [1], [0, 0, 1, 1], [], []>} : vector<2x32xf32>, vector<32x128xf32>, vector<2x128xf32> -> vector<2x128xf32>
    %101 = arith.addf %98, %100 : vector<2x128xf32>
    %102 = vector.extract_strided_slice %101 {offsets = [0, 0], sizes = [2, 32], strides = [1, 1]} : vector<2x128xf32> to vector<2x32xf32>
    %103 = arith.negf %102 : vector<2x32xf32>
    %104 = math.exp %103 : vector<2x32xf32>
    %cst_32 = arith.constant 1.000000e+00 : f32
    %105 = vector.broadcast %cst_32 : f32 to vector<2x32xf32>
    %106 = arith.addf %105, %104 : vector<2x32xf32>
    %107 = arith.divf %105, %106 : vector<2x32xf32>
    %108 = vector.extract_strided_slice %101 {offsets = [0, 32], sizes = [2, 32], strides = [1, 1]} : vector<2x128xf32> to vector<2x32xf32>
    %109 = arith.negf %108 : vector<2x32xf32>
    %110 = math.exp %109 : vector<2x32xf32>
    %cst_33 = arith.constant 1.000000e+00 : f32
    %111 = vector.broadcast %cst_33 : f32 to vector<2x32xf32>
    %112 = arith.addf %111, %110 : vector<2x32xf32>
    %113 = arith.divf %111, %112 : vector<2x32xf32>
    %114 = vector.extract_strided_slice %101 {offsets = [0, 64], sizes = [2, 32], strides = [1, 1]} : vector<2x128xf32> to vector<2x32xf32>
    %115 = math.tanh %114 : vector<2x32xf32>
    %116 = vector.extract_strided_slice %101 {offsets = [0, 96], sizes = [2, 32], strides = [1, 1]} : vector<2x128xf32> to vector<2x32xf32>
    %117 = arith.negf %116 : vector<2x32xf32>
    %118 = math.exp %117 : vector<2x32xf32>
    %cst_34 = arith.constant 1.000000e+00 : f32
    %119 = vector.broadcast %cst_34 : f32 to vector<2x32xf32>
    %120 = arith.addf %119, %118 : vector<2x32xf32>
    %121 = arith.divf %119, %120 : vector<2x32xf32>
    %122 = arith.mulf %113, %94 : vector<2x32xf32>
    %123 = arith.mulf %107, %115 : vector<2x32xf32>
    %124 = arith.addf %122, %123 : vector<2x32xf32>
    %125 = math.tanh %124 : vector<2x32xf32>
    %126 = arith.mulf %121, %125 : vector<2x32xf32>
    %c6 = arith.constant 6 : index
    %c0_35 = arith.constant 0 : index
    %127 = vector.load %arg46[%c6, %c0_35] : memref<16x32xf32, #tpu.memory_space<vmem>>, vector<2x32xf32>
    tpu.vector_store %arg46[%c6, %c0_35], %126 {strides = array<i32>} : memref<16x32xf32, #tpu.memory_space<vmem>>, vector<2x32xf32>,
    %128 = vector.extract_strided_slice %5 {offsets = [8, 0], sizes = [2, 128], strides = [1, 1]} : vector<16x128xf32> to vector<2x128xf32>
    %c0_36 = arith.constant 0 : index
    %c0_37 = arith.constant 0 : index
    %129 = vector.load %arg4[%c0_36, %c0_37] : memref<32x128xf32, #tpu.memory_space<vmem>>, vector<32x128xf32>
    %cst_38 = arith.constant dense<0.000000e+00> : vector<2x128xf32>
    %130 = tpu.matmul %126, %129, %cst_38 {dimension_numbers = #tpu.dot_dimension_numbers<[1], [0], [0], [1], [0, 0, 1, 1], [], []>} : vector<2x32xf32>, vector<32x128xf32>, vector<2x128xf32> -> vector<2x128xf32>
    %131 = arith.addf %128, %130 : vector<2x128xf32>
    %132 = vector.extract_strided_slice %131 {offsets = [0, 0], sizes = [2, 32], strides = [1, 1]} : vector<2x128xf32> to vector<2x32xf32>
    %133 = arith.negf %132 : vector<2x32xf32>
    %134 = math.exp %133 : vector<2x32xf32>
    %cst_39 = arith.constant 1.000000e+00 : f32
    %135 = vector.broadcast %cst_39 : f32 to vector<2x32xf32>
    %136 = arith.addf %135, %134 : vector<2x32xf32>
    %137 = arith.divf %135, %136 : vector<2x32xf32>
    %138 = vector.extract_strided_slice %131 {offsets = [0, 32], sizes = [2, 32], strides = [1, 1]} : vector<2x128xf32> to vector<2x32xf32>
    %139 = arith.negf %138 : vector<2x32xf32>
    %140 = math.exp %139 : vector<2x32xf32>
    %cst_40 = arith.constant 1.000000e+00 : f32
    %141 = vector.broadcast %cst_40 : f32 to vector<2x32xf32>
    %142 = arith.addf %141, %140 : vector<2x32xf32>
    %143 = arith.divf %141, %142 : vector<2x32xf32>
    %144 = vector.extract_strided_slice %131 {offsets = [0, 64], sizes = [2, 32], strides = [1, 1]} : vector<2x128xf32> to vector<2x32xf32>
    %145 = math.tanh %144 : vector<2x32xf32>
    %146 = vector.extract_strided_slice %131 {offsets = [0, 96], sizes = [2, 32], strides = [1, 1]} : vector<2x128xf32> to vector<2x32xf32>
    %147 = arith.negf %146 : vector<2x32xf32>
    %148 = math.exp %147 : vector<2x32xf32>
    %cst_41 = arith.constant 1.000000e+00 : f32
    %149 = vector.broadcast %cst_41 : f32 to vector<2x32xf32>
    %150 = arith.addf %149, %148 : vector<2x32xf32>
    %151 = arith.divf %149, %150 : vector<2x32xf32>
    %152 = arith.mulf %143, %124 : vector<2x32xf32>
    %153 = arith.mulf %137, %145 : vector<2x32xf32>
    %154 = arith.addf %152, %153 : vector<2x32xf32>
    %155 = math.tanh %154 : vector<2x32xf32>
    %156 = arith.mulf %151, %155 : vector<2x32xf32>
    %c8 = arith.constant 8 : index
    %c0_42 = arith.constant 0 : index
    %157 = vector.load %arg46[%c8, %c0_42] : memref<16x32xf32, #tpu.memory_space<vmem>>, vector<2x32xf32>
    tpu.vector_store %arg46[%c8, %c0_42], %156 {strides = array<i32>} : memref<16x32xf32, #tpu.memory_space<vmem>>, vector<2x32xf32>,
    %158 = vector.extract_strided_slice %5 {offsets = [10, 0], sizes = [2, 128], strides = [1, 1]} : vector<16x128xf32> to vector<2x128xf32>
    %c0_43 = arith.constant 0 : index
    %c0_44 = arith.constant 0 : index
    %159 = vector.load %arg4[%c0_43, %c0_44] : memref<32x128xf32, #tpu.memory_space<vmem>>, vector<32x128xf32>
    %cst_45 = arith.constant dense<0.000000e+00> : vector<2x128xf32>
    %160 = tpu.matmul %156, %159, %cst_45 {dimension_numbers = #tpu.dot_dimension_numbers<[1], [0], [0], [1], [0, 0, 1, 1], [], []>} : vector<2x32xf32>, vector<32x128xf32>, vector<2x128xf32> -> vector<2x128xf32>
    %161 = arith.addf %158, %160 : vector<2x128xf32>
    %162 = vector.extract_strided_slice %161 {offsets = [0, 0], sizes = [2, 32], strides = [1, 1]} : vector<2x128xf32> to vector<2x32xf32>
    %163 = arith.negf %162 : vector<2x32xf32>
    %164 = math.exp %163 : vector<2x32xf32>
    %cst_46 = arith.constant 1.000000e+00 : f32
    %165 = vector.broadcast %cst_46 : f32 to vector<2x32xf32>
    %166 = arith.addf %165, %164 : vector<2x32xf32>
    %167 = arith.divf %165, %166 : vector<2x32xf32>
    %168 = vector.extract_strided_slice %161 {offsets = [0, 32], sizes = [2, 32], strides = [1, 1]} : vector<2x128xf32> to vector<2x32xf32>
    %169 = arith.negf %168 : vector<2x32xf32>
    %170 = math.exp %169 : vector<2x32xf32>
    %cst_47 = arith.constant 1.000000e+00 : f32
    %171 = vector.broadcast %cst_47 : f32 to vector<2x32xf32>
    %172 = arith.addf %171, %170 : vector<2x32xf32>
    %173 = arith.divf %171, %172 : vector<2x32xf32>
    %174 = vector.extract_strided_slice %161 {offsets = [0, 64], sizes = [2, 32], strides = [1, 1]} : vector<2x128xf32> to vector<2x32xf32>
    %175 = math.tanh %174 : vector<2x32xf32>
    %176 = vector.extract_strided_slice %161 {offsets = [0, 96], sizes = [2, 32], strides = [1, 1]} : vector<2x128xf32> to vector<2x32xf32>
    %177 = arith.negf %176 : vector<2x32xf32>
    %178 = math.exp %177 : vector<2x32xf32>
    %cst_48 = arith.constant 1.000000e+00 : f32
    %179 = vector.broadcast %cst_48 : f32 to vector<2x32xf32>
    %180 = arith.addf %179, %178 : vector<2x32xf32>
    %181 = arith.divf %179, %180 : vector<2x32xf32>
    %182 = arith.mulf %173, %154 : vector<2x32xf32>
    %183 = arith.mulf %167, %175 : vector<2x32xf32>
    %184 = arith.addf %182, %183 : vector<2x32xf32>
    %185 = math.tanh %184 : vector<2x32xf32>
    %186 = arith.mulf %181, %185 : vector<2x32xf32>
    %c10 = arith.constant 10 : index
    %c0_49 = arith.constant 0 : index
    %187 = vector.load %arg46[%c10, %c0_49] : memref<16x32xf32, #tpu.memory_space<vmem>>, vector<2x32xf32>
    tpu.vector_store %arg46[%c10, %c0_49], %186 {strides = array<i32>} : memref<16x32xf32, #tpu.memory_space<vmem>>, vector<2x32xf32>,
    %188 = vector.extract_strided_slice %5 {offsets = [12, 0], sizes = [2, 128], strides = [1, 1]} : vector<16x128xf32> to vector<2x128xf32>
    %c0_50 = arith.constant 0 : index
    %c0_51 = arith.constant 0 : index
    %189 = vector.load %arg4[%c0_50, %c0_51] : memref<32x128xf32, #tpu.memory_space<vmem>>, vector<32x128xf32>
    %cst_52 = arith.constant dense<0.000000e+00> : vector<2x128xf32>
    %190 = tpu.matmul %186, %189, %cst_52 {dimension_numbers = #tpu.dot_dimension_numbers<[1], [0], [0], [1], [0, 0, 1, 1], [], []>} : vector<2x32xf32>, vector<32x128xf32>, vector<2x128xf32> -> vector<2x128xf32>
    %191 = arith.addf %188, %190 : vector<2x128xf32>
    %192 = vector.extract_strided_slice %191 {offsets = [0, 0], sizes = [2, 32], strides = [1, 1]} : vector<2x128xf32> to vector<2x32xf32>
    %193 = arith.negf %192 : vector<2x32xf32>
    %194 = math.exp %193 : vector<2x32xf32>
    %cst_53 = arith.constant 1.000000e+00 : f32
    %195 = vector.broadcast %cst_53 : f32 to vector<2x32xf32>
    %196 = arith.addf %195, %194 : vector<2x32xf32>
    %197 = arith.divf %195, %196 : vector<2x32xf32>
    %198 = vector.extract_strided_slice %191 {offsets = [0, 32], sizes = [2, 32], strides = [1, 1]} : vector<2x128xf32> to vector<2x32xf32>
    %199 = arith.negf %198 : vector<2x32xf32>
    %200 = math.exp %199 : vector<2x32xf32>
    %cst_54 = arith.constant 1.000000e+00 : f32
    %201 = vector.broadcast %cst_54 : f32 to vector<2x32xf32>
    %202 = arith.addf %201, %200 : vector<2x32xf32>
    %203 = arith.divf %201, %202 : vector<2x32xf32>
    %204 = vector.extract_strided_slice %191 {offsets = [0, 64], sizes = [2, 32], strides = [1, 1]} : vector<2x128xf32> to vector<2x32xf32>
    %205 = math.tanh %204 : vector<2x32xf32>
    %206 = vector.extract_strided_slice %191 {offsets = [0, 96], sizes = [2, 32], strides = [1, 1]} : vector<2x128xf32> to vector<2x32xf32>
    %207 = arith.negf %206 : vector<2x32xf32>
    %208 = math.exp %207 : vector<2x32xf32>
    %cst_55 = arith.constant 1.000000e+00 : f32
    %209 = vector.broadcast %cst_55 : f32 to vector<2x32xf32>
    %210 = arith.addf %209, %208 : vector<2x32xf32>
    %211 = arith.divf %209, %210 : vector<2x32xf32>
    %212 = arith.mulf %203, %184 : vector<2x32xf32>
    %213 = arith.mulf %197, %205 : vector<2x32xf32>
    %214 = arith.addf %212, %213 : vector<2x32xf32>
    %215 = math.tanh %214 : vector<2x32xf32>
    %216 = arith.mulf %211, %215 : vector<2x32xf32>
    %c12 = arith.constant 12 : index
    %c0_56 = arith.constant 0 : index
    %217 = vector.load %arg46[%c12, %c0_56] : memref<16x32xf32, #tpu.memory_space<vmem>>, vector<2x32xf32>
    tpu.vector_store %arg46[%c12, %c0_56], %216 {strides = array<i32>} : memref<16x32xf32, #tpu.memory_space<vmem>>, vector<2x32xf32>,
    %218 = vector.extract_strided_slice %5 {offsets = [14, 0], sizes = [2, 128], strides = [1, 1]} : vector<16x128xf32> to vector<2x128xf32>
    %c0_57 = arith.constant 0 : index
    %c0_58 = arith.constant 0 : index
    %219 = vector.load %arg4[%c0_57, %c0_58] : memref<32x128xf32, #tpu.memory_space<vmem>>, vector<32x128xf32>
    %cst_59 = arith.constant dense<0.000000e+00> : vector<2x128xf32>
    %220 = tpu.matmul %216, %219, %cst_59 {dimension_numbers = #tpu.dot_dimension_numbers<[1], [0], [0], [1], [0, 0, 1, 1], [], []>} : vector<2x32xf32>, vector<32x128xf32>, vector<2x128xf32> -> vector<2x128xf32>
    %221 = arith.addf %218, %220 : vector<2x128xf32>
    %222 = vector.extract_strided_slice %221 {offsets = [0, 0], sizes = [2, 32], strides = [1, 1]} : vector<2x128xf32> to vector<2x32xf32>
    %223 = arith.negf %222 : vector<2x32xf32>
    %224 = math.exp %223 : vector<2x32xf32>
    %cst_60 = arith.constant 1.000000e+00 : f32
    %225 = vector.broadcast %cst_60 : f32 to vector<2x32xf32>
    %226 = arith.addf %225, %224 : vector<2x32xf32>
    %227 = arith.divf %225, %226 : vector<2x32xf32>
    %228 = vector.extract_strided_slice %221 {offsets = [0, 32], sizes = [2, 32], strides = [1, 1]} : vector<2x128xf32> to vector<2x32xf32>
    %229 = arith.negf %228 : vector<2x32xf32>
    %230 = math.exp %229 : vector<2x32xf32>
    %cst_61 = arith.constant 1.000000e+00 : f32
    %231 = vector.broadcast %cst_61 : f32 to vector<2x32xf32>
    %232 = arith.addf %231, %230 : vector<2x32xf32>
    %233 = arith.divf %231, %232 : vector<2x32xf32>
    %234 = vector.extract_strided_slice %221 {offsets = [0, 64], sizes = [2, 32], strides = [1, 1]} : vector<2x128xf32> to vector<2x32xf32>
    %235 = math.tanh %234 : vector<2x32xf32>
    %236 = vector.extract_strided_slice %221 {offsets = [0, 96], sizes = [2, 32], strides = [1, 1]} : vector<2x128xf32> to vector<2x32xf32>
    %237 = arith.negf %236 : vector<2x32xf32>
    %238 = math.exp %237 : vector<2x32xf32>
    %cst_62 = arith.constant 1.000000e+00 : f32
    %239 = vector.broadcast %cst_62 : f32 to vector<2x32xf32>
    %240 = arith.addf %239, %238 : vector<2x32xf32>
    %241 = arith.divf %239, %240 : vector<2x32xf32>
    %242 = arith.mulf %233, %214 : vector<2x32xf32>
    %243 = arith.mulf %227, %235 : vector<2x32xf32>
    %244 = arith.addf %242, %243 : vector<2x32xf32>
    %245 = math.tanh %244 : vector<2x32xf32>
    %246 = arith.mulf %241, %245 : vector<2x32xf32>
    %c14 = arith.constant 14 : index
    %c0_63 = arith.constant 0 : index
    %247 = vector.load %arg46[%c14, %c0_63] : memref<16x32xf32, #tpu.memory_space<vmem>>, vector<2x32xf32>
    tpu.vector_store %arg46[%c14, %c0_63], %246 {strides = array<i32>} : memref<16x32xf32, #tpu.memory_space<vmem>>, vector<2x32xf32>,
    %c0_64 = arith.constant 0 : index
    %c0_65 = arith.constant 0 : index
    %248 = vector.load %arg46[%c0_64, %c0_65] : memref<16x32xf32, #tpu.memory_space<vmem>>, vector<16x32xf32>
    %c0_66 = arith.constant 0 : index
    %c0_67 = arith.constant 0 : index
    %249 = vector.load %arg6[%c0_66, %c0_67] : memref<32x128xf32, #tpu.memory_space<vmem>>, vector<32x128xf32>
    %cst_68 = arith.constant dense<0.000000e+00> : vector<16x128xf32>
    %250 = tpu.matmul %248, %249, %cst_68 {dimension_numbers = #tpu.dot_dimension_numbers<[1], [0], [0], [1], [0, 0, 1, 1], [], []>} : vector<16x32xf32>, vector<32x128xf32>, vector<16x128xf32> -> vector<16x128xf32>
    %c0_69 = arith.constant 0 : index
    %c0_70 = arith.constant 0 : index
    %251 = vector.load %arg8[%c0_69, %c0_70] : memref<1x128xf32, #tpu.memory_space<vmem>>, vector<1x128xf32>
    %252 = vector.broadcast %251 : vector<1x128xf32> to vector<16x128xf32>
    %253 = arith.addf %250, %252 : vector<16x128xf32>
    %cst_71 = arith.constant 0.000000e+00 : f32
    %254 = vector.broadcast %cst_71 : f32 to vector<2x32xf32>
    %cst_72 = arith.constant 0.000000e+00 : f32
    %255 = vector.broadcast %cst_72 : f32 to vector<2x32xf32>
    %256 = vector.extract_strided_slice %253 {offsets = [0, 0], sizes = [2, 128], strides = [1, 1]} : vector<16x128xf32> to vector<2x128xf32>
    %c0_73 = arith.constant 0 : index
    %c0_74 = arith.constant 0 : index
    %257 = vector.load %arg7[%c0_73, %c0_74] : memref<32x128xf32, #tpu.memory_space<vmem>>, vector<32x128xf32>
    %cst_75 = arith.constant dense<0.000000e+00> : vector<2x128xf32>
    %258 = tpu.matmul %254, %257, %cst_75 {dimension_numbers = #tpu.dot_dimension_numbers<[1], [0], [0], [1], [0, 0, 1, 1], [], []>} : vector<2x32xf32>, vector<32x128xf32>, vector<2x128xf32> -> vector<2x128xf32>
    %259 = arith.addf %256, %258 : vector<2x128xf32>
    %260 = vector.extract_strided_slice %259 {offsets = [0, 0], sizes = [2, 32], strides = [1, 1]} : vector<2x128xf32> to vector<2x32xf32>
    %261 = arith.negf %260 : vector<2x32xf32>
    %262 = math.exp %261 : vector<2x32xf32>
    %cst_76 = arith.constant 1.000000e+00 : f32
    %263 = vector.broadcast %cst_76 : f32 to vector<2x32xf32>
    %264 = arith.addf %263, %262 : vector<2x32xf32>
    %265 = arith.divf %263, %264 : vector<2x32xf32>
    %266 = vector.extract_strided_slice %259 {offsets = [0, 32], sizes = [2, 32], strides = [1, 1]} : vector<2x128xf32> to vector<2x32xf32>
    %267 = arith.negf %266 : vector<2x32xf32>
    %268 = math.exp %267 : vector<2x32xf32>
    %cst_77 = arith.constant 1.000000e+00 : f32
    %269 = vector.broadcast %cst_77 : f32 to vector<2x32xf32>
    %270 = arith.addf %269, %268 : vector<2x32xf32>
    %271 = arith.divf %269, %270 : vector<2x32xf32>
    %272 = vector.extract_strided_slice %259 {offsets = [0, 64], sizes = [2, 32], strides = [1, 1]} : vector<2x128xf32> to vector<2x32xf32>
    %273 = math.tanh %272 : vector<2x32xf32>
    %274 = vector.extract_strided_slice %259 {offsets = [0, 96], sizes = [2, 32], strides = [1, 1]} : vector<2x128xf32> to vector<2x32xf32>
    %275 = arith.negf %274 : vector<2x32xf32>
    %276 = math.exp %275 : vector<2x32xf32>
    %cst_78 = arith.constant 1.000000e+00 : f32
    %277 = vector.broadcast %cst_78 : f32 to vector<2x32xf32>
    %278 = arith.addf %277, %276 : vector<2x32xf32>
    %279 = arith.divf %277, %278 : vector<2x32xf32>
    %280 = arith.mulf %271, %255 : vector<2x32xf32>
    %281 = arith.mulf %265, %273 : vector<2x32xf32>
    %282 = arith.addf %280, %281 : vector<2x32xf32>
    %283 = math.tanh %282 : vector<2x32xf32>
    %284 = arith.mulf %279, %283 : vector<2x32xf32>
    %285 = vector.extract_strided_slice %253 {offsets = [2, 0], sizes = [2, 128], strides = [1, 1]} : vector<16x128xf32> to vector<2x128xf32>
    %c0_79 = arith.constant 0 : index
    %c0_80 = arith.constant 0 : index
    %286 = vector.load %arg7[%c0_79, %c0_80] : memref<32x128xf32, #tpu.memory_space<vmem>>, vector<32x128xf32>
    %cst_81 = arith.constant dense<0.000000e+00> : vector<2x128xf32>
    %287 = tpu.matmul %284, %286, %cst_81 {dimension_numbers = #tpu.dot_dimension_numbers<[1], [0], [0], [1], [0, 0, 1, 1], [], []>} : vector<2x32xf32>, vector<32x128xf32>, vector<2x128xf32> -> vector<2x128xf32>
    %288 = arith.addf %285, %287 : vector<2x128xf32>
    %289 = vector.extract_strided_slice %288 {offsets = [0, 0], sizes = [2, 32], strides = [1, 1]} : vector<2x128xf32> to vector<2x32xf32>
    %290 = arith.negf %289 : vector<2x32xf32>
    %291 = math.exp %290 : vector<2x32xf32>
    %cst_82 = arith.constant 1.000000e+00 : f32
    %292 = vector.broadcast %cst_82 : f32 to vector<2x32xf32>
    %293 = arith.addf %292, %291 : vector<2x32xf32>
    %294 = arith.divf %292, %293 : vector<2x32xf32>
    %295 = vector.extract_strided_slice %288 {offsets = [0, 32], sizes = [2, 32], strides = [1, 1]} : vector<2x128xf32> to vector<2x32xf32>
    %296 = arith.negf %295 : vector<2x32xf32>
    %297 = math.exp %296 : vector<2x32xf32>
    %cst_83 = arith.constant 1.000000e+00 : f32
    %298 = vector.broadcast %cst_83 : f32 to vector<2x32xf32>
    %299 = arith.addf %298, %297 : vector<2x32xf32>
    %300 = arith.divf %298, %299 : vector<2x32xf32>
    %301 = vector.extract_strided_slice %288 {offsets = [0, 64], sizes = [2, 32], strides = [1, 1]} : vector<2x128xf32> to vector<2x32xf32>
    %302 = math.tanh %301 : vector<2x32xf32>
    %303 = vector.extract_strided_slice %288 {offsets = [0, 96], sizes = [2, 32], strides = [1, 1]} : vector<2x128xf32> to vector<2x32xf32>
    %304 = arith.negf %303 : vector<2x32xf32>
    %305 = math.exp %304 : vector<2x32xf32>
    %cst_84 = arith.constant 1.000000e+00 : f32
    %306 = vector.broadcast %cst_84 : f32 to vector<2x32xf32>
    %307 = arith.addf %306, %305 : vector<2x32xf32>
    %308 = arith.divf %306, %307 : vector<2x32xf32>
    %309 = arith.mulf %300, %282 : vector<2x32xf32>
    %310 = arith.mulf %294, %302 : vector<2x32xf32>
    %311 = arith.addf %309, %310 : vector<2x32xf32>
    %312 = math.tanh %311 : vector<2x32xf32>
    %313 = arith.mulf %308, %312 : vector<2x32xf32>
    %314 = vector.extract_strided_slice %253 {offsets = [4, 0], sizes = [2, 128], strides = [1, 1]} : vector<16x128xf32> to vector<2x128xf32>
    %c0_85 = arith.constant 0 : index
    %c0_86 = arith.constant 0 : index
    %315 = vector.load %arg7[%c0_85, %c0_86] : memref<32x128xf32, #tpu.memory_space<vmem>>, vector<32x128xf32>
    %cst_87 = arith.constant dense<0.000000e+00> : vector<2x128xf32>
    %316 = tpu.matmul %313, %315, %cst_87 {dimension_numbers = #tpu.dot_dimension_numbers<[1], [0], [0], [1], [0, 0, 1, 1], [], []>} : vector<2x32xf32>, vector<32x128xf32>, vector<2x128xf32> -> vector<2x128xf32>
    %317 = arith.addf %314, %316 : vector<2x128xf32>
    %318 = vector.extract_strided_slice %317 {offsets = [0, 0], sizes = [2, 32], strides = [1, 1]} : vector<2x128xf32> to vector<2x32xf32>
    %319 = arith.negf %318 : vector<2x32xf32>
    %320 = math.exp %319 : vector<2x32xf32>
    %cst_88 = arith.constant 1.000000e+00 : f32
    %321 = vector.broadcast %cst_88 : f32 to vector<2x32xf32>
    %322 = arith.addf %321, %320 : vector<2x32xf32>
    %323 = arith.divf %321, %322 : vector<2x32xf32>
    %324 = vector.extract_strided_slice %317 {offsets = [0, 32], sizes = [2, 32], strides = [1, 1]} : vector<2x128xf32> to vector<2x32xf32>
    %325 = arith.negf %324 : vector<2x32xf32>
    %326 = math.exp %325 : vector<2x32xf32>
    %cst_89 = arith.constant 1.000000e+00 : f32
    %327 = vector.broadcast %cst_89 : f32 to vector<2x32xf32>
    %328 = arith.addf %327, %326 : vector<2x32xf32>
    %329 = arith.divf %327, %328 : vector<2x32xf32>
    %330 = vector.extract_strided_slice %317 {offsets = [0, 64], sizes = [2, 32], strides = [1, 1]} : vector<2x128xf32> to vector<2x32xf32>
    %331 = math.tanh %330 : vector<2x32xf32>
    %332 = vector.extract_strided_slice %317 {offsets = [0, 96], sizes = [2, 32], strides = [1, 1]} : vector<2x128xf32> to vector<2x32xf32>
    %333 = arith.negf %332 : vector<2x32xf32>
    %334 = math.exp %333 : vector<2x32xf32>
    %cst_90 = arith.constant 1.000000e+00 : f32
    %335 = vector.broadcast %cst_90 : f32 to vector<2x32xf32>
    %336 = arith.addf %335, %334 : vector<2x32xf32>
    %337 = arith.divf %335, %336 : vector<2x32xf32>
    %338 = arith.mulf %329, %311 : vector<2x32xf32>
    %339 = arith.mulf %323, %331 : vector<2x32xf32>
    %340 = arith.addf %338, %339 : vector<2x32xf32>
    %341 = math.tanh %340 : vector<2x32xf32>
    %342 = arith.mulf %337, %341 : vector<2x32xf32>
    %343 = vector.extract_strided_slice %253 {offsets = [6, 0], sizes = [2, 128], strides = [1, 1]} : vector<16x128xf32> to vector<2x128xf32>
    %c0_91 = arith.constant 0 : index
    %c0_92 = arith.constant 0 : index
    %344 = vector.load %arg7[%c0_91, %c0_92] : memref<32x128xf32, #tpu.memory_space<vmem>>, vector<32x128xf32>
    %cst_93 = arith.constant dense<0.000000e+00> : vector<2x128xf32>
    %345 = tpu.matmul %342, %344, %cst_93 {dimension_numbers = #tpu.dot_dimension_numbers<[1], [0], [0], [1], [0, 0, 1, 1], [], []>} : vector<2x32xf32>, vector<32x128xf32>, vector<2x128xf32> -> vector<2x128xf32>
    %346 = arith.addf %343, %345 : vector<2x128xf32>
    %347 = vector.extract_strided_slice %346 {offsets = [0, 0], sizes = [2, 32], strides = [1, 1]} : vector<2x128xf32> to vector<2x32xf32>
    %348 = arith.negf %347 : vector<2x32xf32>
    %349 = math.exp %348 : vector<2x32xf32>
    %cst_94 = arith.constant 1.000000e+00 : f32
    %350 = vector.broadcast %cst_94 : f32 to vector<2x32xf32>
    %351 = arith.addf %350, %349 : vector<2x32xf32>
    %352 = arith.divf %350, %351 : vector<2x32xf32>
    %353 = vector.extract_strided_slice %346 {offsets = [0, 32], sizes = [2, 32], strides = [1, 1]} : vector<2x128xf32> to vector<2x32xf32>
    %354 = arith.negf %353 : vector<2x32xf32>
    %355 = math.exp %354 : vector<2x32xf32>
    %cst_95 = arith.constant 1.000000e+00 : f32
    %356 = vector.broadcast %cst_95 : f32 to vector<2x32xf32>
    %357 = arith.addf %356, %355 : vector<2x32xf32>
    %358 = arith.divf %356, %357 : vector<2x32xf32>
    %359 = vector.extract_strided_slice %346 {offsets = [0, 64], sizes = [2, 32], strides = [1, 1]} : vector<2x128xf32> to vector<2x32xf32>
    %360 = math.tanh %359 : vector<2x32xf32>
    %361 = vector.extract_strided_slice %346 {offsets = [0, 96], sizes = [2, 32], strides = [1, 1]} : vector<2x128xf32> to vector<2x32xf32>
    %362 = arith.negf %361 : vector<2x32xf32>
    %363 = math.exp %362 : vector<2x32xf32>
    %cst_96 = arith.constant 1.000000e+00 : f32
    %364 = vector.broadcast %cst_96 : f32 to vector<2x32xf32>
    %365 = arith.addf %364, %363 : vector<2x32xf32>
    %366 = arith.divf %364, %365 : vector<2x32xf32>
    %367 = arith.mulf %358, %340 : vector<2x32xf32>
    %368 = arith.mulf %352, %360 : vector<2x32xf32>
    %369 = arith.addf %367, %368 : vector<2x32xf32>
    %370 = math.tanh %369 : vector<2x32xf32>
    %371 = arith.mulf %366, %370 : vector<2x32xf32>
    %372 = vector.extract_strided_slice %253 {offsets = [8, 0], sizes = [2, 128], strides = [1, 1]} : vector<16x128xf32> to vector<2x128xf32>
    %c0_97 = arith.constant 0 : index
    %c0_98 = arith.constant 0 : index
    %373 = vector.load %arg7[%c0_97, %c0_98] : memref<32x128xf32, #tpu.memory_space<vmem>>, vector<32x128xf32>
    %cst_99 = arith.constant dense<0.000000e+00> : vector<2x128xf32>
    %374 = tpu.matmul %371, %373, %cst_99 {dimension_numbers = #tpu.dot_dimension_numbers<[1], [0], [0], [1], [0, 0, 1, 1], [], []>} : vector<2x32xf32>, vector<32x128xf32>, vector<2x128xf32> -> vector<2x128xf32>
    %375 = arith.addf %372, %374 : vector<2x128xf32>
    %376 = vector.extract_strided_slice %375 {offsets = [0, 0], sizes = [2, 32], strides = [1, 1]} : vector<2x128xf32> to vector<2x32xf32>
    %377 = arith.negf %376 : vector<2x32xf32>
    %378 = math.exp %377 : vector<2x32xf32>
    %cst_100 = arith.constant 1.000000e+00 : f32
    %379 = vector.broadcast %cst_100 : f32 to vector<2x32xf32>
    %380 = arith.addf %379, %378 : vector<2x32xf32>
    %381 = arith.divf %379, %380 : vector<2x32xf32>
    %382 = vector.extract_strided_slice %375 {offsets = [0, 32], sizes = [2, 32], strides = [1, 1]} : vector<2x128xf32> to vector<2x32xf32>
    %383 = arith.negf %382 : vector<2x32xf32>
    %384 = math.exp %383 : vector<2x32xf32>
    %cst_101 = arith.constant 1.000000e+00 : f32
    %385 = vector.broadcast %cst_101 : f32 to vector<2x32xf32>
    %386 = arith.addf %385, %384 : vector<2x32xf32>
    %387 = arith.divf %385, %386 : vector<2x32xf32>
    %388 = vector.extract_strided_slice %375 {offsets = [0, 64], sizes = [2, 32], strides = [1, 1]} : vector<2x128xf32> to vector<2x32xf32>
    %389 = math.tanh %388 : vector<2x32xf32>
    %390 = vector.extract_strided_slice %375 {offsets = [0, 96], sizes = [2, 32], strides = [1, 1]} : vector<2x128xf32> to vector<2x32xf32>
    %391 = arith.negf %390 : vector<2x32xf32>
    %392 = math.exp %391 : vector<2x32xf32>
    %cst_102 = arith.constant 1.000000e+00 : f32
    %393 = vector.broadcast %cst_102 : f32 to vector<2x32xf32>
    %394 = arith.addf %393, %392 : vector<2x32xf32>
    %395 = arith.divf %393, %394 : vector<2x32xf32>
    %396 = arith.mulf %387, %369 : vector<2x32xf32>
    %397 = arith.mulf %381, %389 : vector<2x32xf32>
    %398 = arith.addf %396, %397 : vector<2x32xf32>
    %399 = math.tanh %398 : vector<2x32xf32>
    %400 = arith.mulf %395, %399 : vector<2x32xf32>
    %401 = vector.extract_strided_slice %253 {offsets = [10, 0], sizes = [2, 128], strides = [1, 1]} : vector<16x128xf32> to vector<2x128xf32>
    %c0_103 = arith.constant 0 : index
    %c0_104 = arith.constant 0 : index
    %402 = vector.load %arg7[%c0_103, %c0_104] : memref<32x128xf32, #tpu.memory_space<vmem>>, vector<32x128xf32>
    %cst_105 = arith.constant dense<0.000000e+00> : vector<2x128xf32>
    %403 = tpu.matmul %400, %402, %cst_105 {dimension_numbers = #tpu.dot_dimension_numbers<[1], [0], [0], [1], [0, 0, 1, 1], [], []>} : vector<2x32xf32>, vector<32x128xf32>, vector<2x128xf32> -> vector<2x128xf32>
    %404 = arith.addf %401, %403 : vector<2x128xf32>
    %405 = vector.extract_strided_slice %404 {offsets = [0, 0], sizes = [2, 32], strides = [1, 1]} : vector<2x128xf32> to vector<2x32xf32>
    %406 = arith.negf %405 : vector<2x32xf32>
    %407 = math.exp %406 : vector<2x32xf32>
    %cst_106 = arith.constant 1.000000e+00 : f32
    %408 = vector.broadcast %cst_106 : f32 to vector<2x32xf32>
    %409 = arith.addf %408, %407 : vector<2x32xf32>
    %410 = arith.divf %408, %409 : vector<2x32xf32>
    %411 = vector.extract_strided_slice %404 {offsets = [0, 32], sizes = [2, 32], strides = [1, 1]} : vector<2x128xf32> to vector<2x32xf32>
    %412 = arith.negf %411 : vector<2x32xf32>
    %413 = math.exp %412 : vector<2x32xf32>
    %cst_107 = arith.constant 1.000000e+00 : f32
    %414 = vector.broadcast %cst_107 : f32 to vector<2x32xf32>
    %415 = arith.addf %414, %413 : vector<2x32xf32>
    %416 = arith.divf %414, %415 : vector<2x32xf32>
    %417 = vector.extract_strided_slice %404 {offsets = [0, 64], sizes = [2, 32], strides = [1, 1]} : vector<2x128xf32> to vector<2x32xf32>
    %418 = math.tanh %417 : vector<2x32xf32>
    %419 = vector.extract_strided_slice %404 {offsets = [0, 96], sizes = [2, 32], strides = [1, 1]} : vector<2x128xf32> to vector<2x32xf32>
    %420 = arith.negf %419 : vector<2x32xf32>
    %421 = math.exp %420 : vector<2x32xf32>
    %cst_108 = arith.constant 1.000000e+00 : f32
    %422 = vector.broadcast %cst_108 : f32 to vector<2x32xf32>
    %423 = arith.addf %422, %421 : vector<2x32xf32>
    %424 = arith.divf %422, %423 : vector<2x32xf32>
    %425 = arith.mulf %416, %398 : vector<2x32xf32>
    %426 = arith.mulf %410, %418 : vector<2x32xf32>
    %427 = arith.addf %425, %426 : vector<2x32xf32>
    %428 = math.tanh %427 : vector<2x32xf32>
    %429 = arith.mulf %424, %428 : vector<2x32xf32>
    %430 = vector.extract_strided_slice %253 {offsets = [12, 0], sizes = [2, 128], strides = [1, 1]} : vector<16x128xf32> to vector<2x128xf32>
    %c0_109 = arith.constant 0 : index
    %c0_110 = arith.constant 0 : index
    %431 = vector.load %arg7[%c0_109, %c0_110] : memref<32x128xf32, #tpu.memory_space<vmem>>, vector<32x128xf32>
    %cst_111 = arith.constant dense<0.000000e+00> : vector<2x128xf32>
    %432 = tpu.matmul %429, %431, %cst_111 {dimension_numbers = #tpu.dot_dimension_numbers<[1], [0], [0], [1], [0, 0, 1, 1], [], []>} : vector<2x32xf32>, vector<32x128xf32>, vector<2x128xf32> -> vector<2x128xf32>
    %433 = arith.addf %430, %432 : vector<2x128xf32>
    %434 = vector.extract_strided_slice %433 {offsets = [0, 0], sizes = [2, 32], strides = [1, 1]} : vector<2x128xf32> to vector<2x32xf32>
    %435 = arith.negf %434 : vector<2x32xf32>
    %436 = math.exp %435 : vector<2x32xf32>
    %cst_112 = arith.constant 1.000000e+00 : f32
    %437 = vector.broadcast %cst_112 : f32 to vector<2x32xf32>
    %438 = arith.addf %437, %436 : vector<2x32xf32>
    %439 = arith.divf %437, %438 : vector<2x32xf32>
    %440 = vector.extract_strided_slice %433 {offsets = [0, 32], sizes = [2, 32], strides = [1, 1]} : vector<2x128xf32> to vector<2x32xf32>
    %441 = arith.negf %440 : vector<2x32xf32>
    %442 = math.exp %441 : vector<2x32xf32>
    %cst_113 = arith.constant 1.000000e+00 : f32
    %443 = vector.broadcast %cst_113 : f32 to vector<2x32xf32>
    %444 = arith.addf %443, %442 : vector<2x32xf32>
    %445 = arith.divf %443, %444 : vector<2x32xf32>
    %446 = vector.extract_strided_slice %433 {offsets = [0, 64], sizes = [2, 32], strides = [1, 1]} : vector<2x128xf32> to vector<2x32xf32>
    %447 = math.tanh %446 : vector<2x32xf32>
    %448 = vector.extract_strided_slice %433 {offsets = [0, 96], sizes = [2, 32], strides = [1, 1]} : vector<2x128xf32> to vector<2x32xf32>
    %449 = arith.negf %448 : vector<2x32xf32>
    %450 = math.exp %449 : vector<2x32xf32>
    %cst_114 = arith.constant 1.000000e+00 : f32
    %451 = vector.broadcast %cst_114 : f32 to vector<2x32xf32>
    %452 = arith.addf %451, %450 : vector<2x32xf32>
    %453 = arith.divf %451, %452 : vector<2x32xf32>
    %454 = arith.mulf %445, %427 : vector<2x32xf32>
    %455 = arith.mulf %439, %447 : vector<2x32xf32>
    %456 = arith.addf %454, %455 : vector<2x32xf32>
    %457 = math.tanh %456 : vector<2x32xf32>
    %458 = arith.mulf %453, %457 : vector<2x32xf32>
    %459 = vector.extract_strided_slice %253 {offsets = [14, 0], sizes = [2, 128], strides = [1, 1]} : vector<16x128xf32> to vector<2x128xf32>
    %c0_115 = arith.constant 0 : index
    %c0_116 = arith.constant 0 : index
    %460 = vector.load %arg7[%c0_115, %c0_116] : memref<32x128xf32, #tpu.memory_space<vmem>>, vector<32x128xf32>
    %cst_117 = arith.constant dense<0.000000e+00> : vector<2x128xf32>
    %461 = tpu.matmul %458, %460, %cst_117 {dimension_numbers = #tpu.dot_dimension_numbers<[1], [0], [0], [1], [0, 0, 1, 1], [], []>} : vector<2x32xf32>, vector<32x128xf32>, vector<2x128xf32> -> vector<2x128xf32>
    %462 = arith.addf %459, %461 : vector<2x128xf32>
    %463 = vector.extract_strided_slice %462 {offsets = [0, 0], sizes = [2, 32], strides = [1, 1]} : vector<2x128xf32> to vector<2x32xf32>
    %464 = arith.negf %463 : vector<2x32xf32>
    %465 = math.exp %464 : vector<2x32xf32>
    %cst_118 = arith.constant 1.000000e+00 : f32
    %466 = vector.broadcast %cst_118 : f32 to vector<2x32xf32>
    %467 = arith.addf %466, %465 : vector<2x32xf32>
    %468 = arith.divf %466, %467 : vector<2x32xf32>
    %469 = vector.extract_strided_slice %462 {offsets = [0, 32], sizes = [2, 32], strides = [1, 1]} : vector<2x128xf32> to vector<2x32xf32>
    %470 = arith.negf %469 : vector<2x32xf32>
    %471 = math.exp %470 : vector<2x32xf32>
    %cst_119 = arith.constant 1.000000e+00 : f32
    %472 = vector.broadcast %cst_119 : f32 to vector<2x32xf32>
    %473 = arith.addf %472, %471 : vector<2x32xf32>
    %474 = arith.divf %472, %473 : vector<2x32xf32>
    %475 = vector.extract_strided_slice %462 {offsets = [0, 64], sizes = [2, 32], strides = [1, 1]} : vector<2x128xf32> to vector<2x32xf32>
    %476 = math.tanh %475 : vector<2x32xf32>
    %477 = vector.extract_strided_slice %462 {offsets = [0, 96], sizes = [2, 32], strides = [1, 1]} : vector<2x128xf32> to vector<2x32xf32>
    %478 = arith.negf %477 : vector<2x32xf32>
    %479 = math.exp %478 : vector<2x32xf32>
    %cst_120 = arith.constant 1.000000e+00 : f32
    %480 = vector.broadcast %cst_120 : f32 to vector<2x32xf32>
    %481 = arith.addf %480, %479 : vector<2x32xf32>
    %482 = arith.divf %480, %481 : vector<2x32xf32>
    %483 = arith.mulf %474, %456 : vector<2x32xf32>
    %484 = arith.mulf %468, %476 : vector<2x32xf32>
    %485 = arith.addf %483, %484 : vector<2x32xf32>
    %486 = math.tanh %485 : vector<2x32xf32>
    %487 = arith.mulf %482, %486 : vector<2x32xf32>
    %c0_121 = arith.constant 0 : index
    %c0_122 = arith.constant 0 : index
    %488 = vector.load %arg9[%c0_121, %c0_122] : memref<1x32xf32, #tpu.memory_space<vmem>>, vector<1x32xf32>
    %c0_123 = arith.constant 0 : index
    %c0_124 = arith.constant 0 : index
    %489 = vector.load %arg10[%c0_123, %c0_124] : memref<1x32xf32, #tpu.memory_space<vmem>>, vector<1x32xf32>
    %cst_125 = arith.constant dense<0.000000e+00> : vector<2xf32>
    %490 = vector.multi_reduction <add>, %487, %cst_125 [1] : vector<2x32xf32> to vector<2xf32>
    %491 = vector.shape_cast %490 : vector<2xf32> to vector<2x1xf32>
    %cst_126 = arith.constant 3.200000e+01 : f32
    %492 = vector.broadcast %cst_126 : f32 to vector<2x1xf32>
    %493 = arith.divf %491, %492 : vector<2x1xf32>
    %494 = vector.broadcast %493 : vector<2x1xf32> to vector<2x32xf32>
    %495 = arith.subf %487, %494 : vector<2x32xf32>
    %496 = arith.mulf %495, %495 : vector<2x32xf32>
    %cst_127 = arith.constant dense<0.000000e+00> : vector<2xf32>
    %497 = vector.multi_reduction <add>, %496, %cst_127 [1] : vector<2x32xf32> to vector<2xf32>
    %498 = vector.shape_cast %497 : vector<2xf32> to vector<2x1xf32>
    %cst_128 = arith.constant 3.200000e+01 : f32
    %499 = vector.broadcast %cst_128 : f32 to vector<2x1xf32>
    %500 = arith.divf %498, %499 : vector<2x1xf32>
    %501 = vector.broadcast %493 : vector<2x1xf32> to vector<2x32xf32>
    %502 = arith.subf %487, %501 : vector<2x32xf32>
    %cst_129 = arith.constant 9.99999974E-6 : f32
    %503 = vector.broadcast %cst_129 : f32 to vector<2x1xf32>
    %504 = arith.addf %500, %503 : vector<2x1xf32>
    %505 = math.rsqrt %504 : vector<2x1xf32>
    %506 = vector.broadcast %505 : vector<2x1xf32> to vector<2x32xf32>
    %507 = arith.mulf %502, %506 : vector<2x32xf32>
    %508 = vector.broadcast %488 : vector<1x32xf32> to vector<2x32xf32>
    %509 = arith.mulf %507, %508 : vector<2x32xf32>
    %510 = vector.broadcast %489 : vector<1x32xf32> to vector<2x32xf32>
    %511 = arith.addf %509, %510 : vector<2x32xf32>
    %c0_130 = arith.constant 0 : index
    %c0_131 = arith.constant 0 : index
    %512 = vector.load %arg11[%c0_130, %c0_131] : memref<32x4xf32, #tpu.memory_space<vmem>>, vector<32x4xf32>
    %cst_132 = arith.constant dense<0.000000e+00> : vector<2x4xf32>
    %513 = tpu.matmul %511, %512, %cst_132 {dimension_numbers = #tpu.dot_dimension_numbers<[1], [0], [0], [1], [0, 0, 1, 1], [], []>} : vector<2x32xf32>, vector<32x4xf32>, vector<2x4xf32> -> vector<2x4xf32>
    %c0_133 = arith.constant 0 : index
    %c0_134 = arith.constant 0 : index
    %514 = vector.load %arg12[%c0_133, %c0_134] : memref<1x4xf32, #tpu.memory_space<vmem>>, vector<1x4xf32>
    %515 = vector.broadcast %514 : vector<1x4xf32> to vector<2x4xf32>
    %516 = arith.addf %513, %515 : vector<2x4xf32>
    %c0_135 = arith.constant 0 : index
    %c0_136 = arith.constant 0 : index
    %517 = vector.load %arg1[%c0_135, %c0_136] : memref<16x8xf32, #tpu.memory_space<vmem>>, vector<16x8xf32>
    %c0_137 = arith.constant 0 : index
    %c0_138 = arith.constant 0 : index
    %518 = vector.load %arg13[%c0_137, %c0_138] : memref<8x8xf32, #tpu.memory_space<vmem>>, vector<8x8xf32>
    %cst_139 = arith.constant dense<0.000000e+00> : vector<16x8xf32>
    %519 = tpu.matmul %517, %518, %cst_139 {dimension_numbers = #tpu.dot_dimension_numbers<[1], [0], [0], [1], [0, 0, 1, 1], [], []>} : vector<16x8xf32>, vector<8x8xf32>, vector<16x8xf32> -> vector<16x8xf32>
    %c0_140 = arith.constant 0 : index
    %c0_141 = arith.constant 0 : index
    %520 = vector.load %arg14[%c0_140, %c0_141] : memref<16x8xf32, #tpu.memory_space<vmem>>, vector<16x8xf32>
    %521 = arith.addf %519, %520 : vector<16x8xf32>
    %c0_142 = arith.constant 0 : index
    %c0_143 = arith.constant 0 : index
    %522 = vector.load %arg15[%c0_142, %c0_143] : memref<8x24xf32, #tpu.memory_space<vmem>>, vector<8x24xf32>
    %cst_144 = arith.constant dense<0.000000e+00> : vector<16x24xf32>
    %523 = tpu.matmul %521, %522, %cst_144 {dimension_numbers = #tpu.dot_dimension_numbers<[1], [0], [0], [1], [0, 0, 1, 1], [], []>} : vector<16x8xf32>, vector<8x24xf32>, vector<16x24xf32> -> vector<16x24xf32>
    %c0_145 = arith.constant 0 : index
    %c0_146 = arith.constant 0 : index
    %524 = vector.load %arg16[%c0_145, %c0_146] : memref<1x24xf32, #tpu.memory_space<vmem>>, vector<1x24xf32>
    %525 = vector.broadcast %524 : vector<1x24xf32> to vector<16x24xf32>
    %526 = arith.addf %523, %525 : vector<16x24xf32>
    %cst_147 = arith.constant 0.000000e+00 : f32
    %527 = vector.broadcast %cst_147 : f32 to vector<8x8xf32>
    %528 = vector.extract_strided_slice %526 {offsets = [0, 0], sizes = [8, 2], strides = [1, 1]} : vector<16x24xf32> to vector<8x2xf32>
    %529 = vector.extract_strided_slice %526 {offsets = [0, 8], sizes = [8, 2], strides = [1, 1]} : vector<16x24xf32> to vector<8x2xf32>
    %530 = vector.extract_strided_slice %526 {offsets = [0, 16], sizes = [8, 2], strides = [1, 1]} : vector<16x24xf32> to vector<8x2xf32>
    %cst_148 = arith.constant dense<0.000000e+00> : vector<8x8xf32>
    %531 = tpu.matmul %528, %529, %cst_148 {dimension_numbers = #tpu.dot_dimension_numbers<[1], [1], [0], [0], [0, 0, 1, 0], [], []>} : vector<8x2xf32>, vector<8x2xf32>, vector<8x8xf32> -> vector<8x8xf32>
    %cst_149 = arith.constant 0.707106769 : f32
    %532 = vector.broadcast %cst_149 : f32 to vector<8x8xf32>
    %533 = arith.mulf %531, %532 : vector<8x8xf32>
    %cst_150 = arith.constant dense<0xFF800000> : vector<8xf32>
    %534 = vector.multi_reduction <maximumf>, %533, %cst_150 [1] : vector<8x8xf32> to vector<8xf32>
    %535 = vector.shape_cast %534 : vector<8xf32> to vector<8x1xf32>
    %536 = vector.broadcast %535 : vector<8x1xf32> to vector<8x8xf32>
    %537 = arith.subf %533, %536 : vector<8x8xf32>
    %538 = math.exp %537 : vector<8x8xf32>
    %cst_151 = arith.constant dense<0.000000e+00> : vector<8xf32>
    %539 = vector.multi_reduction <add>, %538, %cst_151 [1] : vector<8x8xf32> to vector<8xf32>
    %540 = vector.shape_cast %539 : vector<8xf32> to vector<8x1xf32>
    %541 = vector.broadcast %540 : vector<8x1xf32> to vector<8x8xf32>
    %542 = arith.divf %538, %541 : vector<8x8xf32>
    %cst_152 = arith.constant dense<0.000000e+00> : vector<8x2xf32>
    %543 = tpu.matmul %542, %530, %cst_152 {dimension_numbers = #tpu.dot_dimension_numbers<[1], [0], [0], [1], [0, 0, 1, 1], [], []>} : vector<8x8xf32>, vector<8x2xf32>, vector<8x2xf32> -> vector<8x2xf32>
    %c0_153 = arith.constant 0 : index
    %c0_154 = arith.constant 0 : index
    %544 = vector.load %arg17[%c0_153, %c0_154] : memref<8x8xf32, #tpu.memory_space<vmem>>, vector<2x8xf32>
    %cst_155 = arith.constant dense<0.000000e+00> : vector<8x8xf32>
    %545 = tpu.matmul %543, %544, %cst_155 {dimension_numbers = #tpu.dot_dimension_numbers<[1], [0], [0], [1], [0, 0, 1, 1], [], []>} : vector<8x2xf32>, vector<2x8xf32>, vector<8x8xf32> -> vector<8x8xf32>
    %546 = arith.addf %527, %545 : vector<8x8xf32>
    %547 = vector.extract_strided_slice %526 {offsets = [0, 2], sizes = [8, 2], strides = [1, 1]} : vector<16x24xf32> to vector<8x2xf32>
    %548 = vector.extract_strided_slice %526 {offsets = [0, 10], sizes = [8, 2], strides = [1, 1]} : vector<16x24xf32> to vector<8x2xf32>
    %549 = vector.extract_strided_slice %526 {offsets = [0, 18], sizes = [8, 2], strides = [1, 1]} : vector<16x24xf32> to vector<8x2xf32>
    %cst_156 = arith.constant dense<0.000000e+00> : vector<8x8xf32>
    %550 = tpu.matmul %547, %548, %cst_156 {dimension_numbers = #tpu.dot_dimension_numbers<[1], [1], [0], [0], [0, 0, 1, 0], [], []>} : vector<8x2xf32>, vector<8x2xf32>, vector<8x8xf32> -> vector<8x8xf32>
    %cst_157 = arith.constant 0.707106769 : f32
    %551 = vector.broadcast %cst_157 : f32 to vector<8x8xf32>
    %552 = arith.mulf %550, %551 : vector<8x8xf32>
    %cst_158 = arith.constant dense<0xFF800000> : vector<8xf32>
    %553 = vector.multi_reduction <maximumf>, %552, %cst_158 [1] : vector<8x8xf32> to vector<8xf32>
    %554 = vector.shape_cast %553 : vector<8xf32> to vector<8x1xf32>
    %555 = vector.broadcast %554 : vector<8x1xf32> to vector<8x8xf32>
    %556 = arith.subf %552, %555 : vector<8x8xf32>
    %557 = math.exp %556 : vector<8x8xf32>
    %cst_159 = arith.constant dense<0.000000e+00> : vector<8xf32>
    %558 = vector.multi_reduction <add>, %557, %cst_159 [1] : vector<8x8xf32> to vector<8xf32>
    %559 = vector.shape_cast %558 : vector<8xf32> to vector<8x1xf32>
    %560 = vector.broadcast %559 : vector<8x1xf32> to vector<8x8xf32>
    %561 = arith.divf %557, %560 : vector<8x8xf32>
    %cst_160 = arith.constant dense<0.000000e+00> : vector<8x2xf32>
    %562 = tpu.matmul %561, %549, %cst_160 {dimension_numbers = #tpu.dot_dimension_numbers<[1], [0], [0], [1], [0, 0, 1, 1], [], []>} : vector<8x8xf32>, vector<8x2xf32>, vector<8x2xf32> -> vector<8x2xf32>
    %c2_161 = arith.constant 2 : index
    %c0_162 = arith.constant 0 : index
    %563 = vector.load %arg17[%c2_161, %c0_162] : memref<8x8xf32, #tpu.memory_space<vmem>>, vector<2x8xf32>
    %cst_163 = arith.constant dense<0.000000e+00> : vector<8x8xf32>
    %564 = tpu.matmul %562, %563, %cst_163 {dimension_numbers = #tpu.dot_dimension_numbers<[1], [0], [0], [1], [0, 0, 1, 1], [], []>} : vector<8x2xf32>, vector<2x8xf32>, vector<8x8xf32> -> vector<8x8xf32>
    %565 = arith.addf %546, %564 : vector<8x8xf32>
    %566 = vector.extract_strided_slice %526 {offsets = [0, 4], sizes = [8, 2], strides = [1, 1]} : vector<16x24xf32> to vector<8x2xf32>
    %567 = vector.extract_strided_slice %526 {offsets = [0, 12], sizes = [8, 2], strides = [1, 1]} : vector<16x24xf32> to vector<8x2xf32>
    %568 = vector.extract_strided_slice %526 {offsets = [0, 20], sizes = [8, 2], strides = [1, 1]} : vector<16x24xf32> to vector<8x2xf32>
    %cst_164 = arith.constant dense<0.000000e+00> : vector<8x8xf32>
    %569 = tpu.matmul %566, %567, %cst_164 {dimension_numbers = #tpu.dot_dimension_numbers<[1], [1], [0], [0], [0, 0, 1, 0], [], []>} : vector<8x2xf32>, vector<8x2xf32>, vector<8x8xf32> -> vector<8x8xf32>
    %cst_165 = arith.constant 0.707106769 : f32
    %570 = vector.broadcast %cst_165 : f32 to vector<8x8xf32>
    %571 = arith.mulf %569, %570 : vector<8x8xf32>
    %cst_166 = arith.constant dense<0xFF800000> : vector<8xf32>
    %572 = vector.multi_reduction <maximumf>, %571, %cst_166 [1] : vector<8x8xf32> to vector<8xf32>
    %573 = vector.shape_cast %572 : vector<8xf32> to vector<8x1xf32>
    %574 = vector.broadcast %573 : vector<8x1xf32> to vector<8x8xf32>
    %575 = arith.subf %571, %574 : vector<8x8xf32>
    %576 = math.exp %575 : vector<8x8xf32>
    %cst_167 = arith.constant dense<0.000000e+00> : vector<8xf32>
    %577 = vector.multi_reduction <add>, %576, %cst_167 [1] : vector<8x8xf32> to vector<8xf32>
    %578 = vector.shape_cast %577 : vector<8xf32> to vector<8x1xf32>
    %579 = vector.broadcast %578 : vector<8x1xf32> to vector<8x8xf32>
    %580 = arith.divf %576, %579 : vector<8x8xf32>
    %cst_168 = arith.constant dense<0.000000e+00> : vector<8x2xf32>
    %581 = tpu.matmul %580, %568, %cst_168 {dimension_numbers = #tpu.dot_dimension_numbers<[1], [0], [0], [1], [0, 0, 1, 1], [], []>} : vector<8x8xf32>, vector<8x2xf32>, vector<8x2xf32> -> vector<8x2xf32>
    %c4_169 = arith.constant 4 : index
    %c0_170 = arith.constant 0 : index
    %582 = vector.load %arg17[%c4_169, %c0_170] : memref<8x8xf32, #tpu.memory_space<vmem>>, vector<2x8xf32>
    %cst_171 = arith.constant dense<0.000000e+00> : vector<8x8xf32>
    %583 = tpu.matmul %581, %582, %cst_171 {dimension_numbers = #tpu.dot_dimension_numbers<[1], [0], [0], [1], [0, 0, 1, 1], [], []>} : vector<8x2xf32>, vector<2x8xf32>, vector<8x8xf32> -> vector<8x8xf32>
    %584 = arith.addf %565, %583 : vector<8x8xf32>
    %585 = vector.extract_strided_slice %526 {offsets = [0, 6], sizes = [8, 2], strides = [1, 1]} : vector<16x24xf32> to vector<8x2xf32>
    %586 = vector.extract_strided_slice %526 {offsets = [0, 14], sizes = [8, 2], strides = [1, 1]} : vector<16x24xf32> to vector<8x2xf32>
    %587 = vector.extract_strided_slice %526 {offsets = [0, 22], sizes = [8, 2], strides = [1, 1]} : vector<16x24xf32> to vector<8x2xf32>
    %cst_172 = arith.constant dense<0.000000e+00> : vector<8x8xf32>
    %588 = tpu.matmul %585, %586, %cst_172 {dimension_numbers = #tpu.dot_dimension_numbers<[1], [1], [0], [0], [0, 0, 1, 0], [], []>} : vector<8x2xf32>, vector<8x2xf32>, vector<8x8xf32> -> vector<8x8xf32>
    %cst_173 = arith.constant 0.707106769 : f32
    %589 = vector.broadcast %cst_173 : f32 to vector<8x8xf32>
    %590 = arith.mulf %588, %589 : vector<8x8xf32>
    %cst_174 = arith.constant dense<0xFF800000> : vector<8xf32>
    %591 = vector.multi_reduction <maximumf>, %590, %cst_174 [1] : vector<8x8xf32> to vector<8xf32>
    %592 = vector.shape_cast %591 : vector<8xf32> to vector<8x1xf32>
    %593 = vector.broadcast %592 : vector<8x1xf32> to vector<8x8xf32>
    %594 = arith.subf %590, %593 : vector<8x8xf32>
    %595 = math.exp %594 : vector<8x8xf32>
    %cst_175 = arith.constant dense<0.000000e+00> : vector<8xf32>
    %596 = vector.multi_reduction <add>, %595, %cst_175 [1] : vector<8x8xf32> to vector<8xf32>
    %597 = vector.shape_cast %596 : vector<8xf32> to vector<8x1xf32>
    %598 = vector.broadcast %597 : vector<8x1xf32> to vector<8x8xf32>
    %599 = arith.divf %595, %598 : vector<8x8xf32>
    %cst_176 = arith.constant dense<0.000000e+00> : vector<8x2xf32>
    %600 = tpu.matmul %599, %587, %cst_176 {dimension_numbers = #tpu.dot_dimension_numbers<[1], [0], [0], [1], [0, 0, 1, 1], [], []>} : vector<8x8xf32>, vector<8x2xf32>, vector<8x2xf32> -> vector<8x2xf32>
    %c6_177 = arith.constant 6 : index
    %c0_178 = arith.constant 0 : index
    %601 = vector.load %arg17[%c6_177, %c0_178] : memref<8x8xf32, #tpu.memory_space<vmem>>, vector<2x8xf32>
    %cst_179 = arith.constant dense<0.000000e+00> : vector<8x8xf32>
    %602 = tpu.matmul %600, %601, %cst_179 {dimension_numbers = #tpu.dot_dimension_numbers<[1], [0], [0], [1], [0, 0, 1, 1], [], []>} : vector<8x2xf32>, vector<2x8xf32>, vector<8x8xf32> -> vector<8x8xf32>
    %603 = arith.addf %584, %602 : vector<8x8xf32>
    %c0_180 = arith.constant 0 : index
    %c0_181 = arith.constant 0 : index
    %604 = vector.load %arg18[%c0_180, %c0_181] : memref<1x8xf32, #tpu.memory_space<vmem>>, vector<1x8xf32>
    %605 = vector.broadcast %604 : vector<1x8xf32> to vector<8x8xf32>
    %606 = arith.addf %603, %605 : vector<8x8xf32>
    %cst_182 = arith.constant 0.000000e+00 : f32
    %607 = vector.broadcast %cst_182 : f32 to vector<8x8xf32>
    %608 = vector.extract_strided_slice %526 {offsets = [8, 0], sizes = [8, 2], strides = [1, 1]} : vector<16x24xf32> to vector<8x2xf32>
    %609 = vector.extract_strided_slice %526 {offsets = [8, 8], sizes = [8, 2], strides = [1, 1]} : vector<16x24xf32> to vector<8x2xf32>
    %610 = vector.extract_strided_slice %526 {offsets = [8, 16], sizes = [8, 2], strides = [1, 1]} : vector<16x24xf32> to vector<8x2xf32>
    %cst_183 = arith.constant dense<0.000000e+00> : vector<8x8xf32>
    %611 = tpu.matmul %608, %609, %cst_183 {dimension_numbers = #tpu.dot_dimension_numbers<[1], [1], [0], [0], [0, 0, 1, 0], [], []>} : vector<8x2xf32>, vector<8x2xf32>, vector<8x8xf32> -> vector<8x8xf32>
    %cst_184 = arith.constant 0.707106769 : f32
    %612 = vector.broadcast %cst_184 : f32 to vector<8x8xf32>
    %613 = arith.mulf %611, %612 : vector<8x8xf32>
    %cst_185 = arith.constant dense<0xFF800000> : vector<8xf32>
    %614 = vector.multi_reduction <maximumf>, %613, %cst_185 [1] : vector<8x8xf32> to vector<8xf32>
    %615 = vector.shape_cast %614 : vector<8xf32> to vector<8x1xf32>
    %616 = vector.broadcast %615 : vector<8x1xf32> to vector<8x8xf32>
    %617 = arith.subf %613, %616 : vector<8x8xf32>
    %618 = math.exp %617 : vector<8x8xf32>
    %cst_186 = arith.constant dense<0.000000e+00> : vector<8xf32>
    %619 = vector.multi_reduction <add>, %618, %cst_186 [1] : vector<8x8xf32> to vector<8xf32>
    %620 = vector.shape_cast %619 : vector<8xf32> to vector<8x1xf32>
    %621 = vector.broadcast %620 : vector<8x1xf32> to vector<8x8xf32>
    %622 = arith.divf %618, %621 : vector<8x8xf32>
    %cst_187 = arith.constant dense<0.000000e+00> : vector<8x2xf32>
    %623 = tpu.matmul %622, %610, %cst_187 {dimension_numbers = #tpu.dot_dimension_numbers<[1], [0], [0], [1], [0, 0, 1, 1], [], []>} : vector<8x8xf32>, vector<8x2xf32>, vector<8x2xf32> -> vector<8x2xf32>
    %c0_188 = arith.constant 0 : index
    %c0_189 = arith.constant 0 : index
    %624 = vector.load %arg17[%c0_188, %c0_189] : memref<8x8xf32, #tpu.memory_space<vmem>>, vector<2x8xf32>
    %cst_190 = arith.constant dense<0.000000e+00> : vector<8x8xf32>
    %625 = tpu.matmul %623, %624, %cst_190 {dimension_numbers = #tpu.dot_dimension_numbers<[1], [0], [0], [1], [0, 0, 1, 1], [], []>} : vector<8x2xf32>, vector<2x8xf32>, vector<8x8xf32> -> vector<8x8xf32>
    %626 = arith.addf %607, %625 : vector<8x8xf32>
    %627 = vector.extract_strided_slice %526 {offsets = [8, 2], sizes = [8, 2], strides = [1, 1]} : vector<16x24xf32> to vector<8x2xf32>
    %628 = vector.extract_strided_slice %526 {offsets = [8, 10], sizes = [8, 2], strides = [1, 1]} : vector<16x24xf32> to vector<8x2xf32>
    %629 = vector.extract_strided_slice %526 {offsets = [8, 18], sizes = [8, 2], strides = [1, 1]} : vector<16x24xf32> to vector<8x2xf32>
    %cst_191 = arith.constant dense<0.000000e+00> : vector<8x8xf32>
    %630 = tpu.matmul %627, %628, %cst_191 {dimension_numbers = #tpu.dot_dimension_numbers<[1], [1], [0], [0], [0, 0, 1, 0], [], []>} : vector<8x2xf32>, vector<8x2xf32>, vector<8x8xf32> -> vector<8x8xf32>
    %cst_192 = arith.constant 0.707106769 : f32
    %631 = vector.broadcast %cst_192 : f32 to vector<8x8xf32>
    %632 = arith.mulf %630, %631 : vector<8x8xf32>
    %cst_193 = arith.constant dense<0xFF800000> : vector<8xf32>
    %633 = vector.multi_reduction <maximumf>, %632, %cst_193 [1] : vector<8x8xf32> to vector<8xf32>
    %634 = vector.shape_cast %633 : vector<8xf32> to vector<8x1xf32>
    %635 = vector.broadcast %634 : vector<8x1xf32> to vector<8x8xf32>
    %636 = arith.subf %632, %635 : vector<8x8xf32>
    %637 = math.exp %636 : vector<8x8xf32>
    %cst_194 = arith.constant dense<0.000000e+00> : vector<8xf32>
    %638 = vector.multi_reduction <add>, %637, %cst_194 [1] : vector<8x8xf32> to vector<8xf32>
    %639 = vector.shape_cast %638 : vector<8xf32> to vector<8x1xf32>
    %640 = vector.broadcast %639 : vector<8x1xf32> to vector<8x8xf32>
    %641 = arith.divf %637, %640 : vector<8x8xf32>
    %cst_195 = arith.constant dense<0.000000e+00> : vector<8x2xf32>
    %642 = tpu.matmul %641, %629, %cst_195 {dimension_numbers = #tpu.dot_dimension_numbers<[1], [0], [0], [1], [0, 0, 1, 1], [], []>} : vector<8x8xf32>, vector<8x2xf32>, vector<8x2xf32> -> vector<8x2xf32>
    %c2_196 = arith.constant 2 : index
    %c0_197 = arith.constant 0 : index
    %643 = vector.load %arg17[%c2_196, %c0_197] : memref<8x8xf32, #tpu.memory_space<vmem>>, vector<2x8xf32>
    %cst_198 = arith.constant dense<0.000000e+00> : vector<8x8xf32>
    %644 = tpu.matmul %642, %643, %cst_198 {dimension_numbers = #tpu.dot_dimension_numbers<[1], [0], [0], [1], [0, 0, 1, 1], [], []>} : vector<8x2xf32>, vector<2x8xf32>, vector<8x8xf32> -> vector<8x8xf32>
    %645 = arith.addf %626, %644 : vector<8x8xf32>
    %646 = vector.extract_strided_slice %526 {offsets = [8, 4], sizes = [8, 2], strides = [1, 1]} : vector<16x24xf32> to vector<8x2xf32>
    %647 = vector.extract_strided_slice %526 {offsets = [8, 12], sizes = [8, 2], strides = [1, 1]} : vector<16x24xf32> to vector<8x2xf32>
    %648 = vector.extract_strided_slice %526 {offsets = [8, 20], sizes = [8, 2], strides = [1, 1]} : vector<16x24xf32> to vector<8x2xf32>
    %cst_199 = arith.constant dense<0.000000e+00> : vector<8x8xf32>
    %649 = tpu.matmul %646, %647, %cst_199 {dimension_numbers = #tpu.dot_dimension_numbers<[1], [1], [0], [0], [0, 0, 1, 0], [], []>} : vector<8x2xf32>, vector<8x2xf32>, vector<8x8xf32> -> vector<8x8xf32>
    %cst_200 = arith.constant 0.707106769 : f32
    %650 = vector.broadcast %cst_200 : f32 to vector<8x8xf32>
    %651 = arith.mulf %649, %650 : vector<8x8xf32>
    %cst_201 = arith.constant dense<0xFF800000> : vector<8xf32>
    %652 = vector.multi_reduction <maximumf>, %651, %cst_201 [1] : vector<8x8xf32> to vector<8xf32>
    %653 = vector.shape_cast %652 : vector<8xf32> to vector<8x1xf32>
    %654 = vector.broadcast %653 : vector<8x1xf32> to vector<8x8xf32>
    %655 = arith.subf %651, %654 : vector<8x8xf32>
    %656 = math.exp %655 : vector<8x8xf32>
    %cst_202 = arith.constant dense<0.000000e+00> : vector<8xf32>
    %657 = vector.multi_reduction <add>, %656, %cst_202 [1] : vector<8x8xf32> to vector<8xf32>
    %658 = vector.shape_cast %657 : vector<8xf32> to vector<8x1xf32>
    %659 = vector.broadcast %658 : vector<8x1xf32> to vector<8x8xf32>
    %660 = arith.divf %656, %659 : vector<8x8xf32>
    %cst_203 = arith.constant dense<0.000000e+00> : vector<8x2xf32>
    %661 = tpu.matmul %660, %648, %cst_203 {dimension_numbers = #tpu.dot_dimension_numbers<[1], [0], [0], [1], [0, 0, 1, 1], [], []>} : vector<8x8xf32>, vector<8x2xf32>, vector<8x2xf32> -> vector<8x2xf32>
    %c4_204 = arith.constant 4 : index
    %c0_205 = arith.constant 0 : index
    %662 = vector.load %arg17[%c4_204, %c0_205] : memref<8x8xf32, #tpu.memory_space<vmem>>, vector<2x8xf32>
    %cst_206 = arith.constant dense<0.000000e+00> : vector<8x8xf32>
    %663 = tpu.matmul %661, %662, %cst_206 {dimension_numbers = #tpu.dot_dimension_numbers<[1], [0], [0], [1], [0, 0, 1, 1], [], []>} : vector<8x2xf32>, vector<2x8xf32>, vector<8x8xf32> -> vector<8x8xf32>
    %664 = arith.addf %645, %663 : vector<8x8xf32>
    %665 = vector.extract_strided_slice %526 {offsets = [8, 6], sizes = [8, 2], strides = [1, 1]} : vector<16x24xf32> to vector<8x2xf32>
    %666 = vector.extract_strided_slice %526 {offsets = [8, 14], sizes = [8, 2], strides = [1, 1]} : vector<16x24xf32> to vector<8x2xf32>
    %667 = vector.extract_strided_slice %526 {offsets = [8, 22], sizes = [8, 2], strides = [1, 1]} : vector<16x24xf32> to vector<8x2xf32>
    %cst_207 = arith.constant dense<0.000000e+00> : vector<8x8xf32>
    %668 = tpu.matmul %665, %666, %cst_207 {dimension_numbers = #tpu.dot_dimension_numbers<[1], [1], [0], [0], [0, 0, 1, 0], [], []>} : vector<8x2xf32>, vector<8x2xf32>, vector<8x8xf32> -> vector<8x8xf32>
    %cst_208 = arith.constant 0.707106769 : f32
    %669 = vector.broadcast %cst_208 : f32 to vector<8x8xf32>
    %670 = arith.mulf %668, %669 : vector<8x8xf32>
    %cst_209 = arith.constant dense<0xFF800000> : vector<8xf32>
    %671 = vector.multi_reduction <maximumf>, %670, %cst_209 [1] : vector<8x8xf32> to vector<8xf32>
    %672 = vector.shape_cast %671 : vector<8xf32> to vector<8x1xf32>
    %673 = vector.broadcast %672 : vector<8x1xf32> to vector<8x8xf32>
    %674 = arith.subf %670, %673 : vector<8x8xf32>
    %675 = math.exp %674 : vector<8x8xf32>
    %cst_210 = arith.constant dense<0.000000e+00> : vector<8xf32>
    %676 = vector.multi_reduction <add>, %675, %cst_210 [1] : vector<8x8xf32> to vector<8xf32>
    %677 = vector.shape_cast %676 : vector<8xf32> to vector<8x1xf32>
    %678 = vector.broadcast %677 : vector<8x1xf32> to vector<8x8xf32>
    %679 = arith.divf %675, %678 : vector<8x8xf32>
    %cst_211 = arith.constant dense<0.000000e+00> : vector<8x2xf32>
    %680 = tpu.matmul %679, %667, %cst_211 {dimension_numbers = #tpu.dot_dimension_numbers<[1], [0], [0], [1], [0, 0, 1, 1], [], []>} : vector<8x8xf32>, vector<8x2xf32>, vector<8x2xf32> -> vector<8x2xf32>
    %c6_212 = arith.constant 6 : index
    %c0_213 = arith.constant 0 : index
    %681 = vector.load %arg17[%c6_212, %c0_213] : memref<8x8xf32, #tpu.memory_space<vmem>>, vector<2x8xf32>
    %cst_214 = arith.constant dense<0.000000e+00> : vector<8x8xf32>
    %682 = tpu.matmul %680, %681, %cst_214 {dimension_numbers = #tpu.dot_dimension_numbers<[1], [0], [0], [1], [0, 0, 1, 1], [], []>} : vector<8x2xf32>, vector<2x8xf32>, vector<8x8xf32> -> vector<8x8xf32>
    %683 = arith.addf %664, %682 : vector<8x8xf32>
    %c0_215 = arith.constant 0 : index
    %c0_216 = arith.constant 0 : index
    %684 = vector.load %arg18[%c0_215, %c0_216] : memref<1x8xf32, #tpu.memory_space<vmem>>, vector<1x8xf32>
    %685 = vector.broadcast %684 : vector<1x8xf32> to vector<8x8xf32>
    %686 = arith.addf %683, %685 : vector<8x8xf32>
    %687 = tpu.concatenate %606, %686 in 0 : vector<8x8xf32>, vector<8x8xf32> -> vector<16x8xf32>
    %688 = arith.addf %521, %687 : vector<16x8xf32>
    %c0_217 = arith.constant 0 : index
    %c0_218 = arith.constant 0 : index
    %689 = vector.load %arg19[%c0_217, %c0_218] : memref<1x8xf32, #tpu.memory_space<vmem>>, vector<1x8xf32>
    %c0_219 = arith.constant 0 : index
    %c0_220 = arith.constant 0 : index
    %690 = vector.load %arg20[%c0_219, %c0_220] : memref<1x8xf32, #tpu.memory_space<vmem>>, vector<1x8xf32>
    %cst_221 = arith.constant dense<0.000000e+00> : vector<16xf32>
    %691 = vector.multi_reduction <add>, %688, %cst_221 [1] : vector<16x8xf32> to vector<16xf32>
    %692 = vector.shape_cast %691 : vector<16xf32> to vector<16x1xf32>
    %cst_222 = arith.constant 8.000000e+00 : f32
    %693 = vector.broadcast %cst_222 : f32 to vector<16x1xf32>
    %694 = arith.divf %692, %693 : vector<16x1xf32>
    %695 = vector.broadcast %694 : vector<16x1xf32> to vector<16x8xf32>
    %696 = arith.subf %688, %695 : vector<16x8xf32>
    %697 = arith.mulf %696, %696 : vector<16x8xf32>
    %cst_223 = arith.constant dense<0.000000e+00> : vector<16xf32>
    %698 = vector.multi_reduction <add>, %697, %cst_223 [1] : vector<16x8xf32> to vector<16xf32>
    %699 = vector.shape_cast %698 : vector<16xf32> to vector<16x1xf32>
    %cst_224 = arith.constant 8.000000e+00 : f32
    %700 = vector.broadcast %cst_224 : f32 to vector<16x1xf32>
    %701 = arith.divf %699, %700 : vector<16x1xf32>
    %702 = vector.broadcast %694 : vector<16x1xf32> to vector<16x8xf32>
    %703 = arith.subf %688, %702 : vector<16x8xf32>
    %cst_225 = arith.constant 9.99999974E-6 : f32
    %704 = vector.broadcast %cst_225 : f32 to vector<16x1xf32>
    %705 = arith.addf %701, %704 : vector<16x1xf32>
    %706 = math.rsqrt %705 : vector<16x1xf32>
    %707 = vector.broadcast %706 : vector<16x1xf32> to vector<16x8xf32>
    %708 = arith.mulf %703, %707 : vector<16x8xf32>
    %709 = vector.broadcast %689 : vector<1x8xf32> to vector<16x8xf32>
    %710 = arith.mulf %708, %709 : vector<16x8xf32>
    %711 = vector.broadcast %690 : vector<1x8xf32> to vector<16x8xf32>
    %712 = arith.addf %710, %711 : vector<16x8xf32>
    %c0_226 = arith.constant 0 : index
    %c0_227 = arith.constant 0 : index
    %713 = vector.load %arg21[%c0_226, %c0_227] : memref<8x2048xf32, #tpu.memory_space<vmem>>, vector<8x2048xf32>
    %cst_228 = arith.constant dense<0.000000e+00> : vector<16x2048xf32>
    %714 = tpu.matmul %712, %713, %cst_228 {dimension_numbers = #tpu.dot_dimension_numbers<[1], [0], [0], [1], [0, 0, 1, 1], [], []>} : vector<16x8xf32>, vector<8x2048xf32>, vector<16x2048xf32> -> vector<16x2048xf32>
    %c0_229 = arith.constant 0 : index
    %c0_230 = arith.constant 0 : index
    %715 = vector.load %arg22[%c0_229, %c0_230] : memref<1x2048xf32, #tpu.memory_space<vmem>>, vector<1x2048xf32>
    %716 = vector.broadcast %715 : vector<1x2048xf32> to vector<16x2048xf32>
    %717 = arith.addf %714, %716 : vector<16x2048xf32>
    %cst_231 = arith.constant 0.000000e+00 : f32
    %718 = vector.broadcast %cst_231 : f32 to vector<16x2048xf32>
    %719 = arith.maximumf %717, %718 : vector<16x2048xf32>
    %c0_232 = arith.constant 0 : index
    %c0_233 = arith.constant 0 : index
    %720 = vector.load %arg23[%c0_232, %c0_233] : memref<2048x8xf32, #tpu.memory_space<vmem>>, vector<2048x8xf32>
    %cst_234 = arith.constant dense<0.000000e+00> : vector<16x8xf32>
    %721 = tpu.matmul %719, %720, %cst_234 {dimension_numbers = #tpu.dot_dimension_numbers<[1], [0], [0], [1], [0, 0, 1, 1], [], []>} : vector<16x2048xf32>, vector<2048x8xf32>, vector<16x8xf32> -> vector<16x8xf32>
    %c0_235 = arith.constant 0 : index
    %c0_236 = arith.constant 0 : index
    %722 = vector.load %arg24[%c0_235, %c0_236] : memref<1x8xf32, #tpu.memory_space<vmem>>, vector<1x8xf32>
    %723 = vector.broadcast %722 : vector<1x8xf32> to vector<16x8xf32>
    %724 = arith.addf %721, %723 : vector<16x8xf32>
    %725 = arith.addf %712, %724 : vector<16x8xf32>
    %c0_237 = arith.constant 0 : index
    %c0_238 = arith.constant 0 : index
    %726 = vector.load %arg25[%c0_237, %c0_238] : memref<1x8xf32, #tpu.memory_space<vmem>>, vector<1x8xf32>
    %c0_239 = arith.constant 0 : index
    %c0_240 = arith.constant 0 : index
    %727 = vector.load %arg26[%c0_239, %c0_240] : memref<1x8xf32, #tpu.memory_space<vmem>>, vector<1x8xf32>
    %cst_241 = arith.constant dense<0.000000e+00> : vector<16xf32>
    %728 = vector.multi_reduction <add>, %725, %cst_241 [1] : vector<16x8xf32> to vector<16xf32>
    %729 = vector.shape_cast %728 : vector<16xf32> to vector<16x1xf32>
    %cst_242 = arith.constant 8.000000e+00 : f32
    %730 = vector.broadcast %cst_242 : f32 to vector<16x1xf32>
    %731 = arith.divf %729, %730 : vector<16x1xf32>
    %732 = vector.broadcast %731 : vector<16x1xf32> to vector<16x8xf32>
    %733 = arith.subf %725, %732 : vector<16x8xf32>
    %734 = arith.mulf %733, %733 : vector<16x8xf32>
    %cst_243 = arith.constant dense<0.000000e+00> : vector<16xf32>
    %735 = vector.multi_reduction <add>, %734, %cst_243 [1] : vector<16x8xf32> to vector<16xf32>
    %736 = vector.shape_cast %735 : vector<16xf32> to vector<16x1xf32>
    %cst_244 = arith.constant 8.000000e+00 : f32
    %737 = vector.broadcast %cst_244 : f32 to vector<16x1xf32>
    %738 = arith.divf %736, %737 : vector<16x1xf32>
    %739 = vector.broadcast %731 : vector<16x1xf32> to vector<16x8xf32>
    %740 = arith.subf %725, %739 : vector<16x8xf32>
    %cst_245 = arith.constant 9.99999974E-6 : f32
    %741 = vector.broadcast %cst_245 : f32 to vector<16x1xf32>
    %742 = arith.addf %738, %741 : vector<16x1xf32>
    %743 = math.rsqrt %742 : vector<16x1xf32>
    %744 = vector.broadcast %743 : vector<16x1xf32> to vector<16x8xf32>
    %745 = arith.mulf %740, %744 : vector<16x8xf32>
    %746 = vector.broadcast %726 : vector<1x8xf32> to vector<16x8xf32>
    %747 = arith.mulf %745, %746 : vector<16x8xf32>
    %748 = vector.broadcast %727 : vector<1x8xf32> to vector<16x8xf32>
    %749 = arith.addf %747, %748 : vector<16x8xf32>
    %c0_246 = arith.constant 0 : index
    %c0_247 = arith.constant 0 : index
    %750 = vector.load %arg27[%c0_246, %c0_247] : memref<8x24xf32, #tpu.memory_space<vmem>>, vector<8x24xf32>
    %cst_248 = arith.constant dense<0.000000e+00> : vector<16x24xf32>
    %751 = tpu.matmul %749, %750, %cst_248 {dimension_numbers = #tpu.dot_dimension_numbers<[1], [0], [0], [1], [0, 0, 1, 1], [], []>} : vector<16x8xf32>, vector<8x24xf32>, vector<16x24xf32> -> vector<16x24xf32>
    %c0_249 = arith.constant 0 : index
    %c0_250 = arith.constant 0 : index
    %752 = vector.load %arg28[%c0_249, %c0_250] : memref<1x24xf32, #tpu.memory_space<vmem>>, vector<1x24xf32>
    %753 = vector.broadcast %752 : vector<1x24xf32> to vector<16x24xf32>
    %754 = arith.addf %751, %753 : vector<16x24xf32>
    %cst_251 = arith.constant 0.000000e+00 : f32
    %755 = vector.broadcast %cst_251 : f32 to vector<8x8xf32>
    %756 = vector.extract_strided_slice %754 {offsets = [0, 0], sizes = [8, 2], strides = [1, 1]} : vector<16x24xf32> to vector<8x2xf32>
    %757 = vector.extract_strided_slice %754 {offsets = [0, 8], sizes = [8, 2], strides = [1, 1]} : vector<16x24xf32> to vector<8x2xf32>
    %758 = vector.extract_strided_slice %754 {offsets = [0, 16], sizes = [8, 2], strides = [1, 1]} : vector<16x24xf32> to vector<8x2xf32>
    %cst_252 = arith.constant dense<0.000000e+00> : vector<8x8xf32>
    %759 = tpu.matmul %756, %757, %cst_252 {dimension_numbers = #tpu.dot_dimension_numbers<[1], [1], [0], [0], [0, 0, 1, 0], [], []>} : vector<8x2xf32>, vector<8x2xf32>, vector<8x8xf32> -> vector<8x8xf32>
    %cst_253 = arith.constant 0.707106769 : f32
    %760 = vector.broadcast %cst_253 : f32 to vector<8x8xf32>
    %761 = arith.mulf %759, %760 : vector<8x8xf32>
    %cst_254 = arith.constant dense<0xFF800000> : vector<8xf32>
    %762 = vector.multi_reduction <maximumf>, %761, %cst_254 [1] : vector<8x8xf32> to vector<8xf32>
    %763 = vector.shape_cast %762 : vector<8xf32> to vector<8x1xf32>
    %764 = vector.broadcast %763 : vector<8x1xf32> to vector<8x8xf32>
    %765 = arith.subf %761, %764 : vector<8x8xf32>
    %766 = math.exp %765 : vector<8x8xf32>
    %cst_255 = arith.constant dense<0.000000e+00> : vector<8xf32>
    %767 = vector.multi_reduction <add>, %766, %cst_255 [1] : vector<8x8xf32> to vector<8xf32>
    %768 = vector.shape_cast %767 : vector<8xf32> to vector<8x1xf32>
    %769 = vector.broadcast %768 : vector<8x1xf32> to vector<8x8xf32>
    %770 = arith.divf %766, %769 : vector<8x8xf32>
    %cst_256 = arith.constant dense<0.000000e+00> : vector<8x2xf32>
    %771 = tpu.matmul %770, %758, %cst_256 {dimension_numbers = #tpu.dot_dimension_numbers<[1], [0], [0], [1], [0, 0, 1, 1], [], []>} : vector<8x8xf32>, vector<8x2xf32>, vector<8x2xf32> -> vector<8x2xf32>
    %c0_257 = arith.constant 0 : index
    %c0_258 = arith.constant 0 : index
    %772 = vector.load %arg29[%c0_257, %c0_258] : memref<8x8xf32, #tpu.memory_space<vmem>>, vector<2x8xf32>
    %cst_259 = arith.constant dense<0.000000e+00> : vector<8x8xf32>
    %773 = tpu.matmul %771, %772, %cst_259 {dimension_numbers = #tpu.dot_dimension_numbers<[1], [0], [0], [1], [0, 0, 1, 1], [], []>} : vector<8x2xf32>, vector<2x8xf32>, vector<8x8xf32> -> vector<8x8xf32>
    %774 = arith.addf %755, %773 : vector<8x8xf32>
    %775 = vector.extract_strided_slice %754 {offsets = [0, 2], sizes = [8, 2], strides = [1, 1]} : vector<16x24xf32> to vector<8x2xf32>
    %776 = vector.extract_strided_slice %754 {offsets = [0, 10], sizes = [8, 2], strides = [1, 1]} : vector<16x24xf32> to vector<8x2xf32>
    %777 = vector.extract_strided_slice %754 {offsets = [0, 18], sizes = [8, 2], strides = [1, 1]} : vector<16x24xf32> to vector<8x2xf32>
    %cst_260 = arith.constant dense<0.000000e+00> : vector<8x8xf32>
    %778 = tpu.matmul %775, %776, %cst_260 {dimension_numbers = #tpu.dot_dimension_numbers<[1], [1], [0], [0], [0, 0, 1, 0], [], []>} : vector<8x2xf32>, vector<8x2xf32>, vector<8x8xf32> -> vector<8x8xf32>
    %cst_261 = arith.constant 0.707106769 : f32
    %779 = vector.broadcast %cst_261 : f32 to vector<8x8xf32>
    %780 = arith.mulf %778, %779 : vector<8x8xf32>
    %cst_262 = arith.constant dense<0xFF800000> : vector<8xf32>
    %781 = vector.multi_reduction <maximumf>, %780, %cst_262 [1] : vector<8x8xf32> to vector<8xf32>
    %782 = vector.shape_cast %781 : vector<8xf32> to vector<8x1xf32>
    %783 = vector.broadcast %782 : vector<8x1xf32> to vector<8x8xf32>
    %784 = arith.subf %780, %783 : vector<8x8xf32>
    %785 = math.exp %784 : vector<8x8xf32>
    %cst_263 = arith.constant dense<0.000000e+00> : vector<8xf32>
    %786 = vector.multi_reduction <add>, %785, %cst_263 [1] : vector<8x8xf32> to vector<8xf32>
    %787 = vector.shape_cast %786 : vector<8xf32> to vector<8x1xf32>
    %788 = vector.broadcast %787 : vector<8x1xf32> to vector<8x8xf32>
    %789 = arith.divf %785, %788 : vector<8x8xf32>
    %cst_264 = arith.constant dense<0.000000e+00> : vector<8x2xf32>
    %790 = tpu.matmul %789, %777, %cst_264 {dimension_numbers = #tpu.dot_dimension_numbers<[1], [0], [0], [1], [0, 0, 1, 1], [], []>} : vector<8x8xf32>, vector<8x2xf32>, vector<8x2xf32> -> vector<8x2xf32>
    %c2_265 = arith.constant 2 : index
    %c0_266 = arith.constant 0 : index
    %791 = vector.load %arg29[%c2_265, %c0_266] : memref<8x8xf32, #tpu.memory_space<vmem>>, vector<2x8xf32>
    %cst_267 = arith.constant dense<0.000000e+00> : vector<8x8xf32>
    %792 = tpu.matmul %790, %791, %cst_267 {dimension_numbers = #tpu.dot_dimension_numbers<[1], [0], [0], [1], [0, 0, 1, 1], [], []>} : vector<8x2xf32>, vector<2x8xf32>, vector<8x8xf32> -> vector<8x8xf32>
    %793 = arith.addf %774, %792 : vector<8x8xf32>
    %794 = vector.extract_strided_slice %754 {offsets = [0, 4], sizes = [8, 2], strides = [1, 1]} : vector<16x24xf32> to vector<8x2xf32>
    %795 = vector.extract_strided_slice %754 {offsets = [0, 12], sizes = [8, 2], strides = [1, 1]} : vector<16x24xf32> to vector<8x2xf32>
    %796 = vector.extract_strided_slice %754 {offsets = [0, 20], sizes = [8, 2], strides = [1, 1]} : vector<16x24xf32> to vector<8x2xf32>
    %cst_268 = arith.constant dense<0.000000e+00> : vector<8x8xf32>
    %797 = tpu.matmul %794, %795, %cst_268 {dimension_numbers = #tpu.dot_dimension_numbers<[1], [1], [0], [0], [0, 0, 1, 0], [], []>} : vector<8x2xf32>, vector<8x2xf32>, vector<8x8xf32> -> vector<8x8xf32>
    %cst_269 = arith.constant 0.707106769 : f32
    %798 = vector.broadcast %cst_269 : f32 to vector<8x8xf32>
    %799 = arith.mulf %797, %798 : vector<8x8xf32>
    %cst_270 = arith.constant dense<0xFF800000> : vector<8xf32>
    %800 = vector.multi_reduction <maximumf>, %799, %cst_270 [1] : vector<8x8xf32> to vector<8xf32>
    %801 = vector.shape_cast %800 : vector<8xf32> to vector<8x1xf32>
    %802 = vector.broadcast %801 : vector<8x1xf32> to vector<8x8xf32>
    %803 = arith.subf %799, %802 : vector<8x8xf32>
    %804 = math.exp %803 : vector<8x8xf32>
    %cst_271 = arith.constant dense<0.000000e+00> : vector<8xf32>
    %805 = vector.multi_reduction <add>, %804, %cst_271 [1] : vector<8x8xf32> to vector<8xf32>
    %806 = vector.shape_cast %805 : vector<8xf32> to vector<8x1xf32>
    %807 = vector.broadcast %806 : vector<8x1xf32> to vector<8x8xf32>
    %808 = arith.divf %804, %807 : vector<8x8xf32>
    %cst_272 = arith.constant dense<0.000000e+00> : vector<8x2xf32>
    %809 = tpu.matmul %808, %796, %cst_272 {dimension_numbers = #tpu.dot_dimension_numbers<[1], [0], [0], [1], [0, 0, 1, 1], [], []>} : vector<8x8xf32>, vector<8x2xf32>, vector<8x2xf32> -> vector<8x2xf32>
    %c4_273 = arith.constant 4 : index
    %c0_274 = arith.constant 0 : index
    %810 = vector.load %arg29[%c4_273, %c0_274] : memref<8x8xf32, #tpu.memory_space<vmem>>, vector<2x8xf32>
    %cst_275 = arith.constant dense<0.000000e+00> : vector<8x8xf32>
    %811 = tpu.matmul %809, %810, %cst_275 {dimension_numbers = #tpu.dot_dimension_numbers<[1], [0], [0], [1], [0, 0, 1, 1], [], []>} : vector<8x2xf32>, vector<2x8xf32>, vector<8x8xf32> -> vector<8x8xf32>
    %812 = arith.addf %793, %811 : vector<8x8xf32>
    %813 = vector.extract_strided_slice %754 {offsets = [0, 6], sizes = [8, 2], strides = [1, 1]} : vector<16x24xf32> to vector<8x2xf32>
    %814 = vector.extract_strided_slice %754 {offsets = [0, 14], sizes = [8, 2], strides = [1, 1]} : vector<16x24xf32> to vector<8x2xf32>
    %815 = vector.extract_strided_slice %754 {offsets = [0, 22], sizes = [8, 2], strides = [1, 1]} : vector<16x24xf32> to vector<8x2xf32>
    %cst_276 = arith.constant dense<0.000000e+00> : vector<8x8xf32>
    %816 = tpu.matmul %813, %814, %cst_276 {dimension_numbers = #tpu.dot_dimension_numbers<[1], [1], [0], [0], [0, 0, 1, 0], [], []>} : vector<8x2xf32>, vector<8x2xf32>, vector<8x8xf32> -> vector<8x8xf32>
    %cst_277 = arith.constant 0.707106769 : f32
    %817 = vector.broadcast %cst_277 : f32 to vector<8x8xf32>
    %818 = arith.mulf %816, %817 : vector<8x8xf32>
    %cst_278 = arith.constant dense<0xFF800000> : vector<8xf32>
    %819 = vector.multi_reduction <maximumf>, %818, %cst_278 [1] : vector<8x8xf32> to vector<8xf32>
    %820 = vector.shape_cast %819 : vector<8xf32> to vector<8x1xf32>
    %821 = vector.broadcast %820 : vector<8x1xf32> to vector<8x8xf32>
    %822 = arith.subf %818, %821 : vector<8x8xf32>
    %823 = math.exp %822 : vector<8x8xf32>
    %cst_279 = arith.constant dense<0.000000e+00> : vector<8xf32>
    %824 = vector.multi_reduction <add>, %823, %cst_279 [1] : vector<8x8xf32> to vector<8xf32>
    %825 = vector.shape_cast %824 : vector<8xf32> to vector<8x1xf32>
    %826 = vector.broadcast %825 : vector<8x1xf32> to vector<8x8xf32>
    %827 = arith.divf %823, %826 : vector<8x8xf32>
    %cst_280 = arith.constant dense<0.000000e+00> : vector<8x2xf32>
    %828 = tpu.matmul %827, %815, %cst_280 {dimension_numbers = #tpu.dot_dimension_numbers<[1], [0], [0], [1], [0, 0, 1, 1], [], []>} : vector<8x8xf32>, vector<8x2xf32>, vector<8x2xf32> -> vector<8x2xf32>
    %c6_281 = arith.constant 6 : index
    %c0_282 = arith.constant 0 : index
    %829 = vector.load %arg29[%c6_281, %c0_282] : memref<8x8xf32, #tpu.memory_space<vmem>>, vector<2x8xf32>
    %cst_283 = arith.constant dense<0.000000e+00> : vector<8x8xf32>
    %830 = tpu.matmul %828, %829, %cst_283 {dimension_numbers = #tpu.dot_dimension_numbers<[1], [0], [0], [1], [0, 0, 1, 1], [], []>} : vector<8x2xf32>, vector<2x8xf32>, vector<8x8xf32> -> vector<8x8xf32>
    %831 = arith.addf %812, %830 : vector<8x8xf32>
    %c0_284 = arith.constant 0 : index
    %c0_285 = arith.constant 0 : index
    %832 = vector.load %arg30[%c0_284, %c0_285] : memref<1x8xf32, #tpu.memory_space<vmem>>, vector<1x8xf32>
    %833 = vector.broadcast %832 : vector<1x8xf32> to vector<8x8xf32>
    %834 = arith.addf %831, %833 : vector<8x8xf32>
    %cst_286 = arith.constant 0.000000e+00 : f32
    %835 = vector.broadcast %cst_286 : f32 to vector<8x8xf32>
    %836 = vector.extract_strided_slice %754 {offsets = [8, 0], sizes = [8, 2], strides = [1, 1]} : vector<16x24xf32> to vector<8x2xf32>
    %837 = vector.extract_strided_slice %754 {offsets = [8, 8], sizes = [8, 2], strides = [1, 1]} : vector<16x24xf32> to vector<8x2xf32>
    %838 = vector.extract_strided_slice %754 {offsets = [8, 16], sizes = [8, 2], strides = [1, 1]} : vector<16x24xf32> to vector<8x2xf32>
    %cst_287 = arith.constant dense<0.000000e+00> : vector<8x8xf32>
    %839 = tpu.matmul %836, %837, %cst_287 {dimension_numbers = #tpu.dot_dimension_numbers<[1], [1], [0], [0], [0, 0, 1, 0], [], []>} : vector<8x2xf32>, vector<8x2xf32>, vector<8x8xf32> -> vector<8x8xf32>
    %cst_288 = arith.constant 0.707106769 : f32
    %840 = vector.broadcast %cst_288 : f32 to vector<8x8xf32>
    %841 = arith.mulf %839, %840 : vector<8x8xf32>
    %cst_289 = arith.constant dense<0xFF800000> : vector<8xf32>
    %842 = vector.multi_reduction <maximumf>, %841, %cst_289 [1] : vector<8x8xf32> to vector<8xf32>
    %843 = vector.shape_cast %842 : vector<8xf32> to vector<8x1xf32>
    %844 = vector.broadcast %843 : vector<8x1xf32> to vector<8x8xf32>
    %845 = arith.subf %841, %844 : vector<8x8xf32>
    %846 = math.exp %845 : vector<8x8xf32>
    %cst_290 = arith.constant dense<0.000000e+00> : vector<8xf32>
    %847 = vector.multi_reduction <add>, %846, %cst_290 [1] : vector<8x8xf32> to vector<8xf32>
    %848 = vector.shape_cast %847 : vector<8xf32> to vector<8x1xf32>
    %849 = vector.broadcast %848 : vector<8x1xf32> to vector<8x8xf32>
    %850 = arith.divf %846, %849 : vector<8x8xf32>
    %cst_291 = arith.constant dense<0.000000e+00> : vector<8x2xf32>
    %851 = tpu.matmul %850, %838, %cst_291 {dimension_numbers = #tpu.dot_dimension_numbers<[1], [0], [0], [1], [0, 0, 1, 1], [], []>} : vector<8x8xf32>, vector<8x2xf32>, vector<8x2xf32> -> vector<8x2xf32>
    %c0_292 = arith.constant 0 : index
    %c0_293 = arith.constant 0 : index
    %852 = vector.load %arg29[%c0_292, %c0_293] : memref<8x8xf32, #tpu.memory_space<vmem>>, vector<2x8xf32>
    %cst_294 = arith.constant dense<0.000000e+00> : vector<8x8xf32>
    %853 = tpu.matmul %851, %852, %cst_294 {dimension_numbers = #tpu.dot_dimension_numbers<[1], [0], [0], [1], [0, 0, 1, 1], [], []>} : vector<8x2xf32>, vector<2x8xf32>, vector<8x8xf32> -> vector<8x8xf32>
    %854 = arith.addf %835, %853 : vector<8x8xf32>
    %855 = vector.extract_strided_slice %754 {offsets = [8, 2], sizes = [8, 2], strides = [1, 1]} : vector<16x24xf32> to vector<8x2xf32>
    %856 = vector.extract_strided_slice %754 {offsets = [8, 10], sizes = [8, 2], strides = [1, 1]} : vector<16x24xf32> to vector<8x2xf32>
    %857 = vector.extract_strided_slice %754 {offsets = [8, 18], sizes = [8, 2], strides = [1, 1]} : vector<16x24xf32> to vector<8x2xf32>
    %cst_295 = arith.constant dense<0.000000e+00> : vector<8x8xf32>
    %858 = tpu.matmul %855, %856, %cst_295 {dimension_numbers = #tpu.dot_dimension_numbers<[1], [1], [0], [0], [0, 0, 1, 0], [], []>} : vector<8x2xf32>, vector<8x2xf32>, vector<8x8xf32> -> vector<8x8xf32>
    %cst_296 = arith.constant 0.707106769 : f32
    %859 = vector.broadcast %cst_296 : f32 to vector<8x8xf32>
    %860 = arith.mulf %858, %859 : vector<8x8xf32>
    %cst_297 = arith.constant dense<0xFF800000> : vector<8xf32>
    %861 = vector.multi_reduction <maximumf>, %860, %cst_297 [1] : vector<8x8xf32> to vector<8xf32>
    %862 = vector.shape_cast %861 : vector<8xf32> to vector<8x1xf32>
    %863 = vector.broadcast %862 : vector<8x1xf32> to vector<8x8xf32>
    %864 = arith.subf %860, %863 : vector<8x8xf32>
    %865 = math.exp %864 : vector<8x8xf32>
    %cst_298 = arith.constant dense<0.000000e+00> : vector<8xf32>
    %866 = vector.multi_reduction <add>, %865, %cst_298 [1] : vector<8x8xf32> to vector<8xf32>
    %867 = vector.shape_cast %866 : vector<8xf32> to vector<8x1xf32>
    %868 = vector.broadcast %867 : vector<8x1xf32> to vector<8x8xf32>
    %869 = arith.divf %865, %868 : vector<8x8xf32>
    %cst_299 = arith.constant dense<0.000000e+00> : vector<8x2xf32>
    %870 = tpu.matmul %869, %857, %cst_299 {dimension_numbers = #tpu.dot_dimension_numbers<[1], [0], [0], [1], [0, 0, 1, 1], [], []>} : vector<8x8xf32>, vector<8x2xf32>, vector<8x2xf32> -> vector<8x2xf32>
    %c2_300 = arith.constant 2 : index
    %c0_301 = arith.constant 0 : index
    %871 = vector.load %arg29[%c2_300, %c0_301] : memref<8x8xf32, #tpu.memory_space<vmem>>, vector<2x8xf32>
    %cst_302 = arith.constant dense<0.000000e+00> : vector<8x8xf32>
    %872 = tpu.matmul %870, %871, %cst_302 {dimension_numbers = #tpu.dot_dimension_numbers<[1], [0], [0], [1], [0, 0, 1, 1], [], []>} : vector<8x2xf32>, vector<2x8xf32>, vector<8x8xf32> -> vector<8x8xf32>
    %873 = arith.addf %854, %872 : vector<8x8xf32>
    %874 = vector.extract_strided_slice %754 {offsets = [8, 4], sizes = [8, 2], strides = [1, 1]} : vector<16x24xf32> to vector<8x2xf32>
    %875 = vector.extract_strided_slice %754 {offsets = [8, 12], sizes = [8, 2], strides = [1, 1]} : vector<16x24xf32> to vector<8x2xf32>
    %876 = vector.extract_strided_slice %754 {offsets = [8, 20], sizes = [8, 2], strides = [1, 1]} : vector<16x24xf32> to vector<8x2xf32>
    %cst_303 = arith.constant dense<0.000000e+00> : vector<8x8xf32>
    %877 = tpu.matmul %874, %875, %cst_303 {dimension_numbers = #tpu.dot_dimension_numbers<[1], [1], [0], [0], [0, 0, 1, 0], [], []>} : vector<8x2xf32>, vector<8x2xf32>, vector<8x8xf32> -> vector<8x8xf32>
    %cst_304 = arith.constant 0.707106769 : f32
    %878 = vector.broadcast %cst_304 : f32 to vector<8x8xf32>
    %879 = arith.mulf %877, %878 : vector<8x8xf32>
    %cst_305 = arith.constant dense<0xFF800000> : vector<8xf32>
    %880 = vector.multi_reduction <maximumf>, %879, %cst_305 [1] : vector<8x8xf32> to vector<8xf32>
    %881 = vector.shape_cast %880 : vector<8xf32> to vector<8x1xf32>
    %882 = vector.broadcast %881 : vector<8x1xf32> to vector<8x8xf32>
    %883 = arith.subf %879, %882 : vector<8x8xf32>
    %884 = math.exp %883 : vector<8x8xf32>
    %cst_306 = arith.constant dense<0.000000e+00> : vector<8xf32>
    %885 = vector.multi_reduction <add>, %884, %cst_306 [1] : vector<8x8xf32> to vector<8xf32>
    %886 = vector.shape_cast %885 : vector<8xf32> to vector<8x1xf32>
    %887 = vector.broadcast %886 : vector<8x1xf32> to vector<8x8xf32>
    %888 = arith.divf %884, %887 : vector<8x8xf32>
    %cst_307 = arith.constant dense<0.000000e+00> : vector<8x2xf32>
    %889 = tpu.matmul %888, %876, %cst_307 {dimension_numbers = #tpu.dot_dimension_numbers<[1], [0], [0], [1], [0, 0, 1, 1], [], []>} : vector<8x8xf32>, vector<8x2xf32>, vector<8x2xf32> -> vector<8x2xf32>
    %c4_308 = arith.constant 4 : index
    %c0_309 = arith.constant 0 : index
    %890 = vector.load %arg29[%c4_308, %c0_309] : memref<8x8xf32, #tpu.memory_space<vmem>>, vector<2x8xf32>
    %cst_310 = arith.constant dense<0.000000e+00> : vector<8x8xf32>
    %891 = tpu.matmul %889, %890, %cst_310 {dimension_numbers = #tpu.dot_dimension_numbers<[1], [0], [0], [1], [0, 0, 1, 1], [], []>} : vector<8x2xf32>, vector<2x8xf32>, vector<8x8xf32> -> vector<8x8xf32>
    %892 = arith.addf %873, %891 : vector<8x8xf32>
    %893 = vector.extract_strided_slice %754 {offsets = [8, 6], sizes = [8, 2], strides = [1, 1]} : vector<16x24xf32> to vector<8x2xf32>
    %894 = vector.extract_strided_slice %754 {offsets = [8, 14], sizes = [8, 2], strides = [1, 1]} : vector<16x24xf32> to vector<8x2xf32>
    %895 = vector.extract_strided_slice %754 {offsets = [8, 22], sizes = [8, 2], strides = [1, 1]} : vector<16x24xf32> to vector<8x2xf32>
    %cst_311 = arith.constant dense<0.000000e+00> : vector<8x8xf32>
    %896 = tpu.matmul %893, %894, %cst_311 {dimension_numbers = #tpu.dot_dimension_numbers<[1], [1], [0], [0], [0, 0, 1, 0], [], []>} : vector<8x2xf32>, vector<8x2xf32>, vector<8x8xf32> -> vector<8x8xf32>
    %cst_312 = arith.constant 0.707106769 : f32
    %897 = vector.broadcast %cst_312 : f32 to vector<8x8xf32>
    %898 = arith.mulf %896, %897 : vector<8x8xf32>
    %cst_313 = arith.constant dense<0xFF800000> : vector<8xf32>
    %899 = vector.multi_reduction <maximumf>, %898, %cst_313 [1] : vector<8x8xf32> to vector<8xf32>
    %900 = vector.shape_cast %899 : vector<8xf32> to vector<8x1xf32>
    %901 = vector.broadcast %900 : vector<8x1xf32> to vector<8x8xf32>
    %902 = arith.subf %898, %901 : vector<8x8xf32>
    %903 = math.exp %902 : vector<8x8xf32>
    %cst_314 = arith.constant dense<0.000000e+00> : vector<8xf32>
    %904 = vector.multi_reduction <add>, %903, %cst_314 [1] : vector<8x8xf32> to vector<8xf32>
    %905 = vector.shape_cast %904 : vector<8xf32> to vector<8x1xf32>
    %906 = vector.broadcast %905 : vector<8x1xf32> to vector<8x8xf32>
    %907 = arith.divf %903, %906 : vector<8x8xf32>
    %cst_315 = arith.constant dense<0.000000e+00> : vector<8x2xf32>
    %908 = tpu.matmul %907, %895, %cst_315 {dimension_numbers = #tpu.dot_dimension_numbers<[1], [0], [0], [1], [0, 0, 1, 1], [], []>} : vector<8x8xf32>, vector<8x2xf32>, vector<8x2xf32> -> vector<8x2xf32>
    %c6_316 = arith.constant 6 : index
    %c0_317 = arith.constant 0 : index
    %909 = vector.load %arg29[%c6_316, %c0_317] : memref<8x8xf32, #tpu.memory_space<vmem>>, vector<2x8xf32>
    %cst_318 = arith.constant dense<0.000000e+00> : vector<8x8xf32>
    %910 = tpu.matmul %908, %909, %cst_318 {dimension_numbers = #tpu.dot_dimension_numbers<[1], [0], [0], [1], [0, 0, 1, 1], [], []>} : vector<8x2xf32>, vector<2x8xf32>, vector<8x8xf32> -> vector<8x8xf32>
    %911 = arith.addf %892, %910 : vector<8x8xf32>
    %c0_319 = arith.constant 0 : index
    %c0_320 = arith.constant 0 : index
    %912 = vector.load %arg30[%c0_319, %c0_320] : memref<1x8xf32, #tpu.memory_space<vmem>>, vector<1x8xf32>
    %913 = vector.broadcast %912 : vector<1x8xf32> to vector<8x8xf32>
    %914 = arith.addf %911, %913 : vector<8x8xf32>
    %915 = tpu.concatenate %834, %914 in 0 : vector<8x8xf32>, vector<8x8xf32> -> vector<16x8xf32>
    %916 = arith.addf %749, %915 : vector<16x8xf32>
    %c0_321 = arith.constant 0 : index
    %c0_322 = arith.constant 0 : index
    %917 = vector.load %arg31[%c0_321, %c0_322] : memref<1x8xf32, #tpu.memory_space<vmem>>, vector<1x8xf32>
    %c0_323 = arith.constant 0 : index
    %c0_324 = arith.constant 0 : index
    %918 = vector.load %arg32[%c0_323, %c0_324] : memref<1x8xf32, #tpu.memory_space<vmem>>, vector<1x8xf32>
    %cst_325 = arith.constant dense<0.000000e+00> : vector<16xf32>
    %919 = vector.multi_reduction <add>, %916, %cst_325 [1] : vector<16x8xf32> to vector<16xf32>
    %920 = vector.shape_cast %919 : vector<16xf32> to vector<16x1xf32>
    %cst_326 = arith.constant 8.000000e+00 : f32
    %921 = vector.broadcast %cst_326 : f32 to vector<16x1xf32>
    %922 = arith.divf %920, %921 : vector<16x1xf32>
    %923 = vector.broadcast %922 : vector<16x1xf32> to vector<16x8xf32>
    %924 = arith.subf %916, %923 : vector<16x8xf32>
    %925 = arith.mulf %924, %924 : vector<16x8xf32>
    %cst_327 = arith.constant dense<0.000000e+00> : vector<16xf32>
    %926 = vector.multi_reduction <add>, %925, %cst_327 [1] : vector<16x8xf32> to vector<16xf32>
    %927 = vector.shape_cast %926 : vector<16xf32> to vector<16x1xf32>
    %cst_328 = arith.constant 8.000000e+00 : f32
    %928 = vector.broadcast %cst_328 : f32 to vector<16x1xf32>
    %929 = arith.divf %927, %928 : vector<16x1xf32>
    %930 = vector.broadcast %922 : vector<16x1xf32> to vector<16x8xf32>
    %931 = arith.subf %916, %930 : vector<16x8xf32>
    %cst_329 = arith.constant 9.99999974E-6 : f32
    %932 = vector.broadcast %cst_329 : f32 to vector<16x1xf32>
    %933 = arith.addf %929, %932 : vector<16x1xf32>
    %934 = math.rsqrt %933 : vector<16x1xf32>
    %935 = vector.broadcast %934 : vector<16x1xf32> to vector<16x8xf32>
    %936 = arith.mulf %931, %935 : vector<16x8xf32>
    %937 = vector.broadcast %917 : vector<1x8xf32> to vector<16x8xf32>
    %938 = arith.mulf %936, %937 : vector<16x8xf32>
    %939 = vector.broadcast %918 : vector<1x8xf32> to vector<16x8xf32>
    %940 = arith.addf %938, %939 : vector<16x8xf32>
    %c0_330 = arith.constant 0 : index
    %c0_331 = arith.constant 0 : index
    %941 = vector.load %arg33[%c0_330, %c0_331] : memref<8x2048xf32, #tpu.memory_space<vmem>>, vector<8x2048xf32>
    %cst_332 = arith.constant dense<0.000000e+00> : vector<16x2048xf32>
    %942 = tpu.matmul %940, %941, %cst_332 {dimension_numbers = #tpu.dot_dimension_numbers<[1], [0], [0], [1], [0, 0, 1, 1], [], []>} : vector<16x8xf32>, vector<8x2048xf32>, vector<16x2048xf32> -> vector<16x2048xf32>
    %c0_333 = arith.constant 0 : index
    %c0_334 = arith.constant 0 : index
    %943 = vector.load %arg34[%c0_333, %c0_334] : memref<1x2048xf32, #tpu.memory_space<vmem>>, vector<1x2048xf32>
    %944 = vector.broadcast %943 : vector<1x2048xf32> to vector<16x2048xf32>
    %945 = arith.addf %942, %944 : vector<16x2048xf32>
    %cst_335 = arith.constant 0.000000e+00 : f32
    %946 = vector.broadcast %cst_335 : f32 to vector<16x2048xf32>
    %947 = arith.maximumf %945, %946 : vector<16x2048xf32>
    %c0_336 = arith.constant 0 : index
    %c0_337 = arith.constant 0 : index
    %948 = vector.load %arg35[%c0_336, %c0_337] : memref<2048x8xf32, #tpu.memory_space<vmem>>, vector<2048x8xf32>
    %cst_338 = arith.constant dense<0.000000e+00> : vector<16x8xf32>
    %949 = tpu.matmul %947, %948, %cst_338 {dimension_numbers = #tpu.dot_dimension_numbers<[1], [0], [0], [1], [0, 0, 1, 1], [], []>} : vector<16x2048xf32>, vector<2048x8xf32>, vector<16x8xf32> -> vector<16x8xf32>
    %c0_339 = arith.constant 0 : index
    %c0_340 = arith.constant 0 : index
    %950 = vector.load %arg36[%c0_339, %c0_340] : memref<1x8xf32, #tpu.memory_space<vmem>>, vector<1x8xf32>
    %951 = vector.broadcast %950 : vector<1x8xf32> to vector<16x8xf32>
    %952 = arith.addf %949, %951 : vector<16x8xf32>
    %953 = arith.addf %940, %952 : vector<16x8xf32>
    %c0_341 = arith.constant 0 : index
    %c0_342 = arith.constant 0 : index
    %954 = vector.load %arg37[%c0_341, %c0_342] : memref<1x8xf32, #tpu.memory_space<vmem>>, vector<1x8xf32>
    %c0_343 = arith.constant 0 : index
    %c0_344 = arith.constant 0 : index
    %955 = vector.load %arg38[%c0_343, %c0_344] : memref<1x8xf32, #tpu.memory_space<vmem>>, vector<1x8xf32>
    %cst_345 = arith.constant dense<0.000000e+00> : vector<16xf32>
    %956 = vector.multi_reduction <add>, %953, %cst_345 [1] : vector<16x8xf32> to vector<16xf32>
    %957 = vector.shape_cast %956 : vector<16xf32> to vector<16x1xf32>
    %cst_346 = arith.constant 8.000000e+00 : f32
    %958 = vector.broadcast %cst_346 : f32 to vector<16x1xf32>
    %959 = arith.divf %957, %958 : vector<16x1xf32>
    %960 = vector.broadcast %959 : vector<16x1xf32> to vector<16x8xf32>
    %961 = arith.subf %953, %960 : vector<16x8xf32>
    %962 = arith.mulf %961, %961 : vector<16x8xf32>
    %cst_347 = arith.constant dense<0.000000e+00> : vector<16xf32>
    %963 = vector.multi_reduction <add>, %962, %cst_347 [1] : vector<16x8xf32> to vector<16xf32>
    %964 = vector.shape_cast %963 : vector<16xf32> to vector<16x1xf32>
    %cst_348 = arith.constant 8.000000e+00 : f32
    %965 = vector.broadcast %cst_348 : f32 to vector<16x1xf32>
    %966 = arith.divf %964, %965 : vector<16x1xf32>
    %967 = vector.broadcast %959 : vector<16x1xf32> to vector<16x8xf32>
    %968 = arith.subf %953, %967 : vector<16x8xf32>
    %cst_349 = arith.constant 9.99999974E-6 : f32
    %969 = vector.broadcast %cst_349 : f32 to vector<16x1xf32>
    %970 = arith.addf %966, %969 : vector<16x1xf32>
    %971 = math.rsqrt %970 : vector<16x1xf32>
    %972 = vector.broadcast %971 : vector<16x1xf32> to vector<16x8xf32>
    %973 = arith.mulf %968, %972 : vector<16x8xf32>
    %974 = vector.broadcast %954 : vector<1x8xf32> to vector<16x8xf32>
    %975 = arith.mulf %973, %974 : vector<16x8xf32>
    %976 = vector.broadcast %955 : vector<1x8xf32> to vector<16x8xf32>
    %977 = arith.addf %975, %976 : vector<16x8xf32>
    %978 = vector.extract_strided_slice %977 {offsets = [7, 0], sizes = [1, 8], strides = [1, 1]} : vector<16x8xf32> to vector<1x8xf32>
    %979 = vector.extract_strided_slice %977 {offsets = [15, 0], sizes = [1, 8], strides = [1, 1]} : vector<16x8xf32> to vector<1x8xf32>
    %980 = tpu.concatenate %978, %979 in 0 : vector<1x8xf32>, vector<1x8xf32> -> vector<2x8xf32>
    %c0_350 = arith.constant 0 : index
    %c0_351 = arith.constant 0 : index
    %981 = vector.load %arg39[%c0_350, %c0_351] : memref<8x4xf32, #tpu.memory_space<vmem>>, vector<8x4xf32>
    %cst_352 = arith.constant dense<0.000000e+00> : vector<2x4xf32>
    %982 = tpu.matmul %980, %981, %cst_352 {dimension_numbers = #tpu.dot_dimension_numbers<[1], [0], [0], [1], [0, 0, 1, 1], [], []>} : vector<2x8xf32>, vector<8x4xf32>, vector<2x4xf32> -> vector<2x4xf32>
    %c0_353 = arith.constant 0 : index
    %c0_354 = arith.constant 0 : index
    %983 = vector.load %arg40[%c0_353, %c0_354] : memref<1x4xf32, #tpu.memory_space<vmem>>, vector<1x4xf32>
    %984 = vector.broadcast %983 : vector<1x4xf32> to vector<2x4xf32>
    %985 = arith.addf %982, %984 : vector<2x4xf32>
    %c0_355 = arith.constant 0 : index
    %c0_356 = arith.constant 0 : index
    %986 = vector.load %arg41[%c0_355, %c0_356] : memref<4x4xf32, #tpu.memory_space<vmem>>, vector<4x4xf32>
    %cst_357 = arith.constant dense<0.000000e+00> : vector<2x4xf32>
    %987 = tpu.matmul %516, %986, %cst_357 {dimension_numbers = #tpu.dot_dimension_numbers<[1], [0], [0], [1], [0, 0, 1, 1], [], []>} : vector<2x4xf32>, vector<4x4xf32>, vector<2x4xf32> -> vector<2x4xf32>
    %c0_358 = arith.constant 0 : index
    %c0_359 = arith.constant 0 : index
    %988 = vector.load %arg42[%c0_358, %c0_359] : memref<4x4xf32, #tpu.memory_space<vmem>>, vector<4x4xf32>
    %cst_360 = arith.constant dense<0.000000e+00> : vector<2x4xf32>
    %989 = tpu.matmul %985, %988, %cst_360 {dimension_numbers = #tpu.dot_dimension_numbers<[1], [0], [0], [1], [0, 0, 1, 1], [], []>} : vector<2x4xf32>, vector<4x4xf32>, vector<2x4xf32> -> vector<2x4xf32>
    %990 = arith.addf %987, %989 : vector<2x4xf32>
    %c0_361 = arith.constant 0 : index
    %c0_362 = arith.constant 0 : index
    %991 = vector.load %arg2[%c0_361, %c0_362] : memref<2x3xf32, #tpu.memory_space<vmem>>, vector<2x3xf32>
    %c0_363 = arith.constant 0 : index
    %c0_364 = arith.constant 0 : index
    %992 = vector.load %arg43[%c0_363, %c0_364] : memref<3x4xf32, #tpu.memory_space<vmem>>, vector<3x4xf32>
    %cst_365 = arith.constant dense<0.000000e+00> : vector<2x4xf32>
    %993 = tpu.matmul %991, %992, %cst_365 {dimension_numbers = #tpu.dot_dimension_numbers<[1], [0], [0], [1], [0, 0, 1, 1], [], []>} : vector<2x3xf32>, vector<3x4xf32>, vector<2x4xf32> -> vector<2x4xf32>
    %994 = arith.addf %990, %993 : vector<2x4xf32>
    %c0_366 = arith.constant 0 : index
    %c0_367 = arith.constant 0 : index
    %995 = vector.load %arg44[%c0_366, %c0_367] : memref<1x4xf32, #tpu.memory_space<vmem>>, vector<1x4xf32>
    %996 = vector.broadcast %995 : vector<1x4xf32> to vector<2x4xf32>
    %997 = arith.addf %994, %996 : vector<2x4xf32>
    %c0_368 = arith.constant 0 : index
    %c0_369 = arith.constant 0 : index
    %998 = vector.load %arg45[%c0_368, %c0_369] : memref<2x4xf32, #tpu.memory_space<vmem>>, vector<2x4xf32>
    tpu.vector_store %arg45[%c0_368, %c0_369], %997 {strides = array<i32>} : memref<2x4xf32, #tpu.memory_space<vmem>>, vector<2x4xf32>,
    return
  }
}

</mosaic_0001>

<bundles_post_ra>
// kernel: hybrid_forward.1
= control target key start
LH: loop header
LB: loop body
LE: loop exit
PB: predicated region body
PF: predicated region fallthrough
CT: control target
= control target key end

     0   :  { %s6409_s6 = smov 1   ;;  %s6410_s10 = smov 2   ;;  %s8150_s0 = inlined_call_operand.smem [shape: u32[46], index: -1, kind: input, shape index: {}] }
   0x1   :  { %s6480_s5 = sld [smem:[%s8150_s0]]   ;;  %s6411_s14 = smov 3  }
   0x2   :  { %s6485_s9 = sld [smem:[%s8150_s0 + %s6409_s6]]   ;;  %s6412_s18 = smov 4  }
   0x3   :  { %s6490_s13 = sld [smem:[%s8150_s0 + %s6410_s10]]   ;;  %s6413_s22 = smov 5  }
   0x4   :  { %s6495_s17 = sld [smem:[%s8150_s0 + %s6411_s14]]   ;;  %s6414_s26 = smov 6  }
   0x5   :  { %s6500_s21 = sld [smem:[%s8150_s0 + %s6412_s18]]   ;;  %s6415_s30 = smov 7  }
   0x6   :  { %s6505_s25 = sld [smem:[%s8150_s0 + %s6413_s22]]   ;;  %s6416_s4 = smov 8  }
   0x7   :  { %s6510_s29 = sld [smem:[%s8150_s0 + %s6414_s26]]   ;;  %s6417_s10 = smov 9  }
   0x8   :  { %s6515_s3 = sld [smem:[%s8150_s0 + %s6415_s30]]   ;;  %s6418_s15 = smov 10  }
   0x9   :  { %8159 = sst [smem:[#allocation6_spill]] %s6490_s13  ;;  %s6419_s20 = smov 11  }
   0xa   :  { %s6520_s8 = sld [smem:[%s8150_s0 + %s6416_s4]]   ;;  %s6420_s26 = smov 12  }
   0xb   :  { %s6525_s14 = sld [smem:[%s8150_s0 + %s6417_s10]]   ;;  %s6421_s1 = smov 13  }
   0xc   :  { %s6530_s19 = sld [smem:[%s8150_s0 + %s6418_s15]]   ;;  %s6422_s7 = smov 14  }
   0xd   :  { %s6535_s24 = sld [smem:[%s8150_s0 + %s6419_s20]]   ;;  %s6423_s15 = smov 15  }
   0xe   :  { %s6540_s30 = sld [smem:[%s8150_s0 + %s6420_s26]]   ;;  %s6424_s22 = smov 16  }
   0xf   :  { %s6545_s6 = sld [smem:[%s8150_s0 + %s6421_s1]]   ;;  %s6425_s28 = smov 17  }
  0x10   :  { %s6550_s12 = sld [smem:[%s8150_s0 + %s6422_s7]]   ;;  %s6426_s7 = smov 18  }
  0x11   :  { %8160 = sst [smem:[#allocation7_spill]] %s6525_s14 }
  0x12   :  { %s6555_s20 = sld [smem:[%s8150_s0 + %s6423_s15]]   ;;  %s6427_s15 = smov 19  }
  0x13   :  { %s6560_s27 = sld [smem:[%s8150_s0 + %s6424_s22]]   ;;  %s6428_s22 = smov 20  }
  0x14   :  { %8161 = sst [smem:[#allocation8_spill]] %s6540_s30 }
  0x15   :  { %s6565_s4 = sld [smem:[%s8150_s0 + %s6425_s28]]   ;;  %s6429_s28 = smov 21  }
  0x16   :  { %s6570_s13 = sld [smem:[%s8150_s0 + %s6426_s7]]   ;;  %s6430_s7 = smov 22  }
  0x17   :  { %s6575_s30 = sld [smem:[%s8150_s0 + %s6427_s15]]   ;;  %s6431_s15 = smov 23  }
  0x18   :  { %s6580_s14 = sld [smem:[%s8150_s0 + %s6428_s22]]   ;;  %s6432_s22 = smov 24  }
  0x1b   :  { %8162 = sst [smem:[#allocation9_spill]] %s6565_s4 }
  0x1c   :  { %8163 = sst [smem:[#allocation10_spill]] %s6570_s13 }
  0x1d   :  { %8164 = sst [smem:[#allocation11_spill]] %s6575_s30 }
  0x1e   :  { %8165 = sst [smem:[#allocation12_spill]] %s6580_s14 }
  0x1f   :  { %s6585_s4 = sld [smem:[%s8150_s0 + %s6429_s28]]   ;;  %s6433_s28 = smov 25  }
  0x20   :  { %s6590_s13 = sld [smem:[%s8150_s0 + %s6430_s7]]   ;;  %s6434_s7 = smov 26  }
  0x21   :  { %s6595_s30 = sld [smem:[%s8150_s0 + %s6431_s15]]   ;;  %s6435_s15 = smov 27  }
  0x22   :  { %s6600_s14 = sld [smem:[%s8150_s0 + %s6432_s22]]   ;;  %s6436_s22 = smov 28  }
  0x25   :  { %8166 = sst [smem:[#allocation13_spill]] %s6585_s4 }
  0x26   :  { %8167 = sst [smem:[#allocation14_spill]] %s6590_s13 }
  0x27   :  { %8168 = sst [smem:[#allocation15_spill]] %s6595_s30 }
  0x28   :  { %8169 = sst [smem:[#allocation16_spill]] %s6600_s14 }
  0x29   :  { %s6605_s4 = sld [smem:[%s8150_s0 + %s6433_s28]]   ;;  %s6437_s28 = smov 29  }
  0x2a   :  { %s6610_s13 = sld [smem:[%s8150_s0 + %s6434_s7]]   ;;  %s6438_s7 = smov 30  }
  0x2b   :  { %s6615_s30 = sld [smem:[%s8150_s0 + %s6435_s15]]   ;;  %s6439_s15 = smov 31  }
  0x2c   :  { %s6620_s14 = sld [smem:[%s8150_s0 + %s6436_s22]]   ;;  %s6440_s22 = smov 32  }
  0x2f   :  { %8170 = sst [smem:[#allocation17_spill]] %s6605_s4 }
  0x30   :  { %8171 = sst [smem:[#allocation18_spill]] %s6610_s13 }
  0x31   :  { %8172 = sst [smem:[#allocation19_spill]] %s6615_s30 }
  0x32   :  { %8173 = sst [smem:[#allocation20_spill]] %s6620_s14 }
  0x33   :  { %s6625_s4 = sld [smem:[%s8150_s0 + %s6437_s28]]   ;;  %s6441_s28 = smov 33  }
  0x34   :  { %s6630_s13 = sld [smem:[%s8150_s0 + %s6438_s7]]   ;;  %s6442_s7 = smov 34  }
  0x35   :  { %s6635_s30 = sld [smem:[%s8150_s0 + %s6439_s15]]   ;;  %s6443_s15 = smov 35  }
  0x36   :  { %s6640_s14 = sld [smem:[%s8150_s0 + %s6440_s22]]   ;;  %s6444_s22 = smov 36  }
  0x39   :  { %8174 = sst [smem:[#allocation21_spill]] %s6625_s4 }
  0x3a   :  { %8175 = sst [smem:[#allocation22_spill]] %s6630_s13 }
  0x3b   :  { %8176 = sst [smem:[#allocation23_spill]] %s6635_s30 }
  0x3c   :  { %8177 = sst [smem:[#allocation24_spill]] %s6640_s14 }
  0x3d   :  { %s6645_s4 = sld [smem:[%s8150_s0 + %s6441_s28]]   ;;  %s6445_s28 = smov 37  }
  0x3e   :  { %s6650_s13 = sld [smem:[%s8150_s0 + %s6442_s7]]   ;;  %s6446_s7 = smov 38  }
  0x3f   :  { %s6655_s30 = sld [smem:[%s8150_s0 + %s6443_s15]]   ;;  %s6447_s15 = smov 39  }
  0x40   :  { %s6660_s14 = sld [smem:[%s8150_s0 + %s6444_s22]]   ;;  %s6448_s22 = smov 40  }
  0x43   :  { %8178 = sst [smem:[#allocation25_spill]] %s6645_s4 }
  0x44   :  { %8179 = sst [smem:[#allocation26_spill]] %s6650_s13 }
  0x45   :  { %8180 = sst [smem:[#allocation27_spill]] %s6655_s30 }
  0x46   :  { %8181 = sst [smem:[#allocation28_spill]] %s6660_s14 }
  0x47   :  { %s6665_s4 = sld [smem:[%s8150_s0 + %s6445_s28]]   ;;  %s6449_s28 = smov 41  }
  0x48   :  { %s6670_s13 = sld [smem:[%s8150_s0 + %s6446_s7]]   ;;  %s6450_s7 = smov 42  }
  0x49   :  { %s6675_s30 = sld [smem:[%s8150_s0 + %s6447_s15]]   ;;  %s6451_s15 = smov 43  }
  0x4a   :  { %s6680_s14 = sld [smem:[%s8150_s0 + %s6448_s22]]   ;;  %s6452_s22 = smov 44  }
  0x4d   :  { %8182 = sst [smem:[#allocation29_spill]] %s6665_s4 }
  0x4e   :  { %8183 = sst [smem:[#allocation30_spill]] %s6670_s13 }
  0x4f   :  { %8184 = sst [smem:[#allocation31_spill]] %s6675_s30 }
  0x50   :  { %8185 = sst [smem:[#allocation32_spill]] %s6680_s14 }
  0x51   :  { %s6685_s4 = sld [smem:[%s8150_s0 + %s6449_s28]]   ;;  %s6453_s28 = smov 45  }
  0x52   :  { %s6690_s13 = sld [smem:[%s8150_s0 + %s6450_s7]]  }
  0x53   :  { %s6695_s30 = sld [smem:[%s8150_s0 + %s6451_s15]]  }
  0x54   :  { %s6700_s14 = sld [smem:[%s8150_s0 + %s6452_s22]]  }
  0x57   :  { %8186 = sst [smem:[#allocation33_spill]] %s6685_s4 }
  0x58   :  { %s6705_s4 = sld [smem:[%s8150_s0 + %s6453_s28]]  }
  0x59   :  { %v227_v0 = vld [vmem:[%s6500_s21 + $0x18] sm:$0xff]  ;;  %v226_v1 = vld [vmem:[%s6500_s21 + $0x10] sm:$0xff]  ;;  %v189_v2 = vld [vmem:[%s6495_s17] sm:$0xff]  ;;  %vm194_vm0 = vcmask 64512   ;;  %v6454_v6 = vmov 0.0  }
  0x5a   :  { %244 = vmatpush.msra.mxu1 %v227_v0  ;;  %216 = vmatpush.msra.mxu0 %v189_v2  ;;  %v225_v3 = vld [vmem:[%s6500_s21 + $0x8] sm:$0xff]  ;;  %v187_v4 = vld [vmem:[%s6480_s5] sm:$0xff] }
  0x5b   :  { %5893 = vmatmul.msk.f32.vlgmr.msra.gmra.mxu0 %vm194_vm0, %v187_v4  ;;  %v224_v5 = vld [vmem:[%s6500_s21] sm:$0xff]  ;;  %314 = vmatpush.msra.mxu2 %v227_v0 }
  0x5c   :  { %245 = vmatpush.msra.mxu1 %v226_v1  ;;  %393 = vmatpush.msra.mxu3 %v227_v0 }
  0x5d   :  { %315 = vmatpush.msra.mxu2 %v226_v1  ;;  %701 = vmatpush.msrb.mxu0 %v227_v0 }
  0x5e   :  { %246 = vmatpush.msra.mxu1 %v225_v3  ;;  %394 = vmatpush.msra.mxu3 %v226_v1 }
  0x5f   :  { %316 = vmatpush.msra.mxu2 %v225_v3  ;;  %702 = vmatpush.msrb.mxu0 %v226_v1 }
  0x60   :  { %247 = vmatpush.msra.mxu1 %v224_v5  ;;  %395 = vmatpush.msra.mxu3 %v225_v3 }
  0x61   :  { %248 = vmatmul.f32.vlgmr.msra.gmra.mxu1 %v6454_v6  ;;  %317 = vmatpush.msra.mxu2 %v224_v5 }
  0x62   :  { %396 = vmatpush.msra.mxu3 %v224_v5  ;;  %472 = vmatpush.msrb.mxu1 %v227_v0 }
  0x63   :  { %96 = vsyncpa [#allocation4], 0  ;;  %551 = vmatpush.msrb.mxu2 %v227_v0  ;;  %703 = vmatpush.msrb.mxu0 %v225_v3  ;;  %v6716_v7 = vld [vmem:[%s6505_s25] ss:$0 sm:$0xff]  ;;  %s6455_s0 = smov 64   ;;  %s6456_s17 = smov 32  }
  0x64   :  { %623 = vmatpush.msrb.mxu3 %v227_v0  ;;  %473 = vmatpush.msrb.mxu1 %v226_v1  ;;  %vm294_vm5 = vcmask 254976   ;;  %vm228_vm6 = vcmask 261120   ;;  %s6458_s21 = smov 118   ;;  %s6459_s25 = smov 126  }
  0x65   :  { %552 = vmatpush.msrb.mxu2 %v226_v1  ;;  %704 = vmatpush.msrb.mxu0 %v224_v5  ;;  %s6469_s7 = smov 106   ;;  %s8189_s10 = sld [smem:[#allocation10_spill]] }
  0x66   :  { %624 = vmatpush.msrb.mxu3 %v226_v1  ;;  %474 = vmatpush.msrb.mxu1 %v225_v3  ;;  %s8190_s11 = sld [smem:[#allocation13_spill]] }
  0x67   :  { %553 = vmatpush.msrb.mxu2 %v225_v3  ;;  %s8191_s15 = sld [smem:[#allocation11_spill]] }
  0x68   :  { %625 = vmatpush.msrb.mxu3 %v225_v3  ;;  %475 = vmatpush.msrb.mxu1 %v224_v5  ;;  %s8192_s16 = sld [smem:[#allocation12_spill]] }
  0x69   :  { %554 = vmatpush.msrb.mxu2 %v224_v5  ;;  %s8193_s18 = sld [smem:[#allocation15_spill]] }
  0x6a   :  { %626 = vmatpush.msrb.mxu3 %v224_v5  ;;  %779 = vmatpush.msra.mxu1 %v227_v0  ;;  %s8194_s22 = sld [smem:[#allocation14_spill]] }
  0x6b   :  { %s8195_s23 = sld [smem:[#allocation16_spill]] }
  0x6c   :  { %780 = vmatpush.msra.mxu1 %v226_v1  ;;  %s8196_s26 = sld [smem:[#allocation19_spill]] }
  0x6d   :  { %s8197_s28 = sld [smem:[#allocation17_spill]] }
  0x6e   :  { %781 = vmatpush.msra.mxu1 %v225_v3  ;;  %s8198_s1 = sld [smem:[#allocation18_spill]] }
  0x6f   :  { %s8199_s2 = sld [smem:[#allocation20_spill]] }
  0x70   :  { %782 = vmatpush.msra.mxu1 %v224_v5 }
  0xd8   :  { %v218_v8 = vpop.f32.mrf.mxu0 }
  0xd9   :  { %v6719_v9 = vadd.f32 %v6716_v7, %v218_v8 }
  0xde   :  { %v249_v10 = vpop.f32.mrf.mxu1 }
  0xdf   :  { %v252_v11 = vadd.f32 %v249_v10, %v6719_v9 }
  0xe1   :  { %6169 = vtanh.f32 %v252_v11  ;;  %v5895_v13 = vmul.f32 -1.442695, %v252_v11 }
  0xe3   :  { %6171 = vpow2.f32 %v5895_v13 }
  0xe7   :  { %v6170_v12 = vpop.eup %6169 }
  0xe8   :  { %275 = vrot.lane.b32.xlu0 %v6170_v12, %s6455_s0 }
  0xe9   :  { %v6172_v14 = vpop.eup %6171 }
  0xea   :  { %v256_v15 = vadd.f32 1.0, %v6172_v14 }
  0xec   :  { %6173 = vrcp.f32 %v256_v15  ;;  %v268_v21 = vand.u32 2147483648, %v256_v15  ;;  %vm262_vm2 = vweird.f32 %v256_v15  ;;  %v266_v22 = vand.u32 2147483647, %v256_v15 }
  0xee   :  { %v269_v24 = vor.u32 1.1754944e-38, %v268_v21  ;;  %vm267_vm4 = vcmp.eq.f32.partialorder %v266_v22, 8.507059e+37 }
  0xf2   :  { %v6174_v16 = vpop.eup %6173 }
  0xf3   :  { %v258_v17 = vmul.f32 %v6174_v16, %v256_v15  ;;  %vm263_vm1 = vweird.f32 %v6174_v16 }
  0xf4   :  { %vm264_vm3 = vmor %vm262_vm2, %vm263_vm1 }
  0xf5   :  { %v259_v18 = vsub.f32 1.0, %v258_v17 }
  0xf7   :  { %v260_v19 = vmul.f32 %v6174_v16, %v259_v18 }
  0xf9   :  { %v261_v20 = vadd.f32 %v6174_v16, %v260_v19 }
  0xfb   :  { %v265_v23 = vsel %vm264_vm3, %v6174_v16, %v261_v20 }
  0xfc   :  { %v270_v26 = vsel %vm267_vm4, %v269_v24, %v265_v23 }
  0xfd   :  { %v273_v28 = vmul.f32 0.0, %v270_v26 }
 0x15a   :  { %v276_v25 = vpop.permute.xlu0 %275 }
 0x15b   :  { %v278_v27 = vmul.f32 %v276_v25, %v270_v26 }
 0x15d   :  { %280 = vrot.lane.b32.xlu0 %v278_v27, %s6456_s17 }
 0x1cf   :  { %v281_v29 = vpop.permute.xlu0 %280 }
 0x1d0   :  { %v283_v30 = vadd.f32 %v281_v29, %v273_v28 }
 0x1d2   :  { %6175 = vtanh.f32 %v283_v30  ;;  %v347_v54 = vrot.slane %v283_v30, 6 }
 0x1d8   :  { %v6176_v31 = vpop.eup %6175 }
 0x1d9   :  { %286 = vrot.lane.b32.xlu1 %v6176_v31, %s6455_s0 }
 0x24b   :  { %v287_v32 = vpop.permute.xlu1 %286 }
 0x24c   :  { %v289_v33 = vmul.f32 %v287_v32, %v270_v26 }
 0x24e   :  { %291 = vrot.lane.b32.xlu1 %v289_v33, %s6456_s17 }
 0x2c0   :  { %v292_v34 = vpop.permute.xlu1 %291 }
 0x2c1   :  { %295 = vst.msk [vmem:[#allocation2] sm:$0x3] %vm294_vm5, %v292_v34  ;;  %5896 = vmatmul.msk.f32.vlgmr.msra.gmra.mxu2 %vm228_vm6, %v292_v34 }
 0x344   :  { %v319_v35 = vpop.f32.mrf.mxu2 }
 0x345   :  { %v323_v36 = vrot.slane %v319_v35, 6 }
 0x347   :  { %v325_v37 = vadd.f32 %v323_v36, %v6719_v9 }
 0x349   :  { %6177 = vtanh.f32 %v325_v37  ;;  %v5897_v39 = vmul.f32 -1.442695, %v325_v37 }
 0x34b   :  { %6179 = vpow2.f32 %v5897_v39 }
 0x34f   :  { %v6178_v38 = vpop.eup %6177 }
 0x350   :  { %351 = vrot.lane.b32.xlu2 %v6178_v38, %s6455_s0 }
 0x351   :  { %v6180_v40 = vpop.eup %6179 }
 0x352   :  { %v329_v41 = vadd.f32 1.0, %v6180_v40 }
 0x354   :  { %6181 = vrcp.f32 %v329_v41  ;;  %v341_v47 = vand.u32 2147483648, %v329_v41  ;;  %vm335_vm8 = vweird.f32 %v329_v41  ;;  %v339_v48 = vand.u32 2147483647, %v329_v41 }
 0x356   :  { %v342_v50 = vor.u32 1.1754944e-38, %v341_v47  ;;  %vm340_vm10 = vcmp.eq.f32.partialorder %v339_v48, 8.507059e+37 }
 0x35a   :  { %v6182_v42 = vpop.eup %6181 }
 0x35b   :  { %v331_v43 = vmul.f32 %v6182_v42, %v329_v41  ;;  %vm336_vm7 = vweird.f32 %v6182_v42 }
 0x35c   :  { %vm337_vm9 = vmor %vm335_vm8, %vm336_vm7 }
 0x35d   :  { %v332_v44 = vsub.f32 1.0, %v331_v43 }
 0x35f   :  { %v333_v45 = vmul.f32 %v6182_v42, %v332_v44 }
 0x361   :  { %v334_v46 = vadd.f32 %v6182_v42, %v333_v45 }
 0x363   :  { %v338_v49 = vsel %vm337_vm9, %v6182_v42, %v334_v46 }
 0x364   :  { %v343_v52 = vsel %vm340_vm10, %v342_v50, %v338_v49  ;;  %vm370_vm10 = vcmask 257026  }
 0x365   :  { %v349_v55 = vmul.f32 %v347_v54, %v343_v52 }
 0x3aa   :  { %v352_v51 = vpop.permute.xlu2 %351 }
 0x3ab   :  { %v354_v53 = vmul.f32 %v352_v51, %v343_v52 }
 0x3ad   :  { %356 = vrot.lane.b32.xlu2 %v354_v53, %s6456_s17 }
 0x407   :  { %v357_v56 = vpop.permute.xlu2 %356 }
 0x408   :  { %v359_v57 = vadd.f32 %v357_v56, %v349_v55  ;;  %v188_v56 = vld [vmem:[%s6480_s5 + $0x8] sm:$0xff]  ;;  %s6457_s5 = smov 120  }
 0x409   :  { %5894 = vmatmul.msk.f32.gmra.mxu0 %vm194_vm0, %v188_v56 }
 0x40a   :  { %6183 = vtanh.f32 %v359_v57  ;;  %v426_v21 = vrot.slane %v359_v57, 6 }
 0x410   :  { %v6184_v58 = vpop.eup %6183 }
 0x411   :  { %362 = vrot.lane.b32.xlu0 %v6184_v58, %s6455_s0 }
 0x483   :  { %v363_v59 = vpop.permute.xlu0 %362 }
 0x484   :  { %v6732_v60 = vmul.f32 %v363_v59, %v343_v52 }
 0x486   :  { %v376_v61 = vrot.slane %v6732_v60, 2  ;;  %v221_v58 = vpop.f32.mrf.mxu0 }
 0x487   :  { %v6755_v59 = vadd.f32 %v6716_v7, %v221_v58 }
 0x488   :  { %377 = vrot.lane.b32.xlu1 %v376_v61, %s6456_s17 }
 0x4fa   :  { %v378_v62 = vpop.permute.xlu1 %377 }
 0x4fb   :  { %5898 = vmatmul.msk.f32.vlgmr.msra.gmra.mxu3 %vm228_vm6, %v378_v62 }
 0x57e   :  { %v398_v63 = vpop.f32.mrf.mxu3 }
 0x57f   :  { %v402_v0 = vrot.slane %v398_v63, 4 }
 0x581   :  { %v404_v1 = vadd.f32 %v402_v0, %v6719_v9 }
 0x583   :  { %6185 = vtanh.f32 %v404_v1  ;;  %v5899_v3 = vmul.f32 -1.442695, %v404_v1 }
 0x585   :  { %6187 = vpow2.f32 %v5899_v3 }
 0x589   :  { %v6186_v2 = vpop.eup %6185 }
 0x58a   :  { %430 = vrot.lane.b32.xlu2 %v6186_v2, %s6455_s0 }
 0x58b   :  { %v6188_v4 = vpop.eup %6187 }
 0x58c   :  { %v408_v5 = vadd.f32 1.0, %v6188_v4 }
 0x58e   :  { %6189 = vrcp.f32 %v408_v5  ;;  %v420_v14 = vand.u32 2147483648, %v408_v5  ;;  %vm414_vm12 = vweird.f32 %v408_v5  ;;  %v418_v15 = vand.u32 2147483647, %v408_v5 }
 0x590   :  { %v421_v17 = vor.u32 1.1754944e-38, %v420_v14  ;;  %vm419_vm14 = vcmp.eq.f32.partialorder %v418_v15, 8.507059e+37 }
 0x594   :  { %v6190_v8 = vpop.eup %6189 }
 0x595   :  { %v410_v10 = vmul.f32 %v6190_v8, %v408_v5  ;;  %vm415_vm11 = vweird.f32 %v6190_v8 }
 0x596   :  { %vm416_vm13 = vmor %vm414_vm12, %vm415_vm11  ;;  %vm449_vm11 = vcmask 259076   ;;  %vm528_vm12 = vcmask 261126  }
 0x597   :  { %v411_v11 = vsub.f32 1.0, %v410_v10 }
 0x599   :  { %v412_v12 = vmul.f32 %v6190_v8, %v411_v11 }
 0x59b   :  { %v413_v13 = vadd.f32 %v6190_v8, %v412_v12 }
 0x59d   :  { %v417_v16 = vsel %vm416_vm13, %v6190_v8, %v413_v13 }
 0x59e   :  { %v422_v19 = vsel %vm419_vm14, %v421_v17, %v417_v16 }
 0x59f   :  { %v428_v22 = vmul.f32 %v426_v21, %v422_v19 }
 0x5e4   :  { %v431_v18 = vpop.permute.xlu2 %430 }
 0x5e5   :  { %v433_v20 = vmul.f32 %v431_v18, %v422_v19 }
 0x5e7   :  { %435 = vrot.lane.b32.xlu0 %v433_v20, %s6456_s17 }
 0x659   :  { %v436_v23 = vpop.permute.xlu0 %435 }
 0x65a   :  { %v438_v24 = vadd.f32 %v436_v23, %v428_v22 }
 0x65c   :  { %6191 = vtanh.f32 %v438_v24  ;;  %v505_v48 = vrot.slane %v438_v24, 6 }
 0x662   :  { %v6192_v25 = vpop.eup %6191 }
 0x663   :  { %441 = vrot.lane.b32.xlu1 %v6192_v25, %s6455_s0  ;;  %v841_v25 = vld [vmem:[%s6510_s29 + $0x18] sm:$0xff] }
 0x664   :  { %864 = vmatpush.msra.mxu2 %v841_v25 }
 0x6d5   :  { %v442_v26 = vpop.permute.xlu1 %441 }
 0x6d6   :  { %v6741_v27 = vmul.f32 %v442_v26, %v422_v19  ;;  %v840_v26 = vld [vmem:[%s6510_s29 + $0x10] sm:$0xff] }
 0x6d7   :  { %865 = vmatpush.msra.mxu2 %v840_v26 }
 0x6d8   :  { %v455_v28 = vrot.slane %v6741_v27, 4 }
 0x6da   :  { %456 = vrot.lane.b32.xlu2 %v455_v28, %s6456_s17  ;;  %v6775_v28 = vld [vmem:[%s6515_s3 + $0x18] sm:$0xff] }
 0x6db   :  { %891 = vmatpush.msra.mxu3 %v6775_v28  ;;  %954 = vmatpush.msra.mxu0 %v6775_v28 }
 0x734   :  { %v457_v29 = vpop.permute.xlu2 %456 }
 0x735   :  { %5900 = vmatmul.msk.f32.vlgmr.msrb.gmra.mxu1 %vm228_vm6, %v457_v29  ;;  %v839_v29 = vld [vmem:[%s6510_s29 + $0x8] sm:$0xff] }
 0x736   :  { %1024 = vmatpush.msrb.mxu1 %v6775_v28  ;;  %866 = vmatpush.msra.mxu2 %v839_v29 }
 0x7b2   :  { %v477_v30 = vpop.f32.mrf.mxu1 }
 0x7b3   :  { %v481_v31 = vrot.slane %v477_v30, 2  ;;  %v6783_v30 = vld [vmem:[%s6515_s3 + $0x8] sm:$0xff] }
 0x7b5   :  { %v483_v32 = vadd.f32 %v481_v31, %v6719_v9  ;;  %v838_v31 = vld [vmem:[%s6510_s29] sm:$0xff]  ;;  %s6460_s29 = smov 124  }
 0x7b6   :  { %867 = vmatpush.msra.mxu2 %v838_v31 }
 0x7b7   :  { %6193 = vtanh.f32 %v483_v32  ;;  %v5901_v34 = vmul.f32 -1.442695, %v483_v32  ;;  %v6795_v32 = vld [vmem:[%s6515_s3] sm:$0xff] }
 0x7b9   :  { %6195 = vpow2.f32 %v5901_v34 }
 0x7bd   :  { %v6194_v33 = vpop.eup %6193 }
 0x7be   :  { %509 = vrot.lane.b32.xlu0 %v6194_v33, %s6455_s0 }
 0x7bf   :  { %v6196_v35 = vpop.eup %6195 }
 0x7c0   :  { %v487_v36 = vadd.f32 1.0, %v6196_v35 }
 0x7c2   :  { %6197 = vrcp.f32 %v487_v36  ;;  %v499_v42 = vand.u32 2147483648, %v487_v36  ;;  %vm493_vm1 = vweird.f32 %v487_v36  ;;  %v497_v43 = vand.u32 2147483647, %v487_v36 }
 0x7c4   :  { %v500_v44 = vor.u32 1.1754944e-38, %v499_v42  ;;  %vm498_vm3 = vcmp.eq.f32.partialorder %v497_v43, 8.507059e+37 }
 0x7c8   :  { %v6198_v37 = vpop.eup %6197 }
 0x7c9   :  { %v489_v38 = vmul.f32 %v6198_v37, %v487_v36  ;;  %vm494_vm15 = vweird.f32 %v6198_v37 }
 0x7ca   :  { %vm495_vm2 = vmor %vm493_vm1, %vm494_vm15 }
 0x7cb   :  { %v490_v39 = vsub.f32 1.0, %v489_v38 }
 0x7cd   :  { %v491_v40 = vmul.f32 %v6198_v37, %v490_v39 }
 0x7cf   :  { %v492_v41 = vadd.f32 %v6198_v37, %v491_v40 }
 0x7d1   :  { %v496_v9 = vsel %vm495_vm2, %v6198_v37, %v492_v41 }
 0x7d2   :  { %v501_v46 = vsel %vm498_vm3, %v500_v44, %v496_v9 }
 0x7d3   :  { %v507_v49 = vmul.f32 %v505_v48, %v501_v46 }
 0x830   :  { %v510_v45 = vpop.permute.xlu0 %509 }
 0x831   :  { %v512_v47 = vmul.f32 %v510_v45, %v501_v46 }
 0x833   :  { %514 = vrot.lane.b32.xlu1 %v512_v47, %s6456_s17 }
 0x8a5   :  { %v515_v50 = vpop.permute.xlu1 %514 }
 0x8a6   :  { %v517_v51 = vadd.f32 %v515_v50, %v507_v49 }
 0x8a8   :  { %6199 = vtanh.f32 %v517_v51  ;;  %v581_v17 = vrot.slane %v517_v51, 6 }
 0x8ae   :  { %v6200_v52 = vpop.eup %6199 }
 0x8af   :  { %520 = vrot.lane.b32.xlu2 %v6200_v52, %s6455_s0 }
 0x909   :  { %v521_v53 = vpop.permute.xlu2 %520 }
 0x90a   :  { %v523_v54 = vmul.f32 %v521_v53, %v501_v46 }
 0x90c   :  { %v534_v55 = vrot.slane %v523_v54, 6 }
 0x90e   :  { %535 = vrot.lane.b32.xlu0 %v534_v55, %s6456_s17 }
 0x980   :  { %v536_v57 = vpop.permute.xlu0 %535 }
 0x981   :  { %5902 = vmatmul.msk.f32.vlgmr.msrb.gmra.mxu2 %vm228_vm6, %v536_v57 }
 0x982   :  { %1300 = vmatpush.msrb.mxu2 %v6775_v28 }
 0xa04   :  { %v556_v61 = vpop.f32.mrf.mxu2 }
 0xa05   :  { %v559_v62 = vadd.f32 %v556_v61, %v6755_v59 }
 0xa07   :  { %6201 = vtanh.f32 %v559_v62  ;;  %v5903_v0 = vmul.f32 -1.442695, %v559_v62 }
 0xa09   :  { %6203 = vpow2.f32 %v5903_v0 }
 0xa0d   :  { %v6202_v63 = vpop.eup %6201 }
 0xa0e   :  { %585 = vrot.lane.b32.xlu1 %v6202_v63, %s6455_s0 }
 0xa0f   :  { %v6204_v1 = vpop.eup %6203 }
 0xa10   :  { %v563_v2 = vadd.f32 1.0, %v6204_v1 }
 0xa12   :  { %6205 = vrcp.f32 %v563_v2  ;;  %v575_v7 = vand.u32 2147483648, %v563_v2  ;;  %vm569_vm7 = vweird.f32 %v563_v2  ;;  %v573_v11 = vand.u32 2147483647, %v563_v2 }
 0xa14   :  { %v576_v13 = vor.u32 1.1754944e-38, %v575_v7  ;;  %vm574_vm9 = vcmp.eq.f32.partialorder %v573_v11, 8.507059e+37 }
 0xa18   :  { %v6206_v3 = vpop.eup %6205 }
 0xa19   :  { %v565_v4 = vmul.f32 %v6206_v3, %v563_v2  ;;  %vm570_vm4 = vweird.f32 %v6206_v3 }
 0xa1a   :  { %vm571_vm8 = vmor %vm569_vm7, %vm570_vm4 }
 0xa1b   :  { %v566_v5 = vsub.f32 1.0, %v565_v4 }
 0xa1d   :  { %v567_v8 = vmul.f32 %v6206_v3, %v566_v5 }
 0xa1f   :  { %v568_v10 = vadd.f32 %v6206_v3, %v567_v8 }
 0xa21   :  { %v572_v12 = vsel %vm571_vm8, %v6206_v3, %v568_v10 }
 0xa22   :  { %v577_v15 = vsel %vm574_vm9, %v576_v13, %v572_v12 }
 0xa23   :  { %v583_v18 = vmul.f32 %v581_v17, %v577_v15 }
 0xa80   :  { %v586_v14 = vpop.permute.xlu1 %585 }
 0xa81   :  { %v588_v16 = vmul.f32 %v586_v14, %v577_v15 }
 0xa83   :  { %590 = vrot.lane.b32.xlu2 %v588_v16, %s6456_s17 }
 0xa8b   :  { %367 = vrot.lane.b32.xlu2 %v6732_v60, %s6456_s17 }
 0xadd   :  { %v591_v19 = vpop.permute.xlu2 %590 }
 0xade   :  { %v6762_v20 = vadd.f32 %v591_v19, %v583_v18 }
 0xae0   :  { %6207 = vtanh.f32 %v6762_v20  ;;  %v656_v14 = vrot.slane %v6762_v20, 6 }
 0xae5   :  { %v368_v21 = vpop.permute.xlu2 %367 }
 0xae6   :  { %v6208_v22 = vpop.eup %6207  ;;  %371 = vst.msk [vmem:[#allocation2] sm:$0xc] %vm370_vm10, %v368_v21 }
 0xae7   :  { %596 = vrot.lane.b32.xlu0 %v6208_v22, %s6455_s0 }
 0xaef   :  { %446 = vrot.lane.b32.xlu0 %v6741_v27, %s6456_s17  ;;  %v6779_v27 = vld [vmem:[%s6515_s3 + $0x10] sm:$0xff]  ;;  %s6461_s3 = smov 116  }
 0xaf0   :  { %892 = vmatpush.msra.mxu3 %v6779_v27  ;;  %955 = vmatpush.msra.mxu0 %v6779_v27 }
 0xaf1   :  { %1025 = vmatpush.msrb.mxu1 %v6779_v27  ;;  %1301 = vmatpush.msrb.mxu2 %v6779_v27 }
 0xaf2   :  { %893 = vmatpush.msra.mxu3 %v6783_v30  ;;  %956 = vmatpush.msra.mxu0 %v6783_v30 }
 0xaf3   :  { %1026 = vmatpush.msrb.mxu1 %v6783_v30  ;;  %1302 = vmatpush.msrb.mxu2 %v6783_v30 }
 0xaf4   :  { %894 = vmatpush.msra.mxu3 %v6795_v32  ;;  %957 = vmatpush.msra.mxu0 %v6795_v32 }
 0xaf5   :  { %1027 = vmatpush.msrb.mxu1 %v6795_v32  ;;  %1303 = vmatpush.msrb.mxu2 %v6795_v32 }
 0xb59   :  { %v597_v60 = vpop.permute.xlu0 %596 }
 0xb5a   :  { %v599_v23 = vmul.f32 %v597_v60, %v577_v15 }
 0xb5c   :  { %601 = vrot.lane.b32.xlu1 %v599_v23, %s6456_s17 }
 0xb61   :  { %v447_v24 = vpop.permute.xlu0 %446 }
 0xb62   :  { %450 = vst.msk [vmem:[#allocation2] sm:$0x30] %vm449_vm11, %v447_v24 }
 0xb64   :  { %525 = vrot.lane.b32.xlu1 %v523_v54, %s6456_s17 }
 0xbce   :  { %v602_v33 = vpop.permute.xlu1 %601 }
 0xbcf   :  { %604 = vst.msk [vmem:[#allocation2 + $0x8] sm:$0x3] %vm294_vm5, %v602_v33  ;;  %5904 = vmatmul.msk.f32.vlgmr.msrb.gmra.mxu3 %vm228_vm6, %v602_v33 }
 0xbd0   :  { %1094 = vmatpush.msrb.mxu3 %v6775_v28 }
 0xbd2   :  { %1095 = vmatpush.msrb.mxu3 %v6779_v27 }
 0xbd4   :  { %1096 = vmatpush.msrb.mxu3 %v6783_v30 }
 0xbd6   :  { %v526_v34 = vpop.permute.xlu1 %525  ;;  %1097 = vmatpush.msrb.mxu3 %v6795_v32 }
 0xbd7   :  { %529 = vst.msk [vmem:[#allocation2] sm:$0xc0] %vm528_vm12, %v526_v34  ;;  %895 = vmatmul.f32.vlgmr.msra.gmra.mxu3 %v6454_v6  ;;  %v6820_v6 = vld [vmem:[%s6520_s8] ss:$0 sm:$0xff]  ;;  %s6463_s8 = smov 112  }
 0xbd8   :  { %1370 = vmatpush.msra.mxu3 %v6775_v28 }
 0xbda   :  { %1371 = vmatpush.msra.mxu3 %v6779_v27 }
 0xbdc   :  { %1372 = vmatpush.msra.mxu3 %v6783_v30 }
 0xbde   :  { %v836_v35 = vld [vmem:[#allocation2] sm:$0xff]  ;;  %1373 = vmatpush.msra.mxu3 %v6795_v32 }
 0xbdf   :  { %5910 = vmatmul.msk.f32.vlgmr.msra.gmra.mxu2 %vm228_vm6, %v836_v35 }
 0xc52   :  { %v628_v36 = vpop.f32.mrf.mxu3 }
 0xc53   :  { %v632_v37 = vrot.slane %v628_v36, 6 }
 0xc55   :  { %v634_v38 = vadd.f32 %v632_v37, %v6755_v59 }
 0xc57   :  { %6209 = vtanh.f32 %v634_v38  ;;  %v5905_v44 = vmul.f32 -1.442695, %v634_v38 }
 0xc5a   :  { %v896_v41 = vpop.f32.mrf.mxu3 }
 0xc5d   :  { %v6210_v39 = vpop.eup %6209 }
 0xc5e   :  { %660 = vrot.lane.b32.xlu2 %v6210_v39, %s6455_s0 }
 0xc62   :  { %v869_v40 = vpop.f32.mrf.mxu2 }
 0xc63   :  { %v6823_v42 = vadd.f32 %v6820_v6, %v869_v40 }
 0xc65   :  { %v899_v43 = vadd.f32 %v896_v41, %v6823_v42 }
 0xc67   :  { %6211 = vtanh.f32 %v899_v43  ;;  %v5912_v53 = vmul.f32 -1.442695, %v899_v43 }
 0xc68   :  { %6213 = vpow2.f32 %v5905_v44 }
 0xc6d   :  { %v6212_v9 = vpop.eup %6211 }
 0xc6e   :  { %922 = vrot.lane.b32.xlu0 %v6212_v9, %s6455_s0  ;;  %v6214_v45 = vpop.eup %6213 }
 0xc6f   :  { %v638_v46 = vadd.f32 1.0, %v6214_v45 }
 0xc71   :  { %6215 = vrcp.f32 %v638_v46  ;;  %v650_v52 = vand.u32 2147483648, %v638_v46  ;;  %vm644_vm13 = vweird.f32 %v638_v46  ;;  %v648_v54 = vand.u32 2147483647, %v638_v46 }
 0xc72   :  { %6217 = vpow2.f32 %v5912_v53 }
 0xc73   :  { %v651_v56 = vor.u32 1.1754944e-38, %v650_v52  ;;  %vm649_vm15 = vcmp.eq.f32.partialorder %v648_v54, 8.507059e+37 }
 0xc77   :  { %v6216_v47 = vpop.eup %6215 }
 0xc78   :  { %v640_v48 = vmul.f32 %v6216_v47, %v638_v46  ;;  %vm645_vm5 = vweird.f32 %v6216_v47  ;;  %v6218_v62 = vpop.eup %6217 }
 0xc79   :  { %vm646_vm14 = vmor %vm644_vm13, %vm645_vm5  ;;  %v903_v63 = vadd.f32 1.0, %v6218_v62 }
 0xc7a   :  { %v641_v49 = vsub.f32 1.0, %v640_v48 }
 0xc7b   :  { %6219 = vrcp.f32 %v903_v63  ;;  %v915_v5 = vand.u32 2147483648, %v903_v63  ;;  %vm909_vm2 = vweird.f32 %v903_v63  ;;  %v913_v8 = vand.u32 2147483647, %v903_v63 }
 0xc7c   :  { %v642_v50 = vmul.f32 %v6216_v47, %v641_v49 }
 0xc7d   :  { %v916_v7 = vor.u32 1.1754944e-38, %v915_v5  ;;  %vm914_vm4 = vcmp.eq.f32.partialorder %v913_v8, 8.507059e+37 }
 0xc7e   :  { %v643_v51 = vadd.f32 %v6216_v47, %v642_v50 }
 0xc80   :  { %v647_v55 = vsel %vm646_vm14, %v6216_v47, %v643_v51 }
 0xc81   :  { %v652_v58 = vsel %vm649_vm15, %v651_v56, %v647_v55  ;;  %v6220_v0 = vpop.eup %6219 }
 0xc82   :  { %v905_v1 = vmul.f32 %v6220_v0, %v903_v63  ;;  %vm910_vm1 = vweird.f32 %v6220_v0  ;;  %v658_v15 = vmul.f32 %v656_v14, %v652_v58 }
 0xc83   :  { %vm911_vm3 = vmor %vm909_vm2, %vm910_vm1 }
 0xc84   :  { %v906_v2 = vsub.f32 1.0, %v905_v1 }
 0xc86   :  { %v907_v3 = vmul.f32 %v6220_v0, %v906_v2 }
 0xc88   :  { %v908_v4 = vadd.f32 %v6220_v0, %v907_v3 }
 0xc8a   :  { %v912_v10 = vsel %vm911_vm3, %v6220_v0, %v908_v4 }
 0xc8b   :  { %v917_v12 = vsel %vm914_vm4, %v916_v7, %v912_v10 }
 0xc8c   :  { %v920_v19 = vmul.f32 0.0, %v917_v12 }
 0xcb8   :  { %v661_v57 = vpop.permute.xlu2 %660 }
 0xcb9   :  { %v663_v61 = vmul.f32 %v661_v57, %v652_v58 }
 0xcbb   :  { %665 = vrot.lane.b32.xlu1 %v663_v61, %s6456_s17 }
 0xce0   :  { %v923_v11 = vpop.permute.xlu0 %922 }
 0xce1   :  { %v925_v13 = vmul.f32 %v923_v11, %v917_v12 }
 0xce3   :  { %927 = vrot.lane.b32.xlu2 %v925_v13, %s6456_s17 }
 0xd2d   :  { %v666_v16 = vpop.permute.xlu1 %665 }
 0xd2e   :  { %v6830_v17 = vadd.f32 %v666_v16, %v658_v15 }
 0xd30   :  { %6221 = vtanh.f32 %v6830_v17  ;;  %v734_v11 = vrot.slane %v6830_v17, 6 }
 0xd36   :  { %v6222_v18 = vpop.eup %6221 }
 0xd37   :  { %671 = vrot.lane.b32.xlu0 %v6222_v18, %s6455_s0 }
 0xd3d   :  { %v928_v21 = vpop.permute.xlu2 %927 }
 0xd3e   :  { %v6834_v22 = vadd.f32 %v928_v21, %v920_v19 }
 0xd40   :  { %6223 = vtanh.f32 %v6834_v22  ;;  %v987_v16 = vrot.slane %v6834_v22, 6 }
 0xd46   :  { %v6224_v60 = vpop.eup %6223 }
 0xd47   :  { %933 = vrot.lane.b32.xlu1 %v6224_v60, %s6455_s0 }
 0xda9   :  { %v672_v23 = vpop.permute.xlu0 %671 }
 0xdaa   :  { %v6838_v20 = vmul.f32 %v672_v23, %v652_v58 }
 0xdac   :  { %v684_v24 = vrot.slane %v6838_v20, 2 }
 0xdae   :  { %685 = vrot.lane.b32.xlu2 %v684_v24, %s6456_s17 }
 0xdb9   :  { %v934_v25 = vpop.permute.xlu1 %933 }
 0xdba   :  { %v936_v26 = vmul.f32 %v934_v25, %v917_v12 }
 0xdbc   :  { %938 = vrot.lane.b32.xlu0 %v936_v26, %s6456_s17 }
 0xe08   :  { %v686_v29 = vpop.permute.xlu2 %685 }
 0xe09   :  { %5906 = vmatmul.msk.f32.vlgmr.msrb.gmra.mxu0 %vm228_vm6, %v686_v29 }
 0xe0a   :  { %1164 = vmatpush.msrb.mxu0 %v6775_v28 }
 0xe0c   :  { %1165 = vmatpush.msrb.mxu0 %v6779_v27 }
 0xe0e   :  { %1166 = vmatpush.msrb.mxu0 %v6783_v30 }
 0xe10   :  { %1167 = vmatpush.msrb.mxu0 %v6795_v32 }
 0xe2e   :  { %v939_v31 = vpop.permute.xlu0 %938 }
 0xe2f   :  { %5913 = vmatmul.msk.f32.vlgmr.msra.gmra.mxu0 %vm228_vm6, %v939_v31 }
 0xe86   :  { %v706_v33 = vpop.f32.mrf.mxu0 }
 0xe87   :  { %v710_v34 = vrot.slane %v706_v33, 4 }
 0xe89   :  { %v712_v35 = vadd.f32 %v710_v34, %v6755_v59 }
 0xe8b   :  { %6225 = vtanh.f32 %v712_v35  ;;  %v5907_v41 = vmul.f32 -1.442695, %v712_v35 }
 0xe91   :  { %v6226_v36 = vpop.eup %6225 }
 0xe92   :  { %738 = vrot.lane.b32.xlu1 %v6226_v36, %s6455_s0 }
 0xeac   :  { %v959_v37 = vpop.f32.mrf.mxu0 }
 0xead   :  { %v963_v38 = vrot.slane %v959_v37, 6 }
 0xeaf   :  { %v965_v39 = vadd.f32 %v963_v38, %v6823_v42 }
 0xeb1   :  { %6227 = vtanh.f32 %v965_v39  ;;  %v5914_v44 = vmul.f32 -1.442695, %v965_v39 }
 0xeb2   :  { %6229 = vpow2.f32 %v5907_v41 }
 0xeb7   :  { %v6228_v40 = vpop.eup %6227 }
 0xeb8   :  { %991 = vrot.lane.b32.xlu2 %v6228_v40, %s6455_s0  ;;  %v6230_v43 = vpop.eup %6229 }
 0xeb9   :  { %v716_v9 = vadd.f32 1.0, %v6230_v43 }
 0xebb   :  { %6231 = vrcp.f32 %v716_v9  ;;  %v728_v53 = vand.u32 2147483648, %v716_v9  ;;  %vm722_vm8 = vweird.f32 %v716_v9  ;;  %v726_v54 = vand.u32 2147483647, %v716_v9 }
 0xebc   :  { %6233 = vpow2.f32 %v5914_v44 }
 0xebd   :  { %v729_v57 = vor.u32 1.1754944e-38, %v728_v53  ;;  %vm727_vm5 = vcmp.eq.f32.partialorder %v726_v54, 8.507059e+37 }
 0xec1   :  { %v6232_v45 = vpop.eup %6231 }
 0xec2   :  { %v6234_v46 = vpop.eup %6233  ;;  %v718_v47 = vmul.f32 %v6232_v45, %v716_v9  ;;  %vm723_vm7 = vweird.f32 %v6232_v45 }
 0xec3   :  { %v969_v48 = vadd.f32 1.0, %v6234_v46  ;;  %vm724_vm9 = vmor %vm722_vm8, %vm723_vm7 }
 0xec4   :  { %v719_v49 = vsub.f32 1.0, %v718_v47 }
 0xec5   :  { %6235 = vrcp.f32 %v969_v48  ;;  %v981_v2 = vand.u32 2147483648, %v969_v48  ;;  %vm975_vm14 = vweird.f32 %v969_v48  ;;  %v979_v3 = vand.u32 2147483647, %v969_v48 }
 0xec6   :  { %v720_v50 = vmul.f32 %v6232_v45, %v719_v49 }
 0xec7   :  { %v982_v5 = vor.u32 1.1754944e-38, %v981_v2  ;;  %vm980_vm1 = vcmp.eq.f32.partialorder %v979_v3, 8.507059e+37 }
 0xec8   :  { %v721_v52 = vadd.f32 %v6232_v45, %v720_v50 }
 0xeca   :  { %v725_v56 = vsel %vm724_vm9, %v6232_v45, %v721_v52 }
 0xecb   :  { %v6236_v51 = vpop.eup %6235  ;;  %v730_v61 = vsel %vm727_vm5, %v729_v57, %v725_v56 }
 0xecc   :  { %v971_v55 = vmul.f32 %v6236_v51, %v969_v48  ;;  %vm976_vm13 = vweird.f32 %v6236_v51  ;;  %v736_v12 = vmul.f32 %v734_v11, %v730_v61 }
 0xecd   :  { %vm977_vm15 = vmor %vm975_vm14, %vm976_vm13 }
 0xece   :  { %v972_v58 = vsub.f32 1.0, %v971_v55 }
 0xed0   :  { %v973_v0 = vmul.f32 %v6236_v51, %v972_v58 }
 0xed2   :  { %v974_v1 = vadd.f32 %v6236_v51, %v973_v0 }
 0xed4   :  { %v978_v4 = vsel %vm977_vm15, %v6236_v51, %v974_v1 }
 0xed5   :  { %v983_v10 = vsel %vm980_vm1, %v982_v5, %v978_v4 }
 0xed6   :  { %v989_v18 = vmul.f32 %v987_v16, %v983_v10 }
 0xf04   :  { %v739_v62 = vpop.permute.xlu1 %738 }
 0xf05   :  { %v741_v63 = vmul.f32 %v739_v62, %v730_v61 }
 0xf07   :  { %743 = vrot.lane.b32.xlu0 %v741_v63, %s6456_s17 }
 0xf12   :  { %v992_v8 = vpop.permute.xlu2 %991 }
 0xf13   :  { %v994_v7 = vmul.f32 %v992_v8, %v983_v10 }
 0xf15   :  { %996 = vrot.lane.b32.xlu1 %v994_v7, %s6456_s17 }
 0xf79   :  { %v744_v13 = vpop.permute.xlu0 %743 }
 0xf7a   :  { %v6856_v14 = vadd.f32 %v744_v13, %v736_v12 }
 0xf7c   :  { %6237 = vtanh.f32 %v6856_v14 }
 0xf82   :  { %v6238_v15 = vpop.eup %6237 }
 0xf83   :  { %749 = vrot.lane.b32.xlu2 %v6238_v15, %s6455_s0 }
 0xf87   :  { %v997_v19 = vpop.permute.xlu1 %996 }
 0xf88   :  { %v999_v21 = vadd.f32 %v997_v19, %v989_v18 }
 0xf8a   :  { %6239 = vtanh.f32 %v999_v21  ;;  %v1057_v52 = vrot.slane %v999_v21, 6  ;;  %v812_v21 = vrot.slane %v6856_v14, 6 }
 0xf90   :  { %v6240_v60 = vpop.eup %6239 }
 0xf91   :  { %1002 = vrot.lane.b32.xlu0 %v6240_v60, %s6455_s0 }
 0xfdd   :  { %v750_v23 = vpop.permute.xlu2 %749 }
 0xfde   :  { %v6862_v17 = vmul.f32 %v750_v23, %v730_v61 }
 0xfe0   :  { %v762_v24 = vrot.slane %v6862_v17, 4 }
 0xfe2   :  { %763 = vrot.lane.b32.xlu1 %v762_v24, %s6456_s17 }
0x1003   :  { %v1003_v25 = vpop.permute.xlu0 %1002 }
0x1004   :  { %v1005_v26 = vmul.f32 %v1003_v25, %v983_v10 }
0x1006   :  { %v1007_v29 = vrot.slane %v1005_v26, 2 }
0x1008   :  { %1008 = vrot.lane.b32.xlu2 %v1007_v29, %s6456_s17 }
0x1054   :  { %v764_v22 = vpop.permute.xlu1 %763 }
0x1055   :  { %5908 = vmatmul.msk.f32.vlgmr.msra.gmra.mxu1 %vm228_vm6, %v764_v22 }
0x1056   :  { %1230 = vmatpush.msra.mxu1 %v6775_v28 }
0x1058   :  { %1231 = vmatpush.msra.mxu1 %v6779_v27 }
0x105a   :  { %1232 = vmatpush.msra.mxu1 %v6783_v30 }
0x105c   :  { %1233 = vmatpush.msra.mxu1 %v6795_v32 }
0x1062   :  { %v1009_v31 = vpop.permute.xlu2 %1008 }
0x1063   :  { %5915 = vmatmul.msk.f32.vlgmr.msrb.gmra.mxu1 %vm228_vm6, %v1009_v31 }
0x10d2   :  { %v784_v33 = vpop.f32.mrf.mxu1 }
0x10d3   :  { %v788_v44 = vrot.slane %v784_v33, 2 }
0x10d5   :  { %v790_v47 = vadd.f32 %v788_v44, %v6755_v59 }
0x10d7   :  { %v5909_v59 = vmul.f32 -1.442695, %v790_v47 }
0x10e0   :  { %v1029_v34 = vpop.f32.mrf.mxu1 }
0x10e1   :  { %v1033_v35 = vrot.slane %v1029_v34, 4 }
0x10e3   :  { %v1035_v36 = vadd.f32 %v1033_v35, %v6823_v42 }
0x10e5   :  { %6241 = vtanh.f32 %v1035_v36  ;;  %v5916_v38 = vmul.f32 -1.442695, %v1035_v36 }
0x10e7   :  { %6243 = vpow2.f32 %v5916_v38 }
0x10eb   :  { %v6242_v37 = vpop.eup %6241 }
0x10ec   :  { %1061 = vrot.lane.b32.xlu0 %v6242_v37, %s6455_s0 }
0x10ed   :  { %v6244_v28 = vpop.eup %6243 }
0x10ee   :  { %v1039_v27 = vadd.f32 1.0, %v6244_v28 }
0x10f0   :  { %6245 = vrcp.f32 %v1039_v27  ;;  %v1051_v43 = vand.u32 2147483648, %v1039_v27  ;;  %vm1045_vm3 = vweird.f32 %v1039_v27  ;;  %v1049_v9 = vand.u32 2147483647, %v1039_v27 }
0x10f1   :  { %6247 = vtanh.f32 %v790_v47 }
0x10f2   :  { %v1052_v46 = vor.u32 1.1754944e-38, %v1051_v43  ;;  %vm1050_vm7 = vcmp.eq.f32.partialorder %v1049_v9, 8.507059e+37 }
0x10f6   :  { %v6246_v30 = vpop.eup %6245 }
0x10f7   :  { %v1041_v39 = vmul.f32 %v6246_v30, %v1039_v27  ;;  %vm1046_vm2 = vweird.f32 %v6246_v30  ;;  %v6248_v51 = vpop.eup %6247 }
0x10f8   :  { %vm1047_vm4 = vmor %vm1045_vm3, %vm1046_vm2 }
0x10f9   :  { %v1042_v32 = vsub.f32 1.0, %v1041_v39 }
0x10fb   :  { %v1043_v40 = vmul.f32 %v6246_v30, %v1042_v32 }
0x10fd   :  { %v1044_v41 = vadd.f32 %v6246_v30, %v1043_v40 }
0x10ff   :  { %v1048_v45 = vsel %vm1047_vm4, %v6246_v30, %v1044_v41 }
0x1100   :  { %v1053_v49 = vsel %vm1050_vm7, %v1052_v46, %v1048_v45 }
0x1101   :  { %v1059_v53 = vmul.f32 %v1057_v52, %v1053_v49 }
0x115e   :  { %v1062_v48 = vpop.permute.xlu0 %1061 }
0x115f   :  { %v1064_v50 = vmul.f32 %v1062_v48, %v1053_v49 }
0x1161   :  { %1066 = vrot.lane.b32.xlu1 %v1064_v50, %s6456_s17 }
0x1169   :  { %816 = vrot.lane.b32.xlu1 %v6248_v51, %s6455_s0 }
0x11d3   :  { %v1067_v54 = vpop.permute.xlu1 %1066 }
0x11d4   :  { %v6878_v55 = vadd.f32 %v1067_v54, %v1059_v53 }
0x11d6   :  { %6249 = vtanh.f32 %v6878_v55  ;;  %v1127_v40 = vrot.slane %v6878_v55, 6 }
0x11d7   :  { %6251 = vpow2.f32 %v5909_v59 }
0x11db   :  { %v817_v7 = vpop.permute.xlu1 %816 }
0x11dc   :  { %v6250_v56 = vpop.eup %6249 }
0x11dd   :  { %1072 = vrot.lane.b32.xlu2 %v6250_v56, %s6455_s0  ;;  %v6252_v57 = vpop.eup %6251 }
0x11de   :  { %v794_v58 = vadd.f32 1.0, %v6252_v57 }
0x11e0   :  { %6253 = vrcp.f32 %v794_v58  ;;  %v806_v5 = vand.u32 2147483648, %v794_v58  ;;  %vm800_vm9 = vweird.f32 %v794_v58  ;;  %v804_v8 = vand.u32 2147483647, %v794_v58 }
0x11e2   :  { %v807_v11 = vor.u32 1.1754944e-38, %v806_v5  ;;  %vm805_vm13 = vcmp.eq.f32.partialorder %v804_v8, 8.507059e+37 }
0x11e6   :  { %v6254_v61 = vpop.eup %6253 }
0x11e7   :  { %v796_v62 = vmul.f32 %v6254_v61, %v794_v58  ;;  %vm801_vm8 = vweird.f32 %v6254_v61 }
0x11e8   :  { %vm802_vm5 = vmor %vm800_vm9, %vm801_vm8 }
0x11e9   :  { %v797_v63 = vsub.f32 1.0, %v796_v62 }
0x11eb   :  { %v798_v0 = vmul.f32 %v6254_v61, %v797_v63 }
0x11ed   :  { %v799_v3 = vadd.f32 %v6254_v61, %v798_v0 }
0x11ef   :  { %v803_v10 = vsel %vm802_vm5, %v6254_v61, %v799_v3 }
0x11f0   :  { %v808_v12 = vsel %vm805_vm13, %v807_v11, %v803_v10 }
0x11f1   :  { %v819_v13 = vmul.f32 %v817_v7, %v808_v12  ;;  %v814_v23 = vmul.f32 %v812_v21, %v808_v12 }
0x1237   :  { %v1073_v1 = vpop.permute.xlu2 %1072 }
0x1238   :  { %v1075_v2 = vmul.f32 %v1073_v1, %v1053_v49 }
0x123a   :  { %v1077_v4 = vrot.slane %v1075_v2, 4 }
0x123c   :  { %1078 = vrot.lane.b32.xlu0 %v1077_v4, %s6456_s17 }
0x1244   :  { %821 = vrot.lane.b32.xlu0 %v819_v13, %s6456_s17 }
0x12ae   :  { %v1079_v15 = vpop.permute.xlu0 %1078 }
0x12af   :  { %5917 = vmatmul.msk.f32.vlgmr.msrb.gmra.mxu3 %vm228_vm6, %v1079_v15 }
0x12b6   :  { %v822_v60 = vpop.permute.xlu0 %821 }
0x12b7   :  { %v824_v24 = vadd.f32 %v822_v60, %v814_v23 }
0x1332   :  { %v1099_v16 = vpop.f32.mrf.mxu3 }
0x1333   :  { %v1103_v18 = vrot.slane %v1099_v16, 2 }
0x1335   :  { %v1105_v19 = vadd.f32 %v1103_v18, %v6823_v42 }
0x1337   :  { %6255 = vtanh.f32 %v1105_v19  ;;  %v5918_v29 = vmul.f32 -1.442695, %v1105_v19 }
0x1338   :  { %6257 = vtanh.f32 %v824_v24 }
0x1339   :  { %6259 = vpow2.f32 %v5918_v29 }
0x133d   :  { %v6256_v25 = vpop.eup %6255 }
0x133e   :  { %1131 = vrot.lane.b32.xlu2 %v6256_v25, %s6455_s0  ;;  %v6258_v26 = vpop.eup %6257 }
0x133f   :  { %v6260_v22 = vpop.eup %6259 }
0x1340   :  { %v1109_v42 = vadd.f32 1.0, %v6260_v22 }
0x1342   :  { %6261 = vrcp.f32 %v1109_v42  ;;  %v1121_v36 = vand.u32 2147483648, %v1109_v42  ;;  %vm1115_vm15 = vweird.f32 %v1109_v42  ;;  %v1119_v37 = vand.u32 2147483647, %v1109_v42 }
0x1344   :  { %v1122_v28 = vor.u32 1.1754944e-38, %v1121_v36  ;;  %vm1120_vm2 = vcmp.eq.f32.partialorder %v1119_v37, 8.507059e+37 }
0x1346   :  { %827 = vrot.lane.b32.xlu2 %v6258_v26, %s6455_s0 }
0x1348   :  { %v6262_v14 = vpop.eup %6261 }
0x1349   :  { %v1111_v31 = vmul.f32 %v6262_v14, %v1109_v42  ;;  %vm1116_vm14 = vweird.f32 %v6262_v14 }
0x134a   :  { %vm1117_vm1 = vmor %vm1115_vm15, %vm1116_vm14 }
0x134b   :  { %v1112_v33 = vsub.f32 1.0, %v1111_v31 }
0x134d   :  { %v1113_v34 = vmul.f32 %v6262_v14, %v1112_v33 }
0x134e   :  { %754 = vrot.lane.b32.xlu2 %v6862_v17, %s6456_s17 }
0x134f   :  { %v1114_v35 = vadd.f32 %v6262_v14, %v1113_v34 }
0x1351   :  { %v1118_v38 = vsel %vm1117_vm1, %v6262_v14, %v1114_v35 }
0x1352   :  { %v1123_v17 = vsel %vm1120_vm2, %v1122_v28, %v1118_v38 }
0x1353   :  { %v1129_v41 = vmul.f32 %v1127_v40, %v1123_v17 }
0x1398   :  { %v1132_v27 = vpop.permute.xlu2 %1131 }
0x1399   :  { %v1134_v30 = vmul.f32 %v1132_v27, %v1123_v17 }
0x139b   :  { %1136 = vrot.lane.b32.xlu1 %v1134_v30, %s6456_s17 }
0x13a0   :  { %v828_v39 = vpop.permute.xlu2 %827 }
0x13a1   :  { %v830_v46 = vmul.f32 %v828_v39, %v808_v12 }
0x13a3   :  { %676 = vrot.lane.b32.xlu1 %v6838_v20, %s6456_s17 }
0x13a8   :  { %v755_v32 = vpop.permute.xlu2 %754 }
0x13a9   :  { %757 = vst.msk [vmem:[#allocation2 + $0x8] sm:$0x30] %vm449_vm11, %v755_v32 }
0x140d   :  { %v1137_v43 = vpop.permute.xlu1 %1136 }
0x140e   :  { %v1139_v9 = vadd.f32 %v1137_v43, %v1129_v41 }
0x1410   :  { %6263 = vtanh.f32 %v1139_v9  ;;  %v1194_v7 = vrot.slane %v1139_v9, 6 }
0x1415   :  { %v677_v44 = vpop.permute.xlu1 %676 }
0x1416   :  { %v6264_v45 = vpop.eup %6263  ;;  %679 = vst.msk [vmem:[#allocation2 + $0x8] sm:$0xc] %vm370_vm10, %v677_v44 }
0x1417   :  { %1142 = vrot.lane.b32.xlu0 %v6264_v45, %s6455_s0 }
0x141f   :  { %832 = vrot.lane.b32.xlu0 %v830_v46, %s6456_s17 }
0x1489   :  { %v1143_v47 = vpop.permute.xlu0 %1142 }
0x148a   :  { %v1145_v20 = vmul.f32 %v1143_v47, %v1123_v17 }
0x148c   :  { %v1147_v48 = vrot.slane %v1145_v20, 6 }
0x148e   :  { %1148 = vrot.lane.b32.xlu1 %v1147_v48, %s6456_s17 }
0x1491   :  { %v833_v49 = vpop.permute.xlu0 %832 }
0x1492   :  { %835 = vst.msk [vmem:[#allocation2 + $0x8] sm:$0xc0] %vm528_vm12, %v833_v49 }
0x1499   :  { %v837_v50 = vld [vmem:[#allocation2 + $0x8] sm:$0xff] }
0x149a   :  { %5911 = vmatmul.msk.f32.gmra.mxu2 %vm228_vm6, %v837_v50 }
0x1500   :  { %v1149_v51 = vpop.permute.xlu1 %1148 }
0x1501   :  { %5919 = vmatmul.msk.f32.vlgmr.msrb.gmra.mxu0 %vm228_vm6, %v1149_v51 }
0x151d   :  { %v872_v52 = vpop.f32.mrf.mxu2 }
0x151e   :  { %v6904_v53 = vadd.f32 %v6820_v6, %v872_v52 }
0x157e   :  { %v1169_v54 = vpop.f32.mrf.mxu0 }
0x157f   :  { %v1172_v55 = vadd.f32 %v1169_v54, %v6904_v53 }
0x1581   :  { %6265 = vtanh.f32 %v1172_v55  ;;  %v5920_v59 = vmul.f32 -1.442695, %v1172_v55 }
0x1583   :  { %6267 = vpow2.f32 %v5920_v59 }
0x1587   :  { %v6266_v56 = vpop.eup %6265 }
0x1588   :  { %1198 = vrot.lane.b32.xlu2 %v6266_v56, %s6455_s0 }
0x1589   :  { %v6268_v57 = vpop.eup %6267 }
0x158a   :  { %v1176_v58 = vadd.f32 1.0, %v6268_v57 }
0x158c   :  { %6269 = vrcp.f32 %v1176_v58  ;;  %v1188_v6 = vand.u32 2147483648, %v1176_v58  ;;  %vm1182_vm11 = vweird.f32 %v1176_v58  ;;  %v1186_v2 = vand.u32 2147483647, %v1176_v58 }
0x158e   :  { %v1189_v4 = vor.u32 1.1754944e-38, %v1188_v6  ;;  %vm1187_vm4 = vcmp.eq.f32.partialorder %v1186_v2, 8.507059e+37 }
0x1592   :  { %v6270_v61 = vpop.eup %6269 }
0x1593   :  { %v1178_v62 = vmul.f32 %v6270_v61, %v1176_v58  ;;  %vm1183_vm10 = vweird.f32 %v6270_v61 }
0x1594   :  { %vm1184_vm3 = vmor %vm1182_vm11, %vm1183_vm10 }
0x1595   :  { %v1179_v63 = vsub.f32 1.0, %v1178_v62 }
0x1597   :  { %v1180_v0 = vmul.f32 %v6270_v61, %v1179_v63 }
0x1599   :  { %v1181_v1 = vadd.f32 %v6270_v61, %v1180_v0 }
0x159b   :  { %v1185_v3 = vsel %vm1184_vm3, %v6270_v61, %v1181_v1 }
0x159c   :  { %v1190_v8 = vsel %vm1187_vm4, %v1189_v4, %v1185_v3  ;;  %vm1578_vm4 = vcmask 15360  }
0x159d   :  { %v1196_v11 = vmul.f32 %v1194_v7, %v1190_v8  ;;  %v1509_v7 = vld [vmem:[%s6545_s6] sm:$0xff]  ;;  %s6464_s6 = smov 110  }
0x159e   :  { %1533 = vmatpush.msrb.mxu1 %v1509_v7 }
0x15e2   :  { %v1199_v5 = vpop.permute.xlu2 %1198 }
0x15e3   :  { %v1201_v10 = vmul.f32 %v1199_v5, %v1190_v8 }
0x15e5   :  { %1203 = vrot.lane.b32.xlu0 %v1201_v10, %s6456_s17 }
0x1657   :  { %v1204_v12 = vpop.permute.xlu0 %1203 }
0x1658   :  { %v1206_v13 = vadd.f32 %v1204_v12, %v1196_v11  ;;  %v1507_v11 = vld [vmem:[%s6485_s9] sm:$0xff] }
0x165a   :  { %6271 = vtanh.f32 %v1206_v13  ;;  %v1263_v17 = vrot.slane %v1206_v13, 6  ;;  %v1510_v13 = vld [vmem:[%s6550_s12] sm:$0xff] }
0x1660   :  { %v6272_v15 = vpop.eup %6271 }
0x1661   :  { %1209 = vrot.lane.b32.xlu1 %v6272_v15, %s6455_s0 }
0x16d3   :  { %v1210_v16 = vpop.permute.xlu1 %1209 }
0x16d4   :  { %v1212_v18 = vmul.f32 %v1210_v16, %v1190_v8  ;;  %v1541_v16 = vld [vmem:[%s6555_s20] sm:$0xff]  ;;  %s6467_s20 = smov 108  }
0x16d5   :  { %1567 = vmatpush.msra.mxu2 %v1541_v16 }
0x16d6   :  { %1214 = vrot.lane.b32.xlu2 %v1212_v18, %s6456_s17 }
0x1730   :  { %v1215_v19 = vpop.permute.xlu2 %1214 }
0x1731   :  { %5921 = vmatmul.msk.f32.vlgmr.msra.gmra.mxu1 %vm228_vm6, %v1215_v19 }
0x1739   :  { %5928 = vmatmul.msk.f32.vlgmr.msrb.gmra.mxu1 %vm194_vm0, %v1507_v11 }
0x17ae   :  { %v1235_v21 = vpop.f32.mrf.mxu1 }
0x17af   :  { %v1239_v60 = vrot.slane %v1235_v21, 6 }
0x17b1   :  { %v1241_v23 = vadd.f32 %v1239_v60, %v6904_v53 }
0x17b3   :  { %6273 = vtanh.f32 %v1241_v23  ;;  %v5922_v25 = vmul.f32 -1.442695, %v1241_v23 }
0x17b5   :  { %6275 = vpow2.f32 %v5922_v25 }
0x17b6   :  { %v1535_v15 = vpop.f32.mrf.mxu1 }
0x17b7   :  { %v6932_v18 = vadd.f32 %v1535_v15, %v1510_v13  ;;  %v1476_v13 = vld [vmem:[%s6535_s24 + $0x18] sm:$0xff]  ;;  %v1475_v15 = vld [vmem:[%s6535_s24 + $0x10] sm:$0xff] }
0x17b8   :  { %1499 = vmatpush.msra.mxu0 %v1476_v13 }
0x17b9   :  { %v6274_v24 = vpop.eup %6273 }
0x17ba   :  { %1267 = vrot.lane.b32.xlu0 %v6274_v24, %s6455_s0  ;;  %1500 = vmatpush.msra.mxu0 %v1475_v15 }
0x17bb   :  { %v6276_v26 = vpop.eup %6275 }
0x17bc   :  { %v1245_v29 = vadd.f32 1.0, %v6276_v26 }
0x17be   :  { %6277 = vrcp.f32 %v1245_v29  ;;  %v1257_v34 = vand.u32 2147483648, %v1245_v29  ;;  %vm1251_vm8 = vweird.f32 %v1245_v29  ;;  %v1255_v35 = vand.u32 2147483647, %v1245_v29 }
0x17c0   :  { %v1258_v37 = vor.u32 1.1754944e-38, %v1257_v34  ;;  %vm1256_vm5 = vcmp.eq.f32.partialorder %v1255_v35, 8.507059e+37 }
0x17c4   :  { %v6278_v22 = vpop.eup %6277 }
0x17c5   :  { %v1247_v42 = vmul.f32 %v6278_v22, %v1245_v29  ;;  %vm1252_vm7 = vweird.f32 %v6278_v22 }
0x17c6   :  { %vm1253_vm9 = vmor %vm1251_vm8, %vm1252_vm7 }
0x17c7   :  { %v1248_v14 = vsub.f32 1.0, %v1247_v42 }
0x17c9   :  { %v1249_v31 = vmul.f32 %v6278_v22, %v1248_v14 }
0x17cb   :  { %v1250_v33 = vadd.f32 %v6278_v22, %v1249_v31 }
0x17cd   :  { %v1254_v36 = vsel %vm1253_vm9, %v6278_v22, %v1250_v33 }
0x17ce   :  { %v1259_v28 = vsel %vm1256_vm5, %v1258_v37, %v1254_v36  ;;  %vm1738_vm5 = vcmask 1041408  }
0x17cf   :  { %v1265_v30 = vmul.f32 %v1263_v17, %v1259_v28 }
0x182c   :  { %v1268_v38 = vpop.permute.xlu0 %1267 }
0x182d   :  { %v1270_v27 = vmul.f32 %v1268_v38, %v1259_v28 }
0x182f   :  { %1272 = vrot.lane.b32.xlu1 %v1270_v27, %s6456_s17 }
0x18a1   :  { %v1273_v39 = vpop.permute.xlu1 %1272 }
0x18a2   :  { %v1275_v32 = vadd.f32 %v1273_v39, %v1265_v30  ;;  %v1508_v30 = vld [vmem:[%s6485_s9 + $0x8] sm:$0xff]  ;;  %s6462_s9 = smov 96  }
0x18a3   :  { %5929 = vmatmul.msk.f32.gmra.mxu1 %vm194_vm0, %v1508_v30 }
0x18a4   :  { %6279 = vtanh.f32 %v1275_v32  ;;  %v1333_v1 = vrot.slane %v1275_v32, 6 }
0x18aa   :  { %v6280_v40 = vpop.eup %6279 }
0x18ab   :  { %1278 = vrot.lane.b32.xlu2 %v6280_v40, %s6455_s0 }
0x1905   :  { %v1279_v41 = vpop.permute.xlu2 %1278 }
0x1906   :  { %v1281_v43 = vmul.f32 %v1279_v41, %v1259_v28  ;;  %v6150_v28 = vld [vmem:[%s6560_s27] ss:$0 sm:$0xff]  ;;  %s6468_s27 = smov 114  }
0x1908   :  { %v1283_v9 = vrot.slane %v1281_v43, 2 }
0x190a   :  { %1284 = vrot.lane.b32.xlu0 %v1283_v9, %s6456_s17 }
0x197c   :  { %v1285_v44 = vpop.permute.xlu0 %1284 }
0x197d   :  { %5923 = vmatmul.msk.f32.vlgmr.msrb.gmra.mxu2 %vm228_vm6, %v1285_v44 }
0x1985   :  { %5930 = vmatmul.msk.f32.vlgmr.msra.gmra.mxu2 %vm194_vm0, %v6932_v18 }
0x1a00   :  { %v1305_v45 = vpop.f32.mrf.mxu2 }
0x1a01   :  { %v1309_v46 = vrot.slane %v1305_v45, 4 }
0x1a03   :  { %v1311_v47 = vadd.f32 %v1309_v46, %v6904_v53 }
0x1a05   :  { %6281 = vtanh.f32 %v1311_v47  ;;  %v5924_v48 = vmul.f32 -1.442695, %v1311_v47 }
0x1a07   :  { %6283 = vpow2.f32 %v5924_v48 }
0x1a08   :  { %v1569_v27 = vpop.f32.mrf.mxu2 }
0x1a09   :  { %v6940_v17 = vadd.f32 %v6150_v28, %v1569_v27 }
0x1a0b   :  { %v6282_v20 = vpop.eup %6281 }
0x1a0c   :  { %1337 = vrot.lane.b32.xlu1 %v6282_v20, %s6455_s0 }
0x1a0d   :  { %v6284_v49 = vpop.eup %6283 }
0x1a0e   :  { %v1315_v50 = vadd.f32 1.0, %v6284_v49  ;;  %v1511_v49 = vld [vmem:[%s6550_s12 + $0x8] sm:$0xff]  ;;  %s8187_s12 = sld [smem:[#allocation7_spill]] }
0x1a10   :  { %6285 = vrcp.f32 %v1315_v50  ;;  %v1327_v59 = vand.u32 2147483648, %v1315_v50  ;;  %vm1321_vm14 = vweird.f32 %v1315_v50  ;;  %v1325_v57 = vand.u32 2147483647, %v1315_v50 }
0x1a12   :  { %v1328_v61 = vor.u32 1.1754944e-38, %v1327_v59  ;;  %vm1326_vm1 = vcmp.eq.f32.partialorder %v1325_v57, 8.507059e+37 }
0x1a16   :  { %v6286_v51 = vpop.eup %6285 }
0x1a17   :  { %v1317_v52 = vmul.f32 %v6286_v51, %v1315_v50  ;;  %vm1322_vm13 = vweird.f32 %v6286_v51  ;;  %v1538_v50 = vpop.f32.mrf.mxu1 }
0x1a18   :  { %vm1323_vm15 = vmor %vm1321_vm14, %vm1322_vm13 }
0x1a19   :  { %v1318_v54 = vsub.f32 1.0, %v1317_v52 }
0x1a1b   :  { %v1319_v55 = vmul.f32 %v6286_v51, %v1318_v54 }
0x1a1d   :  { %v1320_v56 = vadd.f32 %v6286_v51, %v1319_v55 }
0x1a1f   :  { %v1324_v58 = vsel %vm1323_vm15, %v6286_v51, %v1320_v56  ;;  %v6965_v51 = vadd.f32 %v1538_v50, %v1511_v49 }
0x1a20   :  { %v1329_v63 = vsel %vm1326_vm1, %v1328_v61, %v1324_v58 }
0x1a21   :  { %v1335_v6 = vmul.f32 %v1333_v1, %v1329_v63  ;;  %5931 = vmatmul.msk.f32.gmra.mxu2 %vm194_vm0, %v6965_v51 }
0x1a7e   :  { %v1338_v62 = vpop.permute.xlu1 %1337 }
0x1a7f   :  { %v1340_v0 = vmul.f32 %v1338_v62, %v1329_v63 }
0x1a81   :  { %1342 = vrot.lane.b32.xlu2 %v1340_v0, %s6456_s17 }
0x1aa4   :  { %v1572_v0 = vpop.f32.mrf.mxu2 }
0x1aa5   :  { %v6978_v1 = vadd.f32 %v6150_v28, %v1572_v0 }
0x1adb   :  { %v1343_v2 = vpop.permute.xlu2 %1342 }
0x1adc   :  { %v6921_v3 = vadd.f32 %v1343_v2, %v1335_v6  ;;  %v6466_v6 = vmov 32.0  }
0x1ade   :  { %6287 = vtanh.f32 %v6921_v3  ;;  %v1403_v39 = vrot.slane %v6921_v3, 6 }
0x1ae4   :  { %v6288_v4 = vpop.eup %6287 }
0x1ae5   :  { %1348 = vrot.lane.b32.xlu0 %v6288_v4, %s6455_s0 }
0x1b57   :  { %v1349_v5 = vpop.permute.xlu0 %1348 }
0x1b58   :  { %v1351_v8 = vmul.f32 %v1349_v5, %v1329_v63  ;;  %v6151_v63 = vld [vmem:[%s6530_s19] ss:$0 sm:$0xff]  ;;  %s6465_s19 = smov 122  }
0x1b5a   :  { %v1353_v10 = vrot.slane %v1351_v8, 4 }
0x1b5c   :  { %1354 = vrot.lane.b32.xlu1 %v1353_v10, %s6456_s17 }
0x1b64   :  { %1576 = vrot.lane.b32.xlu1 %v6940_v17, %s6457_s5 }
0x1b6c   :  { %1655 = vrot.lane.b32.xlu1 %v6940_v17, %s6459_s25 }
0x1bce   :  { %v1355_v12 = vpop.permute.xlu1 %1354 }
0x1bcf   :  { %5925 = vmatmul.msk.f32.vlgmr.msra.gmra.mxu3 %vm228_vm6, %v1355_v12 }
0x1bd6   :  { %v1577_v9 = vpop.permute.xlu1 %1576 }
0x1bd7   :  { %5932 = vmatpush.xpose.msk.msrb.mxu3 %vm1578_vm4, %v1577_v9 }
0x1bda   :  { %5933 = vmatmul.msk.f32.vlgmr.msrb.gmra.mxu3 %vm1578_vm4, %v6940_v17 }
0x1bde   :  { %v1656_v45 = vpop.permute.xlu1 %1655 }
0x1c52   :  { %v1375_v19 = vpop.f32.mrf.mxu3 }
0x1c53   :  { %v1379_v21 = vrot.slane %v1375_v19, 2  ;;  %v1474_v19 = vld [vmem:[%s6535_s24 + $0x8] sm:$0xff] }
0x1c54   :  { %1501 = vmatpush.msra.mxu0 %v1474_v19 }
0x1c55   :  { %v1381_v60 = vadd.f32 %v1379_v21, %v6904_v53  ;;  %v1473_v21 = vld [vmem:[%s6535_s24] sm:$0xff]  ;;  %s8188_s24 = sld [smem:[#allocation9_spill]] }
0x1c56   :  { %1502 = vmatpush.msra.mxu0 %v1473_v21 }
0x1c57   :  { %6289 = vtanh.f32 %v1381_v60  ;;  %v5926_v24 = vmul.f32 -1.442695, %v1381_v60 }
0x1c59   :  { %6291 = vpow2.f32 %v5926_v24 }
0x1c5d   :  { %v6290_v23 = vpop.eup %6289  ;;  %v1600_v52 = vpop.f32.mrf.mxu3 }
0x1c5e   :  { %1407 = vrot.lane.b32.xlu2 %v6290_v23, %s6455_s0 }
0x1c5f   :  { %v6292_v25 = vpop.eup %6291 }
0x1c60   :  { %v1385_v26 = vadd.f32 1.0, %v6292_v25  ;;  %v1603_v25 = vmul.f32 0.70710677, %v1600_v52 }
0x1c62   :  { %6293 = vrcp.f32 %v1385_v26  ;;  %v1397_v33 = vand.u32 2147483648, %v1385_v26  ;;  %vm1391_vm10 = vweird.f32 %v1385_v26  ;;  %v1395_v34 = vand.u32 2147483647, %v1385_v26 }
0x1c64   :  { %v1398_v35 = vor.u32 1.1754944e-38, %v1397_v33  ;;  %vm1396_vm3 = vcmp.eq.f32.partialorder %v1395_v34, 8.507059e+37 }
0x1c68   :  { %v6294_v29 = vpop.eup %6293 }
0x1c69   :  { %v1387_v22 = vmul.f32 %v6294_v29, %v1385_v26  ;;  %vm1392_vm2 = vweird.f32 %v6294_v29 }
0x1c6a   :  { %vm1393_vm11 = vmor %vm1391_vm10, %vm1392_vm2 }
0x1c6b   :  { %v1388_v42 = vsub.f32 1.0, %v1387_v22 }
0x1c6d   :  { %v1389_v14 = vmul.f32 %v6294_v29, %v1388_v42 }
0x1c6f   :  { %v1390_v31 = vadd.f32 %v6294_v29, %v1389_v14  ;;  %v6152_v14 = vld [vmem:[%s8187_s12] ss:$0 sm:$0xff]  ;;  %s8211_s12 = sld [smem:[#allocation6_spill]] }
0x1c71   :  { %v1394_v53 = vsel %vm1393_vm11, %v6294_v29, %v1390_v31  ;;  %v1604_v29 = vsel %vm194_vm0, %v1603_v25, -inf }
0x1c72   :  { %v1399_v37 = vsel %vm1396_vm3, %v1398_v35, %v1394_v53 }
0x1c73   :  { %v1405_v32 = vmul.f32 %v1403_v39, %v1399_v37 }
0x1cb8   :  { %v1408_v36 = vpop.permute.xlu2 %1407 }
0x1cb9   :  { %v1410_v38 = vmul.f32 %v1408_v36, %v1399_v37 }
0x1cbb   :  { %1412 = vrot.lane.b32.xlu0 %v1410_v38, %s6456_s17 }
0x1cc3   :  { %1657 = vrot.lane.b32.xlu0 %v6940_v17, %s6458_s21 }
0x1ccb   :  { %1788 = vrot.lane.b32.xlu0 %v6940_v17, %s6460_s29 }
0x1d2d   :  { %v1413_v40 = vpop.permute.xlu0 %1412 }
0x1d2e   :  { %v1415_v41 = vadd.f32 %v1413_v40, %v1405_v32 }
0x1d30   :  { %6295 = vtanh.f32 %v1415_v41 }
0x1d31   :  { %6297 = vrcp.f32 %v6466_v6 }
0x1d35   :  { %v1658_v44 = vpop.permute.xlu0 %1657 }
0x1d36   :  { %v6296_v43 = vpop.eup %6295  ;;  %5935 = vmatpush.xpose.msk.msra.mxu3 %vm1578_vm4, %v1658_v44 }
0x1d37   :  { %1418 = vrot.lane.b32.xlu2 %v6296_v43, %s6455_s0  ;;  %v6298_v2 = vpop.eup %6297  ;;  %s8200_s0 = sld [smem:[#allocation21_spill]] }
0x1d38   :  { %v1432_v3 = vmul.f32 32.0, %v6298_v2  ;;  %vm1436_vm7 = vweird.f32 %v6298_v2 }
0x1d39   :  { %5936 = vmatmul.msk.f32.vlgmr.msra.gmra.mxu3 %vm1578_vm4, %v1656_v45 }
0x1d3a   :  { %v1433_v4 = vsub.f32 1.0, %v1432_v3 }
0x1d3c   :  { %v1434_v5 = vmul.f32 %v6298_v2, %v1433_v4 }
0x1d3d   :  { %v1789_v48 = vpop.permute.xlu0 %1788 }
0x1d3e   :  { %v1435_v8 = vadd.f32 %v6298_v2, %v1434_v5 }
0x1d3f   :  { %1790 = vrot.lane.b32.xlu2 %v6940_v17, %s6461_s3 }
0x1d40   :  { %v1437_v10 = vsel %vm1436_vm7, %v6298_v2, %v1435_v8 }
0x1d91   :  { %v1419_v46 = vpop.permute.xlu2 %1418 }
0x1d92   :  { %v1421_v47 = vmul.f32 %v1419_v46, %v1399_v37 }
0x1d94   :  { %1425 = vrot.lane.b32.xlu1 %v1421_v47, %s6456_s17 }
0x1d99   :  { %v1791_v20 = vpop.permute.xlu2 %1790 }
0x1d9a   :  { %5942 = vmatpush.xpose.msk.msrb.mxu3 %vm1578_vm4, %v1791_v20 }
0x1d9d   :  { %5943 = vmatmul.msk.f32.vlgmr.msrb.gmra.mxu3 %vm1578_vm4, %v1789_v48 }
0x1dbc   :  { %v1680_v55 = vpop.f32.mrf.mxu3 }
0x1dbd   :  { %v1683_v59 = vmul.f32 0.70710677, %v1680_v55 }
0x1dbf   :  { %v1684_v57 = vsel %vm194_vm0, %v1683_v59, -inf }
0x1e06   :  { %v1426_v54 = vpop.permute.xlu1 %1425 }
0x1e07   :  { %v1428_v56 = vsel %vm528_vm12, %v1426_v54, 0.0 }
0x1e08   :  { %1429 = vadd.xlane.f32.xlu2 %v1428_v56 }
0x1e10   :  { %1685 = vmax.xlane.f32.xlu2 %v1684_v57 }
0x1e20   :  { %v1813_v58 = vpop.f32.mrf.mxu3 }
0x1e21   :  { %v1816_v61 = vmul.f32 0.70710677, %v1813_v58 }
0x1e23   :  { %v1817_v62 = vsel %vm194_vm0, %v1816_v61, -inf }
0x1e24   :  { %1818 = vmax.xlane.f32.xlu2 %v1817_v62 }
0x1e3c   :  { %1469 = vrot.lane.b32.xlu2 %v6151_v63, %s6462_s9 }
0x1e44   :  { %1628 = vrot.lane.b32.xlu2 %v6940_v17, %s6463_s8 }
0x1e4c   :  { %1708 = vrot.lane.b32.xlu2 %v6940_v17, %s6464_s6 }
0x1e54   :  { %2008 = vrot.lane.b32.xlu2 %v6978_v1, %s6457_s5 }
0x1e5c   :  { %1895 = vrot.lane.b32.xlu2 %v6940_v17, %s6465_s19 }
0x1e7b   :  { %v1430_v7 = vpop.xlane.xlu2 %1429 }
0x1e7c   :  { %v1438_v11 = vmul.f32 %v1437_v10, %v1430_v7 }
0x1e7e   :  { %v1439_v12 = vsub.f32 %v1421_v47, %v1438_v11 }
0x1e80   :  { %v1440_v16 = vmul.f32 %v1439_v12, %v1439_v12 }
0x1e82   :  { %1442 = vrot.lane.b32.xlu0 %v1440_v16, %s6456_s17 }
0x1e83   :  { %v1686_v60 = vpop.xlane.xlu2 %1685 }
0x1e84   :  { %v1687_v34 = vsub.f32 %v1683_v59, %v1686_v60  ;;  %v7013_v59 = vld [vmem:[%s8188_s24] sm:$0x3] }
0x1e85   :  { %5940 = vmatpush.msk.msrb.mxu2 %vm1738_vm5, %v7013_v59 }
0x1e86   :  { %v1688_v35 = vmul.f32 1.442695, %v1687_v34 }
0x1e97   :  { %v1819_v23 = vpop.xlane.xlu2 %1818 }
0x1e98   :  { %v1820_v36 = vsub.f32 %v1816_v61, %v1819_v23 }
0x1e9a   :  { %v1821_v38 = vmul.f32 1.442695, %v1820_v36 }
0x1e9f   :  { %v1470_v24 = vpop.permute.xlu2 %1469 }
0x1ea7   :  { %v1629_v26 = vpop.permute.xlu2 %1628 }
0x1ea8   :  { %1649 = vmatpush.msrb.mxu0 %v1629_v26 }
0x1eac   :  { %1605 = vmax.xlane.f32.xlu0 %v1604_v29 }
0x1eaf   :  { %v1709_v11 = vpop.permute.xlu2 %1708 }
0x1ef4   :  { %v1443_v22 = vpop.permute.xlu0 %1442 }
0x1ef5   :  { %v1445_v42 = vsel %vm528_vm12, %v1443_v22, 0.0 }
0x1ef6   :  { %1446 = vadd.xlane.f32.xlu1 %v1445_v42 }
0x1f0f   :  { %1463 = vrot.lane.b32.xlu1 %v6152_v14, %s6462_s9  ;;  %s8207_s9 = sld [smem:[#allocation33_spill]] }
0x1f1f   :  { %v1606_v31 = vpop.xlane.xlu0 %1605 }
0x1f20   :  { %v1607_v33 = vsub.f32 %v1603_v25, %v1606_v31 }
0x1f22   :  { %v1608_v53 = vmul.f32 1.442695, %v1607_v33 }
0x1f24   :  { %6299 = vpow2.f32 %v1608_v53 }
0x1f25   :  { %6301 = vpow2.f32 %v1688_v35 }
0x1f26   :  { %6303 = vpow2.f32 %v1821_v38 }
0x1f2a   :  { %v6993_v37 = vpop.eup %6299 }
0x1f2b   :  { %v1610_v28 = vsel %vm194_vm0, %v6993_v37, 0.0  ;;  %v6997_v27 = vpop.eup %6301 }
0x1f2c   :  { %1611 = vadd.xlane.f32.xlu0 %v1610_v28  ;;  %v1690_v30 = vsel %vm194_vm0, %v6997_v27, 0.0  ;;  %v7001_v39 = vpop.eup %6303 }
0x1f2d   :  { %v1823_v32 = vsel %vm194_vm0, %v7001_v39, 0.0 }
0x1f34   :  { %1691 = vadd.xlane.f32.xlu0 %v1690_v30  ;;  %v1734_v30 = vld [vmem:[%s8188_s24 + $0x2] sm:$0x3] }
0x1f35   :  { %5938 = vmatpush.msk.msra.mxu1 %vm1738_vm5, %v1734_v30 }
0x1f39   :  { %1824 = vadd.xlane.f32.xlu1 %v1823_v32  ;;  %v1867_v32 = vld [vmem:[%s8188_s24 + $0x4] sm:$0x3] }
0x1f3a   :  { %5945 = vmatpush.msk.msrb.mxu1 %vm1738_vm5, %v1867_v32 }
0x1f52   :  { %2059 = vrot.lane.b32.xlu1 %v6978_v1, %s6463_s8 }
0x1f69   :  { %v1447_v40 = vpop.xlane.xlu1 %1446 }
0x1f6a   :  { %v1448_v41 = vmul.f32 %v1447_v40, %v1437_v10  ;;  %v2009_v40 = vpop.permute.xlu2 %2008 }
0x1f6c   :  { %v1449_v43 = vadd.f32 1e-05, %v1448_v41 }
0x1f6e   :  { %6305 = vrsqrt.f32 %v1449_v43  ;;  %vm1456_vm8 = vweird.f32 %v1449_v43 }
0x1f74   :  { %v6306_v9 = vpop.eup %6305 }
0x1f75   :  { %v1451_v44 = vmul.f32 %v6306_v9, %v1449_v43  ;;  %vm1457_vm12 = vweird.f32 %v6306_v9 }
0x1f76   :  { %vm1458_vm9 = vmor %vm1456_vm8, %vm1457_vm12 }
0x1f77   :  { %v1452_v45 = vmul.f32 %v6306_v9, %v1451_v44 }
0x1f79   :  { %v1453_v46 = vmul.f32 0.5, %v1452_v45 }
0x1f7b   :  { %v1454_v47 = vsub.f32 1.5, %v1453_v46 }
0x1f7d   :  { %v1455_v20 = vmul.f32 %v6306_v9, %v1454_v47 }
0x1f7f   :  { %v1459_v48 = vsel %vm1458_vm9, %v6306_v9, %v1455_v20  ;;  %v1896_v9 = vpop.permute.xlu2 %1895 }
0x1f80   :  { %v1460_v49 = vmul.f32 %v1459_v48, %v1439_v12 }
0x1f81   :  { %v1464_v50 = vpop.permute.xlu1 %1463 }
0x1f82   :  { %v1466_v52 = vmul.f32 %v1464_v50, %v1460_v49 }
0x1f84   :  { %v1472_v54 = vadd.f32 %v1470_v24, %v1466_v52 }
0x1f86   :  { %v1482_v55 = vrot.slane %v1472_v54, 6 }
0x1f88   :  { %1483 = vrot.lane.b32.xlu0 %v1482_v55, %s6456_s17  ;;  %s8201_s17 = sld [smem:[#allocation22_spill]] }
0x1f90   :  { %1841 = vrot.lane.b32.xlu0 %v6940_v17, %s6467_s20 }
0x1f98   :  { %1897 = vrot.lane.b32.xlu0 %v6940_v17, %s6468_s27 }
0x1f9f   :  { %v1612_v56 = vpop.xlane.xlu0 %1611 }
0x1fa0   :  { %6307 = vrcp.f32 %v1612_v56  ;;  %v1624_v8 = vand.u32 2147483648, %v1612_v56  ;;  %vm1618_vm14 = vweird.f32 %v1612_v56  ;;  %v1622_v10 = vand.u32 2147483647, %v1612_v56 }
0x1fa2   :  { %v1625_v16 = vor.u32 1.1754944e-38, %v1624_v8  ;;  %vm1623_vm1 = vcmp.eq.f32.partialorder %v1622_v10, 8.507059e+37 }
0x1fa6   :  { %v6308_v58 = vpop.eup %6307 }
0x1fa7   :  { %v1692_v57 = vpop.xlane.xlu0 %1691  ;;  %v1614_v61 = vmul.f32 %v6308_v58, %v1612_v56  ;;  %vm1619_vm13 = vweird.f32 %v6308_v58 }
0x1fa8   :  { %6309 = vrcp.f32 %v1692_v57  ;;  %vm1620_vm15 = vmor %vm1618_vm14, %vm1619_vm13  ;;  %v1704_v23 = vand.u32 2147483648, %v1692_v57  ;;  %vm1698_vm10 = vweird.f32 %v1692_v57  ;;  %v1702_v24 = vand.u32 2147483647, %v1692_v57 }
0x1fa9   :  { %v1615_v62 = vsub.f32 1.0, %v1614_v61 }
0x1faa   :  { %v1705_v42 = vor.u32 1.1754944e-38, %v1704_v23 }
0x1fab   :  { %v1616_v6 = vmul.f32 %v6308_v58, %v1615_v62 }
0x1fac   :  { %v1825_v63 = vpop.xlane.xlu1 %1824 }
0x1fad   :  { %6311 = vrcp.f32 %v1825_v63  ;;  %v1617_v3 = vadd.f32 %v6308_v58, %v1616_v6  ;;  %v1837_v33 = vand.u32 2147483648, %v1825_v63  ;;  %vm1831_vm7 = vweird.f32 %v1825_v63 }
0x1fae   :  { %v6310_v0 = vpop.eup %6309  ;;  %v1835_v34 = vand.u32 2147483647, %v1825_v63 }
0x1faf   :  { %v1694_v2 = vmul.f32 %v6310_v0, %v1692_v57  ;;  %v1621_v12 = vsel %vm1620_vm15, %v6308_v58, %v1617_v3  ;;  %vm1699_vm2 = vweird.f32 %v6310_v0 }
0x1fb0   :  { %v1626_v19 = vsel %vm1623_vm1, %v1625_v16, %v1621_v12  ;;  %vm1700_vm11 = vmor %vm1698_vm10, %vm1699_vm2  ;;  %vm1836_vm8 = vcmp.eq.f32.partialorder %v1835_v34, 8.507059e+37 }
0x1fb1   :  { %v1695_v4 = vsub.f32 1.0, %v1694_v2  ;;  %v1627_v25 = vmul.f32 %v6993_v37, %v1626_v19  ;;  %v1838_v37 = vor.u32 1.1754944e-38, %v1837_v33 }
0x1fb3   :  { %v6312_v5 = vpop.eup %6311  ;;  %v1696_v13 = vmul.f32 %v6310_v0, %v1695_v4 }
0x1fb4   :  { %v1827_v15 = vmul.f32 %v6312_v5, %v1825_v63  ;;  %vm1832_vm3 = vweird.f32 %v6312_v5 }
0x1fb5   :  { %v1697_v21 = vadd.f32 %v6310_v0, %v1696_v13  ;;  %vm1833_vm12 = vmor %vm1831_vm7, %vm1832_vm3 }
0x1fb6   :  { %v1828_v60 = vsub.f32 1.0, %v1827_v15 }
0x1fb7   :  { %v1701_v29 = vsel %vm1700_vm11, %v6310_v0, %v1697_v21 }
0x1fb8   :  { %v1829_v22 = vmul.f32 %v6312_v5, %v1828_v60 }
0x1fba   :  { %v1830_v31 = vadd.f32 %v6312_v5, %v1829_v22 }
0x1fbc   :  { %v1834_v36 = vsel %vm1833_vm12, %v6312_v5, %v1830_v31 }
0x1fbd   :  { %v1839_v38 = vsel %vm1836_vm8, %v1838_v37, %v1834_v36  ;;  %v7074_v37 = vld [vmem:[%s8188_s24 + $0x6] sm:$0x3]  ;;  %s8212_s24 = sld [smem:[#allocation29_spill]] }
0x1fbe   :  { %v1840_v28 = vmul.f32 %v7001_v39, %v1839_v38 }
0x1fc4   :  { %v2060_v41 = vpop.permute.xlu1 %2059 }
0x1ffa   :  { %v1484_v7 = vpop.permute.xlu0 %1483 }
0x1ffb   :  { %5927 = vmatmul.msk.f32.vlgmr.msra.gmra.mxu0 %vm228_vm6, %v1484_v7  ;;  %vm1703_vm6 = vcmp.eq.f32.partialorder %v1702_v24, 8.507059e+37 }
0x1ffc   :  { %1729 = vmatpush.msra.mxu0 %v1709_v11  ;;  %v1706_v14 = vsel %vm1703_vm6, %v1705_v42, %v1701_v29 }
0x1ffd   :  { %v1707_v53 = vmul.f32 %v6997_v27, %v1706_v14 }
0x2002   :  { %v1842_v26 = vpop.permute.xlu0 %1841 }
0x2003   :  { %5934 = vmatmul.msk.f32.vlgmr.msrb.gmra.mxu0 %vm194_vm0, %v1627_v25 }
0x2004   :  { %1862 = vmatpush.msrb.mxu0 %v1842_v26 }
0x200a   :  { %v1898_v35 = vpop.permute.xlu0 %1897 }
0x200b   :  { %5937 = vmatmul.msk.f32.vlgmr.msra.gmra.mxu0 %vm194_vm0, %v1707_v53  ;;  %5947 = vmatpush.xpose.msk.msra.mxu2 %vm1578_vm4, %v1898_v35 }
0x200c   :  { %5950 = vmatpush.msk.msra.mxu0 %vm1738_vm5, %v7074_v37 }
0x2013   :  { %5944 = vmatmul.msk.f32.vlgmr.msrb.gmra.mxu0 %vm194_vm0, %v1840_v28 }
0x2078   :  { %v7029_v27 = vpop.f32.mrf.mxu0 }
0x2080   :  { %v1651_v43 = vpop.f32.mrf.mxu0 }
0x2081   :  { %5941 = vmatmul.msk.f32.vlgmr.msrb.gmra.mxu2 %vm1578_vm4, %v1651_v43 }
0x2082   :  { %2080 = vmatpush.msrb.mxu2 %v2060_v41 }
0x2088   :  { %v1731_v44 = vpop.f32.mrf.mxu0 }
0x2089   :  { %5939 = vmatmul.msk.f32.vlgmr.msra.gmra.mxu1 %vm1578_vm4, %v1731_v44  ;;  %5948 = vmatmul.msk.f32.vlgmr.msra.gmra.mxu2 %vm1578_vm4, %v1896_v9 }
0x208a   :  { %5952 = vmatpush.xpose.msk.msra.mxu1 %vm1578_vm4, %v2009_v40  ;;  %5960 = vmatpush.msk.msra.mxu2 %vm1738_vm5, %v7013_v59 }
0x2090   :  { %v1864_v39 = vpop.f32.mrf.mxu0 }
0x2091   :  { %5946 = vmatmul.msk.f32.vlgmr.msrb.gmra.mxu1 %vm1578_vm4, %v1864_v39 }
0x2092   :  { %5958 = vmatpush.msk.msrb.mxu1 %vm1738_vm5, %v1734_v30 }
0x2099   :  { %5953 = vmatmul.msk.f32.vlgmr.msra.gmra.mxu1 %vm1578_vm4, %v6978_v1 }
0x209a   :  { %5965 = vmatpush.msk.msra.mxu1 %vm1738_vm5, %v1867_v32 }
0x2104   :  { %v7042_v45 = vpop.f32.mrf.mxu2 }
0x2106   :  { %v7044_v46 = vpop.f32.mrf.mxu1 }
0x210c   :  { %v1920_v47 = vpop.f32.mrf.mxu2 }
0x210d   :  { %v1923_v20 = vmul.f32 0.70710677, %v1920_v47 }
0x210e   :  { %v7046_v48 = vpop.f32.mrf.mxu1 }
0x210f   :  { %v1924_v49 = vsel %vm194_vm0, %v1923_v20, -inf }
0x2110   :  { %1925 = vmax.xlane.f32.xlu1 %v1924_v49 }
0x2116   :  { %v2031_v50 = vpop.f32.mrf.mxu1 }
0x2117   :  { %v2034_v52 = vmul.f32 0.70710677, %v2031_v50 }
0x2119   :  { %v2035_v54 = vsel %vm194_vm0, %v2034_v52, -inf }
0x211a   :  { %2036 = vmax.xlane.f32.xlu0 %v2035_v54 }
0x2129   :  { %2313 = vrot.lane.b32.xlu1 %v6978_v1, %s6465_s19 }
0x2183   :  { %v1926_v55 = vpop.xlane.xlu1 %1925 }
0x2184   :  { %v1927_v56 = vsub.f32 %v1923_v20, %v1926_v55 }
0x2186   :  { %v1928_v59 = vmul.f32 1.442695, %v1927_v56 }
0x2188   :  { %6313 = vpow2.f32 %v1928_v59 }
0x218d   :  { %v2037_v57 = vpop.xlane.xlu0 %2036 }
0x218e   :  { %v6314_v58 = vpop.eup %6313  ;;  %v2038_v61 = vsub.f32 %v2034_v52, %v2037_v57 }
0x218f   :  { %v1930_v62 = vsel %vm194_vm0, %v6314_v58, 0.0 }
0x2190   :  { %v2039_v63 = vmul.f32 1.442695, %v2038_v61  ;;  %1931 = vadd.xlane.f32.xlu0 %v1930_v62 }
0x2192   :  { %6315 = vpow2.f32 %v2039_v63 }
0x2198   :  { %v6316_v0 = vpop.eup %6315 }
0x2199   :  { %v2041_v6 = vsel %vm194_vm0, %v6316_v0, 0.0 }
0x219a   :  { %2042 = vadd.xlane.f32.xlu2 %v2041_v6 }
0x219b   :  { %v2314_v41 = vpop.permute.xlu1 %2313 }
0x21a4   :  { %2087 = vrot.lane.b32.xlu0 %v6978_v1, %s6458_s21 }
0x21ac   :  { %2315 = vrot.lane.b32.xlu0 %v6978_v1, %s6468_s27 }
0x21b2   :  { %1948 = vrot.lane.b32.xlu2 %v6940_v17, %s6469_s7 }
0x21b4   :  { %2210 = vrot.lane.b32.xlu0 %v6978_v1, %s6460_s29 }
0x21ba   :  { %2085 = vrot.lane.b32.xlu2 %v6978_v1, %s6459_s25 }
0x21c2   :  { %2212 = vrot.lane.b32.xlu2 %v6978_v1, %s6461_s3 }
0x2203   :  { %v1932_v2 = vpop.xlane.xlu0 %1931 }
0x2204   :  { %6317 = vrcp.f32 %v1932_v2  ;;  %v1944_v10 = vand.u32 2147483648, %v1932_v2  ;;  %v1942_v17 = vand.u32 2147483647, %v1932_v2  ;;  %vm1938_vm13 = vweird.f32 %v1932_v2 }
0x2206   :  { %v1945_v12 = vor.u32 1.1754944e-38, %v1944_v10  ;;  %vm1943_vm15 = vcmp.eq.f32.partialorder %v1942_v17, 8.507059e+37  ;;  %v7105_v17 = vld [vmem:[%s8189_s10] ss:$0 sm:$0xff]  ;;  %s5839_s10 = sshll.u32 %s6705_s4, 4  ;;  %s5840_s10 = int_to_ptr.hbm [resolvable:$true] %s5839_s10 }
0x220a   :  { %v6318_v3 = vpop.eup %6317 }
0x220b   :  { %v1934_v4 = vmul.f32 %v6318_v3, %v1932_v2  ;;  %vm1939_vm9 = vweird.f32 %v6318_v3 }
0x220c   :  { %vm1940_vm14 = vmor %vm1938_vm13, %vm1939_vm9 }
0x220d   :  { %v1935_v5 = vsub.f32 1.0, %v1934_v4  ;;  %v2043_v8 = vpop.xlane.xlu2 %2042 }
0x220e   :  { %6319 = vrcp.f32 %v2043_v8  ;;  %v2055_v25 = vand.u32 2147483648, %v2043_v8  ;;  %v2053_v29 = vand.u32 2147483647, %v2043_v8  ;;  %vm2049_vm2 = vweird.f32 %v2043_v8 }
0x220f   :  { %v1936_v7 = vmul.f32 %v6318_v3, %v1935_v5  ;;  %v1786_v5 = vadd.f32 %v7042_v45, %v7044_v46 }
0x2210   :  { %v2056_v42 = vor.u32 1.1754944e-38, %v2055_v25  ;;  %vm2054_vm11 = vcmp.eq.f32.partialorder %v2053_v29, 8.507059e+37 }
0x2211   :  { %v1937_v11 = vadd.f32 %v6318_v3, %v1936_v7  ;;  %v1894_v10 = vadd.f32 %v7046_v48, %v1786_v5  ;;  %v2482_v5 = vld [vmem:[%s8190_s11] sm:$0xff] }
0x2213   :  { %v1941_v13 = vsel %vm1940_vm14, %v6318_v3, %v1937_v11 }
0x2214   :  { %v6320_v15 = vpop.eup %6319  ;;  %v1946_v16 = vsel %vm1943_vm15, %v1945_v12, %v1941_v13 }
0x2215   :  { %v2045_v19 = vmul.f32 %v6320_v15, %v2043_v8  ;;  %v1949_v21 = vpop.permute.xlu2 %1948  ;;  %v1947_v60 = vmul.f32 %v6314_v58, %v1946_v16  ;;  %vm2050_vm1 = vweird.f32 %v6320_v15 }
0x2216   :  { %v2088_v23 = vpop.permute.xlu0 %2087  ;;  %1969 = vmatpush.msra.mxu3 %v1949_v21  ;;  %vm2051_vm10 = vmor %vm2049_vm2, %vm2050_vm1 }
0x2217   :  { %v2046_v24 = vsub.f32 1.0, %v2045_v19  ;;  %5949 = vmatmul.msk.f32.vlgmr.msra.gmra.mxu3 %vm194_vm0, %v1947_v60 }
0x2218   :  { %5955 = vmatpush.xpose.msk.msrb.mxu3 %vm1578_vm4, %v2088_v23 }
0x2219   :  { %v2047_v26 = vmul.f32 %v6320_v15, %v2046_v24 }
0x221b   :  { %v2048_v22 = vadd.f32 %v6320_v15, %v2047_v26 }
0x221d   :  { %v2052_v14 = vsel %vm2051_vm10, %v6320_v15, %v2048_v22  ;;  %v2086_v31 = vpop.permute.xlu2 %2085 }
0x221e   :  { %v2057_v33 = vsel %vm2054_vm11, %v2056_v42, %v2052_v14  ;;  %v2316_v34 = vpop.permute.xlu0 %2315 }
0x221f   :  { %5956 = vmatmul.msk.f32.vlgmr.msrb.gmra.mxu3 %vm1578_vm4, %v2086_v31  ;;  %v2058_v53 = vmul.f32 %v6316_v0, %v2057_v33 }
0x2221   :  { %5954 = vmatmul.msk.f32.vlgmr.msrb.gmra.mxu2 %vm194_vm0, %v2058_v53 }
0x2222   :  { %5967 = vmatpush.xpose.msk.msrb.mxu2 %vm1578_vm4, %v2316_v34 }
0x2225   :  { %v2213_v35 = vpop.permute.xlu2 %2212 }
0x2226   :  { %5962 = vmatpush.xpose.msk.msra.mxu3 %vm1578_vm4, %v2213_v35  ;;  %v2211_v36 = vpop.permute.xlu0 %2210 }
0x2229   :  { %5963 = vmatmul.msk.f32.vlgmr.msra.gmra.mxu3 %vm1578_vm4, %v2211_v36 }
0x229a   :  { %v1971_v38 = vpop.f32.mrf.mxu3 }
0x229b   :  { %5951 = vmatmul.msk.f32.vlgmr.msra.gmra.mxu0 %vm1578_vm4, %v1971_v38 }
0x22a2   :  { %v2110_v28 = vpop.f32.mrf.mxu3 }
0x22a3   :  { %v2113_v30 = vmul.f32 0.70710677, %v2110_v28 }
0x22a4   :  { %v2082_v32 = vpop.f32.mrf.mxu2 }
0x22a5   :  { %5961 = vmatmul.msk.f32.vlgmr.msra.gmra.mxu2 %vm1578_vm4, %v2082_v32  ;;  %v2114_v40 = vsel %vm194_vm0, %v2113_v30, -inf }
0x22a6   :  { %2115 = vmax.xlane.f32.xlu2 %v2114_v40 }
0x22ac   :  { %v2235_v43 = vpop.f32.mrf.mxu3 }
0x22ad   :  { %v2238_v9 = vmul.f32 0.70710677, %v2235_v43  ;;  %5968 = vmatmul.msk.f32.vlgmr.msrb.gmra.mxu2 %vm1578_vm4, %v2314_v41 }
0x22af   :  { %v2239_v44 = vsel %vm194_vm0, %v2238_v9, -inf }
0x22b0   :  { %2240 = vmax.xlane.f32.xlu1 %v2239_v44 }
0x22c9   :  { %2366 = vrot.lane.b32.xlu1 %v6978_v1, %s6469_s7 }
0x2318   :  { %v1998_v8 = vpop.f32.mrf.mxu0 }
0x2319   :  { %v2116_v39 = vpop.xlane.xlu2 %2115  ;;  %v2001_v7 = vadd.f32 %v1998_v8, %v1894_v10  ;;  %v2483_v8 = vld [vmem:[%s8190_s11 + $0x8] sm:$0xff]  ;;  %v2484_v10 = vld [vmem:[%s8190_s11 + $0x10] sm:$0xff] }
0x231a   :  { %v2117_v47 = vsub.f32 %v2113_v30, %v2116_v39  ;;  %2578 = vmatpush.msra.mxu2 %v2483_v8  ;;  %v2970_v8 = vld [vmem:[%s8193_s18 + $0xf0] sm:$0xff] }
0x231b   :  { %v2006_v11 = vadd.f32 %v7105_v17, %v2001_v7  ;;  %v2485_v7 = vld [vmem:[%s8190_s11 + $0x18] sm:$0xff] }
0x231c   :  { %v2118_v20 = vmul.f32 1.442695, %v2117_v47 }
0x231d   :  { %v7109_v12 = vadd.f32 %v2006_v11, %v6932_v18 }
0x231e   :  { %6321 = vpow2.f32 %v2118_v20 }
0x231f   :  { %v2421_v13 = vsel %vm194_vm0, %v7109_v12, 0.0 }
0x2323   :  { %v2241_v49 = vpop.xlane.xlu1 %2240 }
0x2324   :  { %v7085_v50 = vpop.eup %6321  ;;  %v2242_v52 = vsub.f32 %v2238_v9, %v2241_v49 }
0x2325   :  { %v2120_v54 = vsel %vm194_vm0, %v7085_v50, 0.0 }
0x2326   :  { %v2243_v55 = vmul.f32 1.442695, %v2242_v52  ;;  %2121 = vadd.xlane.f32.xlu2 %v2120_v54 }
0x2328   :  { %6323 = vpow2.f32 %v2243_v55  ;;  %v7089_v56 = vpop.f32.mrf.mxu2 }
0x232e   :  { %v7091_v59 = vpop.eup %6323 }
0x232f   :  { %v2245_v57 = vsel %vm194_vm0, %v7091_v59, 0.0 }
0x2330   :  { %v2338_v58 = vpop.f32.mrf.mxu2  ;;  %2246 = vadd.xlane.f32.xlu2 %v2245_v57 }
0x2331   :  { %v2341_v61 = vmul.f32 0.70710677, %v2338_v58 }
0x2333   :  { %v2342_v62 = vsel %vm194_vm0, %v2341_v61, -inf }
0x2334   :  { %2343 = vmax.xlane.f32.xlu0 %v2342_v62 }
0x233b   :  { %v2367_v63 = vpop.permute.xlu1 %2366 }
0x233c   :  { %2387 = vmatpush.msrb.mxu3 %v2367_v63 }
0x233e   :  { %2601 = vmatpush.msra.mxu3 %v2484_v10  ;;  %v2986_v10 = vld [vmem:[%s8193_s18 + $0x170] sm:$0xff] }
0x2348   :  { %2263 = vrot.lane.b32.xlu2 %v6978_v1, %s6467_s20 }
0x2399   :  { %v2122_v15 = vpop.xlane.xlu2 %2121 }
0x239a   :  { %v2134_v26 = vand.u32 2147483648, %v2122_v15  ;;  %vm2128_vm3 = vweird.f32 %v2122_v15  ;;  %v2132_v22 = vand.u32 2147483647, %v2122_v15 }
0x239c   :  { %v2135_v53 = vor.u32 1.1754944e-38, %v2134_v26  ;;  %vm2133_vm9 = vcmp.eq.f32.partialorder %v2132_v22, 8.507059e+37 }
0x23a7   :  { %v2344_v0 = vpop.xlane.xlu0 %2343 }
0x23a8   :  { %v2345_v6 = vsub.f32 %v2341_v61, %v2344_v0 }
0x23aa   :  { %v2346_v2 = vmul.f32 1.442695, %v2345_v6 }
0x23ac   :  { %6325 = vpow2.f32 %v2346_v2 }
0x23ad   :  { %6327 = vrcp.f32 %v2122_v15 }
0x23b2   :  { %v6326_v3 = vpop.eup %6325 }
0x23b3   :  { %v2348_v4 = vsel %vm194_vm0, %v6326_v3, 0.0  ;;  %v6328_v16 = vpop.eup %6327 }
0x23b4   :  { %2349 = vadd.xlane.f32.xlu0 %v2348_v4  ;;  %v2124_v45 = vmul.f32 %v6328_v16, %v2122_v15  ;;  %vm2129_vm6 = vweird.f32 %v6328_v16 }
0x23b5   :  { %vm2130_vm7 = vmor %vm2128_vm3, %vm2129_vm6 }
0x23b6   :  { %v2125_v48 = vsub.f32 1.0, %v2124_v45 }
0x23b8   :  { %v2126_v21 = vmul.f32 %v6328_v16, %v2125_v48 }
0x23ba   :  { %v2127_v18 = vadd.f32 %v6328_v16, %v2126_v21 }
0x23bc   :  { %v2131_v33 = vsel %vm2130_vm7, %v6328_v16, %v2127_v18 }
0x23bd   :  { %v2136_v38 = vsel %vm2133_vm9, %v2135_v53, %v2131_v33 }
0x23be   :  { %v2137_v44 = vmul.f32 %v7085_v50, %v2136_v38  ;;  %v6470_v50 = vmov 8.0  }
0x23c8   :  { %2138 = vrot.lane.b32.xlu0 %v6978_v1, %s6464_s6  ;;  %v2247_v1 = vpop.xlane.xlu2 %2246 }
0x23c9   :  { %6329 = vrcp.f32 %v2247_v1  ;;  %v2259_v40 = vand.u32 2147483648, %v2247_v1  ;;  %vm2253_vm1 = vweird.f32 %v2247_v1  ;;  %v2257_v43 = vand.u32 2147483647, %v2247_v1 }
0x23cb   :  { %v2260_v20 = vor.u32 1.1754944e-38, %v2259_v40  ;;  %vm2258_vm10 = vcmp.eq.f32.partialorder %v2257_v43, 8.507059e+37 }
0x23cf   :  { %v6330_v19 = vpop.eup %6329 }
0x23d0   :  { %v2249_v60 = vmul.f32 %v6330_v19, %v2247_v1  ;;  %vm2254_vm15 = vweird.f32 %v6330_v19  ;;  %v2264_v47 = vpop.permute.xlu2 %2263 }
0x23d1   :  { %vm2255_vm2 = vmor %vm2253_vm1, %vm2254_vm15 }
0x23d2   :  { %v2250_v25 = vsub.f32 1.0, %v2249_v60  ;;  %v6156_v60 = vld [vmem:[%s8192_s16] ss:$0 sm:$0xff] }
0x23d4   :  { %v2251_v34 = vmul.f32 %v6330_v19, %v2250_v25 }
0x23d6   :  { %v2252_v30 = vadd.f32 %v6330_v19, %v2251_v34 }
0x23d8   :  { %v2256_v39 = vsel %vm2255_vm2, %v6330_v19, %v2252_v30  ;;  %v6155_v19 = vld [vmem:[%s8191_s15] ss:$0 sm:$0xff]  ;;  %v2487_v30 = vld [vmem:[%s8190_s11 + $0x28] sm:$0xff]  ;;  %s6399_s15 = scalar_lea.hbm %s6705_s4, 2 }
0x23d9   :  { %v2261_v49 = vsel %vm2258_vm10, %v2260_v20, %v2256_v39  ;;  %2670 = vmatpush.msrb.mxu2 %v2487_v30  ;;  %v2490_v39 = vld [vmem:[%s8190_s11 + $0x40] sm:$0xff]  ;;  %v2492_v20 = vld [vmem:[%s8190_s11 + $0x50] sm:$0xff] }
0x23da   :  { %v2262_v52 = vmul.f32 %v7091_v59, %v2261_v49  ;;  %v2493_v49 = vld [vmem:[%s8190_s11 + $0x58] sm:$0xff]  ;;  %v2962_v30 = vld [vmem:[%s8193_s18 + $0xb0] sm:$0xff] }
0x23f2   :  { %2422 = vadd.xlane.f32.xlu0 %v2421_v13 }
0x2427   :  { %v2350_v46 = vpop.xlane.xlu0 %2349 }
0x2428   :  { %6331 = vrcp.f32 %v2350_v46  ;;  %v2362_v42 = vand.u32 2147483648, %v2350_v46  ;;  %v2360_v31 = vand.u32 2147483647, %v2350_v46  ;;  %vm2356_vm8 = vweird.f32 %v2350_v46 }
0x2429   :  { %6333 = vrcp.f32 %v6470_v50 }
0x242a   :  { %v2363_v36 = vor.u32 1.1754944e-38, %v2362_v42  ;;  %vm2361_vm14 = vcmp.eq.f32.partialorder %v2360_v31, 8.507059e+37 }
0x242e   :  { %v6332_v23 = vpop.eup %6331 }
0x242f   :  { %v2352_v24 = vmul.f32 %v6332_v23, %v2350_v46  ;;  %vm2357_vm12 = vweird.f32 %v6332_v23  ;;  %v6334_v54 = vpop.eup %6333 }
0x2430   :  { %vm2358_vm13 = vmor %vm2356_vm8, %vm2357_vm12  ;;  %v2428_v55 = vmul.f32 8.0, %v6334_v54  ;;  %vm2432_vm11 = vweird.f32 %v6334_v54 }
0x2431   :  { %v2353_v29 = vsub.f32 1.0, %v2352_v24 }
0x2432   :  { %v2429_v57 = vsub.f32 1.0, %v2428_v55 }
0x2433   :  { %v2354_v14 = vmul.f32 %v6332_v23, %v2353_v29 }
0x2434   :  { %v2430_v58 = vmul.f32 %v6334_v54, %v2429_v57 }
0x2435   :  { %v2355_v35 = vadd.f32 %v6332_v23, %v2354_v14 }
0x2436   :  { %v2431_v61 = vadd.f32 %v6334_v54, %v2430_v58 }
0x2437   :  { %v2359_v28 = vsel %vm2358_vm13, %v6332_v23, %v2355_v35 }
0x2438   :  { %v2364_v32 = vsel %vm2361_vm14, %v2363_v36, %v2359_v28  ;;  %v7120_v62 = vsel %vm2432_vm11, %v6334_v54, %v2431_v61  ;;  %v2486_v28 = vld [vmem:[%s8190_s11 + $0x20] sm:$0xff] }
0x2439   :  { %v2365_v41 = vmul.f32 %v6326_v3, %v2364_v32  ;;  %v2488_v32 = vld [vmem:[%s8190_s11 + $0x30] sm:$0xff] }
0x243a   :  { %v2139_v9 = vpop.permute.xlu0 %2138 }
0x243b   :  { %2159 = vmatpush.msrb.mxu0 %v2139_v9  ;;  %5969 = vmatmul.msk.f32.vlgmr.msrb.gmra.mxu3 %vm194_vm0, %v2365_v41 }
0x243c   :  { %5957 = vmatmul.msk.f32.vlgmr.msrb.gmra.mxu0 %vm194_vm0, %v2137_v44  ;;  %2693 = vmatpush.msrb.mxu3 %v2488_v32  ;;  %v2978_v32 = vld [vmem:[%s8193_s18 + $0x130] sm:$0xff] }
0x243d   :  { %2284 = vmatpush.msra.mxu0 %v2264_v47  ;;  %v2491_v47 = vld [vmem:[%s8190_s11 + $0x48] sm:$0xff] }
0x243f   :  { %5970 = vmatpush.msk.msrb.mxu0 %vm1738_vm5, %v7074_v37 }
0x2444   :  { %5964 = vmatmul.msk.f32.vlgmr.msra.gmra.mxu0 %vm194_vm0, %v2262_v52 }
0x2445   :  { %2624 = vmatpush.msra.mxu0 %v2485_v7  ;;  %v3002_v7 = vld [vmem:[%s8193_s18 + $0x1f0] sm:$0xff] }
0x2465   :  { %v2423_v63 = vpop.xlane.xlu0 %2422 }
0x2466   :  { %v2434_v37 = vmul.f32 %v7120_v62, %v2423_v63  ;;  %v2494_v63 = vld [vmem:[%s8190_s11 + $0x60] sm:$0xff] }
0x2468   :  { %v2436_v59 = vsub.f32 %v7109_v12, %v2434_v37  ;;  %v2495_v37 = vld [vmem:[%s8190_s11 + $0x68] sm:$0xff] }
0x246a   :  { %v2438_v0 = vmul.f32 %v2436_v59, %v2436_v59 }
0x246c   :  { %v2440_v6 = vsel %vm194_vm0, %v2438_v0, 0.0  ;;  %v2497_v0 = vld [vmem:[%s8190_s11 + $0x78] sm:$0xff] }
0x246d   :  { %2441 = vadd.xlane.f32.xlu1 %v2440_v6  ;;  %v2955_v6 = vld [vmem:[%s8193_s18 + $0x78] sm:$0xff] }
0x24b9   :  { %v2161_v2 = vpop.f32.mrf.mxu0 }
0x24ba   :  { %5959 = vmatmul.msk.f32.vlgmr.msrb.gmra.mxu1 %vm1578_vm4, %v2161_v2  ;;  %v2971_v2 = vld [vmem:[%s8193_s18 + $0xf8] sm:$0xff] }
0x24bb   :  { %2555 = vmatpush.msrb.mxu1 %v2482_v5  ;;  %v2954_v5 = vld [vmem:[%s8193_s18 + $0x70] sm:$0xff] }
0x24be   :  { %v2389_v3 = vpop.f32.mrf.mxu3 }
0x24bf   :  { %5971 = vmatmul.msk.f32.vlgmr.msrb.gmra.mxu0 %vm1578_vm4, %v2389_v3  ;;  %v2987_v3 = vld [vmem:[%s8193_s18 + $0x178] sm:$0xff] }
0x24c1   :  { %v2286_v4 = vpop.f32.mrf.mxu0 }
0x24c2   :  { %5966 = vmatmul.msk.f32.vlgmr.msra.gmra.mxu1 %vm1578_vm4, %v2286_v4  ;;  %v3003_v4 = vld [vmem:[%s8193_s18 + $0x1f8] sm:$0xff] }
0x24c3   :  { %2647 = vmatpush.msra.mxu1 %v2486_v28  ;;  %v2946_v28 = vld [vmem:[%s8193_s18 + $0x30] sm:$0xff] }
0x24e0   :  { %v2442_v11 = vpop.xlane.xlu1 %2441 }
0x24e1   :  { %v2446_v12 = vmul.f32 %v2442_v11, %v7120_v62  ;;  %v2953_v11 = vld [vmem:[%s8193_s18 + $0x68] sm:$0xff] }
0x24e3   :  { %v2448_v13 = vadd.f32 1e-05, %v2446_v12  ;;  %v2969_v12 = vld [vmem:[%s8193_s18 + $0xe8] sm:$0xff] }
0x24e5   :  { %6335 = vrsqrt.f32 %v2448_v13  ;;  %vm2456_vm3 = vweird.f32 %v2448_v13 }
0x24eb   :  { %v6336_v15 = vpop.eup %6335 }
0x24ec   :  { %v2451_v1 = vmul.f32 %v6336_v15, %v2448_v13  ;;  %vm2457_vm6 = vweird.f32 %v6336_v15  ;;  %v2985_v13 = vld [vmem:[%s8193_s18 + $0x168] sm:$0xff] }
0x24ed   :  { %vm2458_vm7 = vmor %vm2456_vm3, %vm2457_vm6 }
0x24ee   :  { %v2452_v16 = vmul.f32 %v6336_v15, %v2451_v1  ;;  %v2952_v1 = vld [vmem:[%s8193_s18 + $0x60] sm:$0xff] }
0x24f0   :  { %v2453_v45 = vmul.f32 0.5, %v2452_v16  ;;  %v2968_v16 = vld [vmem:[%s8193_s18 + $0xe0] sm:$0xff] }
0x24f2   :  { %v2454_v46 = vsub.f32 1.5, %v2453_v45  ;;  %v2984_v45 = vld [vmem:[%s8193_s18 + $0x160] sm:$0xff] }
0x24f4   :  { %v2455_v48 = vmul.f32 %v6336_v15, %v2454_v46  ;;  %v3000_v46 = vld [vmem:[%s8193_s18 + $0x1e0] sm:$0xff] }
0x24f6   :  { %v2459_v21 = vsel %vm2458_vm7, %v6336_v15, %v2455_v48  ;;  %v3001_v15 = vld [vmem:[%s8193_s18 + $0x1e8] sm:$0xff]  ;;  %v2951_v48 = vld [vmem:[%s8193_s18 + $0x58] sm:$0xff] }
0x24f7   :  { %v2470_v23 = vmul.f32 %v2459_v21, %v2436_v59  ;;  %v2496_v59 = vld [vmem:[%s8190_s11 + $0x70] sm:$0xff]  ;;  %v2983_v21 = vld [vmem:[%s8193_s18 + $0x158] sm:$0xff] }
0x24f9   :  { %v2475_v24 = vmul.f32 %v6155_v19, %v2470_v23  ;;  %v2950_v23 = vld [vmem:[%s8193_s18 + $0x50] sm:$0xff] }
0x24fb   :  { %v7135_v18 = vadd.f32 %v6156_v60, %v2475_v24  ;;  %v2966_v24 = vld [vmem:[%s8193_s18 + $0xd0] sm:$0xff] }
0x24fd   :  { %5972 = vmatmul.msk.f32.vlgmr.msrb.gmra.mxu1 %vm194_vm0, %v7135_v18  ;;  %5974 = vmatmul.msk.f32.vlgmr.msra.gmra.mxu2 %vm194_vm0, %v7135_v18 }
0x24fe   :  { %5976 = vmatmul.msk.f32.vlgmr.msra.gmra.mxu3 %vm194_vm0, %v7135_v18  ;;  %5978 = vmatmul.msk.f32.vlgmr.msra.gmra.mxu0 %vm194_vm0, %v7135_v18 }
0x24ff   :  { %2739 = vmatpush.msrb.mxu1 %v2490_v39  ;;  %2762 = vmatpush.msra.mxu2 %v2491_v47  ;;  %v2976_v39 = vld [vmem:[%s8193_s18 + $0x120] sm:$0xff] }
0x2500   :  { %2785 = vmatpush.msra.mxu3 %v2492_v20  ;;  %v2992_v47 = vld [vmem:[%s8193_s18 + $0x1a0] sm:$0xff] }
0x2501   :  { %v7263_v20 = vld [vmem:[%s8194_s22] sm:$0xff] }
0x2537   :  { %v2184_v25 = vpop.f32.mrf.mxu1 }
0x2538   :  { %v2208_v26 = vadd.f32 %v7089_v56, %v2184_v25  ;;  %v2982_v25 = vld [vmem:[%s8193_s18 + $0x150] sm:$0xff] }
0x253c   :  { %v2412_v42 = vpop.f32.mrf.mxu0 }
0x253f   :  { %v2309_v29 = vpop.f32.mrf.mxu1 }
0x2540   :  { %v2312_v22 = vadd.f32 %v2309_v29, %v2208_v26  ;;  %v2998_v26 = vld [vmem:[%s8193_s18 + $0x1d0] sm:$0xff]  ;;  %v2949_v29 = vld [vmem:[%s8193_s18 + $0x48] sm:$0xff] }
0x2542   :  { %v2415_v14 = vadd.f32 %v2412_v42, %v2312_v22  ;;  %v2965_v22 = vld [vmem:[%s8193_s18 + $0xc8] sm:$0xff] }
0x2543   :  { %v2981_v42 = vld [vmem:[%s8193_s18 + $0x148] sm:$0xff] }
0x2544   :  { %v2416_v31 = vadd.f32 %v7105_v17, %v2415_v14  ;;  %v2997_v14 = vld [vmem:[%s8193_s18 + $0x1c8] sm:$0xff] }
0x2546   :  { %v2418_v33 = vadd.f32 %v2416_v31, %v6965_v51  ;;  %v2489_v51 = vld [vmem:[%s8190_s11 + $0x38] sm:$0xff]  ;;  %v2948_v31 = vld [vmem:[%s8193_s18 + $0x40] sm:$0xff] }
0x2547   :  { %2716 = vmatpush.msrb.mxu0 %v2489_v51  ;;  %v2994_v51 = vld [vmem:[%s8193_s18 + $0x1b0] sm:$0xff] }
0x2548   :  { %v2424_v34 = vsel %vm194_vm0, %v2418_v33, 0.0 }
0x2549   :  { %2425 = vadd.xlane.f32.xlu2 %v2424_v34  ;;  %2808 = vmatpush.msra.mxu0 %v2493_v49  ;;  %v2980_v34 = vld [vmem:[%s8193_s18 + $0x140] sm:$0xff]  ;;  %v2943_v49 = vld [vmem:[%s8193_s18 + $0x18] sm:$0xff] }
0x25bc   :  { %v2426_v53 = vpop.xlane.xlu2 %2425 }
0x25bd   :  { %v2435_v35 = vmul.f32 %v7120_v62, %v2426_v53  ;;  %v2996_v53 = vld [vmem:[%s8193_s18 + $0x1c0] sm:$0xff] }
0x25bf   :  { %v2437_v36 = vsub.f32 %v2418_v33, %v2435_v35  ;;  %v2964_v33 = vld [vmem:[%s8193_s18 + $0xc0] sm:$0xff]  ;;  %v2947_v35 = vld [vmem:[%s8193_s18 + $0x38] sm:$0xff] }
0x25c1   :  { %v2439_v38 = vmul.f32 %v2437_v36, %v2437_v36 }
0x25c3   :  { %v2443_v56 = vsel %vm194_vm0, %v2439_v38, 0.0  ;;  %v2979_v38 = vld [vmem:[%s8193_s18 + $0x138] sm:$0xff] }
0x25c4   :  { %2444 = vadd.xlane.f32.xlu0 %v2443_v56  ;;  %v2995_v56 = vld [vmem:[%s8193_s18 + $0x1b8] sm:$0xff] }
0x2637   :  { %v2445_v17 = vpop.xlane.xlu0 %2444 }
0x2638   :  { %v2447_v40 = vmul.f32 %v2445_v17, %v7120_v62  ;;  %v2945_v17 = vld [vmem:[%s8193_s18 + $0x28] sm:$0xff] }
0x263a   :  { %v2449_v41 = vadd.f32 1e-05, %v2447_v40  ;;  %v2961_v40 = vld [vmem:[%s8193_s18 + $0xa8] sm:$0xff] }
0x263c   :  { %6337 = vrsqrt.f32 %v2449_v41  ;;  %vm2466_vm8 = vweird.f32 %v2449_v41 }
0x2642   :  { %v6338_v43 = vpop.eup %6337 }
0x2643   :  { %v2461_v9 = vmul.f32 %v6338_v43, %v2449_v41  ;;  %vm2467_vm12 = vweird.f32 %v6338_v43  ;;  %v2977_v41 = vld [vmem:[%s8193_s18 + $0x128] sm:$0xff] }
0x2644   :  { %vm2468_vm9 = vmor %vm2466_vm8, %vm2467_vm12 }
0x2645   :  { %v2462_v44 = vmul.f32 %v6338_v43, %v2461_v9  ;;  %v2944_v9 = vld [vmem:[%s8193_s18 + $0x20] sm:$0xff] }
0x2647   :  { %v2463_v52 = vmul.f32 0.5, %v2462_v44  ;;  %v2960_v44 = vld [vmem:[%s8193_s18 + $0xa0] sm:$0xff] }
0x2649   :  { %v2464_v50 = vsub.f32 1.5, %v2463_v52  ;;  %v2959_v52 = vld [vmem:[%s8193_s18 + $0x98] sm:$0xff] }
0x264b   :  { %v2465_v54 = vmul.f32 %v6338_v43, %v2464_v50  ;;  %v2502_v50 = vperm.slane %v7263_v20, 0 }
0x264d   :  { %v2469_v55 = vsel %vm2468_vm9, %v6338_v43, %v2465_v54  ;;  %v2993_v43 = vld [vmem:[%s8193_s18 + $0x1a8] sm:$0xff]  ;;  %v2503_v54 = vperm.slane %v7263_v20, 1 }
0x264e   :  { %v2471_v57 = vmul.f32 %v2469_v55, %v2437_v36  ;;  %v2963_v36 = vld [vmem:[%s8193_s18 + $0xb8] sm:$0xff] }
0x264f   :  { %v2975_v55 = vld [vmem:[%s8193_s18 + $0x118] sm:$0xff] }
0x2650   :  { %v2476_v58 = vmul.f32 %v6155_v19, %v2471_v57  ;;  %v2967_v19 = vld [vmem:[%s8193_s18 + $0xd8] sm:$0xff] }
0x2651   :  { %v2991_v57 = vld [vmem:[%s8193_s18 + $0x198] sm:$0xff] }
0x2652   :  { %v7160_v61 = vadd.f32 %v6156_v60, %v2476_v58  ;;  %v2999_v60 = vld [vmem:[%s8193_s18 + $0x1d8] sm:$0xff]  ;;  %v2557_v58 = vpop.f32.mrf.mxu1 }
0x2654   :  { %5973 = vmatmul.msk.f32.gmra.mxu1 %vm194_vm0, %v7160_v61  ;;  %5975 = vmatmul.msk.f32.gmra.mxu2 %vm194_vm0, %v7160_v61 }
0x2655   :  { %5977 = vmatmul.msk.f32.gmra.mxu3 %vm194_vm0, %v7160_v61  ;;  %5979 = vmatmul.msk.f32.gmra.mxu0 %vm194_vm0, %v7160_v61 }
0x265c   :  { %5980 = vmatmul.msk.f32.vlgmr.msra.gmra.mxu1 %vm194_vm0, %v7135_v18  ;;  %5982 = vmatmul.msk.f32.vlgmr.msrb.gmra.mxu2 %vm194_vm0, %v7135_v18 }
0x265d   :  { %5984 = vmatmul.msk.f32.vlgmr.msrb.gmra.mxu3 %vm194_vm0, %v7135_v18  ;;  %5986 = vmatmul.msk.f32.vlgmr.msrb.gmra.mxu0 %vm194_vm0, %v7135_v18 }
0x265e   :  { %2831 = vmatpush.msra.mxu1 %v2494_v63  ;;  %2854 = vmatpush.msrb.mxu2 %v2495_v37  ;;  %v2505_v63 = vperm.slane %v7263_v20, 3  ;;  %v2580_v37 = vpop.f32.mrf.mxu2 }
0x265f   :  { %2877 = vmatpush.msrb.mxu3 %v2496_v59  ;;  %2900 = vmatpush.msrb.mxu0 %v2497_v0  ;;  %v2504_v59 = vperm.slane %v7263_v20, 2  ;;  %v2942_v0 = vld [vmem:[%s8193_s18 + $0x10] sm:$0xff] }
0x2664   :  { %5981 = vmatmul.msk.f32.gmra.mxu1 %vm194_vm0, %v7160_v61  ;;  %5983 = vmatmul.msk.f32.gmra.mxu2 %vm194_vm0, %v7160_v61 }
0x2665   :  { %5985 = vmatmul.msk.f32.gmra.mxu3 %vm194_vm0, %v7160_v61  ;;  %5987 = vmatmul.msk.f32.gmra.mxu0 %vm194_vm0, %v7160_v61 }
0x266c   :  { %5988 = vmatmul.msk.f32.vlgmr.msrb.gmra.mxu1 %vm194_vm0, %v7135_v18  ;;  %5990 = vmatmul.msk.f32.vlgmr.msra.gmra.mxu2 %vm194_vm0, %v7135_v18 }
0x266d   :  { %5992 = vmatmul.msk.f32.vlgmr.msra.gmra.mxu3 %vm194_vm0, %v7135_v18  ;;  %5994 = vmatmul.msk.f32.vlgmr.msra.gmra.mxu0 %vm194_vm0, %v7135_v18 }
0x266e   :  { %3200 = vmatpush.msrb.mxu1 %v2955_v6  ;;  %3223 = vmatpush.msra.mxu2 %v2971_v2  ;;  %v2958_v6 = vld [vmem:[%s8193_s18 + $0x90] sm:$0xff]  ;;  %v2626_v2 = vpop.f32.mrf.mxu0 }
0x266f   :  { %3246 = vmatpush.msra.mxu3 %v2987_v3  ;;  %3269 = vmatpush.msra.mxu0 %v3003_v4  ;;  %v2603_v3 = vpop.f32.mrf.mxu3  ;;  %v2974_v4 = vld [vmem:[%s8193_s18 + $0x110] sm:$0xff] }
0x2670   :  { %3201 = vmatpush.msrb.mxu1 %v2954_v5  ;;  %3224 = vmatpush.msra.mxu2 %v2970_v8  ;;  %v2990_v5 = vld [vmem:[%s8193_s18 + $0x190] sm:$0xff]  ;;  %v2941_v8 = vld [vmem:[%s8193_s18 + $0x8] sm:$0xff] }
0x2671   :  { %3247 = vmatpush.msra.mxu3 %v2986_v10  ;;  %3270 = vmatpush.msra.mxu0 %v3002_v7  ;;  %v2957_v10 = vld [vmem:[%s8193_s18 + $0x88] sm:$0xff]  ;;  %v2558_v7 = vadd.f32 %v2557_v58, %v2502_v50  ;;  %v3044_v58 = vld [vmem:[%s8193_s18 + $0x340] sm:$0xff] }
0x2672   :  { %3202 = vmatpush.msrb.mxu1 %v2953_v11  ;;  %3225 = vmatpush.msra.mxu2 %v2969_v12  ;;  %v2581_v11 = vadd.f32 %v2580_v37, %v2503_v54  ;;  %v2973_v12 = vld [vmem:[%s8193_s18 + $0x108] sm:$0xff]  ;;  %v3011_v37 = vld [vmem:[%s8193_s18 + $0x238] sm:$0xff] }
0x2673   :  { %3248 = vmatpush.msra.mxu3 %v2985_v13  ;;  %3271 = vmatpush.msra.mxu0 %v3001_v15  ;;  %v2989_v13 = vld [vmem:[%s8193_s18 + $0x188] sm:$0xff]  ;;  %v2627_v15 = vadd.f32 %v2626_v2, %v2505_v63  ;;  %v3043_v2 = vld [vmem:[%s8193_s18 + $0x338] sm:$0xff] }
0x2674   :  { %3203 = vmatpush.msrb.mxu1 %v2952_v1  ;;  %3226 = vmatpush.msra.mxu2 %v2968_v16  ;;  %v2604_v1 = vadd.f32 %v2603_v3, %v2504_v59  ;;  %v2940_v16 = vld [vmem:[%s8193_s18] sm:$0xff]  ;;  %v3010_v3 = vld [vmem:[%s8193_s18 + $0x230] sm:$0xff] }
0x2675   :  { %3249 = vmatpush.msra.mxu3 %v2984_v45  ;;  %3272 = vmatpush.msra.mxu0 %v3000_v46  ;;  %v2956_v45 = vld [vmem:[%s8193_s18 + $0x80] sm:$0xff] }
0x2676   :  { %5989 = vmatmul.msk.f32.gmra.mxu1 %vm194_vm0, %v7160_v61  ;;  %5991 = vmatmul.msk.f32.gmra.mxu2 %vm194_vm0, %v7160_v61  ;;  %v2972_v46 = vld [vmem:[%s8193_s18 + $0x100] sm:$0xff] }
0x2677   :  { %5993 = vmatmul.msk.f32.gmra.mxu3 %vm194_vm0, %v7160_v61  ;;  %5995 = vmatmul.msk.f32.gmra.mxu0 %vm194_vm0, %v7160_v61 }
0x2678   :  { %3204 = vmatpush.msrb.mxu1 %v2951_v48  ;;  %3227 = vmatpush.msra.mxu2 %v2967_v19  ;;  %v2988_v48 = vld [vmem:[%s8193_s18 + $0x180] sm:$0xff]  ;;  %v2908_v19 = vmax.f32 %v2558_v7, 0.0  ;;  %v3057_v7 = vld [vmem:[%s8193_s18 + $0x3a8] sm:$0xff] }
0x2679   :  { %3250 = vmatpush.msra.mxu3 %v2983_v21  ;;  %3273 = vmatpush.msra.mxu0 %v2999_v60  ;;  %v2909_v21 = vmax.f32 %v2581_v11, 0.0  ;;  %v2911_v60 = vmax.f32 %v2627_v15, 0.0  ;;  %v3025_v11 = vld [vmem:[%s8193_s18 + $0x2a8] sm:$0xff]  ;;  %v3056_v15 = vld [vmem:[%s8193_s18 + $0x3a0] sm:$0xff] }
0x267a   :  { %3205 = vmatpush.msrb.mxu1 %v2950_v23  ;;  %3228 = vmatpush.msra.mxu2 %v2966_v24  ;;  %v2910_v23 = vmax.f32 %v2604_v1, 0.0  ;;  %v3019_v24 = vld [vmem:[%s8193_s18 + $0x278] sm:$0xff]  ;;  %v3024_v1 = vld [vmem:[%s8193_s18 + $0x2a0] sm:$0xff] }
0x267b   :  { %3251 = vmatpush.msra.mxu3 %v2982_v25  ;;  %3274 = vmatpush.msra.mxu0 %v2998_v26  ;;  %v3067_v25 = vld [vmem:[%s8193_s18 + $0x3f8] sm:$0xff] }
0x267c   :  { %3206 = vmatpush.msrb.mxu1 %v2949_v29  ;;  %3229 = vmatpush.msra.mxu2 %v2965_v22  ;;  %v3035_v26 = vld [vmem:[%s8193_s18 + $0x2f8] sm:$0xff]  ;;  %v3018_v22 = vld [vmem:[%s8193_s18 + $0x270] sm:$0xff] }
0x267d   :  { %3252 = vmatpush.msra.mxu3 %v2981_v42  ;;  %3275 = vmatpush.msra.mxu0 %v2997_v14  ;;  %v3051_v29 = vld [vmem:[%s8193_s18 + $0x378] sm:$0xff]  ;;  %v3066_v42 = vld [vmem:[%s8193_s18 + $0x3f0] sm:$0xff] }
0x267e   :  { %3207 = vmatpush.msrb.mxu1 %v2948_v31  ;;  %3230 = vmatpush.msra.mxu2 %v2964_v33  ;;  %v3034_v14 = vld [vmem:[%s8193_s18 + $0x2f0] sm:$0xff]  ;;  %v3017_v33 = vld [vmem:[%s8193_s18 + $0x268] sm:$0xff] }
0x267f   :  { %3253 = vmatpush.msra.mxu3 %v2980_v34  ;;  %3276 = vmatpush.msra.mxu0 %v2996_v53  ;;  %v3050_v31 = vld [vmem:[%s8193_s18 + $0x370] sm:$0xff]  ;;  %v3065_v34 = vld [vmem:[%s8193_s18 + $0x3e8] sm:$0xff] }
0x2680   :  { %5996 = vmatmul.msk.f32.vlgmr.msra.gmra.mxu1 %vm194_vm0, %v7135_v18  ;;  %5998 = vmatmul.msk.f32.vlgmr.msrb.gmra.mxu2 %vm194_vm0, %v7135_v18  ;;  %v3033_v53 = vld [vmem:[%s8193_s18 + $0x2e8] sm:$0xff] }
0x2681   :  { %6000 = vmatmul.msk.f32.vlgmr.msrb.gmra.mxu3 %vm194_vm0, %v7135_v18  ;;  %6002 = vmatmul.msk.f32.vlgmr.msrb.gmra.mxu0 %vm194_vm0, %v7135_v18 }
0x2682   :  { %3208 = vmatpush.msrb.mxu1 %v2947_v35  ;;  %3231 = vmatpush.msra.mxu2 %v2963_v36  ;;  %v3049_v35 = vld [vmem:[%s8193_s18 + $0x368] sm:$0xff]  ;;  %v3016_v36 = vld [vmem:[%s8193_s18 + $0x260] sm:$0xff] }
0x2683   :  { %3254 = vmatpush.msra.mxu3 %v2979_v38  ;;  %3277 = vmatpush.msra.mxu0 %v2995_v56  ;;  %v3064_v38 = vld [vmem:[%s8193_s18 + $0x3e0] sm:$0xff] }
0x2684   :  { %3209 = vmatpush.msrb.mxu1 %v2946_v28  ;;  %3232 = vmatpush.msra.mxu2 %v2962_v30  ;;  %v3032_v56 = vld [vmem:[%s8193_s18 + $0x2e0] sm:$0xff]  ;;  %v3015_v30 = vld [vmem:[%s8193_s18 + $0x258] sm:$0xff] }
0x2685   :  { %3255 = vmatpush.msra.mxu3 %v2978_v32  ;;  %3278 = vmatpush.msra.mxu0 %v2994_v51  ;;  %v3048_v28 = vld [vmem:[%s8193_s18 + $0x360] sm:$0xff]  ;;  %v3063_v32 = vld [vmem:[%s8193_s18 + $0x3d8] sm:$0xff] }
0x2686   :  { %3210 = vmatpush.msrb.mxu1 %v2945_v17  ;;  %3233 = vmatpush.msra.mxu2 %v2961_v40  ;;  %v3031_v51 = vld [vmem:[%s8193_s18 + $0x2d8] sm:$0xff]  ;;  %v3014_v40 = vld [vmem:[%s8193_s18 + $0x250] sm:$0xff] }
0x2687   :  { %3256 = vmatpush.msra.mxu3 %v2977_v41  ;;  %3279 = vmatpush.msra.mxu0 %v2993_v43  ;;  %v3047_v17 = vld [vmem:[%s8193_s18 + $0x358] sm:$0xff]  ;;  %v3062_v41 = vld [vmem:[%s8193_s18 + $0x3d0] sm:$0xff] }
0x2688   :  { %3211 = vmatpush.msrb.mxu1 %v2944_v9  ;;  %3234 = vmatpush.msra.mxu2 %v2960_v44  ;;  %v3030_v43 = vld [vmem:[%s8193_s18 + $0x2d0] sm:$0xff]  ;;  %v3013_v44 = vld [vmem:[%s8193_s18 + $0x248] sm:$0xff] }
0x2689   :  { %3257 = vmatpush.msra.mxu3 %v2976_v39  ;;  %3280 = vmatpush.msra.mxu0 %v2992_v47  ;;  %v3046_v9 = vld [vmem:[%s8193_s18 + $0x350] sm:$0xff]  ;;  %v3061_v39 = vld [vmem:[%s8193_s18 + $0x3c8] sm:$0xff] }
0x268a   :  { %5997 = vmatmul.msk.f32.gmra.mxu1 %vm194_vm0, %v7160_v61  ;;  %5999 = vmatmul.msk.f32.gmra.mxu2 %vm194_vm0, %v7160_v61  ;;  %v3029_v47 = vld [vmem:[%s8193_s18 + $0x2c8] sm:$0xff] }
0x268b   :  { %6001 = vmatmul.msk.f32.gmra.mxu3 %vm194_vm0, %v7160_v61  ;;  %6003 = vmatmul.msk.f32.gmra.mxu0 %vm194_vm0, %v7160_v61 }
0x268c   :  { %3212 = vmatpush.msrb.mxu1 %v2943_v49  ;;  %3235 = vmatpush.msra.mxu2 %v2959_v52  ;;  %v3045_v49 = vld [vmem:[%s8193_s18 + $0x348] sm:$0xff]  ;;  %v3012_v52 = vld [vmem:[%s8193_s18 + $0x240] sm:$0xff] }
0x268d   :  { %3258 = vmatpush.msra.mxu3 %v2975_v55  ;;  %3281 = vmatpush.msra.mxu0 %v2991_v57  ;;  %v3060_v55 = vld [vmem:[%s8193_s18 + $0x3c0] sm:$0xff] }
0x268e   :  { %3213 = vmatpush.msrb.mxu1 %v2942_v0  ;;  %3236 = vmatpush.msra.mxu2 %v2958_v6  ;;  %v3028_v57 = vld [vmem:[%s8193_s18 + $0x2c0] sm:$0xff]  ;;  %v3059_v0 = vld [vmem:[%s8193_s18 + $0x3b8] sm:$0xff] }
0x268f   :  { %3259 = vmatpush.msra.mxu3 %v2974_v4  ;;  %3282 = vmatpush.msra.mxu0 %v2990_v5  ;;  %v3027_v6 = vld [vmem:[%s8193_s18 + $0x2b8] sm:$0xff]  ;;  %v3058_v4 = vld [vmem:[%s8193_s18 + $0x3b0] sm:$0xff] }
0x2690   :  { %3214 = vmatpush.msrb.mxu1 %v2941_v8  ;;  %3237 = vmatpush.msra.mxu2 %v2957_v10  ;;  %v3026_v5 = vld [vmem:[%s8193_s18 + $0x2b0] sm:$0xff]  ;;  %v3009_v10 = vld [vmem:[%s8193_s18 + $0x228] sm:$0xff] }
0x2691   :  { %3260 = vmatpush.msra.mxu3 %v2973_v12  ;;  %3283 = vmatpush.msra.mxu0 %v2989_v13  ;;  %v3042_v8 = vld [vmem:[%s8193_s18 + $0x330] sm:$0xff]  ;;  %v3041_v12 = vld [vmem:[%s8193_s18 + $0x328] sm:$0xff]  ;;  %v3008_v13 = vld [vmem:[%s8193_s18 + $0x220] sm:$0xff] }
0x2692   :  { %3215 = vmatpush.msrb.mxu1 %v2940_v16  ;;  %3238 = vmatpush.msra.mxu2 %v2956_v45  ;;  %v3040_v16 = vld [vmem:[%s8193_s18 + $0x320] sm:$0xff]  ;;  %v3007_v45 = vld [vmem:[%s8193_s18 + $0x218] sm:$0xff] }
0x2693   :  { %3261 = vmatpush.msra.mxu3 %v2972_v46  ;;  %3284 = vmatpush.msra.mxu0 %v2988_v48  ;;  %v3055_v46 = vld [vmem:[%s8193_s18 + $0x398] sm:$0xff] }
0x2694   :  { %3216 = vmatmul.f32.vlgmr.msrb.gmra.mxu1 %v2908_v19  ;;  %3239 = vmatmul.f32.vlgmr.msra.gmra.mxu2 %v2909_v21  ;;  %v3023_v48 = vld [vmem:[%s8193_s18 + $0x298] sm:$0xff]  ;;  %v3006_v21 = vld [vmem:[%s8193_s18 + $0x210] sm:$0xff] }
0x2695   :  { %3262 = vmatmul.f32.vlgmr.msra.gmra.mxu3 %v2910_v23  ;;  %3285 = vmatmul.f32.vlgmr.msra.gmra.mxu0 %v2911_v60  ;;  %v3039_v19 = vld [vmem:[%s8193_s18 + $0x318] sm:$0xff]  ;;  %v3054_v60 = vld [vmem:[%s8193_s18 + $0x390] sm:$0xff] }
0x2696   :  { %3292 = vmatpush.msra.mxu1 %v3019_v24  ;;  %3361 = vmatpush.msrb.mxu0 %v3067_v25  ;;  %v3022_v23 = vld [vmem:[%s8193_s18 + $0x290] sm:$0xff]  ;;  %v3005_v25 = vld [vmem:[%s8193_s18 + $0x208] sm:$0xff] }
0x2697   :  { %3315 = vmatpush.msrb.mxu2 %v3035_v26  ;;  %3338 = vmatpush.msrb.mxu3 %v3051_v29  ;;  %v3038_v24 = vld [vmem:[%s8193_s18 + $0x310] sm:$0xff]  ;;  %v3053_v26 = vld [vmem:[%s8193_s18 + $0x388] sm:$0xff] }
0x2698   :  { %3293 = vmatpush.msra.mxu1 %v3018_v22  ;;  %3362 = vmatpush.msrb.mxu0 %v3066_v42  ;;  %v3021_v29 = vld [vmem:[%s8193_s18 + $0x288] sm:$0xff]  ;;  %v3004_v42 = vld [vmem:[%s8193_s18 + $0x200] sm:$0xff] }
0x2699   :  { %3316 = vmatpush.msrb.mxu2 %v3034_v14  ;;  %3339 = vmatpush.msrb.mxu3 %v3050_v31  ;;  %v3037_v22 = vld [vmem:[%s8193_s18 + $0x308] sm:$0xff]  ;;  %v3052_v14 = vld [vmem:[%s8193_s18 + $0x380] sm:$0xff]  ;;  %v3083_v31 = vld [vmem:[%s8193_s18 + $0x478] sm:$0xff] }
0x269a   :  { %3294 = vmatpush.msra.mxu1 %v3017_v33  ;;  %3363 = vmatpush.msrb.mxu0 %v3065_v34  ;;  %v3131_v33 = vld [vmem:[%s8193_s18 + $0x5f8] sm:$0xff]  ;;  %v3020_v34 = vld [vmem:[%s8193_s18 + $0x280] sm:$0xff] }
0x269b   :  { %3317 = vmatpush.msrb.mxu2 %v3033_v53  ;;  %3340 = vmatpush.msrb.mxu3 %v3049_v35  ;;  %v3036_v53 = vld [vmem:[%s8193_s18 + $0x300] sm:$0xff]  ;;  %v3082_v35 = vld [vmem:[%s8193_s18 + $0x470] sm:$0xff] }
0x269c   :  { %3295 = vmatpush.msra.mxu1 %v3016_v36  ;;  %3364 = vmatpush.msrb.mxu0 %v3064_v38  ;;  %v3130_v36 = vld [vmem:[%s8193_s18 + $0x5f0] sm:$0xff]  ;;  %v3099_v38 = vld [vmem:[%s8193_s18 + $0x4f8] sm:$0xff] }
0x269d   :  { %3318 = vmatpush.msrb.mxu2 %v3032_v56  ;;  %3341 = vmatpush.msrb.mxu3 %v3048_v28  ;;  %v3115_v56 = vld [vmem:[%s8193_s18 + $0x578] sm:$0xff]  ;;  %v3081_v28 = vld [vmem:[%s8193_s18 + $0x468] sm:$0xff] }
0x269e   :  { %3296 = vmatpush.msra.mxu1 %v3015_v30  ;;  %3365 = vmatpush.msrb.mxu0 %v3063_v32  ;;  %v3129_v30 = vld [vmem:[%s8193_s18 + $0x5e8] sm:$0xff]  ;;  %v3098_v32 = vld [vmem:[%s8193_s18 + $0x4f0] sm:$0xff] }
0x269f   :  { %3319 = vmatpush.msrb.mxu2 %v3031_v51  ;;  %3342 = vmatpush.msrb.mxu3 %v3047_v17  ;;  %v3114_v51 = vld [vmem:[%s8193_s18 + $0x570] sm:$0xff]  ;;  %v3080_v17 = vld [vmem:[%s8193_s18 + $0x460] sm:$0xff] }
0x26a0   :  { %3297 = vmatpush.msra.mxu1 %v3014_v40  ;;  %3366 = vmatpush.msrb.mxu0 %v3062_v41  ;;  %v3128_v40 = vld [vmem:[%s8193_s18 + $0x5e0] sm:$0xff]  ;;  %v3097_v41 = vld [vmem:[%s8193_s18 + $0x4e8] sm:$0xff] }
0x26a1   :  { %3320 = vmatpush.msrb.mxu2 %v3030_v43  ;;  %3343 = vmatpush.msrb.mxu3 %v3046_v9  ;;  %v3113_v43 = vld [vmem:[%s8193_s18 + $0x568] sm:$0xff]  ;;  %v3079_v9 = vld [vmem:[%s8193_s18 + $0x458] sm:$0xff] }
0x26a2   :  { %3298 = vmatpush.msra.mxu1 %v3013_v44  ;;  %3367 = vmatpush.msrb.mxu0 %v3061_v39  ;;  %v3127_v44 = vld [vmem:[%s8193_s18 + $0x5d8] sm:$0xff]  ;;  %v3096_v39 = vld [vmem:[%s8193_s18 + $0x4e0] sm:$0xff] }
0x26a3   :  { %3321 = vmatpush.msrb.mxu2 %v3029_v47  ;;  %3344 = vmatpush.msrb.mxu3 %v3045_v49  ;;  %v3112_v47 = vld [vmem:[%s8193_s18 + $0x560] sm:$0xff]  ;;  %v3078_v49 = vld [vmem:[%s8193_s18 + $0x450] sm:$0xff] }
0x26a4   :  { %3299 = vmatpush.msra.mxu1 %v3012_v52  ;;  %3368 = vmatpush.msrb.mxu0 %v3060_v55  ;;  %v3126_v52 = vld [vmem:[%s8193_s18 + $0x5d0] sm:$0xff]  ;;  %v3095_v55 = vld [vmem:[%s8193_s18 + $0x4d8] sm:$0xff] }
0x26a5   :  { %3322 = vmatpush.msrb.mxu2 %v3028_v57  ;;  %3345 = vmatpush.msrb.mxu3 %v3044_v58  ;;  %v3111_v57 = vld [vmem:[%s8193_s18 + $0x558] sm:$0xff]  ;;  %v3077_v58 = vld [vmem:[%s8193_s18 + $0x448] sm:$0xff] }
0x26a6   :  { %3300 = vmatpush.msra.mxu1 %v3011_v37  ;;  %3369 = vmatpush.msrb.mxu0 %v3059_v0  ;;  %v3125_v37 = vld [vmem:[%s8193_s18 + $0x5c8] sm:$0xff]  ;;  %v3094_v0 = vld [vmem:[%s8193_s18 + $0x4d0] sm:$0xff] }
0x26a7   :  { %3323 = vmatpush.msrb.mxu2 %v3027_v6  ;;  %3346 = vmatpush.msrb.mxu3 %v3043_v2  ;;  %v3110_v6 = vld [vmem:[%s8193_s18 + $0x550] sm:$0xff]  ;;  %v3076_v2 = vld [vmem:[%s8193_s18 + $0x440] sm:$0xff] }
0x26a8   :  { %3301 = vmatpush.msra.mxu1 %v3010_v3  ;;  %3370 = vmatpush.msrb.mxu0 %v3058_v4  ;;  %v3124_v3 = vld [vmem:[%s8193_s18 + $0x5c0] sm:$0xff]  ;;  %v3093_v4 = vld [vmem:[%s8193_s18 + $0x4c8] sm:$0xff] }
0x26a9   :  { %3324 = vmatpush.msrb.mxu2 %v3026_v5  ;;  %3347 = vmatpush.msrb.mxu3 %v3042_v8  ;;  %v3109_v5 = vld [vmem:[%s8193_s18 + $0x548] sm:$0xff]  ;;  %v3075_v8 = vld [vmem:[%s8193_s18 + $0x438] sm:$0xff] }
0x26aa   :  { %3302 = vmatpush.msra.mxu1 %v3009_v10  ;;  %3371 = vmatpush.msrb.mxu0 %v3057_v7  ;;  %v3123_v10 = vld [vmem:[%s8193_s18 + $0x5b8] sm:$0xff]  ;;  %v3092_v7 = vld [vmem:[%s8193_s18 + $0x4c0] sm:$0xff] }
0x26ab   :  { %3325 = vmatpush.msrb.mxu2 %v3025_v11  ;;  %3348 = vmatpush.msrb.mxu3 %v3041_v12  ;;  %v3108_v11 = vld [vmem:[%s8193_s18 + $0x540] sm:$0xff]  ;;  %v3074_v12 = vld [vmem:[%s8193_s18 + $0x430] sm:$0xff] }
0x26ac   :  { %3303 = vmatpush.msra.mxu1 %v3008_v13  ;;  %3372 = vmatpush.msrb.mxu0 %v3056_v15  ;;  %v3122_v13 = vld [vmem:[%s8193_s18 + $0x5b0] sm:$0xff]  ;;  %v3091_v15 = vld [vmem:[%s8193_s18 + $0x4b8] sm:$0xff] }
0x26ad   :  { %3326 = vmatpush.msrb.mxu2 %v3024_v1  ;;  %3349 = vmatpush.msrb.mxu3 %v3040_v16  ;;  %v3107_v1 = vld [vmem:[%s8193_s18 + $0x538] sm:$0xff]  ;;  %v3073_v16 = vld [vmem:[%s8193_s18 + $0x428] sm:$0xff] }
0x26ae   :  { %3304 = vmatpush.msra.mxu1 %v3007_v45  ;;  %3373 = vmatpush.msrb.mxu0 %v3055_v46  ;;  %v3121_v45 = vld [vmem:[%s8193_s18 + $0x5a8] sm:$0xff]  ;;  %v3090_v46 = vld [vmem:[%s8193_s18 + $0x4b0] sm:$0xff] }
0x26af   :  { %3327 = vmatpush.msrb.mxu2 %v3023_v48  ;;  %3350 = vmatpush.msrb.mxu3 %v3039_v19  ;;  %v3106_v48 = vld [vmem:[%s8193_s18 + $0x530] sm:$0xff]  ;;  %v3072_v19 = vld [vmem:[%s8193_s18 + $0x420] sm:$0xff] }
0x26b0   :  { %3305 = vmatpush.msra.mxu1 %v3006_v21  ;;  %3374 = vmatpush.msrb.mxu0 %v3054_v60  ;;  %v3120_v21 = vld [vmem:[%s8193_s18 + $0x5a0] sm:$0xff]  ;;  %v3089_v60 = vld [vmem:[%s8193_s18 + $0x4a8] sm:$0xff] }
0x26b1   :  { %3328 = vmatpush.msrb.mxu2 %v3022_v23  ;;  %3351 = vmatpush.msrb.mxu3 %v3038_v24  ;;  %v3105_v23 = vld [vmem:[%s8193_s18 + $0x528] sm:$0xff]  ;;  %v3071_v24 = vld [vmem:[%s8193_s18 + $0x418] sm:$0xff] }
0x26b2   :  { %3306 = vmatpush.msra.mxu1 %v3005_v25  ;;  %3375 = vmatpush.msrb.mxu0 %v3053_v26  ;;  %v3119_v25 = vld [vmem:[%s8193_s18 + $0x598] sm:$0xff]  ;;  %v3088_v26 = vld [vmem:[%s8193_s18 + $0x4a0] sm:$0xff] }
0x26b3   :  { %3329 = vmatpush.msrb.mxu2 %v3021_v29  ;;  %3352 = vmatpush.msrb.mxu3 %v3037_v22  ;;  %v3104_v29 = vld [vmem:[%s8193_s18 + $0x520] sm:$0xff]  ;;  %v3070_v22 = vld [vmem:[%s8193_s18 + $0x410] sm:$0xff] }
0x26b4   :  { %3307 = vmatpush.msra.mxu1 %v3004_v42  ;;  %3376 = vmatpush.msrb.mxu0 %v3052_v14  ;;  %v3118_v42 = vld [vmem:[%s8193_s18 + $0x590] sm:$0xff]  ;;  %v3087_v14 = vld [vmem:[%s8193_s18 + $0x498] sm:$0xff] }
0x26b5   :  { %3330 = vmatpush.msrb.mxu2 %v3020_v34  ;;  %3353 = vmatpush.msrb.mxu3 %v3036_v53  ;;  %v3117_v34 = vld [vmem:[%s8193_s18 + $0x588] sm:$0xff]  ;;  %v3086_v53 = vld [vmem:[%s8193_s18 + $0x490] sm:$0xff] }
0x26b6   :  { %3384 = vmatpush.msrb.mxu1 %v3083_v31  ;;  %3453 = vmatpush.msra.mxu0 %v3131_v33  ;;  %v3103_v31 = vld [vmem:[%s8193_s18 + $0x518] sm:$0xff]  ;;  %v3069_v33 = vld [vmem:[%s8193_s18 + $0x408] sm:$0xff] }
0x26b7   :  { %3407 = vmatpush.msra.mxu2 %v3099_v38  ;;  %3430 = vmatpush.msra.mxu3 %v3115_v56  ;;  %v3116_v38 = vld [vmem:[%s8193_s18 + $0x580] sm:$0xff] }
0x26b8   :  { %3385 = vmatpush.msrb.mxu1 %v3082_v35  ;;  %3454 = vmatpush.msra.mxu0 %v3130_v36  ;;  %v3102_v35 = vld [vmem:[%s8193_s18 + $0x510] sm:$0xff]  ;;  %v3068_v36 = vld [vmem:[%s8193_s18 + $0x400] sm:$0xff] }
0x26b9   :  { %3408 = vmatpush.msra.mxu2 %v3098_v32  ;;  %3431 = vmatpush.msra.mxu3 %v3114_v51 }
0x26ba   :  { %3386 = vmatpush.msrb.mxu1 %v3081_v28  ;;  %3455 = vmatpush.msra.mxu0 %v3129_v30  ;;  %v3085_v28 = vld [vmem:[%s8193_s18 + $0x488] sm:$0xff] }
0x26bb   :  { %3409 = vmatpush.msra.mxu2 %v3097_v41  ;;  %3432 = vmatpush.msra.mxu3 %v3113_v43  ;;  %v3101_v30 = vld [vmem:[%s8193_s18 + $0x508] sm:$0xff]  ;;  %v3100_v43 = vld [vmem:[%s8193_s18 + $0x500] sm:$0xff] }
0x26bc   :  { %3387 = vmatpush.msrb.mxu1 %v3080_v17  ;;  %3456 = vmatpush.msra.mxu0 %v3128_v40  ;;  %v3084_v40 = vld [vmem:[%s8193_s18 + $0x480] sm:$0xff] }
0x26bd   :  { %3410 = vmatpush.msra.mxu2 %v3096_v39  ;;  %3433 = vmatpush.msra.mxu3 %v3112_v47  ;;  %v2509_v39 = vperm.slane %v7263_v20, 7 }
0x26be   :  { %3388 = vmatpush.msrb.mxu1 %v3079_v9  ;;  %3457 = vmatpush.msra.mxu0 %v3127_v44  ;;  %v2506_v44 = vperm.slane %v7263_v20, 4 }
0x26bf   :  { %3411 = vmatpush.msra.mxu2 %v3095_v55  ;;  %3434 = vmatpush.msra.mxu3 %v3111_v57 }
0x26c0   :  { %3389 = vmatpush.msrb.mxu1 %v3078_v49  ;;  %3458 = vmatpush.msra.mxu0 %v3126_v52 }
0x26c1   :  { %3412 = vmatpush.msra.mxu2 %v3094_v0  ;;  %3435 = vmatpush.msra.mxu3 %v3110_v6 }
0x26c2   :  { %3390 = vmatpush.msrb.mxu1 %v3077_v58  ;;  %3459 = vmatpush.msra.mxu0 %v3125_v37 }
0x26c3   :  { %3413 = vmatpush.msra.mxu2 %v3093_v4  ;;  %3436 = vmatpush.msra.mxu3 %v3109_v5  ;;  %v2508_v4 = vperm.slane %v7263_v20, 6  ;;  %v3146_v5 = vld [vmem:[%s8193_s18 + $0x670] sm:$0xff] }
0x26c4   :  { %3391 = vmatpush.msrb.mxu1 %v3076_v2  ;;  %3460 = vmatpush.msra.mxu0 %v3124_v3  ;;  %v2507_v2 = vperm.slane %v7263_v20, 5  ;;  %v3147_v3 = vld [vmem:[%s8193_s18 + $0x678] sm:$0xff]  ;;  %v3193_v20 = vld [vmem:[%s8193_s18 + $0x7e8] sm:$0xff] }
0x26c5   :  { %3414 = vmatpush.msra.mxu2 %v3092_v7  ;;  %3437 = vmatpush.msra.mxu3 %v3108_v11 }
0x26c6   :  { %3392 = vmatpush.msrb.mxu1 %v3075_v8  ;;  %3461 = vmatpush.msra.mxu0 %v3123_v10  ;;  %v3194_v10 = vld [vmem:[%s8193_s18 + $0x7f0] sm:$0xff] }
0x26c7   :  { %3415 = vmatpush.msra.mxu2 %v3091_v15  ;;  %3438 = vmatpush.msra.mxu3 %v3107_v1 }
0x26c8   :  { %3393 = vmatpush.msrb.mxu1 %v3074_v12  ;;  %3462 = vmatpush.msra.mxu0 %v3122_v13  ;;  %v3145_v12 = vld [vmem:[%s8193_s18 + $0x668] sm:$0xff] }
0x26c9   :  { %3416 = vmatpush.msra.mxu2 %v3090_v46  ;;  %3439 = vmatpush.msra.mxu3 %v3106_v48  ;;  %v3144_v46 = vld [vmem:[%s8193_s18 + $0x660] sm:$0xff] }
0x26ca   :  { %3394 = vmatpush.msrb.mxu1 %v3073_v16  ;;  %3463 = vmatpush.msra.mxu0 %v3121_v45 }
0x26cb   :  { %3417 = vmatpush.msra.mxu2 %v3089_v60  ;;  %3440 = vmatpush.msra.mxu3 %v3105_v23  ;;  %v3179_v60 = vld [vmem:[%s8193_s18 + $0x778] sm:$0xff]  ;;  %v7451_v23 = vld [vmem:[%s8194_s22 + $0x8] sm:$0xff] }
0x26cc   :  { %3395 = vmatpush.msrb.mxu1 %v3072_v19  ;;  %3464 = vmatpush.msra.mxu0 %v3120_v21  ;;  %v3163_v21 = vld [vmem:[%s8193_s18 + $0x6f8] sm:$0xff] }
0x26cd   :  { %3418 = vmatpush.msra.mxu2 %v3088_v26  ;;  %3441 = vmatpush.msra.mxu3 %v3104_v29  ;;  %v3143_v29 = vld [vmem:[%s8193_s18 + $0x658] sm:$0xff] }
0x26ce   :  { %3396 = vmatpush.msrb.mxu1 %v3071_v24  ;;  %3465 = vmatpush.msra.mxu0 %v3119_v25  ;;  %v3192_v24 = vld [vmem:[%s8193_s18 + $0x7e0] sm:$0xff] }
0x26cf   :  { %3419 = vmatpush.msra.mxu2 %v3087_v14  ;;  %3442 = vmatpush.msra.mxu3 %v3103_v31  ;;  %v2510_v14 = vperm.slane %v7451_v23, 0 }
0x26d0   :  { %3397 = vmatpush.msrb.mxu1 %v3070_v22  ;;  %3466 = vmatpush.msra.mxu0 %v3118_v42  ;;  %v3162_v22 = vld [vmem:[%s8193_s18 + $0x6f0] sm:$0xff] }
0x26d1   :  { %v2560_v56 = vpop.f32.mrf.mxu1  ;;  %3420 = vmatpush.msra.mxu2 %v3086_v53  ;;  %3443 = vmatpush.msra.mxu3 %v3102_v35  ;;  %v3178_v42 = vld [vmem:[%s8193_s18 + $0x770] sm:$0xff] }
0x26d2   :  { %3398 = vmatpush.msrb.mxu1 %v3069_v33  ;;  %3467 = vmatpush.msra.mxu0 %v3117_v34  ;;  %v2561_v32 = vadd.f32 %v2560_v56, %v2502_v50  ;;  %v2629_v51 = vpop.f32.mrf.mxu0  ;;  %v3191_v33 = vld [vmem:[%s8193_s18 + $0x7d8] sm:$0xff]  ;;  %v2513_v34 = vperm.slane %v7451_v23, 3  ;;  %v3142_v53 = vld [vmem:[%s8193_s18 + $0x650] sm:$0xff]  ;;  %v3177_v56 = vld [vmem:[%s8193_s18 + $0x768] sm:$0xff] }
0x26d3   :  { %v2630_v17 = vadd.f32 %v2629_v51, %v2505_v63  ;;  %3421 = vmatpush.msra.mxu2 %v3085_v28  ;;  %3444 = vmatpush.msra.mxu3 %v3101_v30  ;;  %v3141_v51 = vld [vmem:[%s8193_s18 + $0x648] sm:$0xff] }
0x26d4   :  { %3399 = vmatpush.msrb.mxu1 %v3068_v36  ;;  %3468 = vmatpush.msra.mxu0 %v3116_v38  ;;  %v2924_v41 = vmax.f32 %v2561_v32, 0.0  ;;  %v3161_v38 = vld [vmem:[%s8193_s18 + $0x6e8] sm:$0xff]  ;;  %v3190_v32 = vld [vmem:[%s8193_s18 + $0x7d0] sm:$0xff] }
0x26d5   :  { %v2927_v9 = vmax.f32 %v2630_v17, 0.0  ;;  %3422 = vmatpush.msra.mxu2 %v3084_v40  ;;  %3445 = vmatpush.msra.mxu3 %v3100_v43  ;;  %v3176_v43 = vld [vmem:[%s8193_s18 + $0x760] sm:$0xff] }
0x26d6   :  { %3219 = vmatmul.f32.gmra.mxu1 %v2924_v41  ;;  %v3160_v41 = vld [vmem:[%s8193_s18 + $0x6e0] sm:$0xff] }
0x26d7   :  { %3288 = vmatmul.f32.gmra.mxu0 %v2927_v9  ;;  %v2583_v50 = vpop.f32.mrf.mxu2 }
0x26d8   :  { %v2584_v63 = vadd.f32 %v2583_v50, %v2503_v54  ;;  %v2606_v47 = vpop.f32.mrf.mxu3  ;;  %v3189_v50 = vld [vmem:[%s8193_s18 + $0x7c8] sm:$0xff] }
0x26d9   :  { %v2607_v49 = vadd.f32 %v2606_v47, %v2504_v59  ;;  %v2649_v52 = vpop.f32.mrf.mxu1  ;;  %v3195_v59 = vld [vmem:[%s8193_s18 + $0x7f8] sm:$0xff]  ;;  %v2511_v47 = vperm.slane %v7451_v23, 1 }
0x26da   :  { %v2650_v55 = vadd.f32 %v2649_v52, %v2506_v44  ;;  %v2718_v57 = vpop.f32.mrf.mxu0  ;;  %v2925_v58 = vmax.f32 %v2584_v63, 0.0  ;;  %v3140_v63 = vld [vmem:[%s8193_s18 + $0x640] sm:$0xff]  ;;  %v3159_v52 = vld [vmem:[%s8193_s18 + $0x6d8] sm:$0xff] }
0x26db   :  { %v2719_v37 = vadd.f32 %v2718_v57, %v2509_v39  ;;  %v2926_v0 = vmax.f32 %v2607_v49, 0.0  ;;  %v2512_v57 = vperm.slane %v7451_v23, 2 }
0x26dc   :  { %v2912_v6 = vmax.f32 %v2650_v55, 0.0  ;;  %3242 = vmatmul.f32.gmra.mxu2 %v2925_v58  ;;  %v3175_v55 = vld [vmem:[%s8193_s18 + $0x758] sm:$0xff] }
0x26dd   :  { %v2915_v54 = vmax.f32 %v2719_v37, 0.0  ;;  %3265 = vmatmul.f32.gmra.mxu3 %v2926_v0  ;;  %v3188_v37 = vld [vmem:[%s8193_s18 + $0x7c0] sm:$0xff] }
0x26de   :  { %3308 = vmatmul.f32.vlgmr.msra.gmra.mxu1 %v2912_v6  ;;  %v3139_v6 = vld [vmem:[%s8193_s18 + $0x638] sm:$0xff] }
0x26df   :  { %3377 = vmatmul.f32.vlgmr.msrb.gmra.mxu0 %v2915_v54  ;;  %v2672_v8 = vpop.f32.mrf.mxu2  ;;  %3476 = vmatpush.msra.mxu1 %v3147_v3  ;;  %v3158_v54 = vld [vmem:[%s8193_s18 + $0x6d0] sm:$0xff] }
0x26e0   :  { %v2673_v7 = vadd.f32 %v2672_v8, %v2507_v2  ;;  %v2695_v11 = vpop.f32.mrf.mxu3  ;;  %3545 = vmatpush.msrb.mxu0 %v3195_v59  ;;  %v3138_v8 = vld [vmem:[%s8193_s18 + $0x630] sm:$0xff] }
0x26e1   :  { %v2696_v13 = vadd.f32 %v2695_v11, %v2508_v4  ;;  %v2652_v15 = vpop.f32.mrf.mxu1  ;;  %3477 = vmatpush.msra.mxu1 %v3146_v5  ;;  %v3187_v5 = vld [vmem:[%s8193_s18 + $0x7b8] sm:$0xff] }
0x26e2   :  { %v2913_v1 = vmax.f32 %v2673_v7, 0.0  ;;  %v2653_v16 = vadd.f32 %v2652_v15, %v2506_v44  ;;  %v2721_v45 = vpop.f32.mrf.mxu0  ;;  %3546 = vmatpush.msrb.mxu0 %v3194_v10  ;;  %v3157_v10 = vld [vmem:[%s8193_s18 + $0x6c8] sm:$0xff] }
0x26e3   :  { %v2914_v48 = vmax.f32 %v2696_v13, 0.0  ;;  %v2722_v19 = vadd.f32 %v2721_v45, %v2509_v39  ;;  %3478 = vmatpush.msra.mxu1 %v3145_v12  ;;  %v3173_v7 = vld [vmem:[%s8193_s18 + $0x748] sm:$0xff]  ;;  %v3186_v12 = vld [vmem:[%s8193_s18 + $0x7b0] sm:$0xff]  ;;  %v3172_v45 = vld [vmem:[%s8193_s18 + $0x740] sm:$0xff] }
0x26e4   :  { %3547 = vmatpush.msrb.mxu0 %v3193_v20  ;;  %3331 = vmatmul.f32.vlgmr.msrb.gmra.mxu2 %v2913_v1  ;;  %v2928_v25 = vmax.f32 %v2653_v16, 0.0  ;;  %v3137_v13 = vld [vmem:[%s8193_s18 + $0x628] sm:$0xff]  ;;  %v3156_v16 = vld [vmem:[%s8193_s18 + $0x6c0] sm:$0xff] }
0x26e5   :  { %v2931_v26 = vmax.f32 %v2722_v19, 0.0  ;;  %3354 = vmatmul.f32.vlgmr.msrb.gmra.mxu3 %v2914_v48  ;;  %3479 = vmatpush.msra.mxu1 %v3144_v46  ;;  %v3185_v19 = vld [vmem:[%s8193_s18 + $0x7a8] sm:$0xff] }
0x26e6   :  { %3499 = vmatpush.msrb.mxu2 %v3163_v21  ;;  %3522 = vmatpush.msrb.mxu3 %v3179_v60  ;;  %v3136_v21 = vld [vmem:[%s8193_s18 + $0x620] sm:$0xff] }
0x26e7   :  { %3548 = vmatpush.msrb.mxu0 %v3192_v24  ;;  %3311 = vmatmul.f32.gmra.mxu1 %v2928_v25  ;;  %v2675_v31 = vpop.f32.mrf.mxu2  ;;  %v3155_v24 = vld [vmem:[%s8193_s18 + $0x6b8] sm:$0xff] }
0x26e8   :  { %3380 = vmatmul.f32.gmra.mxu0 %v2931_v26  ;;  %v2676_v35 = vadd.f32 %v2675_v31, %v2507_v2  ;;  %v2698_v36 = vpop.f32.mrf.mxu3  ;;  %3480 = vmatpush.msra.mxu1 %v3143_v29  ;;  %v3171_v25 = vld [vmem:[%s8193_s18 + $0x738] sm:$0xff]  ;;  %v3184_v29 = vld [vmem:[%s8193_s18 + $0x7a0] sm:$0xff] }
0x26e9   :  { %v2699_v28 = vadd.f32 %v2698_v36, %v2508_v4  ;;  %3500 = vmatpush.msrb.mxu2 %v3162_v22  ;;  %3523 = vmatpush.msrb.mxu3 %v3178_v42  ;;  %v2741_v30 = vpop.f32.mrf.mxu1  ;;  %v3174_v4 = vld [vmem:[%s8193_s18 + $0x750] sm:$0xff]  ;;  %v3135_v42 = vld [vmem:[%s8193_s18 + $0x618] sm:$0xff] }
0x26ea   :  { %3549 = vmatpush.msrb.mxu0 %v3191_v33  ;;  %v2742_v17 = vadd.f32 %v2741_v30, %v2510_v14  ;;  %v2810_v40 = vpop.f32.mrf.mxu0  ;;  %3481 = vmatpush.msra.mxu1 %v3142_v53  ;;  %v2929_v9 = vmax.f32 %v2676_v35, 0.0  ;;  %v3154_v33 = vld [vmem:[%s8193_s18 + $0x6b0] sm:$0xff]  ;;  %v2514_v53 = vperm.slane %v7451_v23, 4  ;;  %v3183_v36 = vld [vmem:[%s8193_s18 + $0x798] sm:$0xff]  ;;  %v3169_v30 = vld [vmem:[%s8193_s18 + $0x728] sm:$0xff] }
0x26eb   :  { %v2811_v44 = vadd.f32 %v2810_v40, %v2513_v34  ;;  %3501 = vmatpush.msrb.mxu2 %v3161_v38  ;;  %3524 = vmatpush.msrb.mxu3 %v3177_v56  ;;  %v2930_v39 = vmax.f32 %v2699_v28, 0.0  ;;  %v2517_v38 = vperm.slane %v7451_v23, 7  ;;  %v3134_v56 = vld [vmem:[%s8193_s18 + $0x610] sm:$0xff]  ;;  %v3153_v28 = vld [vmem:[%s8193_s18 + $0x6a8] sm:$0xff] }
0x26ec   :  { %3550 = vmatpush.msrb.mxu0 %v3190_v32  ;;  %3482 = vmatpush.msra.mxu1 %v3141_v51  ;;  %v2916_v49 = vmax.f32 %v2742_v17, 0.0  ;;  %v3182_v51 = vld [vmem:[%s8193_s18 + $0x790] sm:$0xff]  ;;  %v3133_v17 = vld [vmem:[%s8193_s18 + $0x608] sm:$0xff] }
0x26ed   :  { %3502 = vmatpush.msrb.mxu2 %v3160_v41  ;;  %3525 = vmatpush.msrb.mxu3 %v3176_v43  ;;  %v2919_v58 = vmax.f32 %v2811_v44, 0.0  ;;  %v3168_v44 = vld [vmem:[%s8193_s18 + $0x720] sm:$0xff] }
0x26ee   :  { %3551 = vmatpush.msrb.mxu0 %v3189_v50  ;;  %3334 = vmatmul.f32.gmra.mxu2 %v2929_v9  ;;  %v3152_v9 = vld [vmem:[%s8193_s18 + $0x6a0] sm:$0xff] }
0x26ef   :  { %3357 = vmatmul.f32.gmra.mxu3 %v2930_v39  ;;  %3483 = vmatpush.msra.mxu1 %v3140_v63  ;;  %v2764_v0 = vpop.f32.mrf.mxu2  ;;  %v3181_v63 = vld [vmem:[%s8193_s18 + $0x788] sm:$0xff] }
0x26f0   :  { %3503 = vmatpush.msrb.mxu2 %v3159_v52  ;;  %3526 = vmatpush.msrb.mxu3 %v3175_v55  ;;  %v2765_v2 = vadd.f32 %v2764_v0, %v2511_v47  ;;  %v2787_v3 = vpop.f32.mrf.mxu3  ;;  %v3151_v55 = vld [vmem:[%s8193_s18 + $0x698] sm:$0xff]  ;;  %v3180_v0 = vld [vmem:[%s8193_s18 + $0x780] sm:$0xff] }
0x26f1   :  { %3552 = vmatpush.msrb.mxu0 %v3188_v37  ;;  %3400 = vmatmul.f32.vlgmr.msrb.gmra.mxu1 %v2916_v49  ;;  %v2788_v59 = vadd.f32 %v2787_v3, %v2512_v57  ;;  %v2515_v49 = vperm.slane %v7451_v23, 5 }
0x26f2   :  { %3469 = vmatmul.f32.vlgmr.msra.gmra.mxu0 %v2919_v58  ;;  %3484 = vmatpush.msra.mxu1 %v3139_v6  ;;  %v2917_v15 = vmax.f32 %v2765_v2, 0.0  ;;  %v2516_v58 = vperm.slane %v7451_v23, 6  ;;  %v3150_v2 = vld [vmem:[%s8193_s18 + $0x690] sm:$0xff] }
0x26f3   :  { %3504 = vmatpush.msrb.mxu2 %v3158_v54  ;;  %3527 = vmatpush.msrb.mxu3 %v3174_v4  ;;  %v2744_v11 = vpop.f32.mrf.mxu1  ;;  %v2918_v46 = vmax.f32 %v2788_v59, 0.0  ;;  %v3166_v4 = vld [vmem:[%s8193_s18 + $0x710] sm:$0xff] }
0x26f4   :  { %3553 = vmatpush.msrb.mxu0 %v3187_v5  ;;  %v2745_v20 = vadd.f32 %v2744_v11, %v2510_v14  ;;  %v2813_v1 = vpop.f32.mrf.mxu0  ;;  %3485 = vmatpush.msra.mxu1 %v3138_v8  ;;  %v3149_v5 = vld [vmem:[%s8193_s18 + $0x688] sm:$0xff]  ;;  %v3148_v11 = vld [vmem:[%s8193_s18 + $0x680] sm:$0xff] }
0x26f5   :  { %v2814_v48 = vadd.f32 %v2813_v1, %v2513_v34  ;;  %3505 = vmatpush.msrb.mxu2 %v3157_v10  ;;  %3528 = vmatpush.msrb.mxu3 %v3173_v7  ;;  %v3170_v34 = vld [vmem:[%s8193_s18 + $0x730] sm:$0xff]  ;;  %v3165_v8 = vld [vmem:[%s8193_s18 + $0x708] sm:$0xff] }
0x26f6   :  { %3554 = vmatpush.msrb.mxu0 %v3186_v12  ;;  %3486 = vmatpush.msra.mxu1 %v3137_v13  ;;  %v2932_v60 = vmax.f32 %v2745_v20, 0.0  ;;  %v3164_v20 = vld [vmem:[%s8193_s18 + $0x700] sm:$0xff] }
0x26f7   :  { %3506 = vmatpush.msrb.mxu2 %v3156_v16  ;;  %3529 = vmatpush.msrb.mxu3 %v3172_v45  ;;  %v2935_v26 = vmax.f32 %v2814_v48, 0.0 }
0x26f8   :  { %3555 = vmatpush.msrb.mxu0 %v3185_v19  ;;  %3423 = vmatmul.f32.vlgmr.msra.gmra.mxu2 %v2917_v15 }
0x26f9   :  { %3446 = vmatmul.f32.vlgmr.msra.gmra.mxu3 %v2918_v46  ;;  %3487 = vmatpush.msra.mxu1 %v3136_v21  ;;  %v2767_v22 = vpop.f32.mrf.mxu2 }
0x26fa   :  { %3507 = vmatpush.msrb.mxu2 %v3155_v24  ;;  %3530 = vmatpush.msrb.mxu3 %v3171_v25  ;;  %v2768_v14 = vadd.f32 %v2767_v22, %v2511_v47  ;;  %v2790_v31 = vpop.f32.mrf.mxu3  ;;  %v3132_v47 = vld [vmem:[%s8193_s18 + $0x600] sm:$0xff] }
0x26fb   :  { %3556 = vmatpush.msrb.mxu0 %v3184_v29  ;;  %3403 = vmatmul.f32.gmra.mxu1 %v2932_v60  ;;  %v2791_v35 = vadd.f32 %v2790_v31, %v2512_v57  ;;  %v3167_v57 = vld [vmem:[%s8193_s18 + $0x718] sm:$0xff] }
0x26fc   :  { %3472 = vmatmul.f32.gmra.mxu0 %v2935_v26  ;;  %3488 = vmatpush.msra.mxu1 %v3135_v42  ;;  %v2933_v40 = vmax.f32 %v2768_v14, 0.0 }
0x26fd   :  { %3508 = vmatpush.msrb.mxu2 %v3154_v33  ;;  %3531 = vmatpush.msrb.mxu3 %v3170_v34  ;;  %v2833_v32 = vpop.f32.mrf.mxu1  ;;  %v2934_v50 = vmax.f32 %v2791_v35, 0.0  ;;  %v6157_v33 = vld [vmem:[%s8195_s23] ss:$0 sm:$0xff] }
0x26fe   :  { %3557 = vmatpush.msrb.mxu0 %v3183_v36  ;;  %v2834_v41 = vadd.f32 %v2833_v32, %v2514_v53  ;;  %v2902_v43 = vpop.f32.mrf.mxu0  ;;  %3489 = vmatpush.msra.mxu1 %v3134_v56 }
0x26ff   :  { %v2903_v39 = vadd.f32 %v2902_v43, %v2517_v38  ;;  %3509 = vmatpush.msrb.mxu2 %v3153_v28  ;;  %3532 = vmatpush.msrb.mxu3 %v3169_v30 }
0x2700   :  { %3558 = vmatpush.msrb.mxu0 %v3182_v51  ;;  %3490 = vmatpush.msra.mxu1 %v3133_v17  ;;  %v2920_v52 = vmax.f32 %v2834_v41, 0.0 }
0x2701   :  { %3510 = vmatpush.msrb.mxu2 %v3152_v9  ;;  %3533 = vmatpush.msrb.mxu3 %v3168_v44  ;;  %v2923_v37 = vmax.f32 %v2903_v39, 0.0 }
0x2702   :  { %3559 = vmatpush.msrb.mxu0 %v3181_v63  ;;  %3426 = vmatmul.f32.gmra.mxu2 %v2933_v40 }
0x2703   :  { %3449 = vmatmul.f32.gmra.mxu3 %v2934_v50  ;;  %3491 = vmatpush.msra.mxu1 %v3132_v47  ;;  %v2856_v6 = vpop.f32.mrf.mxu2 }
0x2704   :  { %3511 = vmatpush.msrb.mxu2 %v3151_v55  ;;  %3534 = vmatpush.msrb.mxu3 %v3167_v57  ;;  %v2857_v3 = vadd.f32 %v2856_v6, %v2515_v49  ;;  %v2879_v54 = vpop.f32.mrf.mxu3 }
0x2705   :  { %3560 = vmatpush.msrb.mxu0 %v3180_v0  ;;  %3492 = vmatmul.f32.vlgmr.msra.gmra.mxu1 %v2920_v52  ;;  %v2880_v59 = vadd.f32 %v2879_v54, %v2516_v58 }
0x2706   :  { %3561 = vmatmul.f32.vlgmr.msrb.gmra.mxu0 %v2923_v37  ;;  %3512 = vmatpush.msrb.mxu2 %v3150_v2  ;;  %v2921_v10 = vmax.f32 %v2857_v3, 0.0 }
0x2707   :  { %3535 = vmatpush.msrb.mxu3 %v3166_v4  ;;  %v2836_v7 = vpop.f32.mrf.mxu1  ;;  %v2922_v12 = vmax.f32 %v2880_v59, 0.0 }
0x2708   :  { %v2837_v13 = vadd.f32 %v2836_v7, %v2514_v53  ;;  %v2905_v15 = vpop.f32.mrf.mxu0  ;;  %3513 = vmatpush.msrb.mxu2 %v3149_v5 }
0x2709   :  { %v2906_v1 = vadd.f32 %v2905_v15, %v2517_v38  ;;  %3536 = vmatpush.msrb.mxu3 %v3165_v8 }
0x270a   :  { %v2936_v16 = vmax.f32 %v2837_v13, 0.0  ;;  %3514 = vmatpush.msrb.mxu2 %v3148_v11 }
0x270b   :  { %v2939_v45 = vmax.f32 %v2906_v1, 0.0  ;;  %3537 = vmatpush.msrb.mxu3 %v3164_v20  ;;  %3515 = vmatmul.f32.vlgmr.msrb.gmra.mxu2 %v2921_v10 }
0x270c   :  { %3538 = vmatmul.f32.vlgmr.msrb.gmra.mxu3 %v2922_v12 }
0x270d   :  { %3495 = vmatmul.f32.gmra.mxu1 %v2936_v16  ;;  %v2859_v46 = vpop.f32.mrf.mxu2 }
0x270e   :  { %3564 = vmatmul.f32.gmra.mxu0 %v2939_v45  ;;  %v2860_v48 = vadd.f32 %v2859_v46, %v2515_v49  ;;  %v2882_v19 = vpop.f32.mrf.mxu3 }
0x270f   :  { %v2883_v21 = vadd.f32 %v2882_v19, %v2516_v58 }
0x2710   :  { %v2937_v23 = vmax.f32 %v2860_v48, 0.0 }
0x2711   :  { %v2938_v60 = vmax.f32 %v2883_v21, 0.0  ;;  %v3217_v24 = vpop.f32.mrf.mxu1 }
0x2712   :  { %v3286_v25 = vpop.f32.mrf.mxu0  ;;  %v3218_v53 = vadd.f32 %v6157_v33, %v3217_v24 }
0x2713   :  { %3518 = vmatmul.f32.gmra.mxu2 %v2937_v23 }
0x2714   :  { %3541 = vmatmul.f32.gmra.mxu3 %v2938_v60 }
0x2717   :  { %v3240_v26 = vpop.f32.mrf.mxu2 }
0x2718   :  { %v3263_v29 = vpop.f32.mrf.mxu3  ;;  %v3241_v35 = vadd.f32 %v3240_v26, %v3218_v53 }
0x271a   :  { %v3264_v28 = vadd.f32 %v3263_v29, %v3241_v35 }
0x271c   :  { %v3287_v17 = vadd.f32 %v3286_v25, %v3264_v28 }
0x2753   :  { %v3220_v22 = vpop.f32.mrf.mxu1 }
0x2754   :  { %v3289_v42 = vpop.f32.mrf.mxu0  ;;  %v3221_v30 = vadd.f32 %v6157_v33, %v3220_v22 }
0x275b   :  { %v3309_v34 = vpop.f32.mrf.mxu1 }
0x275c   :  { %v3378_v38 = vpop.f32.mrf.mxu0  ;;  %v3310_v40 = vadd.f32 %v3309_v34, %v3287_v17 }
0x275f   :  { %v3243_v14 = vpop.f32.mrf.mxu2 }
0x2760   :  { %v3266_v31 = vpop.f32.mrf.mxu3  ;;  %v3244_v51 = vadd.f32 %v3243_v14, %v3221_v30 }
0x2762   :  { %v3267_v41 = vadd.f32 %v3266_v31, %v3244_v51 }
0x2764   :  { %v3312_v32 = vpop.f32.mrf.mxu1  ;;  %v3290_v39 = vadd.f32 %v3289_v42, %v3267_v41 }
0x2765   :  { %v3381_v9 = vpop.f32.mrf.mxu0 }
0x2766   :  { %v3313_v49 = vadd.f32 %v3312_v32, %v3290_v39 }
0x2767   :  { %v3332_v36 = vpop.f32.mrf.mxu2 }
0x2768   :  { %v3355_v56 = vpop.f32.mrf.mxu3  ;;  %v3333_v50 = vadd.f32 %v3332_v36, %v3310_v40 }
0x276a   :  { %v3356_v47 = vadd.f32 %v3355_v56, %v3333_v50 }
0x276c   :  { %v3379_v52 = vadd.f32 %v3378_v38, %v3356_v47 }
0x276e   :  { %v3401_v63 = vpop.f32.mrf.mxu1 }
0x276f   :  { %v3470_v58 = vpop.f32.mrf.mxu0  ;;  %v3402_v0 = vadd.f32 %v3401_v63, %v3379_v52 }
0x2771   :  { %v3335_v43 = vpop.f32.mrf.mxu2 }
0x2772   :  { %v3358_v44 = vpop.f32.mrf.mxu3  ;;  %v3336_v55 = vadd.f32 %v3335_v43, %v3313_v49 }
0x2774   :  { %v3359_v6 = vadd.f32 %v3358_v44, %v3336_v55 }
0x2776   :  { %v3382_v54 = vadd.f32 %v3381_v9, %v3359_v6 }
0x2778   :  { %v3404_v2 = vpop.f32.mrf.mxu1 }
0x2779   :  { %v3473_v5 = vpop.f32.mrf.mxu0  ;;  %v3405_v10 = vadd.f32 %v3404_v2, %v3382_v54 }
0x277b   :  { %v3424_v57 = vpop.f32.mrf.mxu2 }
0x277c   :  { %v3447_v37 = vpop.f32.mrf.mxu3  ;;  %v3425_v3 = vadd.f32 %v3424_v57, %v3402_v0  ;;  %v6158_v57 = vld [vmem:[%s8197_s28] ss:$0 sm:$0xff] }
0x277d   :  { %v6159_v0 = vld [vmem:[%s8198_s1] ss:$0 sm:$0xff] }
0x277e   :  { %v3448_v4 = vadd.f32 %v3447_v37, %v3425_v3 }
0x2780   :  { %v3471_v7 = vadd.f32 %v3470_v58, %v3448_v4 }
0x2782   :  { %v3493_v12 = vpop.f32.mrf.mxu1 }
0x2783   :  { %v3494_v13 = vadd.f32 %v3493_v12, %v3471_v7  ;;  %v3562_v45 = vpop.f32.mrf.mxu0 }
0x2785   :  { %v3427_v59 = vpop.f32.mrf.mxu2 }
0x2786   :  { %v3450_v8 = vpop.f32.mrf.mxu3  ;;  %v3428_v11 = vadd.f32 %v3427_v59, %v3405_v10 }
0x2788   :  { %v3451_v15 = vadd.f32 %v3450_v8, %v3428_v11  ;;  %v6160_v11 = vld [vmem:[%s8199_s2] ss:$0 sm:$0xff] }
0x278a   :  { %v3474_v46 = vadd.f32 %v3473_v5, %v3451_v15  ;;  %v3496_v21 = vpop.f32.mrf.mxu1 }
0x278b   :  { %v3565_v42 = vpop.f32.mrf.mxu0 }
0x278c   :  { %v3497_v23 = vadd.f32 %v3496_v21, %v3474_v46 }
0x278e   :  { %v3516_v20 = vpop.f32.mrf.mxu2 }
0x278f   :  { %v3517_v1 = vadd.f32 %v3516_v20, %v3494_v13  ;;  %v3539_v16 = vpop.f32.mrf.mxu3 }
0x2791   :  { %v3540_v48 = vadd.f32 %v3539_v16, %v3517_v1 }
0x2793   :  { %v3563_v19 = vadd.f32 %v3562_v45, %v3540_v48 }
0x2795   :  { %v3568_v60 = vadd.f32 %v3563_v19, %v7135_v18 }
0x2796   :  { %v3519_v24 = vpop.f32.mrf.mxu2 }
0x2797   :  { %v3520_v25 = vadd.f32 %v3519_v24, %v3497_v23  ;;  %v3572_v26 = vsel %vm194_vm0, %v3568_v60, 0.0  ;;  %v3542_v29 = vpop.f32.mrf.mxu3 }
0x2798   :  { %3573 = vadd.xlane.f32.xlu0 %v3572_v26 }
0x2799   :  { %v3543_v22 = vadd.f32 %v3542_v29, %v3520_v25 }
0x279b   :  { %v3566_v14 = vadd.f32 %v3565_v42, %v3543_v22 }
0x279d   :  { %v3569_v31 = vadd.f32 %v3566_v14, %v7160_v61  ;;  %v3626_v61 = vld [vmem:[%s8196_s26] sm:$0xff] }
0x279e   :  { %3652 = vmatpush.msrb.mxu1 %v3626_v61 }
0x279f   :  { %v3575_v33 = vsel %vm194_vm0, %v3569_v31, 0.0 }
0x27a0   :  { %3576 = vadd.xlane.f32.xlu1 %v3575_v33 }
0x280b   :  { %v3574_v34 = vpop.xlane.xlu0 %3573 }
0x280c   :  { %v3578_v53 = vmul.f32 %v3574_v34, %v7120_v62 }
0x280e   :  { %v3580_v35 = vsub.f32 %v3568_v60, %v3578_v53 }
0x2810   :  { %v3582_v18 = vmul.f32 %v3580_v35, %v3580_v35 }
0x2812   :  { %v3584_v36 = vsel %vm194_vm0, %v3582_v18, 0.0 }
0x2813   :  { %3585 = vadd.xlane.f32.xlu2 %v3584_v36  ;;  %v3577_v38 = vpop.xlane.xlu1 %3576 }
0x2814   :  { %v3579_v56 = vmul.f32 %v3577_v38, %v7120_v62 }
0x2816   :  { %v3581_v28 = vsub.f32 %v3569_v31, %v3579_v56 }
0x2818   :  { %v3583_v30 = vmul.f32 %v3581_v28, %v3581_v28 }
0x281a   :  { %v3587_v32 = vsel %vm194_vm0, %v3583_v30, 0.0 }
0x281b   :  { %3588 = vadd.xlane.f32.xlu0 %v3587_v32 }
0x2886   :  { %v3586_v51 = vpop.xlane.xlu2 %3585 }
0x2887   :  { %v3590_v17 = vmul.f32 %v3586_v51, %v7120_v62 }
0x2889   :  { %v3592_v40 = vadd.f32 1e-05, %v3590_v17 }
0x288b   :  { %6339 = vrsqrt.f32 %v3592_v40  ;;  %vm3600_vm14 = vweird.f32 %v3592_v40 }
0x288e   :  { %v3589_v41 = vpop.xlane.xlu0 %3588 }
0x288f   :  { %v3591_v43 = vmul.f32 %v3589_v41, %v7120_v62 }
0x2891   :  { %v6340_v9 = vpop.eup %6339  ;;  %v3593_v44 = vadd.f32 1e-05, %v3591_v43 }
0x2892   :  { %v3595_v50 = vmul.f32 %v6340_v9, %v3592_v40  ;;  %vm3601_vm13 = vweird.f32 %v6340_v9 }
0x2893   :  { %6341 = vrsqrt.f32 %v3593_v44  ;;  %vm3602_vm15 = vmor %vm3600_vm14, %vm3601_vm13  ;;  %vm3610_vm2 = vweird.f32 %v3593_v44 }
0x2894   :  { %v3596_v39 = vmul.f32 %v6340_v9, %v3595_v50 }
0x2896   :  { %v3597_v63 = vmul.f32 0.5, %v3596_v39 }
0x2898   :  { %v3598_v47 = vsub.f32 1.5, %v3597_v63 }
0x2899   :  { %v6342_v49 = vpop.eup %6341 }
0x289a   :  { %v3599_v52 = vmul.f32 %v6340_v9, %v3598_v47  ;;  %v3605_v55 = vmul.f32 %v6342_v49, %v3593_v44  ;;  %vm3611_vm1 = vweird.f32 %v6342_v49 }
0x289b   :  { %vm3612_vm10 = vmor %vm3610_vm2, %vm3611_vm1 }
0x289c   :  { %v3603_v58 = vsel %vm3602_vm15, %v6340_v9, %v3599_v52  ;;  %v3606_v37 = vmul.f32 %v6342_v49, %v3605_v55 }
0x289d   :  { %v3614_v6 = vmul.f32 %v3603_v58, %v3580_v35 }
0x289e   :  { %v3607_v2 = vmul.f32 0.5, %v3606_v37 }
0x289f   :  { %v3619_v3 = vmul.f32 %v6158_v57, %v3614_v6 }
0x28a0   :  { %v3608_v54 = vsub.f32 1.5, %v3607_v2 }
0x28a1   :  { %v7550_v4 = vadd.f32 %v6159_v0, %v3619_v3 }
0x28a2   :  { %v3609_v59 = vmul.f32 %v6342_v49, %v3608_v54 }
0x28a3   :  { %6004 = vmatmul.msk.f32.vlgmr.msrb.gmra.mxu1 %vm194_vm0, %v7550_v4 }
0x28a4   :  { %v3613_v5 = vsel %vm3612_vm10, %v6342_v49, %v3609_v59 }
0x28a5   :  { %v3615_v8 = vmul.f32 %v3613_v5, %v3581_v28  ;;  %v7596_v28 = vld [vmem:[%s8200_s0] sm:$0x3] }
0x28a7   :  { %v3620_v10 = vmul.f32 %v6158_v57, %v3615_v8 }
0x28a9   :  { %v7554_v7 = vadd.f32 %v6159_v0, %v3620_v10 }
0x28ab   :  { %6005 = vmatmul.msk.f32.gmra.mxu1 %vm194_vm0, %v7554_v7 }
0x2920   :  { %v3654_v12 = vpop.f32.mrf.mxu1 }
0x2921   :  { %v7559_v13 = vadd.f32 %v6160_v11, %v3654_v12 }
0x2923   :  { %3741 = vrot.lane.b32.xlu2 %v7559_v13, %s6458_s21  ;;  %3739 = vrot.lane.b32.xlu1 %v7559_v13, %s6459_s25 }
0x2924   :  { %3873 = vrot.lane.b32.xlu0 %v7559_v13, %s6461_s3 }
0x2928   :  { %v3657_v46 = vpop.f32.mrf.mxu1 }
0x2929   :  { %v7582_v25 = vadd.f32 %v6160_v11, %v3657_v46 }
0x292b   :  { %3871 = vrot.lane.b32.xlu2 %v7559_v13, %s6460_s29  ;;  %3661 = vrot.lane.b32.xlu1 %v7559_v13, %s6457_s5 }
0x297d   :  { %v3742_v15 = vpop.permute.xlu2 %3741 }
0x297e   :  { %6009 = vmatpush.xpose.msk.msra.mxu0 %vm1578_vm4, %v3742_v15 }
0x2982   :  { %6014 = vmatpush.msk.msrb.mxu0 %vm1738_vm5, %v7596_v28 }
0x2985   :  { %v3872_v16 = vpop.permute.xlu2 %3871 }
0x2995   :  { %v3740_v20 = vpop.permute.xlu1 %3739 }
0x2996   :  { %v3874_v1 = vpop.permute.xlu0 %3873  ;;  %6010 = vmatmul.msk.f32.vlgmr.msra.gmra.mxu0 %vm1578_vm4, %v3740_v20 }
0x2997   :  { %6016 = vmatpush.xpose.msk.msra.mxu1 %vm1578_vm4, %v3874_v1 }
0x299a   :  { %6017 = vmatmul.msk.f32.vlgmr.msra.gmra.mxu1 %vm1578_vm4, %v3872_v16 }
0x299d   :  { %v3662_v45 = vpop.permute.xlu1 %3661 }
0x299e   :  { %6006 = vmatpush.xpose.msk.msra.mxu2 %vm1578_vm4, %v3662_v45 }
0x29a1   :  { %6007 = vmatmul.msk.f32.vlgmr.msra.gmra.mxu2 %vm1578_vm4, %v7559_v13 }
0x2a13   :  { %v3764_v48 = vpop.f32.mrf.mxu0 }
0x2a14   :  { %v3767_v19 = vmul.f32 0.70710677, %v3764_v48 }
0x2a16   :  { %v3768_v21 = vsel %vm194_vm0, %v3767_v19, -inf }
0x2a17   :  { %v3896_v23 = vpop.f32.mrf.mxu1  ;;  %3769 = vmax.xlane.f32.xlu0 %v3768_v21 }
0x2a18   :  { %v3899_v60 = vmul.f32 0.70710677, %v3896_v23 }
0x2a1a   :  { %v3900_v24 = vsel %vm194_vm0, %v3899_v60, -inf }
0x2a1b   :  { %3901 = vmax.xlane.f32.xlu2 %v3900_v24 }
0x2a24   :  { %v3684_v36 = vpop.f32.mrf.mxu2 }
0x2a25   :  { %v3687_v38 = vmul.f32 0.70710677, %v3684_v36 }
0x2a27   :  { %v3688_v56 = vsel %vm194_vm0, %v3687_v38, -inf }
0x2a33   :  { %3792 = vrot.lane.b32.xlu2 %v7559_v13, %s6464_s6 }
0x2a3b   :  { %4091 = vrot.lane.b32.xlu2 %v7582_v25, %s6457_s5  ;;  %s8202_s5 = sld [smem:[#allocation25_spill]] }
0x2a43   :  { %3978 = vrot.lane.b32.xlu2 %v7559_v13, %s6465_s19 }
0x2a8a   :  { %v3770_v26 = vpop.xlane.xlu0 %3769 }
0x2a8b   :  { %v3771_v29 = vsub.f32 %v3767_v19, %v3770_v26 }
0x2a8d   :  { %v3772_v22 = vmul.f32 1.442695, %v3771_v29  ;;  %v3818_v29 = vld [vmem:[%s8200_s0 + $0x2] sm:$0x3] }
0x2a8e   :  { %v3902_v42 = vpop.xlane.xlu2 %3901 }
0x2a8f   :  { %6343 = vpow2.f32 %v3772_v22  ;;  %v3903_v14 = vsub.f32 %v3899_v60, %v3902_v42  ;;  %v3950_v22 = vld [vmem:[%s8200_s0 + $0x4] sm:$0x3] }
0x2a91   :  { %v3904_v31 = vmul.f32 1.442695, %v3903_v14 }
0x2a93   :  { %6345 = vpow2.f32 %v3904_v31 }
0x2a95   :  { %v6344_v33 = vpop.eup %6343 }
0x2a96   :  { %v3793_v34 = vpop.permute.xlu2 %3792  ;;  %v3774_v53 = vsel %vm194_vm0, %v6344_v33, 0.0 }
0x2a97   :  { %3813 = vmatpush.msrb.mxu2 %v3793_v34  ;;  %3775 = vadd.xlane.f32.xlu1 %v3774_v53 }
0x2a99   :  { %v6346_v35 = vpop.eup %6345 }
0x2a9a   :  { %v3906_v18 = vsel %vm194_vm0, %v6346_v35, 0.0 }
0x2a9b   :  { %3907 = vadd.xlane.f32.xlu0 %v3906_v18 }
0x2a9e   :  { %v4092_v14 = vpop.permute.xlu2 %4091 }
0x2aa3   :  { %3689 = vmax.xlane.f32.xlu0 %v3688_v56 }
0x2aa6   :  { %v3979_v53 = vpop.permute.xlu2 %3978 }
0x2ab0   :  { %3924 = vrot.lane.b32.xlu1 %v7559_v13, %s6467_s20 }
0x2ab8   :  { %3980 = vrot.lane.b32.xlu1 %v7559_v13, %s6468_s27 }
0x2b0a   :  { %v3776_v30 = vpop.xlane.xlu1 %3775 }
0x2b0b   :  { %6347 = vrcp.f32 %v3776_v30  ;;  %v3788_v41 = vand.u32 2147483648, %v3776_v30  ;;  %v3786_v9 = vand.u32 2147483647, %v3776_v30  ;;  %vm3782_vm6 = vweird.f32 %v3776_v30 }
0x2b0d   :  { %v3789_v49 = vor.u32 1.1754944e-38, %v3788_v41  ;;  %vm3787_vm7 = vcmp.eq.f32.partialorder %v3786_v9, 8.507059e+37 }
0x2b0e   :  { %v3908_v32 = vpop.xlane.xlu0 %3907 }
0x2b0f   :  { %6349 = vrcp.f32 %v3908_v32  ;;  %v3920_v37 = vand.u32 2147483648, %v3908_v32  ;;  %vm3914_vm8 = vweird.f32 %v3908_v32  ;;  %v3918_v2 = vand.u32 2147483647, %v3908_v32 }
0x2b11   :  { %v6348_v61 = vpop.eup %6347  ;;  %v3921_v54 = vor.u32 1.1754944e-38, %v3920_v37  ;;  %vm3919_vm13 = vcmp.eq.f32.partialorder %v3918_v2, 8.507059e+37 }
0x2b12   :  { %v3778_v51 = vmul.f32 %v6348_v61, %v3776_v30  ;;  %vm3783_vm11 = vweird.f32 %v6348_v61 }
0x2b13   :  { %vm3784_vm3 = vmor %vm3782_vm6, %vm3783_vm11 }
0x2b14   :  { %v3779_v17 = vsub.f32 1.0, %v3778_v51 }
0x2b15   :  { %v6350_v40 = vpop.eup %6349 }
0x2b16   :  { %v3780_v43 = vmul.f32 %v6348_v61, %v3779_v17  ;;  %v3910_v44 = vmul.f32 %v6350_v40, %v3908_v32  ;;  %v3690_v50 = vpop.xlane.xlu0 %3689  ;;  %vm3915_vm12 = vweird.f32 %v6350_v40 }
0x2b17   :  { %v3691_v39 = vsub.f32 %v3687_v38, %v3690_v50  ;;  %vm3916_vm9 = vmor %vm3914_vm8, %vm3915_vm12 }
0x2b18   :  { %v3781_v63 = vadd.f32 %v6348_v61, %v3780_v43  ;;  %v3911_v47 = vsub.f32 1.0, %v3910_v44 }
0x2b19   :  { %v3692_v52 = vmul.f32 1.442695, %v3691_v39 }
0x2b1a   :  { %v3785_v55 = vsel %vm3784_vm3, %v6348_v61, %v3781_v63  ;;  %v3912_v57 = vmul.f32 %v6350_v40, %v3911_v47 }
0x2b1b   :  { %v3790_v58 = vsel %vm3787_vm7, %v3789_v49, %v3785_v55  ;;  %6351 = vpow2.f32 %v3692_v52 }
0x2b1c   :  { %v3791_v0 = vmul.f32 %v6344_v33, %v3790_v58  ;;  %v3913_v6 = vadd.f32 %v6350_v40, %v3912_v57 }
0x2b1e   :  { %v3917_v3 = vsel %vm3916_vm9, %v6350_v40, %v3913_v6  ;;  %6011 = vmatmul.msk.f32.vlgmr.msrb.gmra.mxu2 %vm194_vm0, %v3791_v0 }
0x2b1f   :  { %v3922_v5 = vsel %vm3919_vm13, %v3921_v54, %v3917_v3 }
0x2b20   :  { %v3923_v11 = vmul.f32 %v6346_v35, %v3922_v5 }
0x2b21   :  { %v6352_v59 = vpop.eup %6351 }
0x2b22   :  { %v3694_v8 = vsel %vm194_vm0, %v6352_v59, 0.0  ;;  %v3925_v10 = vpop.permute.xlu1 %3924 }
0x2b23   :  { %3695 = vadd.xlane.f32.xlu0 %v3694_v8  ;;  %3945 = vmatpush.msra.mxu2 %v3925_v10 }
0x2b26   :  { %6018 = vmatmul.msk.f32.vlgmr.msra.gmra.mxu2 %vm194_vm0, %v3923_v11 }
0x2b2a   :  { %v3981_v12 = vpop.permute.xlu1 %3980 }
0x2b2b   :  { %6021 = vmatpush.xpose.msk.msra.mxu0 %vm1578_vm4, %v3981_v12 }
0x2b37   :  { %3712 = vrot.lane.b32.xlu0 %v7559_v13, %s6463_s8 }
0x2b3f   :  { %4142 = vrot.lane.b32.xlu0 %v7582_v25, %s6463_s8  ;;  %s8208_s8 = sld [smem:[#allocation8_spill]] }
0x2b96   :  { %v3696_v15 = vpop.xlane.xlu0 %3695 }
0x2b97   :  { %6353 = vrcp.f32 %v3696_v15  ;;  %v3708_v45 = vand.u32 2147483648, %v3696_v15  ;;  %v3706_v48 = vand.u32 2147483647, %v3696_v15  ;;  %vm3702_vm15 = vweird.f32 %v3696_v15 }
0x2b99   :  { %v3709_v21 = vor.u32 1.1754944e-38, %v3708_v45  ;;  %vm3707_vm2 = vcmp.eq.f32.partialorder %v3706_v48, 8.507059e+37 }
0x2b9d   :  { %v6354_v20 = vpop.eup %6353 }
0x2b9e   :  { %v3698_v1 = vmul.f32 %v6354_v20, %v3696_v15  ;;  %vm3703_vm14 = vweird.f32 %v6354_v20 }
0x2b9f   :  { %vm3704_vm1 = vmor %vm3702_vm15, %vm3703_vm14 }
0x2ba0   :  { %v3699_v16 = vsub.f32 1.0, %v3698_v1 }
0x2ba1   :  { %v3815_v42 = vpop.f32.mrf.mxu2 }
0x2ba2   :  { %v3700_v46 = vmul.f32 %v6354_v20, %v3699_v16 }
0x2ba4   :  { %v3701_v19 = vadd.f32 %v6354_v20, %v3700_v46 }
0x2ba6   :  { %v3705_v23 = vsel %vm3704_vm1, %v6354_v20, %v3701_v19 }
0x2ba7   :  { %v3710_v60 = vsel %vm3707_vm2, %v3709_v21, %v3705_v23 }
0x2ba8   :  { %v3711_v24 = vmul.f32 %v6352_v59, %v3710_v60 }
0x2ba9   :  { %v3713_v26 = vpop.permute.xlu0 %3712  ;;  %v3947_v31 = vpop.f32.mrf.mxu2 }
0x2baa   :  { %3733 = vmatpush.msra.mxu3 %v3713_v26 }
0x2bab   :  { %6008 = vmatmul.msk.f32.vlgmr.msra.gmra.mxu3 %vm194_vm0, %v3711_v24 }
0x2bac   :  { %6012 = vmatpush.msk.msrb.mxu3 %vm1738_vm5, %v3818_v29 }
0x2bae   :  { %6019 = vmatpush.msk.msra.mxu3 %vm1738_vm5, %v3950_v22 }
0x2bb1   :  { %v4143_v34 = vpop.permute.xlu0 %4142 }
0x2bb3   :  { %6013 = vmatmul.msk.f32.vlgmr.msrb.gmra.mxu3 %vm1578_vm4, %v3815_v42 }
0x2bb4   :  { %6026 = vmatpush.xpose.msk.msrb.mxu3 %vm1578_vm4, %v4092_v14 }
0x2bbb   :  { %6020 = vmatmul.msk.f32.vlgmr.msra.gmra.mxu3 %vm1578_vm4, %v3947_v31 }
0x2bbc   :  { %6032 = vmatpush.msk.msra.mxu3 %vm1738_vm5, %v3818_v29  ;;  %v7658_v29 = vld [vmem:[%s8200_s0 + $0x6] sm:$0x3] }
0x2bbd   :  { %6024 = vmatpush.msk.msrb.mxu2 %vm1738_vm5, %v7658_v29 }
0x2bc3   :  { %6027 = vmatmul.msk.f32.vlgmr.msrb.gmra.mxu3 %vm1578_vm4, %v7582_v25 }
0x2bc4   :  { %6039 = vmatpush.msk.msrb.mxu3 %vm1738_vm5, %v3950_v22 }
0x2c2e   :  { %v3735_v33 = vpop.f32.mrf.mxu3 }
0x2c2f   :  { %6015 = vmatmul.msk.f32.vlgmr.msrb.gmra.mxu0 %vm1578_vm4, %v3735_v33 }
0x2c30   :  { %4163 = vmatpush.msrb.mxu0 %v4143_v34 }
0x2c36   :  { %v7621_v35 = vpop.f32.mrf.mxu3 }
0x2c37   :  { %6022 = vmatmul.msk.f32.vlgmr.msra.gmra.mxu0 %vm1578_vm4, %v3979_v53 }
0x2c38   :  { %6034 = vmatpush.msk.msra.mxu0 %vm1738_vm5, %v7596_v28 }
0x2c3e   :  { %v7626_v18 = vpop.f32.mrf.mxu3 }
0x2c46   :  { %v4114_v36 = vpop.f32.mrf.mxu3 }
0x2c47   :  { %v4117_v38 = vmul.f32 0.70710677, %v4114_v36 }
0x2c49   :  { %v4118_v56 = vsel %vm194_vm0, %v4117_v38, -inf }
0x2c4a   :  { %4119 = vmax.xlane.f32.xlu1 %v4118_v56 }
0x2cac   :  { %v7629_v30 = vpop.f32.mrf.mxu0 }
0x2cb4   :  { %v4003_v32 = vpop.f32.mrf.mxu0 }
0x2cb5   :  { %v4006_v61 = vmul.f32 0.70710677, %v4003_v32 }
0x2cb7   :  { %v4007_v51 = vsel %vm194_vm0, %v4006_v61, -inf }
0x2cb8   :  { %4008 = vmax.xlane.f32.xlu0 %v4007_v51 }
0x2cbd   :  { %v4120_v17 = vpop.xlane.xlu1 %4119 }
0x2cbe   :  { %v4121_v40 = vsub.f32 %v4117_v38, %v4120_v17 }
0x2cc0   :  { %v4122_v41 = vmul.f32 1.442695, %v4121_v40 }
0x2cc2   :  { %6355 = vpow2.f32 %v4122_v41 }
0x2cc8   :  { %v6356_v43 = vpop.eup %6355 }
0x2cc9   :  { %v4124_v28 = vsel %vm194_vm0, %v6356_v43, 0.0 }
0x2cca   :  { %4125 = vadd.xlane.f32.xlu2 %v4124_v28 }
0x2ccc   :  { %4168 = vrot.lane.b32.xlu0 %v7582_v25, %s6459_s25  ;;  %s8204_s25 = sld [smem:[#allocation24_spill]] }
0x2cd4   :  { %4293 = vrot.lane.b32.xlu0 %v7582_v25, %s6460_s29  ;;  %s8205_s29 = sld [smem:[#allocation27_spill]] }
0x2ce2   :  { %4031 = vrot.lane.b32.xlu2 %v7559_v13, %s6469_s7 }
0x2cea   :  { %4295 = vrot.lane.b32.xlu2 %v7582_v25, %s6461_s3  ;;  %s8206_s3 = sld [smem:[#allocation26_spill]] }
0x2cf2   :  { %4396 = vrot.lane.b32.xlu2 %v7582_v25, %s6465_s19  ;;  %s8210_s19 = sld [smem:[#allocation31_spill]] }
0x2d2b   :  { %v4009_v9 = vpop.xlane.xlu0 %4008 }
0x2d2c   :  { %v4010_v44 = vsub.f32 %v4006_v61, %v4009_v9 }
0x2d2e   :  { %v4011_v50 = vmul.f32 1.442695, %v4010_v44 }
0x2d30   :  { %6357 = vpow2.f32 %v4011_v50 }
0x2d36   :  { %v6358_v39 = vpop.eup %6357 }
0x2d37   :  { %v4013_v63 = vsel %vm194_vm0, %v6358_v39, 0.0 }
0x2d38   :  { %4014 = vadd.xlane.f32.xlu1 %v4013_v63 }
0x2d3d   :  { %v4126_v47 = vpop.xlane.xlu2 %4125 }
0x2d3e   :  { %6359 = vrcp.f32 %v4126_v47  ;;  %v4138_v57 = vand.u32 2147483648, %v4126_v47  ;;  %v4136_v37 = vand.u32 2147483647, %v4126_v47  ;;  %vm4132_vm11 = vweird.f32 %v4126_v47  ;;  %v4169_v19 = vpop.permute.xlu0 %4168 }
0x2d40   :  { %v4139_v6 = vor.u32 1.1754944e-38, %v4138_v57  ;;  %vm4137_vm3 = vcmp.eq.f32.partialorder %v4136_v37, 8.507059e+37  ;;  %v7687_v37 = vld [vmem:[%s8201_s17] ss:$0 sm:$0xff] }
0x2d44   :  { %v6360_v49 = vpop.eup %6359 }
0x2d45   :  { %v4128_v52 = vmul.f32 %v6360_v49, %v4126_v47  ;;  %v4032_v55 = vpop.permute.xlu2 %4031  ;;  %vm4133_vm10 = vweird.f32 %v6360_v49 }
0x2d46   :  { %4052 = vmatpush.msrb.mxu1 %v4032_v55  ;;  %vm4134_vm6 = vmor %vm4132_vm11, %vm4133_vm10  ;;  %v4294_v60 = vpop.permute.xlu0 %4293  ;;  %v3869_v55 = vadd.f32 %v7629_v30, %v7621_v35 }
0x2d47   :  { %v4129_v13 = vsub.f32 1.0, %v4128_v52 }
0x2d48   :  { %v3977_v57 = vadd.f32 %v7626_v18, %v3869_v55 }
0x2d49   :  { %v4130_v58 = vmul.f32 %v6360_v49, %v4129_v13 }
0x2d4b   :  { %v4131_v0 = vadd.f32 %v6360_v49, %v4130_v58 }
0x2d4d   :  { %v4135_v2 = vsel %vm4134_vm6, %v6360_v49, %v4131_v0  ;;  %v4296_v21 = vpop.permute.xlu2 %4295 }
0x2d4e   :  { %v4140_v3 = vsel %vm4137_vm3, %v4139_v6, %v4135_v2 }
0x2d4f   :  { %v4141_v54 = vmul.f32 %v6356_v43, %v4140_v3 }
0x2d51   :  { %4170 = vrot.lane.b32.xlu1 %v7582_v25, %s6458_s21  ;;  %6028 = vmatmul.msk.f32.vlgmr.msrb.gmra.mxu0 %vm194_vm0, %v4141_v54  ;;  %s8203_s21 = sld [smem:[#allocation23_spill]] }
0x2d55   :  { %v4397_v26 = vpop.permute.xlu2 %4396 }
0x2d59   :  { %4398 = vrot.lane.b32.xlu1 %v7582_v25, %s6468_s27  ;;  %s6471_s27 = smov [#allocation3]  }
0x2dab   :  { %v4015_v59 = vpop.xlane.xlu1 %4014 }
0x2dac   :  { %6361 = vrcp.f32 %v4015_v59  ;;  %v4027_v11 = vand.u32 2147483648, %v4015_v59  ;;  %v4025_v15 = vand.u32 2147483647, %v4015_v59  ;;  %vm4021_vm12 = vweird.f32 %v4015_v59 }
0x2dae   :  { %v4028_v1 = vor.u32 1.1754944e-38, %v4027_v11  ;;  %vm4026_vm9 = vcmp.eq.f32.partialorder %v4025_v15, 8.507059e+37 }
0x2db2   :  { %v6362_v5 = vpop.eup %6361 }
0x2db3   :  { %v4017_v8 = vmul.f32 %v6362_v5, %v4015_v59  ;;  %vm4022_vm7 = vweird.f32 %v6362_v5 }
0x2db4   :  { %vm4023_vm8 = vmor %vm4021_vm12, %vm4022_vm7 }
0x2db5   :  { %v4018_v10 = vsub.f32 1.0, %v4017_v8 }
0x2db7   :  { %v4019_v12 = vmul.f32 %v6362_v5, %v4018_v10 }
0x2db9   :  { %v4020_v20 = vadd.f32 %v6362_v5, %v4019_v12 }
0x2dbb   :  { %v4024_v16 = vsel %vm4023_vm8, %v6362_v5, %v4020_v20 }
0x2dbc   :  { %v4029_v45 = vsel %vm4026_vm9, %v4028_v1, %v4024_v16 }
0x2dbd   :  { %v4030_v46 = vmul.f32 %v6358_v39, %v4029_v45 }
0x2dbf   :  { %6023 = vmatmul.msk.f32.vlgmr.msrb.gmra.mxu1 %vm194_vm0, %v4030_v46 }
0x2dc3   :  { %v4171_v48 = vpop.permute.xlu1 %4170 }
0x2dc4   :  { %6029 = vmatpush.xpose.msk.msra.mxu1 %vm1578_vm4, %v4171_v48 }
0x2dc7   :  { %6030 = vmatmul.msk.f32.vlgmr.msra.gmra.mxu1 %vm1578_vm4, %v4169_v19 }
0x2dc8   :  { %6036 = vmatpush.xpose.msk.msrb.mxu1 %vm1578_vm4, %v4296_v21 }
0x2dcb   :  { %v4399_v23 = vpop.permute.xlu1 %4398 }
0x2dcc   :  { %6041 = vmatpush.xpose.msk.msrb.mxu0 %vm1578_vm4, %v4399_v23 }
0x2dce   :  { %v4165_v24 = vpop.f32.mrf.mxu0 }
0x2dcf   :  { %6035 = vmatmul.msk.f32.vlgmr.msra.gmra.mxu0 %vm1578_vm4, %v4165_v24  ;;  %6037 = vmatmul.msk.f32.vlgmr.msrb.gmra.mxu1 %vm1578_vm4, %v4294_v60 }
0x2dd7   :  { %6042 = vmatmul.msk.f32.vlgmr.msrb.gmra.mxu0 %vm1578_vm4, %v4397_v26 }
0x2e3c   :  { %v4054_v22 = vpop.f32.mrf.mxu1 }
0x2e3d   :  { %6025 = vmatmul.msk.f32.vlgmr.msrb.gmra.mxu2 %vm1578_vm4, %v4054_v22 }
0x2e44   :  { %v4193_v42 = vpop.f32.mrf.mxu1 }
0x2e45   :  { %v4196_v14 = vmul.f32 0.70710677, %v4193_v42 }
0x2e47   :  { %v4197_v31 = vsel %vm194_vm0, %v4196_v14, -inf }
0x2e48   :  { %4198 = vmax.xlane.f32.xlu0 %v4197_v31 }
0x2e4c   :  { %v7664_v33 = vpop.f32.mrf.mxu0  ;;  %v4318_v34 = vpop.f32.mrf.mxu1 }
0x2e4d   :  { %v4321_v53 = vmul.f32 0.70710677, %v4318_v34 }
0x2e4f   :  { %v4322_v36 = vsel %vm194_vm0, %v4321_v53, -inf }
0x2e50   :  { %4323 = vmax.xlane.f32.xlu1 %v4322_v36 }
0x2e54   :  { %v4421_v38 = vpop.f32.mrf.mxu0 }
0x2e55   :  { %v4424_v56 = vmul.f32 0.70710677, %v4421_v38 }
0x2e57   :  { %v4425_v32 = vsel %vm194_vm0, %v4424_v56, -inf }
0x2e58   :  { %4426 = vmax.xlane.f32.xlu2 %v4425_v32 }
0x2ebb   :  { %v4199_v61 = vpop.xlane.xlu0 %4198 }
0x2ebc   :  { %v4200_v51 = vsub.f32 %v4196_v14, %v4199_v61 }
0x2ebe   :  { %v4201_v17 = vmul.f32 1.442695, %v4200_v51 }
0x2ec0   :  { %6363 = vpow2.f32 %v4201_v17  ;;  %v4081_v13 = vpop.f32.mrf.mxu2 }
0x2ec1   :  { %v4084_v58 = vadd.f32 %v4081_v13, %v3977_v57 }
0x2ec3   :  { %v4324_v40 = vpop.xlane.xlu1 %4323  ;;  %v4089_v0 = vadd.f32 %v7687_v37, %v4084_v58 }
0x2ec4   :  { %v4325_v41 = vsub.f32 %v4321_v53, %v4324_v40 }
0x2ec5   :  { %v7691_v6 = vadd.f32 %v4089_v0, %v7550_v4 }
0x2ec6   :  { %v6364_v43 = vpop.eup %6363  ;;  %v4326_v28 = vmul.f32 1.442695, %v4325_v41 }
0x2ec7   :  { %v4203_v9 = vsel %vm194_vm0, %v6364_v43, 0.0  ;;  %v4504_v2 = vsel %vm194_vm0, %v7691_v6, 0.0 }
0x2ec8   :  { %6365 = vpow2.f32 %v4326_v28  ;;  %4204 = vadd.xlane.f32.xlu0 %v4203_v9 }
0x2ecb   :  { %v4427_v44 = vpop.xlane.xlu2 %4426 }
0x2ecc   :  { %v4428_v50 = vsub.f32 %v4424_v56, %v4427_v44 }
0x2ece   :  { %v7669_v39 = vpop.eup %6365  ;;  %v4429_v63 = vmul.f32 1.442695, %v4428_v50 }
0x2ecf   :  { %v4328_v47 = vsel %vm194_vm0, %v7669_v39, 0.0 }
0x2ed0   :  { %6367 = vpow2.f32 %v4429_v63  ;;  %4329 = vadd.xlane.f32.xlu1 %v4328_v47  ;;  %v4559_v63 = vld [vmem:[%s8202_s5 + $0x8] sm:$0xff]  ;;  %v4560_v47 = vld [vmem:[%s8202_s5 + $0x10] sm:$0xff] }
0x2ed1   :  { %4654 = vmatpush.msra.mxu0 %v4559_v63  ;;  %v5046_v63 = vld [vmem:[%s8205_s29 + $0xf0] sm:$0xff] }
0x2ed6   :  { %v7673_v49 = vpop.eup %6367 }
0x2ed7   :  { %v4431_v52 = vsel %vm194_vm0, %v7673_v49, 0.0 }
0x2ed8   :  { %4432 = vadd.xlane.f32.xlu2 %v4431_v52 }
0x2edc   :  { %4221 = vrot.lane.b32.xlu0 %v7582_v25, %s6464_s6  ;;  %s8209_s6 = sld [smem:[#allocation28_spill]] }
0x2ee9   :  { %4346 = vrot.lane.b32.xlu1 %v7582_v25, %s6467_s20  ;;  %s8213_s20 = sld [smem:[#allocation30_spill]] }
0x2ef0   :  { %4449 = vrot.lane.b32.xlu2 %v7582_v25, %s6469_s7  ;;  %s5837_s7 = sshll.u32 %s6471_s27, 4  ;;  %s5838_s7 = int_to_ptr.vmem [resolvable:$true] %s5837_s7 }
0x2f06   :  { %4505 = vadd.xlane.f32.xlu0 %v4504_v2 }
0x2f3b   :  { %v4205_v3 = vpop.xlane.xlu0 %4204 }
0x2f3c   :  { %6369 = vrcp.f32 %v4205_v3  ;;  %v4217_v18 = vand.u32 2147483648, %v4205_v3  ;;  %v4215_v5 = vand.u32 2147483647, %v4205_v3  ;;  %vm4211_vm14 = vweird.f32 %v4205_v3 }
0x2f3e   :  { %v4218_v4 = vor.u32 1.1754944e-38, %v4217_v18  ;;  %vm4216_vm1 = vcmp.eq.f32.partialorder %v4215_v5, 8.507059e+37 }
0x2f42   :  { %v6370_v25 = vpop.eup %6369 }
0x2f43   :  { %v4207_v54 = vmul.f32 %v6370_v25, %v4205_v3  ;;  %v4330_v35 = vpop.xlane.xlu1 %4329  ;;  %vm4212_vm13 = vweird.f32 %v6370_v25 }
0x2f44   :  { %6371 = vrcp.f32 %v4330_v35  ;;  %vm4213_vm15 = vmor %vm4211_vm14, %vm4212_vm13  ;;  %v4342_v21 = vand.u32 2147483648, %v4330_v35  ;;  %vm4336_vm10 = vweird.f32 %v4330_v35  ;;  %v4340_v23 = vand.u32 2147483647, %v4330_v35 }
0x2f45   :  { %v4208_v30 = vsub.f32 1.0, %v4207_v54 }
0x2f46   :  { %v4343_v42 = vor.u32 1.1754944e-38, %v4342_v21  ;;  %vm4341_vm6 = vcmp.eq.f32.partialorder %v4340_v23, 8.507059e+37  ;;  %v4563_v21 = vld [vmem:[%s8202_s5 + $0x28] sm:$0xff]  ;;  %v4564_v23 = vld [vmem:[%s8202_s5 + $0x30] sm:$0xff] }
0x2f47   :  { %v4209_v59 = vmul.f32 %v6370_v25, %v4208_v30  ;;  %4746 = vmatpush.msrb.mxu0 %v4563_v21  ;;  %v5038_v21 = vld [vmem:[%s8205_s29 + $0xb0] sm:$0xff] }
0x2f49   :  { %v4210_v8 = vadd.f32 %v6370_v25, %v4209_v59 }
0x2f4a   :  { %v6372_v10 = vpop.eup %6371 }
0x2f4b   :  { %v4214_v11 = vsel %vm4213_vm15, %v6370_v25, %v4210_v8  ;;  %v4332_v12 = vmul.f32 %v6372_v10, %v4330_v35  ;;  %v4433_v15 = vpop.xlane.xlu2 %4432  ;;  %vm4337_vm2 = vweird.f32 %v6372_v10  ;;  %v6162_v25 = vld [vmem:[%s8203_s21] ss:$0 sm:$0xff] }
0x2f4c   :  { %v4219_v20 = vsel %vm4216_vm1, %v4218_v4, %v4214_v11  ;;  %6373 = vrcp.f32 %v4433_v15  ;;  %vm4338_vm11 = vmor %vm4336_vm10, %vm4337_vm2  ;;  %v4445_v14 = vand.u32 2147483648, %v4433_v15  ;;  %v4443_v34 = vand.u32 2147483647, %v4433_v15  ;;  %v6163_v35 = vld [vmem:[%s8204_s25] ss:$0 sm:$0xff] }
0x2f4d   :  { %v4220_v1 = vmul.f32 %v6364_v43, %v4219_v20  ;;  %v4333_v16 = vsub.f32 1.0, %v4332_v12  ;;  %vm4439_vm7 = vweird.f32 %v4433_v15  ;;  %vm5744_vm1 = vcmask 1043456  }
0x2f4e   :  { %v4222_v45 = vpop.permute.xlu0 %4221  ;;  %v4446_v38 = vor.u32 1.1754944e-38, %v4445_v14  ;;  %vm4444_vm8 = vcmp.eq.f32.partialorder %v4443_v34, 8.507059e+37  ;;  %v4566_v14 = vld [vmem:[%s8202_s5 + $0x40] sm:$0xff]  ;;  %v4568_v34 = vld [vmem:[%s8202_s5 + $0x50] sm:$0xff]  ;;  %vm5740_vm2 = vcmask 31744   ;;  %vm5800_vm10 = vcmask 1042432  }
0x2f4f   :  { %v4334_v46 = vmul.f32 %v6372_v10, %v4333_v16  ;;  %4242 = vmatpush.msra.mxu2 %v4222_v45 }
0x2f50   :  { %6031 = vmatmul.msk.f32.vlgmr.msra.gmra.mxu2 %vm194_vm0, %v4220_v1 }
0x2f51   :  { %v4335_v48 = vadd.f32 %v6372_v10, %v4334_v46 }
0x2f52   :  { %v6374_v19 = vpop.eup %6373 }
0x2f53   :  { %v4435_v60 = vmul.f32 %v6374_v19, %v4433_v15  ;;  %v4450_v24 = vpop.permute.xlu2 %4449  ;;  %v4339_v26 = vsel %vm4338_vm11, %v6372_v10, %v4335_v48  ;;  %vm4440_vm3 = vweird.f32 %v6374_v19  ;;  %vm5796_vm11 = vcmask 23552  }
0x2f54   :  { %4470 = vmatpush.msra.mxu1 %v4450_v24  ;;  %v4344_v53 = vsel %vm4341_vm6, %v4343_v42, %v4339_v26  ;;  %vm4441_vm12 = vmor %vm4439_vm7, %vm4440_vm3 }
0x2f55   :  { %v4436_v22 = vsub.f32 1.0, %v4435_v60  ;;  %v4345_v56 = vmul.f32 %v7669_v39, %v4344_v53  ;;  %v4558_v39 = vld [vmem:[%s8202_s5] sm:$0xff]  ;;  %v4569_v53 = vld [vmem:[%s8202_s5 + $0x58] sm:$0xff] }
0x2f56   :  { %4677 = vmatpush.msrb.mxu1 %v4560_v47  ;;  %v5062_v47 = vld [vmem:[%s8205_s29 + $0x170] sm:$0xff] }
0x2f57   :  { %v4437_v31 = vmul.f32 %v6374_v19, %v4436_v22 }
0x2f59   :  { %v4438_v36 = vadd.f32 %v6374_v19, %v4437_v31  ;;  %v4567_v31 = vld [vmem:[%s8202_s5 + $0x48] sm:$0xff] }
0x2f5b   :  { %v4442_v32 = vsel %vm4441_vm12, %v6374_v19, %v4438_v36  ;;  %v4347_v61 = vpop.permute.xlu1 %4346  ;;  %v4562_v19 = vld [vmem:[%s8202_s5 + $0x20] sm:$0xff] }
0x2f5c   :  { %v4447_v51 = vsel %vm4444_vm8, %v4446_v38, %v4442_v32  ;;  %4367 = vmatpush.msrb.mxu2 %v4347_v61 }
0x2f5d   :  { %v4448_v17 = vmul.f32 %v7673_v49, %v4447_v51  ;;  %6038 = vmatmul.msk.f32.vlgmr.msrb.gmra.mxu2 %vm194_vm0, %v4345_v56  ;;  %v4561_v49 = vld [vmem:[%s8202_s5 + $0x18] sm:$0xff] }
0x2f5e   :  { %6044 = vmatpush.msk.msra.mxu2 %vm1738_vm5, %v7658_v29 }
0x2f5f   :  { %6043 = vmatmul.msk.f32.vlgmr.msra.gmra.mxu1 %vm194_vm0, %v4448_v17 }
0x2f60   :  { %4700 = vmatpush.msrb.mxu2 %v4561_v49  ;;  %4769 = vmatpush.msra.mxu1 %v4564_v23  ;;  %v5078_v49 = vld [vmem:[%s8205_s29 + $0x1f0] sm:$0xff] }
0x2f61   :  { %v5054_v23 = vld [vmem:[%s8205_s29 + $0x130] sm:$0xff] }
0x2f79   :  { %v4506_v40 = vpop.xlane.xlu0 %4505 }
0x2f7a   :  { %v4510_v41 = vmul.f32 %v4506_v40, %v7120_v62  ;;  %v4570_v40 = vld [vmem:[%s8202_s5 + $0x60] sm:$0xff] }
0x2f7c   :  { %v4512_v43 = vsub.f32 %v7691_v6, %v4510_v41  ;;  %v4571_v41 = vld [vmem:[%s8202_s5 + $0x68] sm:$0xff] }
0x2f7e   :  { %v4514_v28 = vmul.f32 %v4512_v43, %v4512_v43 }
0x2f80   :  { %v4516_v9 = vsel %vm194_vm0, %v4514_v28, 0.0  ;;  %v4573_v28 = vld [vmem:[%s8202_s5 + $0x78] sm:$0xff] }
0x2f81   :  { %4517 = vadd.xlane.f32.xlu1 %v4516_v9  ;;  %v5031_v9 = vld [vmem:[%s8205_s29 + $0x78] sm:$0xff] }
0x2fd3   :  { %v4244_v44 = vpop.f32.mrf.mxu2 }
0x2fd4   :  { %6033 = vmatmul.msk.f32.vlgmr.msra.gmra.mxu3 %vm1578_vm4, %v4244_v44  ;;  %v5047_v44 = vld [vmem:[%s8205_s29 + $0xf8] sm:$0xff] }
0x2fd5   :  { %4631 = vmatpush.msra.mxu3 %v4558_v39  ;;  %v5030_v39 = vld [vmem:[%s8205_s29 + $0x70] sm:$0xff] }
0x2fdc   :  { %v4472_v50 = vpop.f32.mrf.mxu1 }
0x2fdd   :  { %6045 = vmatmul.msk.f32.vlgmr.msra.gmra.mxu2 %vm1578_vm4, %v4472_v50  ;;  %v5063_v50 = vld [vmem:[%s8205_s29 + $0x178] sm:$0xff] }
0x2fe0   :  { %v4369_v29 = vpop.f32.mrf.mxu2 }
0x2fe1   :  { %6040 = vmatmul.msk.f32.vlgmr.msrb.gmra.mxu3 %vm1578_vm4, %v4369_v29  ;;  %v5079_v29 = vld [vmem:[%s8205_s29 + $0x1f8] sm:$0xff] }
0x2fe2   :  { %4723 = vmatpush.msrb.mxu3 %v4562_v19  ;;  %v5022_v19 = vld [vmem:[%s8205_s29 + $0x30] sm:$0xff] }
0x2ff4   :  { %v4518_v52 = vpop.xlane.xlu1 %4517 }
0x2ff5   :  { %v4522_v55 = vmul.f32 %v4518_v52, %v7120_v62  ;;  %v5029_v52 = vld [vmem:[%s8205_s29 + $0x68] sm:$0xff] }
0x2ff7   :  { %v4524_v13 = vadd.f32 1e-05, %v4522_v55  ;;  %v5045_v55 = vld [vmem:[%s8205_s29 + $0xe8] sm:$0xff] }
0x2ff9   :  { %6375 = vrsqrt.f32 %v4524_v13  ;;  %vm4532_vm5 = vweird.f32 %v4524_v13 }
0x2fff   :  { %v6376_v57 = vpop.eup %6375 }
0x3000   :  { %v4527_v58 = vmul.f32 %v6376_v57, %v4524_v13  ;;  %vm4533_vm4 = vweird.f32 %v6376_v57  ;;  %v5061_v13 = vld [vmem:[%s8205_s29 + $0x168] sm:$0xff] }
0x3001   :  { %vm4534_vm9 = vmor %vm4532_vm5, %vm4533_vm4  ;;  %vm5708_vm5 = vcmask 1040384  }
0x3002   :  { %v4528_v0 = vmul.f32 %v6376_v57, %v4527_v58  ;;  %v5028_v58 = vld [vmem:[%s8205_s29 + $0x60] sm:$0xff] }
0x3004   :  { %v4529_v6 = vmul.f32 0.5, %v4528_v0  ;;  %v5044_v0 = vld [vmem:[%s8205_s29 + $0xe0] sm:$0xff] }
0x3006   :  { %v4530_v2 = vsub.f32 1.5, %v4529_v6  ;;  %v5060_v6 = vld [vmem:[%s8205_s29 + $0x160] sm:$0xff] }
0x3008   :  { %v4531_v3 = vmul.f32 %v6376_v57, %v4530_v2  ;;  %v5076_v2 = vld [vmem:[%s8205_s29 + $0x1e0] sm:$0xff] }
0x300a   :  { %v4535_v54 = vsel %vm4534_vm9, %v6376_v57, %v4531_v3  ;;  %v5077_v57 = vld [vmem:[%s8205_s29 + $0x1e8] sm:$0xff]  ;;  %v5027_v3 = vld [vmem:[%s8205_s29 + $0x58] sm:$0xff] }
0x300b   :  { %v4546_v30 = vmul.f32 %v4535_v54, %v4512_v43  ;;  %v4572_v43 = vld [vmem:[%s8202_s5 + $0x70] sm:$0xff]  ;;  %v5059_v54 = vld [vmem:[%s8205_s29 + $0x158] sm:$0xff] }
0x300d   :  { %v4551_v18 = vmul.f32 %v6162_v25, %v4546_v30  ;;  %v5026_v30 = vld [vmem:[%s8205_s29 + $0x50] sm:$0xff] }
0x300f   :  { %v7715_v59 = vadd.f32 %v6163_v35, %v4551_v18  ;;  %v5042_v18 = vld [vmem:[%s8205_s29 + $0xd0] sm:$0xff] }
0x3011   :  { %6046 = vmatmul.msk.f32.vlgmr.msra.gmra.mxu3 %vm194_vm0, %v7715_v59  ;;  %6048 = vmatmul.msk.f32.vlgmr.msra.gmra.mxu0 %vm194_vm0, %v7715_v59 }
0x3012   :  { %6050 = vmatmul.msk.f32.vlgmr.msrb.gmra.mxu1 %vm194_vm0, %v7715_v59  ;;  %6052 = vmatmul.msk.f32.vlgmr.msrb.gmra.mxu2 %vm194_vm0, %v7715_v59 }
0x3013   :  { %4815 = vmatpush.msra.mxu3 %v4566_v14  ;;  %4838 = vmatpush.msra.mxu0 %v4567_v31  ;;  %v5052_v14 = vld [vmem:[%s8205_s29 + $0x120] sm:$0xff] }
0x3014   :  { %4861 = vmatpush.msrb.mxu1 %v4568_v34  ;;  %v5068_v31 = vld [vmem:[%s8205_s29 + $0x1a0] sm:$0xff] }
0x3015   :  { %v7843_v34 = vld [vmem:[%s8206_s3] sm:$0xff] }
0x3057   :  { %v4267_v5 = vpop.f32.mrf.mxu3 }
0x3058   :  { %v4291_v8 = vadd.f32 %v7664_v33, %v4267_v5  ;;  %v5058_v5 = vld [vmem:[%s8205_s29 + $0x150] sm:$0xff] }
0x3060   :  { %v4495_v11 = vpop.f32.mrf.mxu2 }
0x3064   :  { %v4392_v10 = vpop.f32.mrf.mxu3 }
0x3065   :  { %v4395_v4 = vadd.f32 %v4392_v10, %v4291_v8  ;;  %v5074_v8 = vld [vmem:[%s8205_s29 + $0x1d0] sm:$0xff]  ;;  %v5025_v10 = vld [vmem:[%s8205_s29 + $0x48] sm:$0xff] }
0x3067   :  { %v4498_v12 = vadd.f32 %v4495_v11, %v4395_v4  ;;  %v5041_v4 = vld [vmem:[%s8205_s29 + $0xc8] sm:$0xff] }
0x3068   :  { %v5057_v11 = vld [vmem:[%s8205_s29 + $0x148] sm:$0xff] }
0x3069   :  { %v4499_v15 = vadd.f32 %v7687_v37, %v4498_v12  ;;  %v5073_v12 = vld [vmem:[%s8205_s29 + $0x1c8] sm:$0xff] }
0x306b   :  { %v4501_v20 = vadd.f32 %v4499_v15, %v7554_v7  ;;  %v4565_v7 = vld [vmem:[%s8202_s5 + $0x38] sm:$0xff]  ;;  %v5024_v15 = vld [vmem:[%s8205_s29 + $0x40] sm:$0xff] }
0x306c   :  { %4792 = vmatpush.msra.mxu2 %v4565_v7  ;;  %v5070_v7 = vld [vmem:[%s8205_s29 + $0x1b0] sm:$0xff] }
0x306d   :  { %v4507_v1 = vsel %vm194_vm0, %v4501_v20, 0.0 }
0x306e   :  { %4508 = vadd.xlane.f32.xlu2 %v4507_v1  ;;  %4884 = vmatpush.msrb.mxu2 %v4569_v53  ;;  %v5056_v1 = vld [vmem:[%s8205_s29 + $0x140] sm:$0xff]  ;;  %v5019_v53 = vld [vmem:[%s8205_s29 + $0x18] sm:$0xff] }
0x30e1   :  { %v4509_v16 = vpop.xlane.xlu2 %4508 }
0x30e2   :  { %v4511_v45 = vmul.f32 %v4509_v16, %v7120_v62  ;;  %v5072_v16 = vld [vmem:[%s8205_s29 + $0x1c0] sm:$0xff] }
0x30e4   :  { %v4513_v46 = vsub.f32 %v4501_v20, %v4511_v45  ;;  %v5040_v20 = vld [vmem:[%s8205_s29 + $0xc0] sm:$0xff]  ;;  %v5023_v45 = vld [vmem:[%s8205_s29 + $0x38] sm:$0xff] }
0x30e6   :  { %v4515_v48 = vmul.f32 %v4513_v46, %v4513_v46 }
0x30e8   :  { %v4519_v33 = vsel %vm194_vm0, %v4515_v48, 0.0  ;;  %v5055_v48 = vld [vmem:[%s8205_s29 + $0x138] sm:$0xff] }
0x30e9   :  { %4520 = vadd.xlane.f32.xlu0 %v4519_v33  ;;  %v5071_v33 = vld [vmem:[%s8205_s29 + $0x1b8] sm:$0xff] }
0x315c   :  { %v4521_v37 = vpop.xlane.xlu0 %4520 }
0x315d   :  { %v4523_v60 = vmul.f32 %v4521_v37, %v7120_v62  ;;  %v5021_v37 = vld [vmem:[%s8205_s29 + $0x28] sm:$0xff] }
0x315f   :  { %v4525_v24 = vadd.f32 1e-05, %v4523_v60  ;;  %v5037_v60 = vld [vmem:[%s8205_s29 + $0xa8] sm:$0xff] }
0x3161   :  { %6377 = vrsqrt.f32 %v4525_v24  ;;  %vm4542_vm14 = vweird.f32 %v4525_v24 }
0x3167   :  { %v6378_v26 = vpop.eup %6377 }
0x3168   :  { %v4537_v22 = vmul.f32 %v6378_v26, %v4525_v24  ;;  %vm4543_vm13 = vweird.f32 %v6378_v26  ;;  %v5053_v24 = vld [vmem:[%s8205_s29 + $0x128] sm:$0xff] }
0x3169   :  { %vm4544_vm15 = vmor %vm4542_vm14, %vm4543_vm13 }
0x316a   :  { %v4538_v42 = vmul.f32 %v6378_v26, %v4537_v22  ;;  %v5020_v22 = vld [vmem:[%s8205_s29 + $0x20] sm:$0xff] }
0x316c   :  { %v4539_v36 = vmul.f32 0.5, %v4538_v42  ;;  %v5036_v42 = vld [vmem:[%s8205_s29 + $0xa0] sm:$0xff] }
0x316e   :  { %v4540_v38 = vsub.f32 1.5, %v4539_v36  ;;  %v5035_v36 = vld [vmem:[%s8205_s29 + $0x98] sm:$0xff] }
0x3170   :  { %v4541_v56 = vmul.f32 %v6378_v26, %v4540_v38  ;;  %v4579_v38 = vperm.slane %v7843_v34, 1 }
0x3172   :  { %v4545_v32 = vsel %vm4544_vm15, %v6378_v26, %v4541_v56  ;;  %v5069_v26 = vld [vmem:[%s8205_s29 + $0x1a8] sm:$0xff]  ;;  %v4578_v56 = vperm.slane %v7843_v34, 0 }
0x3173   :  { %v4547_v61 = vmul.f32 %v4545_v32, %v4513_v46  ;;  %v5039_v46 = vld [vmem:[%s8205_s29 + $0xb8] sm:$0xff] }
0x3174   :  { %v5051_v32 = vld [vmem:[%s8205_s29 + $0x118] sm:$0xff] }
0x3175   :  { %v4552_v51 = vmul.f32 %v6162_v25, %v4547_v61  ;;  %v5043_v25 = vld [vmem:[%s8205_s29 + $0xd8] sm:$0xff] }
0x3176   :  { %v5067_v61 = vld [vmem:[%s8205_s29 + $0x198] sm:$0xff] }
0x3177   :  { %v7740_v17 = vadd.f32 %v6163_v35, %v4552_v51  ;;  %v5075_v35 = vld [vmem:[%s8205_s29 + $0x1d8] sm:$0xff]  ;;  %v4656_v51 = vpop.f32.mrf.mxu0 }
0x3179   :  { %6047 = vmatmul.msk.f32.gmra.mxu3 %vm194_vm0, %v7740_v17  ;;  %6049 = vmatmul.msk.f32.gmra.mxu0 %vm194_vm0, %v7740_v17 }
0x317a   :  { %6051 = vmatmul.msk.f32.gmra.mxu1 %vm194_vm0, %v7740_v17  ;;  %6053 = vmatmul.msk.f32.gmra.mxu2 %vm194_vm0, %v7740_v17 }
0x3181   :  { %6054 = vmatmul.msk.f32.vlgmr.msrb.gmra.mxu3 %vm194_vm0, %v7715_v59  ;;  %6056 = vmatmul.msk.f32.vlgmr.msrb.gmra.mxu0 %vm194_vm0, %v7715_v59 }
0x3182   :  { %6058 = vmatmul.msk.f32.vlgmr.msra.gmra.mxu1 %vm194_vm0, %v7715_v59  ;;  %6060 = vmatmul.msk.f32.vlgmr.msra.gmra.mxu2 %vm194_vm0, %v7715_v59 }
0x3183   :  { %4907 = vmatpush.msrb.mxu3 %v4570_v40  ;;  %4930 = vmatpush.msrb.mxu0 %v4571_v41  ;;  %v4580_v40 = vperm.slane %v7843_v34, 2  ;;  %v4633_v41 = vpop.f32.mrf.mxu3 }
0x3184   :  { %4953 = vmatpush.msra.mxu1 %v4572_v43  ;;  %4976 = vmatpush.msra.mxu2 %v4573_v28  ;;  %v4581_v43 = vperm.slane %v7843_v34, 3  ;;  %v5018_v28 = vld [vmem:[%s8205_s29 + $0x10] sm:$0xff] }
0x3189   :  { %6055 = vmatmul.msk.f32.gmra.mxu3 %vm194_vm0, %v7740_v17  ;;  %6057 = vmatmul.msk.f32.gmra.mxu0 %vm194_vm0, %v7740_v17 }
0x318a   :  { %6059 = vmatmul.msk.f32.gmra.mxu1 %vm194_vm0, %v7740_v17  ;;  %6061 = vmatmul.msk.f32.gmra.mxu2 %vm194_vm0, %v7740_v17 }
0x3191   :  { %6062 = vmatmul.msk.f32.vlgmr.msra.gmra.mxu3 %vm194_vm0, %v7715_v59  ;;  %6064 = vmatmul.msk.f32.vlgmr.msra.gmra.mxu0 %vm194_vm0, %v7715_v59 }
0x3192   :  { %6066 = vmatmul.msk.f32.vlgmr.msrb.gmra.mxu1 %vm194_vm0, %v7715_v59  ;;  %6068 = vmatmul.msk.f32.vlgmr.msrb.gmra.mxu2 %vm194_vm0, %v7715_v59 }
0x3193   :  { %5276 = vmatpush.msra.mxu3 %v5031_v9  ;;  %5299 = vmatpush.msra.mxu0 %v5047_v44  ;;  %v5034_v9 = vld [vmem:[%s8205_s29 + $0x90] sm:$0xff]  ;;  %v4679_v44 = vpop.f32.mrf.mxu1 }
0x3194   :  { %5322 = vmatpush.msrb.mxu1 %v5063_v50  ;;  %5345 = vmatpush.msrb.mxu2 %v5079_v29  ;;  %v4702_v50 = vpop.f32.mrf.mxu2  ;;  %v5050_v29 = vld [vmem:[%s8205_s29 + $0x110] sm:$0xff] }
0x3195   :  { %5277 = vmatpush.msra.mxu3 %v5030_v39  ;;  %5300 = vmatpush.msra.mxu0 %v5046_v63  ;;  %v5066_v39 = vld [vmem:[%s8205_s29 + $0x190] sm:$0xff]  ;;  %v5017_v63 = vld [vmem:[%s8205_s29 + $0x8] sm:$0xff] }
0x3196   :  { %5323 = vmatpush.msrb.mxu1 %v5062_v47  ;;  %5346 = vmatpush.msrb.mxu2 %v5078_v49  ;;  %v5033_v47 = vld [vmem:[%s8205_s29 + $0x88] sm:$0xff]  ;;  %v4657_v49 = vadd.f32 %v4656_v51, %v4579_v38  ;;  %v5136_v51 = vld [vmem:[%s8205_s29 + $0x3c0] sm:$0xff] }
0x3197   :  { %5278 = vmatpush.msra.mxu3 %v5029_v52  ;;  %5301 = vmatpush.msra.mxu0 %v5045_v55  ;;  %v4634_v52 = vadd.f32 %v4633_v41, %v4578_v56  ;;  %v5049_v55 = vld [vmem:[%s8205_s29 + $0x108] sm:$0xff]  ;;  %v5103_v41 = vld [vmem:[%s8205_s29 + $0x2b8] sm:$0xff] }
0x3198   :  { %5324 = vmatpush.msrb.mxu1 %v5061_v13  ;;  %5347 = vmatpush.msrb.mxu2 %v5077_v57  ;;  %v5065_v13 = vld [vmem:[%s8205_s29 + $0x188] sm:$0xff]  ;;  %v4680_v57 = vadd.f32 %v4679_v44, %v4580_v40  ;;  %v5135_v44 = vld [vmem:[%s8205_s29 + $0x3b8] sm:$0xff] }
0x3199   :  { %5279 = vmatpush.msra.mxu3 %v5028_v58  ;;  %5302 = vmatpush.msra.mxu0 %v5044_v0  ;;  %v4703_v58 = vadd.f32 %v4702_v50, %v4581_v43  ;;  %v5016_v0 = vld [vmem:[%s8205_s29] sm:$0xff]  ;;  %v5102_v50 = vld [vmem:[%s8205_s29 + $0x2b0] sm:$0xff] }
0x319a   :  { %5325 = vmatpush.msrb.mxu1 %v5060_v6  ;;  %5348 = vmatpush.msrb.mxu2 %v5076_v2  ;;  %v5032_v6 = vld [vmem:[%s8205_s29 + $0x80] sm:$0xff] }
0x319b   :  { %6063 = vmatmul.msk.f32.gmra.mxu3 %vm194_vm0, %v7740_v17  ;;  %6065 = vmatmul.msk.f32.gmra.mxu0 %vm194_vm0, %v7740_v17  ;;  %v5048_v2 = vld [vmem:[%s8205_s29 + $0x100] sm:$0xff] }
0x319c   :  { %6067 = vmatmul.msk.f32.gmra.mxu1 %vm194_vm0, %v7740_v17  ;;  %6069 = vmatmul.msk.f32.gmra.mxu2 %vm194_vm0, %v7740_v17 }
0x319d   :  { %5280 = vmatpush.msra.mxu3 %v5027_v3  ;;  %5303 = vmatpush.msra.mxu0 %v5043_v25  ;;  %v5064_v3 = vld [vmem:[%s8205_s29 + $0x180] sm:$0xff]  ;;  %v4985_v25 = vmax.f32 %v4657_v49, 0.0  ;;  %v5117_v49 = vld [vmem:[%s8205_s29 + $0x328] sm:$0xff] }
0x319e   :  { %5326 = vmatpush.msrb.mxu1 %v5059_v54  ;;  %5349 = vmatpush.msrb.mxu2 %v5075_v35  ;;  %v4984_v54 = vmax.f32 %v4634_v52, 0.0  ;;  %v4986_v35 = vmax.f32 %v4680_v57, 0.0  ;;  %v5085_v52 = vld [vmem:[%s8205_s29 + $0x228] sm:$0xff]  ;;  %v5116_v57 = vld [vmem:[%s8205_s29 + $0x320] sm:$0xff] }
0x319f   :  { %5281 = vmatpush.msra.mxu3 %v5026_v30  ;;  %5304 = vmatpush.msra.mxu0 %v5042_v18  ;;  %v4987_v30 = vmax.f32 %v4703_v58, 0.0  ;;  %v5111_v18 = vld [vmem:[%s8205_s29 + $0x2f8] sm:$0xff]  ;;  %v5084_v58 = vld [vmem:[%s8205_s29 + $0x220] sm:$0xff] }
0x31a0   :  { %5327 = vmatpush.msrb.mxu1 %v5058_v5  ;;  %5350 = vmatpush.msrb.mxu2 %v5074_v8  ;;  %v5127_v5 = vld [vmem:[%s8205_s29 + $0x378] sm:$0xff] }
0x31a1   :  { %5282 = vmatpush.msra.mxu3 %v5025_v10  ;;  %5305 = vmatpush.msra.mxu0 %v5041_v4  ;;  %v5095_v8 = vld [vmem:[%s8205_s29 + $0x278] sm:$0xff]  ;;  %v5110_v4 = vld [vmem:[%s8205_s29 + $0x2f0] sm:$0xff] }
0x31a2   :  { %5328 = vmatpush.msrb.mxu1 %v5057_v11  ;;  %5351 = vmatpush.msrb.mxu2 %v5073_v12  ;;  %v5143_v10 = vld [vmem:[%s8205_s29 + $0x3f8] sm:$0xff]  ;;  %v5126_v11 = vld [vmem:[%s8205_s29 + $0x370] sm:$0xff] }
0x31a3   :  { %5283 = vmatpush.msra.mxu3 %v5024_v15  ;;  %5306 = vmatpush.msra.mxu0 %v5040_v20  ;;  %v5094_v12 = vld [vmem:[%s8205_s29 + $0x270] sm:$0xff]  ;;  %v5109_v20 = vld [vmem:[%s8205_s29 + $0x2e8] sm:$0xff] }
0x31a4   :  { %5329 = vmatpush.msrb.mxu1 %v5056_v1  ;;  %5352 = vmatpush.msrb.mxu2 %v5072_v16  ;;  %v5142_v15 = vld [vmem:[%s8205_s29 + $0x3f0] sm:$0xff]  ;;  %v5125_v1 = vld [vmem:[%s8205_s29 + $0x368] sm:$0xff] }
0x31a5   :  { %6070 = vmatmul.msk.f32.vlgmr.msrb.gmra.mxu3 %vm194_vm0, %v7715_v59  ;;  %6072 = vmatmul.msk.f32.vlgmr.msrb.gmra.mxu0 %vm194_vm0, %v7715_v59  ;;  %v5093_v16 = vld [vmem:[%s8205_s29 + $0x268] sm:$0xff] }
0x31a6   :  { %6074 = vmatmul.msk.f32.vlgmr.msra.gmra.mxu1 %vm194_vm0, %v7715_v59  ;;  %6076 = vmatmul.msk.f32.vlgmr.msra.gmra.mxu2 %vm194_vm0, %v7715_v59 }
0x31a7   :  { %5284 = vmatpush.msra.mxu3 %v5023_v45  ;;  %5307 = vmatpush.msra.mxu0 %v5039_v46  ;;  %v5141_v45 = vld [vmem:[%s8205_s29 + $0x3e8] sm:$0xff]  ;;  %v5108_v46 = vld [vmem:[%s8205_s29 + $0x2e0] sm:$0xff] }
0x31a8   :  { %5330 = vmatpush.msrb.mxu1 %v5055_v48  ;;  %5353 = vmatpush.msrb.mxu2 %v5071_v33  ;;  %v5124_v48 = vld [vmem:[%s8205_s29 + $0x360] sm:$0xff] }
0x31a9   :  { %5285 = vmatpush.msra.mxu3 %v5022_v19  ;;  %5308 = vmatpush.msra.mxu0 %v5038_v21  ;;  %v5092_v33 = vld [vmem:[%s8205_s29 + $0x260] sm:$0xff]  ;;  %v5107_v21 = vld [vmem:[%s8205_s29 + $0x2d8] sm:$0xff] }
0x31aa   :  { %5331 = vmatpush.msrb.mxu1 %v5054_v23  ;;  %5354 = vmatpush.msrb.mxu2 %v5070_v7  ;;  %v5140_v19 = vld [vmem:[%s8205_s29 + $0x3e0] sm:$0xff]  ;;  %v5123_v23 = vld [vmem:[%s8205_s29 + $0x358] sm:$0xff] }
0x31ab   :  { %5286 = vmatpush.msra.mxu3 %v5021_v37  ;;  %5309 = vmatpush.msra.mxu0 %v5037_v60  ;;  %v5091_v7 = vld [vmem:[%s8205_s29 + $0x258] sm:$0xff]  ;;  %v5106_v60 = vld [vmem:[%s8205_s29 + $0x2d0] sm:$0xff] }
0x31ac   :  { %5332 = vmatpush.msrb.mxu1 %v5053_v24  ;;  %5355 = vmatpush.msrb.mxu2 %v5069_v26  ;;  %v5139_v37 = vld [vmem:[%s8205_s29 + $0x3d8] sm:$0xff]  ;;  %v5122_v24 = vld [vmem:[%s8205_s29 + $0x350] sm:$0xff] }
0x31ad   :  { %5287 = vmatpush.msra.mxu3 %v5020_v22  ;;  %5310 = vmatpush.msra.mxu0 %v5036_v42  ;;  %v5090_v26 = vld [vmem:[%s8205_s29 + $0x250] sm:$0xff]  ;;  %v5105_v42 = vld [vmem:[%s8205_s29 + $0x2c8] sm:$0xff] }
0x31ae   :  { %5333 = vmatpush.msrb.mxu1 %v5052_v14  ;;  %5356 = vmatpush.msrb.mxu2 %v5068_v31  ;;  %v5138_v22 = vld [vmem:[%s8205_s29 + $0x3d0] sm:$0xff]  ;;  %v5121_v14 = vld [vmem:[%s8205_s29 + $0x348] sm:$0xff] }
0x31af   :  { %6071 = vmatmul.msk.f32.gmra.mxu3 %vm194_vm0, %v7740_v17  ;;  %6073 = vmatmul.msk.f32.gmra.mxu0 %vm194_vm0, %v7740_v17  ;;  %v5089_v31 = vld [vmem:[%s8205_s29 + $0x248] sm:$0xff] }
0x31b0   :  { %6075 = vmatmul.msk.f32.gmra.mxu1 %vm194_vm0, %v7740_v17  ;;  %6077 = vmatmul.msk.f32.gmra.mxu2 %vm194_vm0, %v7740_v17 }
0x31b1   :  { %5288 = vmatpush.msra.mxu3 %v5019_v53  ;;  %5311 = vmatpush.msra.mxu0 %v5035_v36  ;;  %v5137_v53 = vld [vmem:[%s8205_s29 + $0x3c8] sm:$0xff]  ;;  %v5104_v36 = vld [vmem:[%s8205_s29 + $0x2c0] sm:$0xff] }
0x31b2   :  { %5334 = vmatpush.msrb.mxu1 %v5051_v32  ;;  %5357 = vmatpush.msrb.mxu2 %v5067_v61  ;;  %v5120_v32 = vld [vmem:[%s8205_s29 + $0x340] sm:$0xff] }
0x31b3   :  { %5289 = vmatpush.msra.mxu3 %v5018_v28  ;;  %5312 = vmatpush.msra.mxu0 %v5034_v9  ;;  %v5088_v61 = vld [vmem:[%s8205_s29 + $0x240] sm:$0xff]  ;;  %v5119_v28 = vld [vmem:[%s8205_s29 + $0x338] sm:$0xff] }
0x31b4   :  { %5335 = vmatpush.msrb.mxu1 %v5050_v29  ;;  %5358 = vmatpush.msrb.mxu2 %v5066_v39  ;;  %v5087_v9 = vld [vmem:[%s8205_s29 + $0x238] sm:$0xff]  ;;  %v5118_v29 = vld [vmem:[%s8205_s29 + $0x330] sm:$0xff] }
0x31b5   :  { %5290 = vmatpush.msra.mxu3 %v5017_v63  ;;  %5313 = vmatpush.msra.mxu0 %v5033_v47  ;;  %v5086_v39 = vld [vmem:[%s8205_s29 + $0x230] sm:$0xff]  ;;  %v5101_v47 = vld [vmem:[%s8205_s29 + $0x2a8] sm:$0xff] }
0x31b6   :  { %5336 = vmatpush.msrb.mxu1 %v5049_v55  ;;  %5359 = vmatpush.msrb.mxu2 %v5065_v13  ;;  %v5134_v63 = vld [vmem:[%s8205_s29 + $0x3b0] sm:$0xff]  ;;  %v5133_v55 = vld [vmem:[%s8205_s29 + $0x3a8] sm:$0xff]  ;;  %v5100_v13 = vld [vmem:[%s8205_s29 + $0x2a0] sm:$0xff] }
0x31b7   :  { %5291 = vmatpush.msra.mxu3 %v5016_v0  ;;  %5314 = vmatpush.msra.mxu0 %v5032_v6  ;;  %v5132_v0 = vld [vmem:[%s8205_s29 + $0x3a0] sm:$0xff]  ;;  %v5099_v6 = vld [vmem:[%s8205_s29 + $0x298] sm:$0xff] }
0x31b8   :  { %5337 = vmatpush.msrb.mxu1 %v5048_v2  ;;  %5360 = vmatpush.msrb.mxu2 %v5064_v3  ;;  %v5115_v2 = vld [vmem:[%s8205_s29 + $0x318] sm:$0xff] }
0x31b9   :  { %5292 = vmatmul.f32.vlgmr.msra.gmra.mxu3 %v4984_v54  ;;  %5315 = vmatmul.f32.vlgmr.msra.gmra.mxu0 %v4985_v25  ;;  %v5083_v3 = vld [vmem:[%s8205_s29 + $0x218] sm:$0xff]  ;;  %v5098_v54 = vld [vmem:[%s8205_s29 + $0x290] sm:$0xff] }
0x31ba   :  { %5338 = vmatmul.f32.vlgmr.msrb.gmra.mxu1 %v4986_v35  ;;  %5361 = vmatmul.f32.vlgmr.msrb.gmra.mxu2 %v4987_v30  ;;  %v5131_v25 = vld [vmem:[%s8205_s29 + $0x398] sm:$0xff]  ;;  %v5114_v35 = vld [vmem:[%s8205_s29 + $0x310] sm:$0xff] }
0x31bb   :  { %5391 = vmatpush.msrb.mxu0 %v5111_v18  ;;  %5414 = vmatpush.msra.mxu1 %v5127_v5  ;;  %v5082_v30 = vld [vmem:[%s8205_s29 + $0x210] sm:$0xff]  ;;  %v5097_v5 = vld [vmem:[%s8205_s29 + $0x288] sm:$0xff] }
0x31bc   :  { %5368 = vmatpush.msrb.mxu3 %v5095_v8  ;;  %5437 = vmatpush.msra.mxu2 %v5143_v10  ;;  %v5130_v18 = vld [vmem:[%s8205_s29 + $0x390] sm:$0xff]  ;;  %v5113_v8 = vld [vmem:[%s8205_s29 + $0x308] sm:$0xff] }
0x31bd   :  { %5392 = vmatpush.msrb.mxu0 %v5110_v4  ;;  %5415 = vmatpush.msra.mxu1 %v5126_v11  ;;  %v5081_v10 = vld [vmem:[%s8205_s29 + $0x208] sm:$0xff]  ;;  %v5096_v11 = vld [vmem:[%s8205_s29 + $0x280] sm:$0xff] }
0x31be   :  { %5369 = vmatpush.msrb.mxu3 %v5094_v12  ;;  %5438 = vmatpush.msra.mxu2 %v5142_v15  ;;  %v5129_v4 = vld [vmem:[%s8205_s29 + $0x388] sm:$0xff]  ;;  %v5112_v12 = vld [vmem:[%s8205_s29 + $0x300] sm:$0xff]  ;;  %v5175_v15 = vld [vmem:[%s8205_s29 + $0x4f8] sm:$0xff] }
0x31bf   :  { %5393 = vmatpush.msrb.mxu0 %v5109_v20  ;;  %5416 = vmatpush.msra.mxu1 %v5125_v1  ;;  %v5191_v20 = vld [vmem:[%s8205_s29 + $0x578] sm:$0xff]  ;;  %v5080_v1 = vld [vmem:[%s8205_s29 + $0x200] sm:$0xff] }
0x31c0   :  { %5370 = vmatpush.msrb.mxu3 %v5093_v16  ;;  %5439 = vmatpush.msra.mxu2 %v5141_v45  ;;  %v5128_v16 = vld [vmem:[%s8205_s29 + $0x380] sm:$0xff]  ;;  %v5174_v45 = vld [vmem:[%s8205_s29 + $0x4f0] sm:$0xff] }
0x31c1   :  { %5394 = vmatpush.msrb.mxu0 %v5108_v46  ;;  %5417 = vmatpush.msra.mxu1 %v5124_v48  ;;  %v5190_v46 = vld [vmem:[%s8205_s29 + $0x570] sm:$0xff]  ;;  %v5159_v48 = vld [vmem:[%s8205_s29 + $0x478] sm:$0xff] }
0x31c2   :  { %5371 = vmatpush.msrb.mxu3 %v5092_v33  ;;  %5440 = vmatpush.msra.mxu2 %v5140_v19  ;;  %v5207_v33 = vld [vmem:[%s8205_s29 + $0x5f8] sm:$0xff]  ;;  %v5173_v19 = vld [vmem:[%s8205_s29 + $0x4e8] sm:$0xff] }
0x31c3   :  { %5395 = vmatpush.msrb.mxu0 %v5107_v21  ;;  %5418 = vmatpush.msra.mxu1 %v5123_v23  ;;  %v5189_v21 = vld [vmem:[%s8205_s29 + $0x568] sm:$0xff]  ;;  %v5158_v23 = vld [vmem:[%s8205_s29 + $0x470] sm:$0xff] }
0x31c4   :  { %5372 = vmatpush.msrb.mxu3 %v5091_v7  ;;  %5441 = vmatpush.msra.mxu2 %v5139_v37  ;;  %v5206_v7 = vld [vmem:[%s8205_s29 + $0x5f0] sm:$0xff]  ;;  %v5172_v37 = vld [vmem:[%s8205_s29 + $0x4e0] sm:$0xff] }
0x31c5   :  { %5396 = vmatpush.msrb.mxu0 %v5106_v60  ;;  %5419 = vmatpush.msra.mxu1 %v5122_v24  ;;  %v5188_v60 = vld [vmem:[%s8205_s29 + $0x560] sm:$0xff]  ;;  %v5157_v24 = vld [vmem:[%s8205_s29 + $0x468] sm:$0xff] }
0x31c6   :  { %5373 = vmatpush.msrb.mxu3 %v5090_v26  ;;  %5442 = vmatpush.msra.mxu2 %v5138_v22  ;;  %v5205_v26 = vld [vmem:[%s8205_s29 + $0x5e8] sm:$0xff]  ;;  %v5171_v22 = vld [vmem:[%s8205_s29 + $0x4d8] sm:$0xff] }
0x31c7   :  { %5397 = vmatpush.msrb.mxu0 %v5105_v42  ;;  %5420 = vmatpush.msra.mxu1 %v5121_v14  ;;  %v5187_v42 = vld [vmem:[%s8205_s29 + $0x558] sm:$0xff]  ;;  %v5156_v14 = vld [vmem:[%s8205_s29 + $0x460] sm:$0xff] }
0x31c8   :  { %5374 = vmatpush.msrb.mxu3 %v5089_v31  ;;  %5443 = vmatpush.msra.mxu2 %v5137_v53  ;;  %v5204_v31 = vld [vmem:[%s8205_s29 + $0x5e0] sm:$0xff]  ;;  %v5170_v53 = vld [vmem:[%s8205_s29 + $0x4d0] sm:$0xff] }
0x31c9   :  { %5398 = vmatpush.msrb.mxu0 %v5104_v36  ;;  %5421 = vmatpush.msra.mxu1 %v5120_v32  ;;  %v5186_v36 = vld [vmem:[%s8205_s29 + $0x550] sm:$0xff]  ;;  %v5155_v32 = vld [vmem:[%s8205_s29 + $0x458] sm:$0xff] }
0x31ca   :  { %5375 = vmatpush.msrb.mxu3 %v5088_v61  ;;  %5444 = vmatpush.msra.mxu2 %v5136_v51  ;;  %v5203_v61 = vld [vmem:[%s8205_s29 + $0x5d8] sm:$0xff]  ;;  %v5169_v51 = vld [vmem:[%s8205_s29 + $0x4c8] sm:$0xff] }
0x31cb   :  { %5399 = vmatpush.msrb.mxu0 %v5103_v41  ;;  %5422 = vmatpush.msra.mxu1 %v5119_v28  ;;  %v5185_v41 = vld [vmem:[%s8205_s29 + $0x548] sm:$0xff]  ;;  %v5154_v28 = vld [vmem:[%s8205_s29 + $0x450] sm:$0xff] }
0x31cc   :  { %5376 = vmatpush.msrb.mxu3 %v5087_v9  ;;  %5445 = vmatpush.msra.mxu2 %v5135_v44  ;;  %v5202_v9 = vld [vmem:[%s8205_s29 + $0x5d0] sm:$0xff]  ;;  %v5168_v44 = vld [vmem:[%s8205_s29 + $0x4c0] sm:$0xff] }
0x31cd   :  { %5400 = vmatpush.msrb.mxu0 %v5102_v50  ;;  %5423 = vmatpush.msra.mxu1 %v5118_v29  ;;  %v5184_v50 = vld [vmem:[%s8205_s29 + $0x540] sm:$0xff]  ;;  %v5153_v29 = vld [vmem:[%s8205_s29 + $0x448] sm:$0xff] }
0x31ce   :  { %5377 = vmatpush.msrb.mxu3 %v5086_v39  ;;  %5446 = vmatpush.msra.mxu2 %v5134_v63  ;;  %v5201_v39 = vld [vmem:[%s8205_s29 + $0x5c8] sm:$0xff]  ;;  %v5167_v63 = vld [vmem:[%s8205_s29 + $0x4b8] sm:$0xff] }
0x31cf   :  { %5401 = vmatpush.msrb.mxu0 %v5101_v47  ;;  %5424 = vmatpush.msra.mxu1 %v5117_v49  ;;  %v5183_v47 = vld [vmem:[%s8205_s29 + $0x538] sm:$0xff]  ;;  %v5152_v49 = vld [vmem:[%s8205_s29 + $0x440] sm:$0xff] }
0x31d0   :  { %5378 = vmatpush.msrb.mxu3 %v5085_v52  ;;  %5447 = vmatpush.msra.mxu2 %v5133_v55  ;;  %v5200_v52 = vld [vmem:[%s8205_s29 + $0x5c0] sm:$0xff]  ;;  %v5166_v55 = vld [vmem:[%s8205_s29 + $0x4b0] sm:$0xff] }
0x31d1   :  { %5402 = vmatpush.msrb.mxu0 %v5100_v13  ;;  %5425 = vmatpush.msra.mxu1 %v5116_v57  ;;  %v5182_v13 = vld [vmem:[%s8205_s29 + $0x530] sm:$0xff]  ;;  %v5151_v57 = vld [vmem:[%s8205_s29 + $0x438] sm:$0xff] }
0x31d2   :  { %5379 = vmatpush.msrb.mxu3 %v5084_v58  ;;  %5448 = vmatpush.msra.mxu2 %v5132_v0  ;;  %v5199_v58 = vld [vmem:[%s8205_s29 + $0x5b8] sm:$0xff]  ;;  %v5165_v0 = vld [vmem:[%s8205_s29 + $0x4a8] sm:$0xff] }
0x31d3   :  { %5403 = vmatpush.msrb.mxu0 %v5099_v6  ;;  %5426 = vmatpush.msra.mxu1 %v5115_v2  ;;  %v5181_v6 = vld [vmem:[%s8205_s29 + $0x528] sm:$0xff]  ;;  %v5150_v2 = vld [vmem:[%s8205_s29 + $0x430] sm:$0xff] }
0x31d4   :  { %5380 = vmatpush.msrb.mxu3 %v5083_v3  ;;  %5449 = vmatpush.msra.mxu2 %v5131_v25  ;;  %v5198_v3 = vld [vmem:[%s8205_s29 + $0x5b0] sm:$0xff]  ;;  %v5164_v25 = vld [vmem:[%s8205_s29 + $0x4a0] sm:$0xff] }
0x31d5   :  { %5404 = vmatpush.msrb.mxu0 %v5098_v54  ;;  %5427 = vmatpush.msra.mxu1 %v5114_v35  ;;  %v5180_v54 = vld [vmem:[%s8205_s29 + $0x520] sm:$0xff]  ;;  %v5149_v35 = vld [vmem:[%s8205_s29 + $0x428] sm:$0xff] }
0x31d6   :  { %5381 = vmatpush.msrb.mxu3 %v5082_v30  ;;  %5450 = vmatpush.msra.mxu2 %v5130_v18  ;;  %v5197_v30 = vld [vmem:[%s8205_s29 + $0x5a8] sm:$0xff]  ;;  %v5163_v18 = vld [vmem:[%s8205_s29 + $0x498] sm:$0xff] }
0x31d7   :  { %5405 = vmatpush.msrb.mxu0 %v5097_v5  ;;  %5428 = vmatpush.msra.mxu1 %v5113_v8  ;;  %v5179_v5 = vld [vmem:[%s8205_s29 + $0x518] sm:$0xff]  ;;  %v5148_v8 = vld [vmem:[%s8205_s29 + $0x420] sm:$0xff] }
0x31d8   :  { %5382 = vmatpush.msrb.mxu3 %v5081_v10  ;;  %5451 = vmatpush.msra.mxu2 %v5129_v4  ;;  %v5196_v10 = vld [vmem:[%s8205_s29 + $0x5a0] sm:$0xff]  ;;  %v5162_v4 = vld [vmem:[%s8205_s29 + $0x490] sm:$0xff] }
0x31d9   :  { %5406 = vmatpush.msrb.mxu0 %v5096_v11  ;;  %5429 = vmatpush.msra.mxu1 %v5112_v12  ;;  %v5178_v11 = vld [vmem:[%s8205_s29 + $0x510] sm:$0xff]  ;;  %v5147_v12 = vld [vmem:[%s8205_s29 + $0x418] sm:$0xff] }
0x31da   :  { %5383 = vmatpush.msrb.mxu3 %v5080_v1  ;;  %5452 = vmatpush.msra.mxu2 %v5128_v16  ;;  %v5177_v1 = vld [vmem:[%s8205_s29 + $0x508] sm:$0xff]  ;;  %v5146_v16 = vld [vmem:[%s8205_s29 + $0x410] sm:$0xff] }
0x31db   :  { %5483 = vmatpush.msra.mxu0 %v5175_v15  ;;  %5506 = vmatpush.msrb.mxu1 %v5191_v20  ;;  %v5195_v15 = vld [vmem:[%s8205_s29 + $0x598] sm:$0xff]  ;;  %v5161_v20 = vld [vmem:[%s8205_s29 + $0x488] sm:$0xff] }
0x31dc   :  { %5460 = vmatpush.msra.mxu3 %v5159_v48  ;;  %5529 = vmatpush.msrb.mxu2 %v5207_v33  ;;  %v5176_v48 = vld [vmem:[%s8205_s29 + $0x500] sm:$0xff] }
0x31dd   :  { %5484 = vmatpush.msra.mxu0 %v5174_v45  ;;  %5507 = vmatpush.msrb.mxu1 %v5190_v46  ;;  %v5194_v45 = vld [vmem:[%s8205_s29 + $0x590] sm:$0xff]  ;;  %v5160_v46 = vld [vmem:[%s8205_s29 + $0x480] sm:$0xff] }
0x31de   :  { %5461 = vmatpush.msra.mxu3 %v5158_v23  ;;  %5530 = vmatpush.msrb.mxu2 %v5206_v7 }
0x31df   :  { %5485 = vmatpush.msra.mxu0 %v5173_v19  ;;  %5508 = vmatpush.msrb.mxu1 %v5189_v21  ;;  %v5145_v19 = vld [vmem:[%s8205_s29 + $0x408] sm:$0xff] }
0x31e0   :  { %5462 = vmatpush.msra.mxu3 %v5157_v24  ;;  %5531 = vmatpush.msrb.mxu2 %v5205_v26  ;;  %v5193_v21 = vld [vmem:[%s8205_s29 + $0x588] sm:$0xff]  ;;  %v5192_v26 = vld [vmem:[%s8205_s29 + $0x580] sm:$0xff] }
0x31e1   :  { %5486 = vmatpush.msra.mxu0 %v5172_v37  ;;  %5509 = vmatpush.msrb.mxu1 %v5188_v60  ;;  %v5144_v60 = vld [vmem:[%s8205_s29 + $0x400] sm:$0xff] }
0x31e2   :  { %5463 = vmatpush.msra.mxu3 %v5156_v14  ;;  %5532 = vmatpush.msrb.mxu2 %v5204_v31  ;;  %v4584_v14 = vperm.slane %v7843_v34, 6 }
0x31e3   :  { %5487 = vmatpush.msra.mxu0 %v5171_v22  ;;  %5510 = vmatpush.msrb.mxu1 %v5187_v42  ;;  %v4583_v42 = vperm.slane %v7843_v34, 5 }
0x31e4   :  { %5464 = vmatpush.msra.mxu3 %v5155_v32  ;;  %5533 = vmatpush.msrb.mxu2 %v5203_v61 }
0x31e5   :  { %5488 = vmatpush.msra.mxu0 %v5170_v53  ;;  %5511 = vmatpush.msrb.mxu1 %v5186_v36 }
0x31e6   :  { %5465 = vmatpush.msra.mxu3 %v5154_v28  ;;  %5534 = vmatpush.msrb.mxu2 %v5202_v9 }
0x31e7   :  { %5489 = vmatpush.msra.mxu0 %v5169_v51  ;;  %5512 = vmatpush.msrb.mxu1 %v5185_v41 }
0x31e8   :  { %5466 = vmatpush.msra.mxu3 %v5153_v29  ;;  %5535 = vmatpush.msrb.mxu2 %v5201_v39  ;;  %v4585_v29 = vperm.slane %v7843_v34, 7  ;;  %v5238_v39 = vld [vmem:[%s8205_s29 + $0x6f0] sm:$0xff] }
0x31e9   :  { %5490 = vmatpush.msra.mxu0 %v5168_v44  ;;  %5513 = vmatpush.msrb.mxu1 %v5184_v50  ;;  %v4582_v44 = vperm.slane %v7843_v34, 4  ;;  %v5239_v50 = vld [vmem:[%s8205_s29 + $0x6f8] sm:$0xff]  ;;  %v5253_v34 = vld [vmem:[%s8205_s29 + $0x768] sm:$0xff] }
0x31ea   :  { %5467 = vmatpush.msra.mxu3 %v5152_v49  ;;  %5536 = vmatpush.msrb.mxu2 %v5200_v52 }
0x31eb   :  { %5491 = vmatpush.msra.mxu0 %v5167_v63  ;;  %5514 = vmatpush.msrb.mxu1 %v5183_v47  ;;  %v5254_v47 = vld [vmem:[%s8205_s29 + $0x770] sm:$0xff] }
0x31ec   :  { %5468 = vmatpush.msra.mxu3 %v5151_v57  ;;  %5537 = vmatpush.msrb.mxu2 %v5199_v58 }
0x31ed   :  { %5492 = vmatpush.msra.mxu0 %v5166_v55  ;;  %5515 = vmatpush.msrb.mxu1 %v5182_v13  ;;  %v5237_v55 = vld [vmem:[%s8205_s29 + $0x6e8] sm:$0xff] }
0x31ee   :  { %5469 = vmatpush.msra.mxu3 %v5150_v2  ;;  %5538 = vmatpush.msrb.mxu2 %v5198_v3  ;;  %v5223_v2 = vld [vmem:[%s8205_s29 + $0x678] sm:$0xff] }
0x31ef   :  { %5493 = vmatpush.msra.mxu0 %v5165_v0  ;;  %5516 = vmatpush.msrb.mxu1 %v5181_v6 }
0x31f0   :  { %5470 = vmatpush.msra.mxu3 %v5149_v35  ;;  %5539 = vmatpush.msrb.mxu2 %v5197_v30  ;;  %v5252_v35 = vld [vmem:[%s8205_s29 + $0x760] sm:$0xff]  ;;  %v8031_v30 = vld [vmem:[%s8206_s3 + $0x8] sm:$0xff] }
0x31f1   :  { %5494 = vmatpush.msra.mxu0 %v5164_v25  ;;  %5517 = vmatpush.msrb.mxu1 %v5180_v54  ;;  %v5236_v54 = vld [vmem:[%s8205_s29 + $0x6e0] sm:$0xff] }
0x31f2   :  { %5471 = vmatpush.msra.mxu3 %v5148_v8  ;;  %5540 = vmatpush.msrb.mxu2 %v5196_v10  ;;  %v5222_v10 = vld [vmem:[%s8205_s29 + $0x670] sm:$0xff] }
0x31f3   :  { %5495 = vmatpush.msra.mxu0 %v5163_v18  ;;  %5518 = vmatpush.msrb.mxu1 %v5179_v5  ;;  %v5271_v5 = vld [vmem:[%s8205_s29 + $0x7f8] sm:$0xff] }
0x31f4   :  { %5472 = vmatpush.msra.mxu3 %v5147_v12  ;;  %5541 = vmatpush.msrb.mxu2 %v5195_v15  ;;  %v4587_v12 = vperm.slane %v8031_v30, 1 }
0x31f5   :  { %5496 = vmatpush.msra.mxu0 %v5162_v4  ;;  %5519 = vmatpush.msrb.mxu1 %v5178_v11  ;;  %v5235_v4 = vld [vmem:[%s8205_s29 + $0x6d8] sm:$0xff] }
0x31f6   :  { %v4659_v33 = vpop.f32.mrf.mxu0  ;;  %5473 = vmatpush.msra.mxu3 %v5146_v16  ;;  %5542 = vmatpush.msrb.mxu2 %v5194_v45  ;;  %v5251_v11 = vld [vmem:[%s8205_s29 + $0x758] sm:$0xff]  ;;  %v5221_v16 = vld [vmem:[%s8205_s29 + $0x668] sm:$0xff] }
0x31f7   :  { %5497 = vmatpush.msra.mxu0 %v5161_v20  ;;  %5520 = vmatpush.msrb.mxu1 %v5177_v1  ;;  %v4660_v23 = vadd.f32 %v4659_v33, %v4579_v38  ;;  %v4682_v7 = vpop.f32.mrf.mxu1  ;;  %v5270_v20 = vld [vmem:[%s8205_s29 + $0x7f0] sm:$0xff]  ;;  %v4588_v1 = vperm.slane %v8031_v30, 2 }
0x31f8   :  { %v4683_v37 = vadd.f32 %v4682_v7, %v4580_v40  ;;  %5474 = vmatpush.msra.mxu3 %v5145_v19  ;;  %5543 = vmatpush.msrb.mxu2 %v5193_v21  ;;  %v5250_v33 = vld [vmem:[%s8205_s29 + $0x750] sm:$0xff]  ;;  %v5220_v7 = vld [vmem:[%s8205_s29 + $0x660] sm:$0xff] }
0x31f9   :  { %5498 = vmatpush.msra.mxu0 %v5160_v46  ;;  %5521 = vmatpush.msrb.mxu1 %v5176_v48  ;;  %v5001_v24 = vmax.f32 %v4660_v23, 0.0  ;;  %v5234_v48 = vld [vmem:[%s8205_s29 + $0x6d0] sm:$0xff]  ;;  %v5269_v23 = vld [vmem:[%s8205_s29 + $0x7e8] sm:$0xff] }
0x31fa   :  { %v5002_v22 = vmax.f32 %v4683_v37, 0.0  ;;  %5475 = vmatpush.msra.mxu3 %v5144_v60  ;;  %5544 = vmatpush.msrb.mxu2 %v5192_v26  ;;  %v5233_v26 = vld [vmem:[%s8205_s29 + $0x6c8] sm:$0xff] }
0x31fb   :  { %5318 = vmatmul.f32.gmra.mxu0 %v5001_v24 }
0x31fc   :  { %5341 = vmatmul.f32.gmra.mxu1 %v5002_v22  ;;  %v4636_v38 = vpop.f32.mrf.mxu3  ;;  %v5249_v22 = vld [vmem:[%s8205_s29 + $0x748] sm:$0xff] }
0x31fd   :  { %v4637_v40 = vadd.f32 %v4636_v38, %v4578_v56  ;;  %v4705_v31 = vpop.f32.mrf.mxu2 }
0x31fe   :  { %v4706_v53 = vadd.f32 %v4705_v31, %v4581_v43  ;;  %v4748_v36 = vpop.f32.mrf.mxu0  ;;  %v5255_v43 = vld [vmem:[%s8205_s29 + $0x778] sm:$0xff]  ;;  %v4586_v31 = vperm.slane %v8031_v30, 0 }
0x31ff   :  { %v5000_v32 = vmax.f32 %v4637_v40, 0.0  ;;  %v4749_v61 = vadd.f32 %v4748_v36, %v4583_v42  ;;  %v4771_v51 = vpop.f32.mrf.mxu1  ;;  %v5219_v40 = vld [vmem:[%s8205_s29 + $0x658] sm:$0xff]  ;;  %v5232_v36 = vld [vmem:[%s8205_s29 + $0x6c0] sm:$0xff] }
0x3200   :  { %v5003_v41 = vmax.f32 %v4706_v53, 0.0  ;;  %v4772_v28 = vadd.f32 %v4771_v51, %v4584_v14 }
0x3201   :  { %v4989_v9 = vmax.f32 %v4749_v61, 0.0  ;;  %5295 = vmatmul.f32.gmra.mxu3 %v5000_v32  ;;  %v5248_v32 = vld [vmem:[%s8205_s29 + $0x740] sm:$0xff]  ;;  %v4589_v61 = vperm.slane %v8031_v30, 3 }
0x3202   :  { %v4990_v56 = vmax.f32 %v4772_v28, 0.0  ;;  %5364 = vmatmul.f32.gmra.mxu2 %v5003_v41  ;;  %v5267_v41 = vld [vmem:[%s8205_s29 + $0x7d8] sm:$0xff] }
0x3203   :  { %5407 = vmatmul.f32.vlgmr.msrb.gmra.mxu0 %v4989_v9  ;;  %v5218_v9 = vld [vmem:[%s8205_s29 + $0x650] sm:$0xff] }
0x3204   :  { %5430 = vmatmul.f32.vlgmr.msra.gmra.mxu1 %v4990_v56  ;;  %v4725_v63 = vpop.f32.mrf.mxu3  ;;  %5575 = vmatpush.msrb.mxu0 %v5239_v50  ;;  %v5231_v56 = vld [vmem:[%s8205_s29 + $0x6b8] sm:$0xff] }
0x3205   :  { %v4726_v49 = vadd.f32 %v4725_v63, %v4582_v44  ;;  %v4794_v52 = vpop.f32.mrf.mxu2  ;;  %5598 = vmatpush.msra.mxu1 %v5255_v43  ;;  %v5217_v63 = vld [vmem:[%s8205_s29 + $0x648] sm:$0xff] }
0x3206   :  { %v4795_v13 = vadd.f32 %v4794_v52, %v4585_v29  ;;  %v4751_v57 = vpop.f32.mrf.mxu0  ;;  %5576 = vmatpush.msrb.mxu0 %v5238_v39  ;;  %v5266_v39 = vld [vmem:[%s8205_s29 + $0x7d0] sm:$0xff] }
0x3207   :  { %v4988_v58 = vmax.f32 %v4726_v49, 0.0  ;;  %v4752_v0 = vadd.f32 %v4751_v57, %v4583_v42  ;;  %v4774_v6 = vpop.f32.mrf.mxu1  ;;  %5599 = vmatpush.msra.mxu1 %v5254_v47  ;;  %v5230_v47 = vld [vmem:[%s8205_s29 + $0x6b0] sm:$0xff] }
0x3208   :  { %v4991_v3 = vmax.f32 %v4795_v13, 0.0  ;;  %v4775_v25 = vadd.f32 %v4774_v6, %v4584_v14  ;;  %5577 = vmatpush.msrb.mxu0 %v5237_v55  ;;  %v5268_v14 = vld [vmem:[%s8205_s29 + $0x7e0] sm:$0xff]  ;;  %v5246_v49 = vld [vmem:[%s8205_s29 + $0x730] sm:$0xff]  ;;  %v5265_v55 = vld [vmem:[%s8205_s29 + $0x7c8] sm:$0xff] }
0x3209   :  { %v5005_v18 = vmax.f32 %v4752_v0, 0.0  ;;  %5600 = vmatpush.msra.mxu1 %v5253_v34  ;;  %5384 = vmatmul.f32.vlgmr.msrb.gmra.mxu3 %v4988_v58  ;;  %v5216_v13 = vld [vmem:[%s8205_s29 + $0x640] sm:$0xff]  ;;  %v5229_v0 = vld [vmem:[%s8205_s29 + $0x6a8] sm:$0xff] }
0x320a   :  { %v5006_v8 = vmax.f32 %v4775_v25, 0.0  ;;  %5453 = vmatmul.f32.vlgmr.msra.gmra.mxu2 %v4991_v3  ;;  %5552 = vmatpush.msrb.mxu3 %v5223_v2  ;;  %v5245_v6 = vld [vmem:[%s8205_s29 + $0x728] sm:$0xff]  ;;  %v5264_v25 = vld [vmem:[%s8205_s29 + $0x7c0] sm:$0xff] }
0x320b   :  { %5578 = vmatpush.msrb.mxu0 %v5236_v54  ;;  %5601 = vmatpush.msra.mxu1 %v5252_v35  ;;  %v5215_v54 = vld [vmem:[%s8205_s29 + $0x638] sm:$0xff] }
0x320c   :  { %5621 = vmatpush.msra.mxu2 %v5271_v5  ;;  %5410 = vmatmul.f32.gmra.mxu0 %v5005_v18  ;;  %v4728_v15 = vpop.f32.mrf.mxu3  ;;  %v5228_v18 = vld [vmem:[%s8205_s29 + $0x6a0] sm:$0xff] }
0x320d   :  { %5433 = vmatmul.f32.gmra.mxu1 %v5006_v8  ;;  %v4729_v45 = vadd.f32 %v4728_v15, %v4582_v44  ;;  %v4797_v46 = vpop.f32.mrf.mxu2  ;;  %5553 = vmatpush.msrb.mxu3 %v5222_v10  ;;  %v5244_v5 = vld [vmem:[%s8205_s29 + $0x720] sm:$0xff]  ;;  %v5263_v10 = vld [vmem:[%s8205_s29 + $0x7b8] sm:$0xff] }
0x320e   :  { %v4798_v19 = vadd.f32 %v4797_v46, %v4585_v29  ;;  %5579 = vmatpush.msrb.mxu0 %v5235_v4  ;;  %5602 = vmatpush.msra.mxu1 %v5251_v11  ;;  %v4840_v21 = vpop.f32.mrf.mxu0  ;;  %v5247_v29 = vld [vmem:[%s8205_s29 + $0x738] sm:$0xff]  ;;  %v5214_v11 = vld [vmem:[%s8205_s29 + $0x630] sm:$0xff] }
0x320f   :  { %v5004_v37 = vmax.f32 %v4729_v45, 0.0  ;;  %5622 = vmatpush.msra.mxu2 %v5270_v20  ;;  %v4841_v60 = vadd.f32 %v4840_v21, %v4587_v12  ;;  %v4863_v24 = vpop.f32.mrf.mxu1  ;;  %5554 = vmatpush.msrb.mxu3 %v5221_v16  ;;  %v5227_v20 = vld [vmem:[%s8205_s29 + $0x698] sm:$0xff]  ;;  %v4591_v16 = vperm.slane %v8031_v30, 5  ;;  %v5262_v46 = vld [vmem:[%s8205_s29 + $0x7b0] sm:$0xff] }
0x3210   :  { %v5007_v42 = vmax.f32 %v4798_v19, 0.0  ;;  %v4864_v38 = vadd.f32 %v4863_v24, %v4588_v1  ;;  %5580 = vmatpush.msrb.mxu0 %v5234_v48  ;;  %5603 = vmatpush.msra.mxu1 %v5250_v33  ;;  %v4592_v48 = vperm.slane %v8031_v30, 6  ;;  %v5213_v33 = vld [vmem:[%s8205_s29 + $0x628] sm:$0xff]  ;;  %v5226_v19 = vld [vmem:[%s8205_s29 + $0x690] sm:$0xff] }
0x3211   :  { %5623 = vmatpush.msra.mxu2 %v5269_v23  ;;  %5555 = vmatpush.msrb.mxu3 %v5220_v7  ;;  %v4993_v53 = vmax.f32 %v4841_v60, 0.0  ;;  %v5242_v21 = vld [vmem:[%s8205_s29 + $0x710] sm:$0xff]  ;;  %v5261_v7 = vld [vmem:[%s8205_s29 + $0x7a8] sm:$0xff] }
0x3212   :  { %5581 = vmatpush.msrb.mxu0 %v5233_v26  ;;  %5604 = vmatpush.msra.mxu1 %v5249_v22  ;;  %v4994_v51 = vmax.f32 %v4864_v38, 0.0  ;;  %v5225_v22 = vld [vmem:[%s8205_s29 + $0x688] sm:$0xff] }
0x3213   :  { %5624 = vmatpush.msra.mxu2 %v5268_v14  ;;  %5387 = vmatmul.f32.gmra.mxu3 %v5004_v37  ;;  %v5212_v37 = vld [vmem:[%s8205_s29 + $0x620] sm:$0xff] }
0x3214   :  { %5456 = vmatmul.f32.gmra.mxu2 %v5007_v42  ;;  %5556 = vmatpush.msrb.mxu3 %v5219_v40  ;;  %v4817_v28 = vpop.f32.mrf.mxu3  ;;  %v5241_v42 = vld [vmem:[%s8205_s29 + $0x708] sm:$0xff]  ;;  %v5260_v40 = vld [vmem:[%s8205_s29 + $0x7a0] sm:$0xff] }
0x3215   :  { %5582 = vmatpush.msrb.mxu0 %v5232_v36  ;;  %5605 = vmatpush.msra.mxu1 %v5248_v32  ;;  %v4818_v44 = vadd.f32 %v4817_v28, %v4586_v31  ;;  %v4886_v50 = vpop.f32.mrf.mxu2  ;;  %v5224_v32 = vld [vmem:[%s8205_s29 + $0x680] sm:$0xff]  ;;  %v5259_v28 = vld [vmem:[%s8205_s29 + $0x798] sm:$0xff] }
0x3216   :  { %5625 = vmatpush.msra.mxu2 %v5267_v41  ;;  %5499 = vmatmul.f32.vlgmr.msra.gmra.mxu0 %v4993_v53  ;;  %v4887_v43 = vadd.f32 %v4886_v50, %v4589_v61  ;;  %v4590_v53 = vperm.slane %v8031_v30, 4 }
0x3217   :  { %5522 = vmatmul.f32.vlgmr.msrb.gmra.mxu1 %v4994_v51  ;;  %5557 = vmatpush.msrb.mxu3 %v5218_v9  ;;  %v4992_v57 = vmax.f32 %v4818_v44, 0.0  ;;  %v4593_v51 = vperm.slane %v8031_v30, 7  ;;  %v5210_v44 = vld [vmem:[%s8205_s29 + $0x610] sm:$0xff] }
0x3218   :  { %5583 = vmatpush.msrb.mxu0 %v5231_v56  ;;  %5606 = vmatpush.msra.mxu1 %v5247_v29  ;;  %v4843_v52 = vpop.f32.mrf.mxu0  ;;  %v4995_v2 = vmax.f32 %v4887_v43, 0.0  ;;  %v5258_v29 = vld [vmem:[%s8205_s29 + $0x790] sm:$0xff]  ;;  %v5738_v43 = vld [vmem:[%s8207_s9] sm:$0xf] }
0x3219   :  { %5626 = vmatpush.msra.mxu2 %v5266_v39  ;;  %v4844_v34 = vadd.f32 %v4843_v52, %v4587_v12  ;;  %v4866_v58 = vpop.f32.mrf.mxu1  ;;  %5558 = vmatpush.msrb.mxu3 %v5217_v63  ;;  %v5209_v63 = vld [vmem:[%s8205_s29 + $0x608] sm:$0xff] }
0x321a   :  { %v4867_v3 = vadd.f32 %v4866_v58, %v4588_v1  ;;  %5584 = vmatpush.msrb.mxu0 %v5230_v47  ;;  %5607 = vmatpush.msra.mxu1 %v5246_v49  ;;  %v5243_v1 = vld [vmem:[%s8205_s29 + $0x718] sm:$0xff]  ;;  %v5257_v47 = vld [vmem:[%s8205_s29 + $0x788] sm:$0xff]  ;;  %v5256_v58 = vld [vmem:[%s8205_s29 + $0x780] sm:$0xff] }
0x321b   :  { %5627 = vmatpush.msra.mxu2 %v5265_v55  ;;  %5559 = vmatpush.msrb.mxu3 %v5216_v13  ;;  %v5009_v35 = vmax.f32 %v4844_v34, 0.0  ;;  %v5208_v55 = vld [vmem:[%s8205_s29 + $0x600] sm:$0xff] }
0x321c   :  { %5585 = vmatpush.msrb.mxu0 %v5229_v0  ;;  %5608 = vmatpush.msra.mxu1 %v5245_v6  ;;  %v5010_v8 = vmax.f32 %v4867_v3, 0.0 }
0x321d   :  { %5628 = vmatpush.msra.mxu2 %v5264_v25  ;;  %5476 = vmatmul.f32.vlgmr.msra.gmra.mxu3 %v4992_v57 }
0x321e   :  { %5545 = vmatmul.f32.vlgmr.msrb.gmra.mxu2 %v4995_v2  ;;  %5560 = vmatpush.msrb.mxu3 %v5215_v54  ;;  %v4820_v4 = vpop.f32.mrf.mxu3 }
0x321f   :  { %5586 = vmatpush.msrb.mxu0 %v5228_v18  ;;  %5609 = vmatpush.msra.mxu1 %v5244_v5  ;;  %v4821_v12 = vadd.f32 %v4820_v4, %v4586_v31  ;;  %v4889_v15 = vpop.f32.mrf.mxu2  ;;  %v5211_v31 = vld [vmem:[%s8205_s29 + $0x618] sm:$0xff]  ;;  %v6153_v18 = vld [vmem:[%s8208_s8] ss:$0 sm:$0xff] }
0x3220   :  { %5629 = vmatpush.msra.mxu2 %v5263_v10  ;;  %5502 = vmatmul.f32.gmra.mxu0 %v5009_v35  ;;  %v4890_v45 = vadd.f32 %v4889_v15, %v4589_v61  ;;  %v5240_v61 = vld [vmem:[%s8205_s29 + $0x700] sm:$0xff]  ;;  %v1505_v30 = vadd.f32 %v6153_v18, %v7029_v27 }
0x3221   :  { %5525 = vmatmul.f32.gmra.mxu1 %v5010_v8  ;;  %5561 = vmatpush.msrb.mxu3 %v5214_v11  ;;  %v5008_v60 = vmax.f32 %v4821_v12, 0.0 }
0x3222   :  { %5587 = vmatpush.msrb.mxu0 %v5227_v20  ;;  %5610 = vmatpush.msra.mxu1 %v5243_v1  ;;  %v4932_v23 = vpop.f32.mrf.mxu0  ;;  %v5011_v38 = vmax.f32 %v4890_v45, 0.0  ;;  %v6164_v45 = vld [vmem:[%s8209_s6] ss:$0 sm:$0xff] }
0x3223   :  { %5630 = vmatpush.msra.mxu2 %v5262_v46  ;;  %v4933_v24 = vadd.f32 %v4932_v23, %v4591_v16  ;;  %v4955_v26 = vpop.f32.mrf.mxu1  ;;  %5562 = vmatpush.msrb.mxu3 %v5213_v33 }
0x3224   :  { %v4956_v14 = vadd.f32 %v4955_v26, %v4592_v48  ;;  %5588 = vmatpush.msrb.mxu0 %v5226_v19  ;;  %5611 = vmatpush.msra.mxu1 %v5242_v21 }
0x3225   :  { %5631 = vmatpush.msra.mxu2 %v5261_v7  ;;  %5563 = vmatpush.msrb.mxu3 %v5212_v37  ;;  %v4997_v36 = vmax.f32 %v4933_v24, 0.0 }
0x3226   :  { %5589 = vmatpush.msrb.mxu0 %v5225_v22  ;;  %5612 = vmatpush.msra.mxu1 %v5241_v42  ;;  %v4998_v41 = vmax.f32 %v4956_v14, 0.0 }
0x3227   :  { %5632 = vmatpush.msra.mxu2 %v5260_v40  ;;  %5479 = vmatmul.f32.gmra.mxu3 %v5008_v60 }
0x3228   :  { %5548 = vmatmul.f32.gmra.mxu2 %v5011_v38  ;;  %5564 = vmatpush.msrb.mxu3 %v5211_v31  ;;  %v4909_v9 = vpop.f32.mrf.mxu3 }
0x3229   :  { %5590 = vmatpush.msrb.mxu0 %v5224_v32  ;;  %5613 = vmatpush.msra.mxu1 %v5240_v61  ;;  %v4910_v50 = vadd.f32 %v4909_v9, %v4590_v53  ;;  %v4978_v56 = vpop.f32.mrf.mxu2 }
0x322a   :  { %5633 = vmatpush.msra.mxu2 %v5259_v28  ;;  %5591 = vmatmul.f32.vlgmr.msrb.gmra.mxu0 %v4997_v36  ;;  %v4979_v39 = vadd.f32 %v4978_v56, %v4593_v51 }
0x322b   :  { %5614 = vmatmul.f32.vlgmr.msra.gmra.mxu1 %v4998_v41  ;;  %5565 = vmatpush.msrb.mxu3 %v5210_v44  ;;  %v4996_v49 = vmax.f32 %v4910_v50, 0.0 }
0x322c   :  { %5634 = vmatpush.msra.mxu2 %v5258_v29  ;;  %v4935_v52 = vpop.f32.mrf.mxu0  ;;  %6081 = vmatpush.msk.msrb.mxu1 %vm5744_vm1, %v5738_v43  ;;  %v4999_v13 = vmax.f32 %v4979_v39, 0.0 }
0x322d   :  { %v4936_v57 = vadd.f32 %v4935_v52, %v4591_v16  ;;  %v4958_v34 = vpop.f32.mrf.mxu1  ;;  %5566 = vmatpush.msrb.mxu3 %v5209_v63 }
0x322e   :  { %v4959_v0 = vadd.f32 %v4958_v34, %v4592_v48  ;;  %5635 = vmatpush.msra.mxu2 %v5257_v47 }
0x322f   :  { %v5013_v6 = vmax.f32 %v4936_v57, 0.0  ;;  %5567 = vmatpush.msrb.mxu3 %v5208_v55 }
0x3230   :  { %v5014_v2 = vmax.f32 %v4959_v0, 0.0  ;;  %5636 = vmatpush.msra.mxu2 %v5256_v58  ;;  %5568 = vmatmul.f32.vlgmr.msrb.gmra.mxu3 %v4996_v49 }
0x3231   :  { %5637 = vmatmul.f32.vlgmr.msra.gmra.mxu2 %v4999_v13 }
0x3232   :  { %5594 = vmatmul.f32.gmra.mxu0 %v5013_v6  ;;  %v4912_v3 = vpop.f32.mrf.mxu3 }
0x3233   :  { %5617 = vmatmul.f32.gmra.mxu1 %v5014_v2  ;;  %v4913_v25 = vadd.f32 %v4912_v3, %v4590_v53  ;;  %v4981_v54 = vpop.f32.mrf.mxu2 }
0x3234   :  { %v4982_v35 = vadd.f32 %v4981_v54, %v4593_v51 }
0x3235   :  { %v5012_v5 = vmax.f32 %v4913_v25, 0.0 }
0x3236   :  { %v5015_v8 = vmax.f32 %v4982_v35, 0.0  ;;  %v5316_v10 = vpop.f32.mrf.mxu0 }
0x3237   :  { %v5339_v4 = vpop.f32.mrf.mxu1 }
0x3238   :  { %5571 = vmatmul.f32.gmra.mxu3 %v5012_v5 }
0x3239   :  { %5640 = vmatmul.f32.gmra.mxu2 %v5015_v8 }
0x323b   :  { %6082 = vmatmul.msk.f32.vlgmr.msrb.gmra.mxu1 %vm5740_vm2, %v1505_v30 }
0x323c   :  { %v5293_v11 = vpop.f32.mrf.mxu3 }
0x323d   :  { %v5362_v12 = vpop.f32.mrf.mxu2  ;;  %v5294_v46 = vadd.f32 %v6164_v45, %v5293_v11 }
0x323f   :  { %v5317_v21 = vadd.f32 %v5316_v10, %v5294_v46 }
0x3241   :  { %v5340_v7 = vadd.f32 %v5339_v4, %v5317_v21 }
0x3243   :  { %v5363_v60 = vadd.f32 %v5362_v12, %v5340_v7 }
0x3278   :  { %v5319_v15 = vpop.f32.mrf.mxu0 }
0x3279   :  { %v5342_v20 = vpop.f32.mrf.mxu1 }
0x3280   :  { %v5408_v48 = vpop.f32.mrf.mxu0 }
0x3281   :  { %v5431_v19 = vpop.f32.mrf.mxu1 }
0x3284   :  { %v5296_v1 = vpop.f32.mrf.mxu3 }
0x3285   :  { %v5365_v16 = vpop.f32.mrf.mxu2  ;;  %v5297_v27 = vadd.f32 %v6164_v45, %v5296_v1 }
0x3287   :  { %v5320_v24 = vadd.f32 %v5319_v15, %v5297_v27 }
0x3289   :  { %v5411_v37 = vpop.f32.mrf.mxu0  ;;  %v5343_v14 = vadd.f32 %v5342_v20, %v5320_v24 }
0x328a   :  { %v5434_v22 = vpop.f32.mrf.mxu1 }
0x328b   :  { %v5366_v31 = vadd.f32 %v5365_v16, %v5343_v14 }
0x328c   :  { %v5385_v33 = vpop.f32.mrf.mxu3 }
0x328d   :  { %v5454_v23 = vpop.f32.mrf.mxu2  ;;  %v5386_v42 = vadd.f32 %v5385_v33, %v5363_v60  ;;  %v5710_v60 = vld [vmem:[%s8210_s19] sm:$0xff] }
0x328e   :  { %5733 = vmatpush.msra.mxu3 %v5710_v60 }
0x328f   :  { %v5409_v40 = vadd.f32 %v5408_v48, %v5386_v42  ;;  %v5794_v42 = vld [vmem:[%s8211_s12] sm:$0x3] }
0x3291   :  { %v5432_v36 = vadd.f32 %v5431_v19, %v5409_v40 }
0x3293   :  { %v5500_v53 = vpop.f32.mrf.mxu0  ;;  %v5455_v28 = vadd.f32 %v5454_v23, %v5432_v36 }
0x3294   :  { %v5523_v51 = vpop.f32.mrf.mxu1 }
0x3296   :  { %v5388_v26 = vpop.f32.mrf.mxu3 }
0x3297   :  { %v5457_v38 = vpop.f32.mrf.mxu2  ;;  %v5389_v32 = vadd.f32 %v5388_v26, %v5366_v31 }
0x3299   :  { %v5412_v9 = vadd.f32 %v5411_v37, %v5389_v32 }
0x329b   :  { %v5435_v50 = vadd.f32 %v5434_v22, %v5412_v9  ;;  %v5795_v22 = vld [vmem:[%s6695_s30] sm:$0x7]  ;;  %s8214_s30 = sld [smem:[#allocation32_spill]] }
0x329c   :  { %6083 = vmatpush.msk.msrb.mxu2 %vm5800_vm10, %v5795_v22 }
0x329d   :  { %v5503_v56 = vpop.f32.mrf.mxu0  ;;  %v5458_v63 = vadd.f32 %v5457_v38, %v5435_v50  ;;  %6084 = vmatmul.msk.f32.vlgmr.msrb.gmra.mxu2 %vm5796_vm11, %v5794_v42 }
0x329e   :  { %v5526_v39 = vpop.f32.mrf.mxu1 }
0x32a0   :  { %v5477_v61 = vpop.f32.mrf.mxu3 }
0x32a1   :  { %v5546_v41 = vpop.f32.mrf.mxu2  ;;  %v5478_v44 = vadd.f32 %v5477_v61, %v5455_v28 }
0x32a3   :  { %v5501_v29 = vadd.f32 %v5500_v53, %v5478_v44  ;;  %v6165_v44 = vld [vmem:[%s8212_s24] ss:$0 sm:$0xff] }
0x32a5   :  { %v5524_v49 = vadd.f32 %v5523_v51, %v5501_v29 }
0x32a7   :  { %v5547_v55 = vadd.f32 %v5546_v41, %v5524_v49  ;;  %v5592_v57 = vpop.f32.mrf.mxu0 }
0x32a8   :  { %v5615_v0 = vpop.f32.mrf.mxu1 }
0x32aa   :  { %v5480_v43 = vpop.f32.mrf.mxu3 }
0x32ab   :  { %v5549_v47 = vpop.f32.mrf.mxu2  ;;  %v5481_v52 = vadd.f32 %v5480_v43, %v5458_v63 }
0x32ad   :  { %v5504_v13 = vadd.f32 %v5503_v56, %v5481_v52 }
0x32af   :  { %v5527_v6 = vadd.f32 %v5526_v39, %v5504_v13  ;;  %v5595_v30 = vpop.f32.mrf.mxu0  ;;  %v6166_v39 = vld [vmem:[%s8213_s20] ss:$0 sm:$0xff] }
0x32b0   :  { %v5618_v11 = vpop.f32.mrf.mxu1 }
0x32b1   :  { %v5550_v54 = vadd.f32 %v5549_v47, %v5527_v6 }
0x32b3   :  { %v5569_v34 = vpop.f32.mrf.mxu3 }
0x32b4   :  { %v5570_v58 = vadd.f32 %v5569_v34, %v5547_v55  ;;  %v5638_v3 = vpop.f32.mrf.mxu2 }
0x32b6   :  { %v5593_v2 = vadd.f32 %v5592_v57, %v5570_v58  ;;  %v5739_v58 = vld [vmem:[%s6690_s13] sm:$0xf]  ;;  %s6395_s13 = sshra.s32 %s5840_s10, 4  ;;  %s6396_s13 = int_to_ptr.hbm [resolvable:$true] %s6395_s13 }
0x32b7   :  { %6079 = vmatpush.msk.msra.mxu0 %vm5744_vm1, %v5739_v58  ;;  %s6397_s11 = scalar_lea.hbm %s6396_s13, 2  ;;  %p6400_p1 = scmp.lt.s32.totalorder %s6396_s13, %s6705_s4 }
0x32b8   :  { %v5616_v25 = vadd.f32 %v5615_v0, %v5593_v2  ;;  %v6167_v0 = vld [vmem:[%s8214_s30] ss:$0 sm:$0xff]  ;;  %p6398_p0 = scmp.ne.s32.totalorder %s6396_s13, %s6397_s11  ;;  %p6401_p2 = scmp.lt.s32.totalorder %s6399_s15, %s6397_s11 }
0x32ba   :  { %v5639_v35 = vadd.f32 %v5638_v3, %v5616_v25  ;;  %v5791_v3 = vpop.f32.mrf.mxu1  ;;  %p6402_p3 = por %p6401_p2, %p6400_p1 }
0x32bb   :  { %v5572_v18 = vpop.f32.mrf.mxu3 }
0x32bc   :  { %v5644_v5 = vadd.f32 %v5639_v35, %v7715_v59  ;;  %v5573_v8 = vadd.f32 %v5572_v18, %v5550_v54  ;;  %v5641_v15 = vpop.f32.mrf.mxu2  ;;  %v6168_v18 = vld [vmem:[%s6700_s14] ss:$0 sm:$0xff]  ;;  %p6403_p4 = pnand %p6402_p3, %p6398_p0 }
0x32be   :  { %v5596_v10 = vadd.f32 %v5595_v30, %v5573_v8  ;;  %v5648_v4 = vsel %vm194_vm0, %v5644_v5, 0.0 }
0x32bf   :  { %5649 = vadd.xlane.f32.xlu2 %v5648_v4 }
0x32c0   :  { %v5619_v12 = vadd.f32 %v5618_v11, %v5596_v10 }
0x32c2   :  { %v5642_v20 = vadd.f32 %v5641_v15, %v5619_v12 }
0x32c4   :  { %v5645_v1 = vadd.f32 %v5642_v20, %v7740_v17 }
0x32c6   :  { %v5651_v16 = vsel %vm194_vm0, %v5645_v1, 0.0 }
0x32c7   :  { %5652 = vadd.xlane.f32.xlu1 %v5651_v16 }
0x3320   :  { %v5821_v54 = vpop.f32.mrf.mxu2 }
0x3332   :  { %v5650_v45 = vpop.xlane.xlu2 %5649 }
0x3333   :  { %v5654_v46 = vmul.f32 %v5650_v45, %v7120_v62 }
0x3335   :  { %v5656_v59 = vsub.f32 %v5644_v5, %v5654_v46 }
0x3337   :  { %v5658_v48 = vmul.f32 %v5656_v59, %v5656_v59 }
0x3339   :  { %v5660_v33 = vsel %vm194_vm0, %v5658_v48, 0.0 }
0x333a   :  { %v5653_v19 = vpop.xlane.xlu1 %5652  ;;  %5661 = vadd.xlane.f32.xlu0 %v5660_v33 }
0x333b   :  { %v5655_v21 = vmul.f32 %v5653_v19, %v7120_v62 }
0x333d   :  { %v5657_v23 = vsub.f32 %v5645_v1, %v5655_v21 }
0x333f   :  { %v5659_v7 = vmul.f32 %v5657_v23, %v5657_v23 }
0x3341   :  { %v5663_v17 = vsel %vm194_vm0, %v5659_v7, 0.0 }
0x3342   :  { %5664 = vadd.xlane.f32.xlu2 %v5663_v17 }
0x33ad   :  { %v5662_v27 = vpop.xlane.xlu0 %5661 }
0x33ae   :  { %v5666_v37 = vmul.f32 %v5662_v27, %v7120_v62 }
0x33b0   :  { %v5668_v24 = vadd.f32 1e-05, %v5666_v37 }
0x33b2   :  { %6379 = vrsqrt.f32 %v5668_v24  ;;  %vm5676_vm3 = vweird.f32 %v5668_v24 }
0x33b5   :  { %v5665_v26 = vpop.xlane.xlu2 %5664 }
0x33b6   :  { %v5667_v38 = vmul.f32 %v5665_v26, %v7120_v62 }
0x33b8   :  { %v6380_v14 = vpop.eup %6379  ;;  %v5669_v40 = vadd.f32 1e-05, %v5667_v38 }
0x33b9   :  { %v5671_v31 = vmul.f32 %v6380_v14, %v5668_v24  ;;  %vm5677_vm6 = vweird.f32 %v6380_v14 }
0x33ba   :  { %6381 = vrsqrt.f32 %v5669_v40  ;;  %vm5678_vm7 = vmor %vm5676_vm3, %vm5677_vm6  ;;  %vm5686_vm8 = vweird.f32 %v5669_v40 }
0x33bb   :  { %v5672_v53 = vmul.f32 %v6380_v14, %v5671_v31 }
0x33bd   :  { %v5673_v36 = vmul.f32 0.5, %v5672_v53 }
0x33bf   :  { %v5674_v32 = vsub.f32 1.5, %v5673_v36 }
0x33c0   :  { %v6382_v61 = vpop.eup %6381 }
0x33c1   :  { %v5675_v51 = vmul.f32 %v6380_v14, %v5674_v32  ;;  %v5681_v41 = vmul.f32 %v6382_v61, %v5669_v40  ;;  %vm5687_vm12 = vweird.f32 %v6382_v61 }
0x33c2   :  { %vm5688_vm4 = vmor %vm5686_vm8, %vm5687_vm12 }
0x33c3   :  { %v5679_v28 = vsel %vm5678_vm7, %v6380_v14, %v5675_v51  ;;  %v5682_v9 = vmul.f32 %v6382_v61, %v5681_v41 }
0x33c4   :  { %v5690_v50 = vmul.f32 %v5679_v28, %v5656_v59 }
0x33c5   :  { %v5683_v62 = vmul.f32 0.5, %v5682_v9 }
0x33c6   :  { %v5695_v43 = vmul.f32 %v6165_v44, %v5690_v50 }
0x33c7   :  { %v5684_v56 = vsub.f32 1.5, %v5683_v62 }
0x33c8   :  { %v5700_v52 = vadd.f32 %v6166_v39, %v5695_v43 }
0x33c9   :  { %v5685_v29 = vmul.f32 %v6382_v61, %v5684_v56 }
0x33ca   :  { %v5703_v13 = vrot.slane %v5700_v52, 7 }
0x33cb   :  { %v5689_v63 = vsel %vm5688_vm4, %v6382_v61, %v5685_v29 }
0x33cc   :  { %v5691_v47 = vmul.f32 %v5689_v63, %v5657_v23 }
0x33ce   :  { %v5696_v49 = vmul.f32 %v6165_v44, %v5691_v47 }
0x33d0   :  { %v5701_v55 = vadd.f32 %v6166_v39, %v5696_v49 }
0x33d2   :  { %v5706_v57 = vrot.slane %v5701_v55, 6 }
0x33d4   :  { %v5709_v34 = vsel %vm5708_vm5, %v5703_v13, %v5706_v57 }
0x33d5   :  { %6078 = vmatmul.msk.f32.vlgmr.msra.gmra.mxu3 %vm194_vm0, %v5709_v34  ;;  %vm5830_vm0 = vcmask 25600  }
0x3458   :  { %v5735_v6 = vpop.f32.mrf.mxu3 }
0x3459   :  { %v5736_v2 = vadd.f32 %v6167_v0, %v5735_v6 }
0x345b   :  { %6080 = vmatmul.msk.f32.vlgmr.msra.gmra.mxu0 %vm5740_vm2, %v5736_v2 }
0x34d8   :  { %v5765_v25 = vpop.f32.mrf.mxu0 }
0x34d9   :  { %v5792_v35 = vadd.f32 %v5791_v3, %v5765_v25 }
0x34db   :  { %v5824_v5 = vadd.f32 %v5821_v54, %v5792_v35 }
0x34dd   :  { %v5829_v8 = vadd.f32 %v6168_v18, %v5824_v5 }
0x34df   :  { %5831 = vst.msk [vmem:[#allocation3] sm:$0x3] %vm5830_vm0, %v5829_v8 }
0x34e0   :  { %6406 = shalt.err (!%p6403_p4)
}
0x34e1   :  { %5842 = dma.vmem_to_hbm [thread:$0]  %s5838_s7, 32, %s5840_s10, [#allocation4]  }
0x34e2   :  { %6407 = dma.done.wait [#allocation4], 32  }
0x34e3   :  { %6408 = vsyncadd [#allocation4], 4294967264 }
0x34e4   :  { %5847 = vsyncpa [#allocation4], 1 }

</bundles_post_ra>
